<compile_context>
chip_gen: v6e
topology: v6e:2x2x1
jax: 0.10.0
libtpu: 0.0.40
codegen_flags: <defaults>
</compile_context>

<pallas_src>
import math
import functools

import jax
import jax.numpy as jnp
from jax import lax
from jax.experimental import pallas as pl
from jax.experimental.pallas import tpu as pltpu

BN_EPS = 1e-5
BN_SCALE = 1.0 / math.sqrt(1.0 + BN_EPS)  # eval-mode BN folded scale (mean=0, var=1, g=1, b=0)


def _round_up(x, m):
    return ((x + m - 1) // m) * m


# ----------------------------------------------------------------------------- Pallas kernel
def _mm_bias_act_kernel(x_ref, w_ref, b_ref, o_ref, *, act):
    """Fused conv-as-matmul: (TM, K)bf16 @ (K, Cp)bf16 -> f32 acc + bias + activation."""
    acc = jnp.dot(x_ref[...], w_ref[...], preferred_element_type=jnp.float32)
    acc = acc + b_ref[...]
    if act == "silu":
        acc = acc * pl.reciprocal(1.0 + jnp.exp(-acc), approx=True)
    elif act == "relu":
        acc = jnp.maximum(acc, 0.0)
    elif act == "lrelu":
        acc = jnp.where(acc > 0, acc, 0.1 * acc)
    o_ref[...] = acc.astype(o_ref.dtype)


def pallas_linear(x2d, w, b, act):
    """x2d: (M, K) bf16, w: (K, Cp) bf16 with Cp % 128 == 0, b: (1, Cp) f32.

    Returns (Mp, Cp) bf16; caller slices rows/channels back to the true extent.
    """
    M, K = x2d.shape
    Cp = w.shape[1]
    # Tile selection: always >=128 rows; single tile for small M, 512/1024 for large M.
    if M <= 2048:
        TM = _round_up(max(M, 1), 128)
    elif M <= 8192:
        TM = 512
    else:
        TM = 1024
    Mp = _round_up(M, TM)
    if Mp != M:
        x2d = jnp.pad(x2d, ((0, Mp - M), (0, 0)))
    out = pl.pallas_call(
        functools.partial(_mm_bias_act_kernel, act=act),
        out_shape=jax.ShapeDtypeStruct((Mp, Cp), jnp.bfloat16),
        grid=(Mp // TM,),
        in_specs=[
            pl.BlockSpec((TM, K), lambda i: (i, 0)),
            pl.BlockSpec((K, Cp), lambda i: (0, 0)),   # constant index_map -> fetched once
            pl.BlockSpec((1, Cp), lambda i: (0, 0)),   # constant index_map -> fetched once
        ],
        out_specs=pl.BlockSpec((TM, Cp), lambda i: (i, 0)),
        compiler_params=pltpu.CompilerParams(
            dimension_semantics=("parallel",),          # independent M tiles (v7x 2 TCs)
            vmem_limit_bytes=32 * 1024 * 1024,
        ),
    )(x2d, w, b)
    return out


# ----------------------------------------------------------------------------- conv helpers
def _im2col(x, kh, kw, stride, pad):
    """x: (N, H, W, C) bf16 -> (N, Ho, Wo, kh*kw*C) bf16."""
    x = jnp.pad(x, ((0, 0), (pad, pad), (pad, pad), (0, 0)))
    N, Hp, Wp, C = x.shape
    Ho = (Hp - kh) // stride + 1
    Wo = (Wp - kw) // stride + 1
    cols = []
    for i in range(kh):
        for j in range(kw):
            cols.append(x[:, i:i + stride * Ho:stride, j:j + stride * Wo:stride, :])
    return jnp.concatenate(cols, axis=-1), Ho, Wo


def conv_bn_act(x, prep, geom, stride=1, act="silu"):
    """Conv2d(k, stride, pad=k//2) + BatchNorm(eval, folded) + activation.

    x: (N, H, W, Cin) NHWC.  prep = (w2 (K, Cp) bf16, b2 (1, Cp) f32).  geom = (kh,kw,cin,cout).
    """
    w2, b2 = prep
    kh, kw, cin, cout = geom
    N = x.shape[0]
    x = x.astype(jnp.bfloat16)
    if kh == 1 and kw == 1 and stride == 1:
        _, H, W, _ = x.shape
        cols, Ho, Wo = x.reshape(N * H * W, cin), H, W
    else:
        patches, Ho, Wo = _im2col(x, kh, kw, stride, kh // 2)
        cols = patches.reshape(N * Ho * Wo, kh * kw * cin)
    y = pallas_linear(cols, w2, b2, act)
    y = y[: N * Ho * Wo, :cout]
    return y.reshape(N, Ho, Wo, cout)


def maxpool_same(x, k):
    # TODO(synk): PyTorch MaxPool2d(k, stride=1, padding=k//2) is only identical to SAME
    # padding for odd k; the adjusted pooling size here is even, so SAME is used (glue op).
    neg_inf = jnp.array(-jnp.inf, dtype=x.dtype)
    return lax.reduce_window(x, neg_inf, lax.max, (1, k, k, 1), (1, 1, 1, 1), "SAME")


def upsample2x(x):
    return jnp.repeat(jnp.repeat(x, 2, axis=1), 2, axis=2)


def process_high_res_features(feat_nhwc):
    # Mirrors _process_high_res_features: only active when W >= 240 (static check).
    if feat_nhwc.shape[2] >= 240:
        att = jax.nn.sigmoid(jnp.mean(feat_nhwc, axis=(1, 2), keepdims=True))
        feat_nhwc = feat_nhwc * att
    return feat_nhwc


# ----------------------------------------------------------------------------- config / params
def build_config():
    cfg = {
        "backbone": "elannet_tiny",
        "neck": "sppf",
        "neck_dim": 4,
        "expand_ratio": 0.5,
        "pooling_size": (5, 5),
        "neck_act": "silu",
        "neck_norm": "BN",
        "neck_depthwise": False,
        "fpn": "pafpn",
        "fpn_size": "tiny",
        "fpn_dim": [2, 3, 4],
        "fpn_depthwise": False,
        "fpn_norm": "BN",
        "fpn_act": "silu",
        "head_dim": 4,
        "num_cls_head": 2,
        "num_reg_head": 2,
        "head_act": "silu",
        "head_norm": "BN",
        "head_depthwise": False,
        "stride": [8, 16, 32],
    }
    # _adjust_model_capacity (high_resolution=True)
    scale = math.sqrt(1920 * 1080 / (224 * 224))
    cfg["neck_dim"] = int(cfg["neck_dim"] * scale)
    cfg["head_dim"] = int(cfg["head_dim"] * scale)
    cfg["fpn_dim"] = [int(d * scale) for d in cfg["fpn_dim"]]
    # _adjust_pooling_size (high_resolution=True)
    cfg["pooling_size"] = (cfg["pooling_size"][0] * 2, cfg["pooling_size"][1] * 2)
    # backbone channel plan (bk_dim feeds the neck; layer2/layer3 dims match fpn_dim[0:2])
    cfg["bk_stem"] = 8
    cfg["bk_dim"] = [cfg["fpn_dim"][0], cfg["fpn_dim"][1], 24]
    return cfg


def init_params(key, cfg):
    c1 = cfg["bk_stem"]
    c3d, c4d, c5in = cfg["bk_dim"]
    neck_dim = cfg["neck_dim"]
    head_dim = cfg["head_dim"]
    inter = int(c5in * cfg["expand_ratio"] * 1.5)  # high_resolution expand-ratio boost

    specs = {
        # backbone
        "stem1": (3, 3, 3, c1),
        "stem2": (3, 3, c1, c1),
        "layer2": (3, 3, c1, c3d),
        "layer3": (3, 3, c3d, c4d),
        "layer4": (3, 3, c4d, c5in),
        # neck (SPPF)
        "neck_cv1": (1, 1, c5in, inter),
        "neck_cv2": (1, 1, inter * 4, neck_dim),
        # PaFPN
        "reduce5": (1, 1, neck_dim, c4d),
        "td4": (3, 3, c4d * 2, c4d),
        "reduce4": (1, 1, c4d, c3d),
        "td3": (3, 3, c3d * 2, c3d),
        "down3": (3, 3, c3d, c3d),
        "bu4": (3, 3, c3d + c4d, c4d),
        "down4": (3, 3, c4d, c4d),
        "bu5": (3, 3, c4d * 2, neck_dim),
        "out3": (1, 1, c3d, head_dim),
        "out4": (1, 1, c4d, head_dim),
        "out5": (1, 1, neck_dim, head_dim),
    }
    # non-shared decoupled heads (one per stride)
    for lvl in range(len(cfg["stride"])):
        for j in range(cfg["num_cls_head"]):
            specs[f"head{lvl}_cls{j}"] = (3, 3, head_dim, head_dim)
        for j in range(cfg["num_reg_head"]):
            specs[f"head{lvl}_reg{j}"] = (3, 3, head_dim, head_dim)

    keys = jax.random.split(key, len(specs))
    params = {}
    for k_i, (name, (kh, kw, cin, cout)) in zip(keys, specs.items()):
        fan_out = cout * kh * kw
        std = math.sqrt(2.0 / fan_out)  # kaiming_normal_(mode='fan_out', nonlinearity='relu')
        w = std * jax.random.normal(k_i, (kh, kw, cin, cout), jnp.float32)
        b = jnp.zeros((cout,), jnp.float32)  # nn.init.constant_(bias, 0)
        params[name] = (w, b)
    return params


def prepare_params(params, cfg):
    """Fold BN, reshape to (K, Cout), zero-pad Cout to a multiple of 128, cast weights to bf16.

    Also fuses each level's first cls-head and reg-head convs (same input, same K) along Cout.
    Returns (prepped arrays pytree, static geometry dict of python ints).
    """
    def prep_one(w, b):
        kh, kw, cin, cout = w.shape
        K = kh * kw * cin
        cp = _round_up(cout, 128)
        w2 = (w.astype(jnp.float32) * BN_SCALE).reshape(K, cout)
        w2 = jnp.pad(w2, ((0, 0), (0, cp - cout))).astype(jnp.bfloat16)
        b2 = jnp.pad((b.astype(jnp.float32) * BN_SCALE), (0, cp - cout)).reshape(1, cp)
        return (w2, b2), (kh, kw, cin, cout)

    prepped, geom = {}, {}
    fused = set()
    for lvl in range(len(cfg["stride"])):
        wc, bc = params[f"head{lvl}_cls0"]
        wr, br = params[f"head{lvl}_reg0"]
        wf = jnp.concatenate([wc, wr], axis=-1)
        bf_ = jnp.concatenate([bc, br], axis=-1)
        prepped[f"head{lvl}_cr0"], geom[f"head{lvl}_cr0"] = prep_one(wf, bf_)
        fused.update({f"head{lvl}_cls0", f"head{lvl}_reg0"})
    for name, (w, b) in params.items():
        if name in fused:
            continue
        prepped[name], geom[name] = prep_one(w, b)
    return prepped, geom


# ----------------------------------------------------------------------------- forward pass
def freeyolo_forward(prepped, x_nchw, cfg, geom):
    # _validate_input_size
    # TODO(synk): original check raises unless H >= 1080 and W <= 1920; relaxed for the
    # small synthetic demo (high-res passthrough _process_high_res_input is an identity).
    act = cfg["neck_act"]

    def cba(x, name, stride=1, act_=act):
        return conv_bn_act(x, prepped[name], geom[name], stride=stride, act=act_)

    x = jnp.transpose(x_nchw, (0, 2, 3, 1)).astype(jnp.bfloat16)  # NCHW -> NHWC, bf16

    # backbone -> feats['layer2'], feats['layer3'], feats['layer4']
    x = cba(x, "stem1", stride=2)
    x = cba(x, "stem2", stride=2)
    c3 = cba(x, "layer2", stride=2)    # stride 8
    c4 = cba(c3, "layer3", stride=2)   # stride 16
    c5 = cba(c4, "layer4", stride=2)   # stride 32

    # neck (SPPF) on layer4
    y = cba(c5, "neck_cv1")
    k = cfg["pooling_size"][0]
    m1 = maxpool_same(y, k)
    m2 = maxpool_same(m1, k)
    m3 = maxpool_same(m2, k)
    y = jnp.concatenate([y, m1, m2, m3], axis=-1)
    c5 = cba(y, "neck_cv2")

    # PaFPN over [layer2, layer3, neck(layer4)]
    p5 = cba(c5, "reduce5")
    td4 = cba(jnp.concatenate([upsample2x(p5), c4], -1), "td4")
    p4r = cba(td4, "reduce4")
    td3 = cba(jnp.concatenate([upsample2x(p4r), c3], -1), "td3")
    d3 = cba(td3, "down3", stride=2)
    bu4 = cba(jnp.concatenate([d3, td4], -1), "bu4")
    d4 = cba(bu4, "down4", stride=2)
    bu5 = cba(jnp.concatenate([d4, p5], -1), "bu5")
    pyramid_feats = [cba(td3, "out3"), cba(bu4, "out4"), cba(bu5, "out5")]

    # non-shared heads (first cls/reg conv fused along Cout per level)
    hd = cfg["head_dim"]
    all_cls_feats, all_reg_feats = [], []
    for lvl, feat in enumerate(pyramid_feats):
        cr = cba(feat, f"head{lvl}_cr0", act_=cfg["head_act"])
        cf, rf = cr[..., :hd], cr[..., hd:]
        for j in range(1, cfg["num_cls_head"]):
            cf = cba(cf, f"head{lvl}_cls{j}", act_=cfg["head_act"])
        for j in range(1, cfg["num_reg_head"]):
            rf = cba(rf, f"head{lvl}_reg{j}", act_=cfg["head_act"])
        cf = process_high_res_features(cf.astype(jnp.float32))
        rf = process_high_res_features(rf.astype(jnp.float32))
        all_cls_feats.append(jnp.transpose(cf, (0, 3, 1, 2)))  # back to NCHW
        all_reg_feats.append(jnp.transpose(rf, (0, 3, 1, 2)))
    return all_cls_feats, all_reg_feats


# ----------------------------------------------------------------------------- main
if __name__ == "__main__":
    cfg = build_config()
    key = jax.random.PRNGKey(0)
    pkey, xkey = jax.random.split(key)
    raw_params = init_params(pkey, cfg)
    prepped, geom = prepare_params(raw_params, cfg)

    # small synthetic input (NCHW), strides [8,16,32] -> 8x8 / 4x4 / 2x2 feature maps
    x = jax.random.normal(xkey, (2, 3, 64, 64), jnp.float32)

    fwd = jax.jit(lambda p, inp: freeyolo_forward(p, inp, cfg, geom))
    cls_feats, reg_feats = fwd(prepped, x)
    jax.block_until_ready((cls_feats, reg_feats))

    assert len(cls_feats) == 3 and len(reg_feats) == 3
    assert cls_feats[0].shape == (2, cfg["head_dim"], 8, 8)
    assert cls_feats[1].shape == (2, cfg["head_dim"], 4, 4)
    assert cls_feats[2].shape == (2, cfg["head_dim"], 2, 2)
    assert all(c.shape == r.shape for c, r in zip(cls_feats, reg_feats))
    print("KERNEL_OK")
</pallas_src>

<mosaic_0001>
module attributes {stable_mosaic.version = 11 : i64} {
  func.func @_mm_bias_act_kernel(%arg0: i32, %arg1: memref<2048x27xbf16, #tpu.memory_space<vmem>>, %arg2: memref<27x128xbf16, #tpu.memory_space<vmem>>, %arg3: memref<1x128xf32, #tpu.memory_space<vmem>>, %arg4: memref<2048x128xbf16, #tpu.memory_space<vmem>>) attributes {dimension_semantics = [#tpu.dimension_semantics<parallel>], iteration_bounds = array<i64: 1>, scalar_prefetch = 0 : i64, scratch_operands = 0 : i64, tpu.core_type = #tpu.core_type<tc>, window_params = [{transform_indices = @transform_0, window_bounds = array<i64: 2048, 27>}, {pipeline_mode = #tpu.pipeline_mode<synchronous>, transform_indices = @transform_1, window_bounds = array<i64: 27, 128>}, {pipeline_mode = #tpu.pipeline_mode<synchronous>, transform_indices = @transform_2, window_bounds = array<i64: 1, 128>}, {transform_indices = @transform_3, window_bounds = array<i64: 2048, 128>}]} {
    %c0 = arith.constant 0 : index
    %c0_0 = arith.constant 0 : index
    %0 = vector.load %arg1[%c0, %c0_0] : memref<2048x27xbf16, #tpu.memory_space<vmem>>, vector<2048x27xbf16>
    %c0_1 = arith.constant 0 : index
    %c0_2 = arith.constant 0 : index
    %1 = vector.load %arg2[%c0_1, %c0_2] : memref<27x128xbf16, #tpu.memory_space<vmem>>, vector<27x128xbf16>
    %cst = arith.constant dense<0.000000e+00> : vector<2048x128xf32>
    %2 = tpu.matmul %0, %1, %cst {dimension_numbers = #tpu.dot_dimension_numbers<[1], [0], [0], [1], [0, 0, 1, 1], [], []>} : vector<2048x27xbf16>, vector<27x128xbf16>, vector<2048x128xf32> -> vector<2048x128xf32>
    %c0_3 = arith.constant 0 : index
    %c0_4 = arith.constant 0 : index
    %3 = vector.load %arg3[%c0_3, %c0_4] : memref<1x128xf32, #tpu.memory_space<vmem>>, vector<1x128xf32>
    %4 = vector.broadcast %3 : vector<1x128xf32> to vector<2048x128xf32>
    %5 = arith.addf %2, %4 : vector<2048x128xf32>
    %cst_5 = arith.constant 0.000000e+00 : f32
    %6 = vector.broadcast %cst_5 : f32 to vector<2048x128xf32>
    %7 = arith.subf %6, %5 : vector<2048x128xf32>
    %8 = math.exp %7 : vector<2048x128xf32>
    %cst_6 = arith.constant 1.000000e+00 : f32
    %9 = vector.broadcast %cst_6 : f32 to vector<2048x128xf32>
    %10 = arith.addf %9, %8 : vector<2048x128xf32>
    %11 = tpu.reciprocal %10 {approx = true} : vector<2048x128xf32> -> vector<2048x128xf32>
    %12 = arith.mulf %5, %11 : vector<2048x128xf32>
    %13 = arith.truncf %12 : vector<2048x128xf32> to vector<2048x128xbf16>
    %c0_7 = arith.constant 0 : index
    %c0_8 = arith.constant 0 : index
    %14 = vector.load %arg4[%c0_7, %c0_8] : memref<2048x128xbf16, #tpu.memory_space<vmem>>, vector<2048x128xbf16>
    tpu.vector_store %arg4[%c0_7, %c0_8], %13 {strides = array<i32>} : memref<2048x128xbf16, #tpu.memory_space<vmem>>, vector<2048x128xbf16>,
    return
  }
  func.func @transform_0(%arg0: i32) -> (i32, i32) {
    %c0_i32 = arith.constant 0 : i32
    %c0_i32_0 = arith.constant 0 : i32
    return %arg0, %c0_i32 : i32, i32
  }
  func.func @transform_1(%arg0: i32) -> (i32, i32) {
    %c0_i32 = arith.constant 0 : i32
    %c0_i32_0 = arith.constant 0 : i32
    %c0_i32_1 = arith.constant 0 : i32
    return %c0_i32, %c0_i32_0 : i32, i32
  }
  func.func @transform_2(%arg0: i32) -> (i32, i32) {
    %c0_i32 = arith.constant 0 : i32
    %c0_i32_0 = arith.constant 0 : i32
    %c0_i32_1 = arith.constant 0 : i32
    return %c0_i32, %c0_i32_0 : i32, i32
  }
  func.func @transform_3(%arg0: i32) -> (i32, i32) {
    %c0_i32 = arith.constant 0 : i32
    %c0_i32_0 = arith.constant 0 : i32
    return %arg0, %c0_i32 : i32, i32
  }
}

module attributes {stable_mosaic.version = 11 : i64} {
  func.func @_mm_bias_act_kernel(%arg0: i32, %arg1: memref<512x72xbf16, #tpu.memory_space<vmem>>, %arg2: memref<72x128xbf16, #tpu.memory_space<vmem>>, %arg3: memref<1x128xf32, #tpu.memory_space<vmem>>, %arg4: memref<512x128xbf16, #tpu.memory_space<vmem>>) attributes {dimension_semantics = [#tpu.dimension_semantics<parallel>], iteration_bounds = array<i64: 1>, scalar_prefetch = 0 : i64, scratch_operands = 0 : i64, tpu.core_type = #tpu.core_type<tc>, window_params = [{transform_indices = @transform_0, window_bounds = array<i64: 512, 72>}, {pipeline_mode = #tpu.pipeline_mode<synchronous>, transform_indices = @transform_1, window_bounds = array<i64: 72, 128>}, {pipeline_mode = #tpu.pipeline_mode<synchronous>, transform_indices = @transform_2, window_bounds = array<i64: 1, 128>}, {transform_indices = @transform_3, window_bounds = array<i64: 512, 128>}]} {
    %c0 = arith.constant 0 : index
    %c0_0 = arith.constant 0 : index
    %0 = vector.load %arg1[%c0, %c0_0] : memref<512x72xbf16, #tpu.memory_space<vmem>>, vector<512x72xbf16>
    %c0_1 = arith.constant 0 : index
    %c0_2 = arith.constant 0 : index
    %1 = vector.load %arg2[%c0_1, %c0_2] : memref<72x128xbf16, #tpu.memory_space<vmem>>, vector<72x128xbf16>
    %cst = arith.constant dense<0.000000e+00> : vector<512x128xf32>
    %2 = tpu.matmul %0, %1, %cst {dimension_numbers = #tpu.dot_dimension_numbers<[1], [0], [0], [1], [0, 0, 1, 1], [], []>} : vector<512x72xbf16>, vector<72x128xbf16>, vector<512x128xf32> -> vector<512x128xf32>
    %c0_3 = arith.constant 0 : index
    %c0_4 = arith.constant 0 : index
    %3 = vector.load %arg3[%c0_3, %c0_4] : memref<1x128xf32, #tpu.memory_space<vmem>>, vector<1x128xf32>
    %4 = vector.broadcast %3 : vector<1x128xf32> to vector<512x128xf32>
    %5 = arith.addf %2, %4 : vector<512x128xf32>
    %cst_5 = arith.constant 0.000000e+00 : f32
    %6 = vector.broadcast %cst_5 : f32 to vector<512x128xf32>
    %7 = arith.subf %6, %5 : vector<512x128xf32>
    %8 = math.exp %7 : vector<512x128xf32>
    %cst_6 = arith.constant 1.000000e+00 : f32
    %9 = vector.broadcast %cst_6 : f32 to vector<512x128xf32>
    %10 = arith.addf %9, %8 : vector<512x128xf32>
    %11 = tpu.reciprocal %10 {approx = true} : vector<512x128xf32> -> vector<512x128xf32>
    %12 = arith.mulf %5, %11 : vector<512x128xf32>
    %13 = arith.truncf %12 : vector<512x128xf32> to vector<512x128xbf16>
    %c0_7 = arith.constant 0 : index
    %c0_8 = arith.constant 0 : index
    %14 = vector.load %arg4[%c0_7, %c0_8] : memref<512x128xbf16, #tpu.memory_space<vmem>>, vector<512x128xbf16>
    tpu.vector_store %arg4[%c0_7, %c0_8], %13 {strides = array<i32>} : memref<512x128xbf16, #tpu.memory_space<vmem>>, vector<512x128xbf16>,
    return
  }
  func.func @transform_0(%arg0: i32) -> (i32, i32) {
    %c0_i32 = arith.constant 0 : i32
    %c0_i32_0 = arith.constant 0 : i32
    return %arg0, %c0_i32 : i32, i32
  }
  func.func @transform_1(%arg0: i32) -> (i32, i32) {
    %c0_i32 = arith.constant 0 : i32
    %c0_i32_0 = arith.constant 0 : i32
    %c0_i32_1 = arith.constant 0 : i32
    return %c0_i32, %c0_i32_0 : i32, i32
  }
  func.func @transform_2(%arg0: i32) -> (i32, i32) {
    %c0_i32 = arith.constant 0 : i32
    %c0_i32_0 = arith.constant 0 : i32
    %c0_i32_1 = arith.constant 0 : i32
    return %c0_i32, %c0_i32_0 : i32, i32
  }
  func.func @transform_3(%arg0: i32) -> (i32, i32) {
    %c0_i32 = arith.constant 0 : i32
    %c0_i32_0 = arith.constant 0 : i32
    return %arg0, %c0_i32 : i32, i32
  }
}

module attributes {stable_mosaic.version = 11 : i64} {
  func.func @_mm_bias_act_kernel(%arg0: i32, %arg1: memref<128x72xbf16, #tpu.memory_space<vmem>>, %arg2: memref<72x128xbf16, #tpu.memory_space<vmem>>, %arg3: memref<1x128xf32, #tpu.memory_space<vmem>>, %arg4: memref<128x128xbf16, #tpu.memory_space<vmem>>) attributes {dimension_semantics = [#tpu.dimension_semantics<parallel>], iteration_bounds = array<i64: 1>, scalar_prefetch = 0 : i64, scratch_operands = 0 : i64, tpu.core_type = #tpu.core_type<tc>, window_params = [{transform_indices = @transform_0, window_bounds = array<i64: 128, 72>}, {pipeline_mode = #tpu.pipeline_mode<synchronous>, transform_indices = @transform_1, window_bounds = array<i64: 72, 128>}, {pipeline_mode = #tpu.pipeline_mode<synchronous>, transform_indices = @transform_2, window_bounds = array<i64: 1, 128>}, {transform_indices = @transform_3, window_bounds = array<i64: 128, 128>}]} {
    %c0 = arith.constant 0 : index
    %c0_0 = arith.constant 0 : index
    %0 = vector.load %arg1[%c0, %c0_0] : memref<128x72xbf16, #tpu.memory_space<vmem>>, vector<128x72xbf16>
    %c0_1 = arith.constant 0 : index
    %c0_2 = arith.constant 0 : index
    %1 = vector.load %arg2[%c0_1, %c0_2] : memref<72x128xbf16, #tpu.memory_space<vmem>>, vector<72x128xbf16>
    %cst = arith.constant dense<0.000000e+00> : vector<128x128xf32>
    %2 = tpu.matmul %0, %1, %cst {dimension_numbers = #tpu.dot_dimension_numbers<[1], [0], [0], [1], [0, 0, 1, 1], [], []>} : vector<128x72xbf16>, vector<72x128xbf16>, vector<128x128xf32> -> vector<128x128xf32>
    %c0_3 = arith.constant 0 : index
    %c0_4 = arith.constant 0 : index
    %3 = vector.load %arg3[%c0_3, %c0_4] : memref<1x128xf32, #tpu.memory_space<vmem>>, vector<1x128xf32>
    %4 = vector.broadcast %3 : vector<1x128xf32> to vector<128x128xf32>
    %5 = arith.addf %2, %4 : vector<128x128xf32>
    %cst_5 = arith.constant 0.000000e+00 : f32
    %6 = vector.broadcast %cst_5 : f32 to vector<128x128xf32>
    %7 = arith.subf %6, %5 : vector<128x128xf32>
    %8 = math.exp %7 : vector<128x128xf32>
    %cst_6 = arith.constant 1.000000e+00 : f32
    %9 = vector.broadcast %cst_6 : f32 to vector<128x128xf32>
    %10 = arith.addf %9, %8 : vector<128x128xf32>
    %11 = tpu.reciprocal %10 {approx = true} : vector<128x128xf32> -> vector<128x128xf32>
    %12 = arith.mulf %5, %11 : vector<128x128xf32>
    %13 = arith.truncf %12 : vector<128x128xf32> to vector<128x128xbf16>
    %c0_7 = arith.constant 0 : index
    %c0_8 = arith.constant 0 : index
    %14 = vector.load %arg4[%c0_7, %c0_8] : memref<128x128xbf16, #tpu.memory_space<vmem>>, vector<128x128xbf16>
    tpu.vector_store %arg4[%c0_7, %c0_8], %13 {strides = array<i32>} : memref<128x128xbf16, #tpu.memory_space<vmem>>, vector<128x128xbf16>,
    return
  }
  func.func @transform_0(%arg0: i32) -> (i32, i32) {
    %c0_i32 = arith.constant 0 : i32
    %c0_i32_0 = arith.constant 0 : i32
    return %arg0, %c0_i32 : i32, i32
  }
  func.func @transform_1(%arg0: i32) -> (i32, i32) {
    %c0_i32 = arith.constant 0 : i32
    %c0_i32_0 = arith.constant 0 : i32
    %c0_i32_1 = arith.constant 0 : i32
    return %c0_i32, %c0_i32_0 : i32, i32
  }
  func.func @transform_2(%arg0: i32) -> (i32, i32) {
    %c0_i32 = arith.constant 0 : i32
    %c0_i32_0 = arith.constant 0 : i32
    %c0_i32_1 = arith.constant 0 : i32
    return %c0_i32, %c0_i32_0 : i32, i32
  }
  func.func @transform_3(%arg0: i32) -> (i32, i32) {
    %c0_i32 = arith.constant 0 : i32
    %c0_i32_0 = arith.constant 0 : i32
    return %arg0, %c0_i32 : i32, i32
  }
}

module attributes {stable_mosaic.version = 11 : i64} {
  func.func @_mm_bias_act_kernel(%arg0: i32, %arg1: memref<128x108xbf16, #tpu.memory_space<vmem>>, %arg2: memref<108x128xbf16, #tpu.memory_space<vmem>>, %arg3: memref<1x128xf32, #tpu.memory_space<vmem>>, %arg4: memref<128x128xbf16, #tpu.memory_space<vmem>>) attributes {dimension_semantics = [#tpu.dimension_semantics<parallel>], iteration_bounds = array<i64: 1>, scalar_prefetch = 0 : i64, scratch_operands = 0 : i64, tpu.core_type = #tpu.core_type<tc>, window_params = [{transform_indices = @transform_0, window_bounds = array<i64: 128, 108>}, {pipeline_mode = #tpu.pipeline_mode<synchronous>, transform_indices = @transform_1, window_bounds = array<i64: 108, 128>}, {pipeline_mode = #tpu.pipeline_mode<synchronous>, transform_indices = @transform_2, window_bounds = array<i64: 1, 128>}, {transform_indices = @transform_3, window_bounds = array<i64: 128, 128>}]} {
    %c0 = arith.constant 0 : index
    %c0_0 = arith.constant 0 : index
    %0 = vector.load %arg1[%c0, %c0_0] : memref<128x108xbf16, #tpu.memory_space<vmem>>, vector<128x108xbf16>
    %c0_1 = arith.constant 0 : index
    %c0_2 = arith.constant 0 : index
    %1 = vector.load %arg2[%c0_1, %c0_2] : memref<108x128xbf16, #tpu.memory_space<vmem>>, vector<108x128xbf16>
    %cst = arith.constant dense<0.000000e+00> : vector<128x128xf32>
    %2 = tpu.matmul %0, %1, %cst {dimension_numbers = #tpu.dot_dimension_numbers<[1], [0], [0], [1], [0, 0, 1, 1], [], []>} : vector<128x108xbf16>, vector<108x128xbf16>, vector<128x128xf32> -> vector<128x128xf32>
    %c0_3 = arith.constant 0 : index
    %c0_4 = arith.constant 0 : index
    %3 = vector.load %arg3[%c0_3, %c0_4] : memref<1x128xf32, #tpu.memory_space<vmem>>, vector<1x128xf32>
    %4 = vector.broadcast %3 : vector<1x128xf32> to vector<128x128xf32>
    %5 = arith.addf %2, %4 : vector<128x128xf32>
    %cst_5 = arith.constant 0.000000e+00 : f32
    %6 = vector.broadcast %cst_5 : f32 to vector<128x128xf32>
    %7 = arith.subf %6, %5 : vector<128x128xf32>
    %8 = math.exp %7 : vector<128x128xf32>
    %cst_6 = arith.constant 1.000000e+00 : f32
    %9 = vector.broadcast %cst_6 : f32 to vector<128x128xf32>
    %10 = arith.addf %9, %8 : vector<128x128xf32>
    %11 = tpu.reciprocal %10 {approx = true} : vector<128x128xf32> -> vector<128x128xf32>
    %12 = arith.mulf %5, %11 : vector<128x128xf32>
    %13 = arith.truncf %12 : vector<128x128xf32> to vector<128x128xbf16>
    %c0_7 = arith.constant 0 : index
    %c0_8 = arith.constant 0 : index
    %14 = vector.load %arg4[%c0_7, %c0_8] : memref<128x128xbf16, #tpu.memory_space<vmem>>, vector<128x128xbf16>
    tpu.vector_store %arg4[%c0_7, %c0_8], %13 {strides = array<i32>} : memref<128x128xbf16, #tpu.memory_space<vmem>>, vector<128x128xbf16>,
    return
  }
  func.func @transform_0(%arg0: i32) -> (i32, i32) {
    %c0_i32 = arith.constant 0 : i32
    %c0_i32_0 = arith.constant 0 : i32
    return %arg0, %c0_i32 : i32, i32
  }
  func.func @transform_1(%arg0: i32) -> (i32, i32) {
    %c0_i32 = arith.constant 0 : i32
    %c0_i32_0 = arith.constant 0 : i32
    %c0_i32_1 = arith.constant 0 : i32
    return %c0_i32, %c0_i32_0 : i32, i32
  }
  func.func @transform_2(%arg0: i32) -> (i32, i32) {
    %c0_i32 = arith.constant 0 : i32
    %c0_i32_0 = arith.constant 0 : i32
    %c0_i32_1 = arith.constant 0 : i32
    return %c0_i32, %c0_i32_0 : i32, i32
  }
  func.func @transform_3(%arg0: i32) -> (i32, i32) {
    %c0_i32 = arith.constant 0 : i32
    %c0_i32_0 = arith.constant 0 : i32
    return %arg0, %c0_i32 : i32, i32
  }
}

module attributes {stable_mosaic.version = 11 : i64} {
  func.func @_mm_bias_act_kernel(%arg0: i32, %arg1: memref<128x24xbf16, #tpu.memory_space<vmem>>, %arg2: memref<24x128xbf16, #tpu.memory_space<vmem>>, %arg3: memref<1x128xf32, #tpu.memory_space<vmem>>, %arg4: memref<128x128xbf16, #tpu.memory_space<vmem>>) attributes {dimension_semantics = [#tpu.dimension_semantics<parallel>], iteration_bounds = array<i64: 1>, scalar_prefetch = 0 : i64, scratch_operands = 0 : i64, tpu.core_type = #tpu.core_type<tc>, window_params = [{transform_indices = @transform_0, window_bounds = array<i64: 128, 24>}, {pipeline_mode = #tpu.pipeline_mode<synchronous>, transform_indices = @transform_1, window_bounds = array<i64: 24, 128>}, {pipeline_mode = #tpu.pipeline_mode<synchronous>, transform_indices = @transform_2, window_bounds = array<i64: 1, 128>}, {transform_indices = @transform_3, window_bounds = array<i64: 128, 128>}]} {
    %c0 = arith.constant 0 : index
    %c0_0 = arith.constant 0 : index
    %0 = vector.load %arg1[%c0, %c0_0] : memref<128x24xbf16, #tpu.memory_space<vmem>>, vector<128x24xbf16>
    %c0_1 = arith.constant 0 : index
    %c0_2 = arith.constant 0 : index
    %1 = vector.load %arg2[%c0_1, %c0_2] : memref<24x128xbf16, #tpu.memory_space<vmem>>, vector<24x128xbf16>
    %cst = arith.constant dense<0.000000e+00> : vector<128x128xf32>
    %2 = tpu.matmul %0, %1, %cst {dimension_numbers = #tpu.dot_dimension_numbers<[1], [0], [0], [1], [0, 0, 1, 1], [], []>} : vector<128x24xbf16>, vector<24x128xbf16>, vector<128x128xf32> -> vector<128x128xf32>
    %c0_3 = arith.constant 0 : index
    %c0_4 = arith.constant 0 : index
    %3 = vector.load %arg3[%c0_3, %c0_4] : memref<1x128xf32, #tpu.memory_space<vmem>>, vector<1x128xf32>
    %4 = vector.broadcast %3 : vector<1x128xf32> to vector<128x128xf32>
    %5 = arith.addf %2, %4 : vector<128x128xf32>
    %cst_5 = arith.constant 0.000000e+00 : f32
    %6 = vector.broadcast %cst_5 : f32 to vector<128x128xf32>
    %7 = arith.subf %6, %5 : vector<128x128xf32>
    %8 = math.exp %7 : vector<128x128xf32>
    %cst_6 = arith.constant 1.000000e+00 : f32
    %9 = vector.broadcast %cst_6 : f32 to vector<128x128xf32>
    %10 = arith.addf %9, %8 : vector<128x128xf32>
    %11 = tpu.reciprocal %10 {approx = true} : vector<128x128xf32> -> vector<128x128xf32>
    %12 = arith.mulf %5, %11 : vector<128x128xf32>
    %13 = arith.truncf %12 : vector<128x128xf32> to vector<128x128xbf16>
    %c0_7 = arith.constant 0 : index
    %c0_8 = arith.constant 0 : index
    %14 = vector.load %arg4[%c0_7, %c0_8] : memref<128x128xbf16, #tpu.memory_space<vmem>>, vector<128x128xbf16>
    tpu.vector_store %arg4[%c0_7, %c0_8], %13 {strides = array<i32>} : memref<128x128xbf16, #tpu.memory_space<vmem>>, vector<128x128xbf16>,
    return
  }
  func.func @transform_0(%arg0: i32) -> (i32, i32) {
    %c0_i32 = arith.constant 0 : i32
    %c0_i32_0 = arith.constant 0 : i32
    return %arg0, %c0_i32 : i32, i32
  }
  func.func @transform_1(%arg0: i32) -> (i32, i32) {
    %c0_i32 = arith.constant 0 : i32
    %c0_i32_0 = arith.constant 0 : i32
    %c0_i32_1 = arith.constant 0 : i32
    return %c0_i32, %c0_i32_0 : i32, i32
  }
  func.func @transform_2(%arg0: i32) -> (i32, i32) {
    %c0_i32 = arith.constant 0 : i32
    %c0_i32_0 = arith.constant 0 : i32
    %c0_i32_1 = arith.constant 0 : i32
    return %c0_i32, %c0_i32_0 : i32, i32
  }
  func.func @transform_3(%arg0: i32) -> (i32, i32) {
    %c0_i32 = arith.constant 0 : i32
    %c0_i32_0 = arith.constant 0 : i32
    return %arg0, %c0_i32 : i32, i32
  }
}

module attributes {stable_mosaic.version = 11 : i64} {
  func.func @_mm_bias_act_kernel(%arg0: i32, %arg1: memref<128x171xbf16, #tpu.memory_space<vmem>>, %arg2: memref<171x128xbf16, #tpu.memory_space<vmem>>, %arg3: memref<1x128xf32, #tpu.memory_space<vmem>>, %arg4: memref<128x128xbf16, #tpu.memory_space<vmem>>) attributes {dimension_semantics = [#tpu.dimension_semantics<parallel>], iteration_bounds = array<i64: 1>, scalar_prefetch = 0 : i64, scratch_operands = 0 : i64, tpu.core_type = #tpu.core_type<tc>, window_params = [{transform_indices = @transform_0, window_bounds = array<i64: 128, 171>}, {pipeline_mode = #tpu.pipeline_mode<synchronous>, transform_indices = @transform_1, window_bounds = array<i64: 171, 128>}, {pipeline_mode = #tpu.pipeline_mode<synchronous>, transform_indices = @transform_2, window_bounds = array<i64: 1, 128>}, {transform_indices = @transform_3, window_bounds = array<i64: 128, 128>}]} {
    %c0 = arith.constant 0 : index
    %c0_0 = arith.constant 0 : index
    %0 = vector.load %arg1[%c0, %c0_0] : memref<128x171xbf16, #tpu.memory_space<vmem>>, vector<128x171xbf16>
    %c0_1 = arith.constant 0 : index
    %c0_2 = arith.constant 0 : index
    %1 = vector.load %arg2[%c0_1, %c0_2] : memref<171x128xbf16, #tpu.memory_space<vmem>>, vector<171x128xbf16>
    %cst = arith.constant dense<0.000000e+00> : vector<128x128xf32>
    %2 = tpu.matmul %0, %1, %cst {dimension_numbers = #tpu.dot_dimension_numbers<[1], [0], [0], [1], [0, 0, 1, 1], [], []>} : vector<128x171xbf16>, vector<171x128xbf16>, vector<128x128xf32> -> vector<128x128xf32>
    %c0_3 = arith.constant 0 : index
    %c0_4 = arith.constant 0 : index
    %3 = vector.load %arg3[%c0_3, %c0_4] : memref<1x128xf32, #tpu.memory_space<vmem>>, vector<1x128xf32>
    %4 = vector.broadcast %3 : vector<1x128xf32> to vector<128x128xf32>
    %5 = arith.addf %2, %4 : vector<128x128xf32>
    %cst_5 = arith.constant 0.000000e+00 : f32
    %6 = vector.broadcast %cst_5 : f32 to vector<128x128xf32>
    %7 = arith.subf %6, %5 : vector<128x128xf32>
    %8 = math.exp %7 : vector<128x128xf32>
    %cst_6 = arith.constant 1.000000e+00 : f32
    %9 = vector.broadcast %cst_6 : f32 to vector<128x128xf32>
    %10 = arith.addf %9, %8 : vector<128x128xf32>
    %11 = tpu.reciprocal %10 {approx = true} : vector<128x128xf32> -> vector<128x128xf32>
    %12 = arith.mulf %5, %11 : vector<128x128xf32>
    %13 = arith.truncf %12 : vector<128x128xf32> to vector<128x128xbf16>
    %c0_7 = arith.constant 0 : index
    %c0_8 = arith.constant 0 : index
    %14 = vector.load %arg4[%c0_7, %c0_8] : memref<128x128xbf16, #tpu.memory_space<vmem>>, vector<128x128xbf16>
    tpu.vector_store %arg4[%c0_7, %c0_8], %13 {strides = array<i32>} : memref<128x128xbf16, #tpu.memory_space<vmem>>, vector<128x128xbf16>,
    return
  }
  func.func @transform_0(%arg0: i32) -> (i32, i32) {
    %c0_i32 = arith.constant 0 : i32
    %c0_i32_0 = arith.constant 0 : i32
    return %arg0, %c0_i32 : i32, i32
  }
  func.func @transform_1(%arg0: i32) -> (i32, i32) {
    %c0_i32 = arith.constant 0 : i32
    %c0_i32_0 = arith.constant 0 : i32
    %c0_i32_1 = arith.constant 0 : i32
    return %c0_i32, %c0_i32_0 : i32, i32
  }
  func.func @transform_2(%arg0: i32) -> (i32, i32) {
    %c0_i32 = arith.constant 0 : i32
    %c0_i32_0 = arith.constant 0 : i32
    %c0_i32_1 = arith.constant 0 : i32
    return %c0_i32, %c0_i32_0 : i32, i32
  }
  func.func @transform_3(%arg0: i32) -> (i32, i32) {
    %c0_i32 = arith.constant 0 : i32
    %c0_i32_0 = arith.constant 0 : i32
    return %arg0, %c0_i32 : i32, i32
  }
}

module attributes {stable_mosaic.version = 11 : i64} {
  func.func @_mm_bias_act_kernel(%arg0: i32, %arg1: memref<128x25xbf16, #tpu.memory_space<vmem>>, %arg2: memref<25x128xbf16, #tpu.memory_space<vmem>>, %arg3: memref<1x128xf32, #tpu.memory_space<vmem>>, %arg4: memref<128x128xbf16, #tpu.memory_space<vmem>>) attributes {dimension_semantics = [#tpu.dimension_semantics<parallel>], iteration_bounds = array<i64: 1>, scalar_prefetch = 0 : i64, scratch_operands = 0 : i64, tpu.core_type = #tpu.core_type<tc>, window_params = [{transform_indices = @transform_0, window_bounds = array<i64: 128, 25>}, {pipeline_mode = #tpu.pipeline_mode<synchronous>, transform_indices = @transform_1, window_bounds = array<i64: 25, 128>}, {pipeline_mode = #tpu.pipeline_mode<synchronous>, transform_indices = @transform_2, window_bounds = array<i64: 1, 128>}, {transform_indices = @transform_3, window_bounds = array<i64: 128, 128>}]} {
    %c0 = arith.constant 0 : index
    %c0_0 = arith.constant 0 : index
    %0 = vector.load %arg1[%c0, %c0_0] : memref<128x25xbf16, #tpu.memory_space<vmem>>, vector<128x25xbf16>
    %c0_1 = arith.constant 0 : index
    %c0_2 = arith.constant 0 : index
    %1 = vector.load %arg2[%c0_1, %c0_2] : memref<25x128xbf16, #tpu.memory_space<vmem>>, vector<25x128xbf16>
    %cst = arith.constant dense<0.000000e+00> : vector<128x128xf32>
    %2 = tpu.matmul %0, %1, %cst {dimension_numbers = #tpu.dot_dimension_numbers<[1], [0], [0], [1], [0, 0, 1, 1], [], []>} : vector<128x25xbf16>, vector<25x128xbf16>, vector<128x128xf32> -> vector<128x128xf32>
    %c0_3 = arith.constant 0 : index
    %c0_4 = arith.constant 0 : index
    %3 = vector.load %arg3[%c0_3, %c0_4] : memref<1x128xf32, #tpu.memory_space<vmem>>, vector<1x128xf32>
    %4 = vector.broadcast %3 : vector<1x128xf32> to vector<128x128xf32>
    %5 = arith.addf %2, %4 : vector<128x128xf32>
    %cst_5 = arith.constant 0.000000e+00 : f32
    %6 = vector.broadcast %cst_5 : f32 to vector<128x128xf32>
    %7 = arith.subf %6, %5 : vector<128x128xf32>
    %8 = math.exp %7 : vector<128x128xf32>
    %cst_6 = arith.constant 1.000000e+00 : f32
    %9 = vector.broadcast %cst_6 : f32 to vector<128x128xf32>
    %10 = arith.addf %9, %8 : vector<128x128xf32>
    %11 = tpu.reciprocal %10 {approx = true} : vector<128x128xf32> -> vector<128x128xf32>
    %12 = arith.mulf %5, %11 : vector<128x128xf32>
    %13 = arith.truncf %12 : vector<128x128xf32> to vector<128x128xbf16>
    %c0_7 = arith.constant 0 : index
    %c0_8 = arith.constant 0 : index
    %14 = vector.load %arg4[%c0_7, %c0_8] : memref<128x128xbf16, #tpu.memory_space<vmem>>, vector<128x128xbf16>
    tpu.vector_store %arg4[%c0_7, %c0_8], %13 {strides = array<i32>} : memref<128x128xbf16, #tpu.memory_space<vmem>>, vector<128x128xbf16>,
    return
  }
  func.func @transform_0(%arg0: i32) -> (i32, i32) {
    %c0_i32 = arith.constant 0 : i32
    %c0_i32_0 = arith.constant 0 : i32
    return %arg0, %c0_i32 : i32, i32
  }
  func.func @transform_1(%arg0: i32) -> (i32, i32) {
    %c0_i32 = arith.constant 0 : i32
    %c0_i32_0 = arith.constant 0 : i32
    %c0_i32_1 = arith.constant 0 : i32
    return %c0_i32, %c0_i32_0 : i32, i32
  }
  func.func @transform_2(%arg0: i32) -> (i32, i32) {
    %c0_i32 = arith.constant 0 : i32
    %c0_i32_0 = arith.constant 0 : i32
    %c0_i32_1 = arith.constant 0 : i32
    return %c0_i32, %c0_i32_0 : i32, i32
  }
  func.func @transform_3(%arg0: i32) -> (i32, i32) {
    %c0_i32 = arith.constant 0 : i32
    %c0_i32_0 = arith.constant 0 : i32
    return %arg0, %c0_i32 : i32, i32
  }
}

module attributes {stable_mosaic.version = 11 : i64} {
  func.func @_mm_bias_act_kernel(%arg0: i32, %arg1: memref<128x342xbf16, #tpu.memory_space<vmem>>, %arg2: memref<342x128xbf16, #tpu.memory_space<vmem>>, %arg3: memref<1x128xf32, #tpu.memory_space<vmem>>, %arg4: memref<128x128xbf16, #tpu.memory_space<vmem>>) attributes {dimension_semantics = [#tpu.dimension_semantics<parallel>], iteration_bounds = array<i64: 1>, scalar_prefetch = 0 : i64, scratch_operands = 0 : i64, tpu.core_type = #tpu.core_type<tc>, window_params = [{transform_indices = @transform_0, window_bounds = array<i64: 128, 342>}, {pipeline_mode = #tpu.pipeline_mode<synchronous>, transform_indices = @transform_1, window_bounds = array<i64: 342, 128>}, {pipeline_mode = #tpu.pipeline_mode<synchronous>, transform_indices = @transform_2, window_bounds = array<i64: 1, 128>}, {transform_indices = @transform_3, window_bounds = array<i64: 128, 128>}]} {
    %c0 = arith.constant 0 : index
    %c0_0 = arith.constant 0 : index
    %0 = vector.load %arg1[%c0, %c0_0] : memref<128x342xbf16, #tpu.memory_space<vmem>>, vector<128x342xbf16>
    %c0_1 = arith.constant 0 : index
    %c0_2 = arith.constant 0 : index
    %1 = vector.load %arg2[%c0_1, %c0_2] : memref<342x128xbf16, #tpu.memory_space<vmem>>, vector<342x128xbf16>
    %cst = arith.constant dense<0.000000e+00> : vector<128x128xf32>
    %2 = tpu.matmul %0, %1, %cst {dimension_numbers = #tpu.dot_dimension_numbers<[1], [0], [0], [1], [0, 0, 1, 1], [], []>} : vector<128x342xbf16>, vector<342x128xbf16>, vector<128x128xf32> -> vector<128x128xf32>
    %c0_3 = arith.constant 0 : index
    %c0_4 = arith.constant 0 : index
    %3 = vector.load %arg3[%c0_3, %c0_4] : memref<1x128xf32, #tpu.memory_space<vmem>>, vector<1x128xf32>
    %4 = vector.broadcast %3 : vector<1x128xf32> to vector<128x128xf32>
    %5 = arith.addf %2, %4 : vector<128x128xf32>
    %cst_5 = arith.constant 0.000000e+00 : f32
    %6 = vector.broadcast %cst_5 : f32 to vector<128x128xf32>
    %7 = arith.subf %6, %5 : vector<128x128xf32>
    %8 = math.exp %7 : vector<128x128xf32>
    %cst_6 = arith.constant 1.000000e+00 : f32
    %9 = vector.broadcast %cst_6 : f32 to vector<128x128xf32>
    %10 = arith.addf %9, %8 : vector<128x128xf32>
    %11 = tpu.reciprocal %10 {approx = true} : vector<128x128xf32> -> vector<128x128xf32>
    %12 = arith.mulf %5, %11 : vector<128x128xf32>
    %13 = arith.truncf %12 : vector<128x128xf32> to vector<128x128xbf16>
    %c0_7 = arith.constant 0 : index
    %c0_8 = arith.constant 0 : index
    %14 = vector.load %arg4[%c0_7, %c0_8] : memref<128x128xbf16, #tpu.memory_space<vmem>>, vector<128x128xbf16>
    tpu.vector_store %arg4[%c0_7, %c0_8], %13 {strides = array<i32>} : memref<128x128xbf16, #tpu.memory_space<vmem>>, vector<128x128xbf16>,
    return
  }
  func.func @transform_0(%arg0: i32) -> (i32, i32) {
    %c0_i32 = arith.constant 0 : i32
    %c0_i32_0 = arith.constant 0 : i32
    return %arg0, %c0_i32 : i32, i32
  }
  func.func @transform_1(%arg0: i32) -> (i32, i32) {
    %c0_i32 = arith.constant 0 : i32
    %c0_i32_0 = arith.constant 0 : i32
    %c0_i32_1 = arith.constant 0 : i32
    return %c0_i32, %c0_i32_0 : i32, i32
  }
  func.func @transform_2(%arg0: i32) -> (i32, i32) {
    %c0_i32 = arith.constant 0 : i32
    %c0_i32_0 = arith.constant 0 : i32
    %c0_i32_1 = arith.constant 0 : i32
    return %c0_i32, %c0_i32_0 : i32, i32
  }
  func.func @transform_3(%arg0: i32) -> (i32, i32) {
    %c0_i32 = arith.constant 0 : i32
    %c0_i32_0 = arith.constant 0 : i32
    return %arg0, %c0_i32 : i32, i32
  }
}

module attributes {stable_mosaic.version = 11 : i64} {
  func.func @_mm_bias_act_kernel(%arg0: i32, %arg1: memref<128x19xbf16, #tpu.memory_space<vmem>>, %arg2: memref<19x128xbf16, #tpu.memory_space<vmem>>, %arg3: memref<1x128xf32, #tpu.memory_space<vmem>>, %arg4: memref<128x128xbf16, #tpu.memory_space<vmem>>) attributes {dimension_semantics = [#tpu.dimension_semantics<parallel>], iteration_bounds = array<i64: 1>, scalar_prefetch = 0 : i64, scratch_operands = 0 : i64, tpu.core_type = #tpu.core_type<tc>, window_params = [{transform_indices = @transform_0, window_bounds = array<i64: 128, 19>}, {pipeline_mode = #tpu.pipeline_mode<synchronous>, transform_indices = @transform_1, window_bounds = array<i64: 19, 128>}, {pipeline_mode = #tpu.pipeline_mode<synchronous>, transform_indices = @transform_2, window_bounds = array<i64: 1, 128>}, {transform_indices = @transform_3, window_bounds = array<i64: 128, 128>}]} {
    %c0 = arith.constant 0 : index
    %c0_0 = arith.constant 0 : index
    %0 = vector.load %arg1[%c0, %c0_0] : memref<128x19xbf16, #tpu.memory_space<vmem>>, vector<128x19xbf16>
    %c0_1 = arith.constant 0 : index
    %c0_2 = arith.constant 0 : index
    %1 = vector.load %arg2[%c0_1, %c0_2] : memref<19x128xbf16, #tpu.memory_space<vmem>>, vector<19x128xbf16>
    %cst = arith.constant dense<0.000000e+00> : vector<128x128xf32>
    %2 = tpu.matmul %0, %1, %cst {dimension_numbers = #tpu.dot_dimension_numbers<[1], [0], [0], [1], [0, 0, 1, 1], [], []>} : vector<128x19xbf16>, vector<19x128xbf16>, vector<128x128xf32> -> vector<128x128xf32>
    %c0_3 = arith.constant 0 : index
    %c0_4 = arith.constant 0 : index
    %3 = vector.load %arg3[%c0_3, %c0_4] : memref<1x128xf32, #tpu.memory_space<vmem>>, vector<1x128xf32>
    %4 = vector.broadcast %3 : vector<1x128xf32> to vector<128x128xf32>
    %5 = arith.addf %2, %4 : vector<128x128xf32>
    %cst_5 = arith.constant 0.000000e+00 : f32
    %6 = vector.broadcast %cst_5 : f32 to vector<128x128xf32>
    %7 = arith.subf %6, %5 : vector<128x128xf32>
    %8 = math.exp %7 : vector<128x128xf32>
    %cst_6 = arith.constant 1.000000e+00 : f32
    %9 = vector.broadcast %cst_6 : f32 to vector<128x128xf32>
    %10 = arith.addf %9, %8 : vector<128x128xf32>
    %11 = tpu.reciprocal %10 {approx = true} : vector<128x128xf32> -> vector<128x128xf32>
    %12 = arith.mulf %5, %11 : vector<128x128xf32>
    %13 = arith.truncf %12 : vector<128x128xf32> to vector<128x128xbf16>
    %c0_7 = arith.constant 0 : index
    %c0_8 = arith.constant 0 : index
    %14 = vector.load %arg4[%c0_7, %c0_8] : memref<128x128xbf16, #tpu.memory_space<vmem>>, vector<128x128xbf16>
    tpu.vector_store %arg4[%c0_7, %c0_8], %13 {strides = array<i32>} : memref<128x128xbf16, #tpu.memory_space<vmem>>, vector<128x128xbf16>,
    return
  }
  func.func @transform_0(%arg0: i32) -> (i32, i32) {
    %c0_i32 = arith.constant 0 : i32
    %c0_i32_0 = arith.constant 0 : i32
    return %arg0, %c0_i32 : i32, i32
  }
  func.func @transform_1(%arg0: i32) -> (i32, i32) {
    %c0_i32 = arith.constant 0 : i32
    %c0_i32_0 = arith.constant 0 : i32
    %c0_i32_1 = arith.constant 0 : i32
    return %c0_i32, %c0_i32_0 : i32, i32
  }
  func.func @transform_2(%arg0: i32) -> (i32, i32) {
    %c0_i32 = arith.constant 0 : i32
    %c0_i32_0 = arith.constant 0 : i32
    %c0_i32_1 = arith.constant 0 : i32
    return %c0_i32, %c0_i32_0 : i32, i32
  }
  func.func @transform_3(%arg0: i32) -> (i32, i32) {
    %c0_i32 = arith.constant 0 : i32
    %c0_i32_0 = arith.constant 0 : i32
    return %arg0, %c0_i32 : i32, i32
  }
}

module attributes {stable_mosaic.version = 11 : i64} {
  func.func @_mm_bias_act_kernel(%arg0: i32, %arg1: memref<128x12xbf16, #tpu.memory_space<vmem>>, %arg2: memref<12x128xbf16, #tpu.memory_space<vmem>>, %arg3: memref<1x128xf32, #tpu.memory_space<vmem>>, %arg4: memref<128x128xbf16, #tpu.memory_space<vmem>>) attributes {dimension_semantics = [#tpu.dimension_semantics<parallel>], iteration_bounds = array<i64: 1>, scalar_prefetch = 0 : i64, scratch_operands = 0 : i64, tpu.core_type = #tpu.core_type<tc>, window_params = [{transform_indices = @transform_0, window_bounds = array<i64: 128, 12>}, {pipeline_mode = #tpu.pipeline_mode<synchronous>, transform_indices = @transform_1, window_bounds = array<i64: 12, 128>}, {pipeline_mode = #tpu.pipeline_mode<synchronous>, transform_indices = @transform_2, window_bounds = array<i64: 1, 128>}, {transform_indices = @transform_3, window_bounds = array<i64: 128, 128>}]} {
    %c0 = arith.constant 0 : index
    %c0_0 = arith.constant 0 : index
    %0 = vector.load %arg1[%c0, %c0_0] : memref<128x12xbf16, #tpu.memory_space<vmem>>, vector<128x12xbf16>
    %c0_1 = arith.constant 0 : index
    %c0_2 = arith.constant 0 : index
    %1 = vector.load %arg2[%c0_1, %c0_2] : memref<12x128xbf16, #tpu.memory_space<vmem>>, vector<12x128xbf16>
    %cst = arith.constant dense<0.000000e+00> : vector<128x128xf32>
    %2 = tpu.matmul %0, %1, %cst {dimension_numbers = #tpu.dot_dimension_numbers<[1], [0], [0], [1], [0, 0, 1, 1], [], []>} : vector<128x12xbf16>, vector<12x128xbf16>, vector<128x128xf32> -> vector<128x128xf32>
    %c0_3 = arith.constant 0 : index
    %c0_4 = arith.constant 0 : index
    %3 = vector.load %arg3[%c0_3, %c0_4] : memref<1x128xf32, #tpu.memory_space<vmem>>, vector<1x128xf32>
    %4 = vector.broadcast %3 : vector<1x128xf32> to vector<128x128xf32>
    %5 = arith.addf %2, %4 : vector<128x128xf32>
    %cst_5 = arith.constant 0.000000e+00 : f32
    %6 = vector.broadcast %cst_5 : f32 to vector<128x128xf32>
    %7 = arith.subf %6, %5 : vector<128x128xf32>
    %8 = math.exp %7 : vector<128x128xf32>
    %cst_6 = arith.constant 1.000000e+00 : f32
    %9 = vector.broadcast %cst_6 : f32 to vector<128x128xf32>
    %10 = arith.addf %9, %8 : vector<128x128xf32>
    %11 = tpu.reciprocal %10 {approx = true} : vector<128x128xf32> -> vector<128x128xf32>
    %12 = arith.mulf %5, %11 : vector<128x128xf32>
    %13 = arith.truncf %12 : vector<128x128xf32> to vector<128x128xbf16>
    %c0_7 = arith.constant 0 : index
    %c0_8 = arith.constant 0 : index
    %14 = vector.load %arg4[%c0_7, %c0_8] : memref<128x128xbf16, #tpu.memory_space<vmem>>, vector<128x128xbf16>
    tpu.vector_store %arg4[%c0_7, %c0_8], %13 {strides = array<i32>} : memref<128x128xbf16, #tpu.memory_space<vmem>>, vector<128x128xbf16>,
    return
  }
  func.func @transform_0(%arg0: i32) -> (i32, i32) {
    %c0_i32 = arith.constant 0 : i32
    %c0_i32_0 = arith.constant 0 : i32
    return %arg0, %c0_i32 : i32, i32
  }
  func.func @transform_1(%arg0: i32) -> (i32, i32) {
    %c0_i32 = arith.constant 0 : i32
    %c0_i32_0 = arith.constant 0 : i32
    %c0_i32_1 = arith.constant 0 : i32
    return %c0_i32, %c0_i32_0 : i32, i32
  }
  func.func @transform_2(%arg0: i32) -> (i32, i32) {
    %c0_i32 = arith.constant 0 : i32
    %c0_i32_0 = arith.constant 0 : i32
    %c0_i32_1 = arith.constant 0 : i32
    return %c0_i32, %c0_i32_0 : i32, i32
  }
  func.func @transform_3(%arg0: i32) -> (i32, i32) {
    %c0_i32 = arith.constant 0 : i32
    %c0_i32_0 = arith.constant 0 : i32
    return %arg0, %c0_i32 : i32, i32
  }
}

module attributes {stable_mosaic.version = 11 : i64} {
  func.func @_mm_bias_act_kernel(%arg0: i32, %arg1: memref<128x216xbf16, #tpu.memory_space<vmem>>, %arg2: memref<216x128xbf16, #tpu.memory_space<vmem>>, %arg3: memref<1x128xf32, #tpu.memory_space<vmem>>, %arg4: memref<128x128xbf16, #tpu.memory_space<vmem>>) attributes {dimension_semantics = [#tpu.dimension_semantics<parallel>], iteration_bounds = array<i64: 1>, scalar_prefetch = 0 : i64, scratch_operands = 0 : i64, tpu.core_type = #tpu.core_type<tc>, window_params = [{transform_indices = @transform_0, window_bounds = array<i64: 128, 216>}, {pipeline_mode = #tpu.pipeline_mode<synchronous>, transform_indices = @transform_1, window_bounds = array<i64: 216, 128>}, {pipeline_mode = #tpu.pipeline_mode<synchronous>, transform_indices = @transform_2, window_bounds = array<i64: 1, 128>}, {transform_indices = @transform_3, window_bounds = array<i64: 128, 128>}]} {
    %c0 = arith.constant 0 : index
    %c0_0 = arith.constant 0 : index
    %0 = vector.load %arg1[%c0, %c0_0] : memref<128x216xbf16, #tpu.memory_space<vmem>>, vector<128x216xbf16>
    %c0_1 = arith.constant 0 : index
    %c0_2 = arith.constant 0 : index
    %1 = vector.load %arg2[%c0_1, %c0_2] : memref<216x128xbf16, #tpu.memory_space<vmem>>, vector<216x128xbf16>
    %cst = arith.constant dense<0.000000e+00> : vector<128x128xf32>
    %2 = tpu.matmul %0, %1, %cst {dimension_numbers = #tpu.dot_dimension_numbers<[1], [0], [0], [1], [0, 0, 1, 1], [], []>} : vector<128x216xbf16>, vector<216x128xbf16>, vector<128x128xf32> -> vector<128x128xf32>
    %c0_3 = arith.constant 0 : index
    %c0_4 = arith.constant 0 : index
    %3 = vector.load %arg3[%c0_3, %c0_4] : memref<1x128xf32, #tpu.memory_space<vmem>>, vector<1x128xf32>
    %4 = vector.broadcast %3 : vector<1x128xf32> to vector<128x128xf32>
    %5 = arith.addf %2, %4 : vector<128x128xf32>
    %cst_5 = arith.constant 0.000000e+00 : f32
    %6 = vector.broadcast %cst_5 : f32 to vector<128x128xf32>
    %7 = arith.subf %6, %5 : vector<128x128xf32>
    %8 = math.exp %7 : vector<128x128xf32>
    %cst_6 = arith.constant 1.000000e+00 : f32
    %9 = vector.broadcast %cst_6 : f32 to vector<128x128xf32>
    %10 = arith.addf %9, %8 : vector<128x128xf32>
    %11 = tpu.reciprocal %10 {approx = true} : vector<128x128xf32> -> vector<128x128xf32>
    %12 = arith.mulf %5, %11 : vector<128x128xf32>
    %13 = arith.truncf %12 : vector<128x128xf32> to vector<128x128xbf16>
    %c0_7 = arith.constant 0 : index
    %c0_8 = arith.constant 0 : index
    %14 = vector.load %arg4[%c0_7, %c0_8] : memref<128x128xbf16, #tpu.memory_space<vmem>>, vector<128x128xbf16>
    tpu.vector_store %arg4[%c0_7, %c0_8], %13 {strides = array<i32>} : memref<128x128xbf16, #tpu.memory_space<vmem>>, vector<128x128xbf16>,
    return
  }
  func.func @transform_0(%arg0: i32) -> (i32, i32) {
    %c0_i32 = arith.constant 0 : i32
    %c0_i32_0 = arith.constant 0 : i32
    return %arg0, %c0_i32 : i32, i32
  }
  func.func @transform_1(%arg0: i32) -> (i32, i32) {
    %c0_i32 = arith.constant 0 : i32
    %c0_i32_0 = arith.constant 0 : i32
    %c0_i32_1 = arith.constant 0 : i32
    return %c0_i32, %c0_i32_0 : i32, i32
  }
  func.func @transform_2(%arg0: i32) -> (i32, i32) {
    %c0_i32 = arith.constant 0 : i32
    %c0_i32_0 = arith.constant 0 : i32
    %c0_i32_1 = arith.constant 0 : i32
    return %c0_i32, %c0_i32_0 : i32, i32
  }
  func.func @transform_3(%arg0: i32) -> (i32, i32) {
    %c0_i32 = arith.constant 0 : i32
    %c0_i32_0 = arith.constant 0 : i32
    return %arg0, %c0_i32 : i32, i32
  }
}

module attributes {stable_mosaic.version = 11 : i64} {
  func.func @_mm_bias_act_kernel(%arg0: i32, %arg1: memref<128x279xbf16, #tpu.memory_space<vmem>>, %arg2: memref<279x128xbf16, #tpu.memory_space<vmem>>, %arg3: memref<1x128xf32, #tpu.memory_space<vmem>>, %arg4: memref<128x128xbf16, #tpu.memory_space<vmem>>) attributes {dimension_semantics = [#tpu.dimension_semantics<parallel>], iteration_bounds = array<i64: 1>, scalar_prefetch = 0 : i64, scratch_operands = 0 : i64, tpu.core_type = #tpu.core_type<tc>, window_params = [{transform_indices = @transform_0, window_bounds = array<i64: 128, 279>}, {pipeline_mode = #tpu.pipeline_mode<synchronous>, transform_indices = @transform_1, window_bounds = array<i64: 279, 128>}, {pipeline_mode = #tpu.pipeline_mode<synchronous>, transform_indices = @transform_2, window_bounds = array<i64: 1, 128>}, {transform_indices = @transform_3, window_bounds = array<i64: 128, 128>}]} {
    %c0 = arith.constant 0 : index
    %c0_0 = arith.constant 0 : index
    %0 = vector.load %arg1[%c0, %c0_0] : memref<128x279xbf16, #tpu.memory_space<vmem>>, vector<128x279xbf16>
    %c0_1 = arith.constant 0 : index
    %c0_2 = arith.constant 0 : index
    %1 = vector.load %arg2[%c0_1, %c0_2] : memref<279x128xbf16, #tpu.memory_space<vmem>>, vector<279x128xbf16>
    %cst = arith.constant dense<0.000000e+00> : vector<128x128xf32>
    %2 = tpu.matmul %0, %1, %cst {dimension_numbers = #tpu.dot_dimension_numbers<[1], [0], [0], [1], [0, 0, 1, 1], [], []>} : vector<128x279xbf16>, vector<279x128xbf16>, vector<128x128xf32> -> vector<128x128xf32>
    %c0_3 = arith.constant 0 : index
    %c0_4 = arith.constant 0 : index
    %3 = vector.load %arg3[%c0_3, %c0_4] : memref<1x128xf32, #tpu.memory_space<vmem>>, vector<1x128xf32>
    %4 = vector.broadcast %3 : vector<1x128xf32> to vector<128x128xf32>
    %5 = arith.addf %2, %4 : vector<128x128xf32>
    %cst_5 = arith.constant 0.000000e+00 : f32
    %6 = vector.broadcast %cst_5 : f32 to vector<128x128xf32>
    %7 = arith.subf %6, %5 : vector<128x128xf32>
    %8 = math.exp %7 : vector<128x128xf32>
    %cst_6 = arith.constant 1.000000e+00 : f32
    %9 = vector.broadcast %cst_6 : f32 to vector<128x128xf32>
    %10 = arith.addf %9, %8 : vector<128x128xf32>
    %11 = tpu.reciprocal %10 {approx = true} : vector<128x128xf32> -> vector<128x128xf32>
    %12 = arith.mulf %5, %11 : vector<128x128xf32>
    %13 = arith.truncf %12 : vector<128x128xf32> to vector<128x128xbf16>
    %c0_7 = arith.constant 0 : index
    %c0_8 = arith.constant 0 : index
    %14 = vector.load %arg4[%c0_7, %c0_8] : memref<128x128xbf16, #tpu.memory_space<vmem>>, vector<128x128xbf16>
    tpu.vector_store %arg4[%c0_7, %c0_8], %13 {strides = array<i32>} : memref<128x128xbf16, #tpu.memory_space<vmem>>, vector<128x128xbf16>,
    return
  }
  func.func @transform_0(%arg0: i32) -> (i32, i32) {
    %c0_i32 = arith.constant 0 : i32
    %c0_i32_0 = arith.constant 0 : i32
    return %arg0, %c0_i32 : i32, i32
  }
  func.func @transform_1(%arg0: i32) -> (i32, i32) {
    %c0_i32 = arith.constant 0 : i32
    %c0_i32_0 = arith.constant 0 : i32
    %c0_i32_1 = arith.constant 0 : i32
    return %c0_i32, %c0_i32_0 : i32, i32
  }
  func.func @transform_2(%arg0: i32) -> (i32, i32) {
    %c0_i32 = arith.constant 0 : i32
    %c0_i32_0 = arith.constant 0 : i32
    %c0_i32_1 = arith.constant 0 : i32
    return %c0_i32, %c0_i32_0 : i32, i32
  }
  func.func @transform_3(%arg0: i32) -> (i32, i32) {
    %c0_i32 = arith.constant 0 : i32
    %c0_i32_0 = arith.constant 0 : i32
    return %arg0, %c0_i32 : i32, i32
  }
}

module attributes {stable_mosaic.version = 11 : i64} {
  func.func @_mm_bias_act_kernel(%arg0: i32, %arg1: memref<128x225xbf16, #tpu.memory_space<vmem>>, %arg2: memref<225x128xbf16, #tpu.memory_space<vmem>>, %arg3: memref<1x128xf32, #tpu.memory_space<vmem>>, %arg4: memref<128x128xbf16, #tpu.memory_space<vmem>>) attributes {dimension_semantics = [#tpu.dimension_semantics<parallel>], iteration_bounds = array<i64: 1>, scalar_prefetch = 0 : i64, scratch_operands = 0 : i64, tpu.core_type = #tpu.core_type<tc>, window_params = [{transform_indices = @transform_0, window_bounds = array<i64: 128, 225>}, {pipeline_mode = #tpu.pipeline_mode<synchronous>, transform_indices = @transform_1, window_bounds = array<i64: 225, 128>}, {pipeline_mode = #tpu.pipeline_mode<synchronous>, transform_indices = @transform_2, window_bounds = array<i64: 1, 128>}, {transform_indices = @transform_3, window_bounds = array<i64: 128, 128>}]} {
    %c0 = arith.constant 0 : index
    %c0_0 = arith.constant 0 : index
    %0 = vector.load %arg1[%c0, %c0_0] : memref<128x225xbf16, #tpu.memory_space<vmem>>, vector<128x225xbf16>
    %c0_1 = arith.constant 0 : index
    %c0_2 = arith.constant 0 : index
    %1 = vector.load %arg2[%c0_1, %c0_2] : memref<225x128xbf16, #tpu.memory_space<vmem>>, vector<225x128xbf16>
    %cst = arith.constant dense<0.000000e+00> : vector<128x128xf32>
    %2 = tpu.matmul %0, %1, %cst {dimension_numbers = #tpu.dot_dimension_numbers<[1], [0], [0], [1], [0, 0, 1, 1], [], []>} : vector<128x225xbf16>, vector<225x128xbf16>, vector<128x128xf32> -> vector<128x128xf32>
    %c0_3 = arith.constant 0 : index
    %c0_4 = arith.constant 0 : index
    %3 = vector.load %arg3[%c0_3, %c0_4] : memref<1x128xf32, #tpu.memory_space<vmem>>, vector<1x128xf32>
    %4 = vector.broadcast %3 : vector<1x128xf32> to vector<128x128xf32>
    %5 = arith.addf %2, %4 : vector<128x128xf32>
    %cst_5 = arith.constant 0.000000e+00 : f32
    %6 = vector.broadcast %cst_5 : f32 to vector<128x128xf32>
    %7 = arith.subf %6, %5 : vector<128x128xf32>
    %8 = math.exp %7 : vector<128x128xf32>
    %cst_6 = arith.constant 1.000000e+00 : f32
    %9 = vector.broadcast %cst_6 : f32 to vector<128x128xf32>
    %10 = arith.addf %9, %8 : vector<128x128xf32>
    %11 = tpu.reciprocal %10 {approx = true} : vector<128x128xf32> -> vector<128x128xf32>
    %12 = arith.mulf %5, %11 : vector<128x128xf32>
    %13 = arith.truncf %12 : vector<128x128xf32> to vector<128x128xbf16>
    %c0_7 = arith.constant 0 : index
    %c0_8 = arith.constant 0 : index
    %14 = vector.load %arg4[%c0_7, %c0_8] : memref<128x128xbf16, #tpu.memory_space<vmem>>, vector<128x128xbf16>
    tpu.vector_store %arg4[%c0_7, %c0_8], %13 {strides = array<i32>} : memref<128x128xbf16, #tpu.memory_space<vmem>>, vector<128x128xbf16>,
    return
  }
  func.func @transform_0(%arg0: i32) -> (i32, i32) {
    %c0_i32 = arith.constant 0 : i32
    %c0_i32_0 = arith.constant 0 : i32
    return %arg0, %c0_i32 : i32, i32
  }
  func.func @transform_1(%arg0: i32) -> (i32, i32) {
    %c0_i32 = arith.constant 0 : i32
    %c0_i32_0 = arith.constant 0 : i32
    %c0_i32_1 = arith.constant 0 : i32
    return %c0_i32, %c0_i32_0 : i32, i32
  }
  func.func @transform_2(%arg0: i32) -> (i32, i32) {
    %c0_i32 = arith.constant 0 : i32
    %c0_i32_0 = arith.constant 0 : i32
    %c0_i32_1 = arith.constant 0 : i32
    return %c0_i32, %c0_i32_0 : i32, i32
  }
  func.func @transform_3(%arg0: i32) -> (i32, i32) {
    %c0_i32 = arith.constant 0 : i32
    %c0_i32_0 = arith.constant 0 : i32
    return %arg0, %c0_i32 : i32, i32
  }
}

</mosaic_0001>

<bundles_post_ra>
// kernel: _lambda_.27
= control target key start
LH: loop header
LB: loop body
LE: loop exit
PB: predicated region body
PF: predicated region fallthrough
CT: control target
= control target key end

     0   :  { %vm1318_vm0 = vcmask 1044480   ;;  %vm1319_vm1 = vcmask 1045504   ;;  %v8294_v1 = vmov 65535   ;;  %vm933_vm2 = vcmask 220160   ;;  %s10704_s1 = inlined_call_operand.vmem [shape: bf16[27,128], index: 1, kind: input, shape index: {}]   ;;  %s10705_s0 = inlined_call_operand.vmem [shape: bf16[2048,27], index: 0, kind: input, shape index: {}]   ;;  %s10706_s2 = inlined_call_operand.vmem [shape: f32[1,128], index: 2, kind: input, shape index: {}]   ;;  %s10707_s3 = inlined_call_operand.vmem [shape: bf16[2048,128], index: 3, kind: output, shape index: {}]  }
   0x1   :  { %v7135_v0 = vld [vmem:[%s10704_s1 + $0x8] sm:$0x3f]   ;;  %v1320_v2 = vsel %vm1318_vm0, 4294967295, %v8294_v1  ;;  %v7137_v4 = vld [vmem:[%s10705_s0] sm:$0xff]   ;;  %v7141_v10 = vld [vmem:[%s10705_s0 + $0x10] sm:$0xff]  }
   0x2   :  { %v1321_v3 = vsel %vm1319_vm1, %v1320_v2, 0  ;;  %v7136_v6 = vld [vmem:[%s10704_s1] sm:$0xff]   ;;  %6874 = vmatprep.mubr.msk.bf16.mxu0 %vm933_vm2, %v7137_v4  ;;  %v7139_v8 = vld [vmem:[%s10705_s0 + $0x8] sm:$0xff]   ;;  %v7142_v11 = vld [vmem:[%s10705_s0 + $0x210] sm:$0xff]  }
   0x3   :  { %v1323_v5 = vand.u32 %v7135_v0, %v1321_v3  ;;  %v7138_v7 = vld [vmem:[%s10705_s0 + $0x200] sm:$0xff]   ;;  %v7140_v9 = vld [vmem:[%s10705_s0 + $0x208] sm:$0xff]   ;;  %v7143_v12 = vld [vmem:[%s10705_s0 + $0x18] sm:$0xff]  }
   0x4   :  { %7002 = vmatprep.mubr.msk.bf16.mxu1 %vm933_vm2, %v7138_v7  ;;  %v7144_v13 = vld [vmem:[%s10705_s0 + $0x218] sm:$0xff]   ;;  %v7145_v14 = vld [vmem:[%s10705_s0 + $0x20] sm:$0xff]   ;;  %v7147_v16 = vld [vmem:[%s10705_s0 + $0x28] sm:$0xff]  }
   0x5   :  { %6870 = vmatprep.subr.bf16.mxu0 %v1323_v5  ;;  %7130 = vmatprep.subr.bf16.mxu1 %v1323_v5  ;;  %v7146_v15 = vld [vmem:[%s10705_s0 + $0x220] sm:$0xff]   ;;  %v7148_v17 = vld [vmem:[%s10705_s0 + $0x228] sm:$0xff]   ;;  %v7149_v18 = vld [vmem:[%s10705_s0 + $0x30] sm:$0xff]  }
   0x6   :  { %6871 = vmatpush3.bf16.msra.mxu0 %v1323_v5  ;;  %7132 = vmatpush3.bf16.msra.mxu1 %v1323_v5  ;;  %v7150_v19 = vld [vmem:[%s10705_s0 + $0x230] sm:$0xff]   ;;  %v7151_v20 = vld [vmem:[%s10705_s0 + $0x38] sm:$0xff]   ;;  %v7153_v22 = vld [vmem:[%s10705_s0 + $0x40] sm:$0xff]  }
   0x7   :  { %6872 = vmatprep.subr.bf16.mxu0 %v7136_v6  ;;  %7131 = vmatprep.subr.bf16.mxu1 %v7136_v6  ;;  %v7152_v21 = vld [vmem:[%s10705_s0 + $0x238] sm:$0xff]   ;;  %v7154_v23 = vld [vmem:[%s10705_s0 + $0x240] sm:$0xff]   ;;  %v7155_v24 = vld [vmem:[%s10705_s0 + $0x48] sm:$0xff]  }
   0x8   :  { %v7156_v25 = vld [vmem:[%s10705_s0 + $0x248] sm:$0xff]   ;;  %v7157_v26 = vld [vmem:[%s10705_s0 + $0x50] sm:$0xff]   ;;  %v7159_v28 = vld [vmem:[%s10705_s0 + $0x58] sm:$0xff]  }
   0x9   :  { %v7158_v27 = vld [vmem:[%s10705_s0 + $0x250] sm:$0xff]   ;;  %v7160_v29 = vld [vmem:[%s10705_s0 + $0x258] sm:$0xff]   ;;  %v7161_v30 = vld [vmem:[%s10705_s0 + $0x60] sm:$0xff]  }
   0xa   :  { %6873 = vmatpush3.bf16.msra.mxu0 %v7136_v6  ;;  %7133 = vmatpush3.bf16.msra.mxu1 %v7136_v6  ;;  %v7162_v31 = vld [vmem:[%s10705_s0 + $0x260] sm:$0xff]   ;;  %v7163_v32 = vld [vmem:[%s10705_s0 + $0x68] sm:$0xff]   ;;  %v7165_v34 = vld [vmem:[%s10705_s0 + $0x70] sm:$0xff]  }
   0xb   :  { %v7164_v33 = vld [vmem:[%s10705_s0 + $0x268] sm:$0xff]   ;;  %v7166_v35 = vld [vmem:[%s10705_s0 + $0x270] sm:$0xff]   ;;  %v7167_v36 = vld [vmem:[%s10705_s0 + $0x78] sm:$0xff]  }
   0xc   :  { %v7168_v37 = vld [vmem:[%s10705_s0 + $0x278] sm:$0xff]   ;;  %v7169_v38 = vld [vmem:[%s10705_s0 + $0x80] sm:$0xff]   ;;  %v7171_v40 = vld [vmem:[%s10705_s0 + $0x88] sm:$0xff]  }
   0xd   :  { %6875 = vmatmul.mubr.msk.bf16.vlgmr.msra.gmra.mxu0 %vm933_vm2, %v7139_v8  ;;  %7003 = vmatmul.mubr.msk.bf16.vlgmr.msra.gmra.mxu1 %vm933_vm2, %v7140_v9  ;;  %v7170_v39 = vld [vmem:[%s10705_s0 + $0x280] sm:$0xff]   ;;  %v7172_v41 = vld [vmem:[%s10705_s0 + $0x288] sm:$0xff]   ;;  %v7173_v42 = vld [vmem:[%s10705_s0 + $0x90] sm:$0xff]  }
   0xe   :  { %6878 = vmatprep.mubr.msk.bf16.mxu0 %vm933_vm2, %v7141_v10  ;;  %7006 = vmatprep.mubr.msk.bf16.mxu1 %vm933_vm2, %v7142_v11  ;;  %v7174_v43 = vld [vmem:[%s10705_s0 + $0x290] sm:$0xff]   ;;  %v7175_v44 = vld [vmem:[%s10705_s0 + $0x98] sm:$0xff]   ;;  %v7177_v46 = vld [vmem:[%s10705_s0 + $0xa0] sm:$0xff]  }
   0xf   :  { %v7176_v45 = vld [vmem:[%s10705_s0 + $0x298] sm:$0xff]   ;;  %v7178_v47 = vld [vmem:[%s10705_s0 + $0x2a0] sm:$0xff]   ;;  %v7179_v48 = vld [vmem:[%s10705_s0 + $0xa8] sm:$0xff]  }
  0x10   :  { %v7180_v49 = vld [vmem:[%s10705_s0 + $0x2a8] sm:$0xff]   ;;  %v7181_v50 = vld [vmem:[%s10705_s0 + $0xb0] sm:$0xff]   ;;  %v7183_v52 = vld [vmem:[%s10705_s0 + $0xb8] sm:$0xff]  }
  0x11   :  { %v7182_v51 = vld [vmem:[%s10705_s0 + $0x2b0] sm:$0xff]   ;;  %v7184_v53 = vld [vmem:[%s10705_s0 + $0x2b8] sm:$0xff]   ;;  %v7185_v54 = vld [vmem:[%s10705_s0 + $0xc0] sm:$0xff]  }
  0x12   :  { %v7186_v55 = vld [vmem:[%s10705_s0 + $0x2c0] sm:$0xff]   ;;  %v7187_v56 = vld [vmem:[%s10705_s0 + $0xc8] sm:$0xff]   ;;  %v7189_v58 = vld [vmem:[%s10705_s0 + $0xd0] sm:$0xff]  }
  0x13   :  { %v7188_v57 = vld [vmem:[%s10705_s0 + $0x2c8] sm:$0xff]   ;;  %v7190_v59 = vld [vmem:[%s10705_s0 + $0x2d0] sm:$0xff]   ;;  %v7191_v60 = vld [vmem:[%s10705_s0 + $0xd8] sm:$0xff]  }
  0x14   :  { %v7192_v61 = vld [vmem:[%s10705_s0 + $0x2d8] sm:$0xff]   ;;  %v7193_v62 = vld [vmem:[%s10705_s0 + $0xe0] sm:$0xff]   ;;  %v7195_v0 = vld [vmem:[%s10705_s0 + $0xe8] sm:$0xff]  }
  0x15   :  { %6879 = vmatmul.mubr.msk.bf16.gmra.mxu0 %vm933_vm2, %v7143_v12  ;;  %7007 = vmatmul.mubr.msk.bf16.gmra.mxu1 %vm933_vm2, %v7144_v13  ;;  %v7194_v63 = vld [vmem:[%s10705_s0 + $0x2e0] sm:$0xff]   ;;  %v7196_v1 = vld [vmem:[%s10705_s0 + $0x2e8] sm:$0xff]   ;;  %v7197_v2 = vld [vmem:[%s10705_s0 + $0xf0] sm:$0xff]  }
  0x16   :  { %6882 = vmatprep.mubr.msk.bf16.mxu0 %vm933_vm2, %v7145_v14  ;;  %7010 = vmatprep.mubr.msk.bf16.mxu1 %vm933_vm2, %v7146_v15  ;;  %v7198_v3 = vld [vmem:[%s10705_s0 + $0x2f0] sm:$0xff]   ;;  %v7199_v4 = vld [vmem:[%s10705_s0 + $0xf8] sm:$0xff]   ;;  %v7201_v6 = vld [vmem:[%s10705_s0 + $0x100] sm:$0xff]  }
  0x17   :  { %v7200_v5 = vld [vmem:[%s10705_s0 + $0x2f8] sm:$0xff]   ;;  %v7202_v7 = vld [vmem:[%s10705_s0 + $0x300] sm:$0xff]   ;;  %v7203_v8 = vld [vmem:[%s10705_s0 + $0x108] sm:$0xff]  }
  0x18   :  { %v7204_v9 = vld [vmem:[%s10705_s0 + $0x308] sm:$0xff]   ;;  %v7205_v10 = vld [vmem:[%s10705_s0 + $0x110] sm:$0xff]   ;;  %v7207_v12 = vld [vmem:[%s10705_s0 + $0x118] sm:$0xff]  }
  0x19   :  { %v7206_v11 = vld [vmem:[%s10705_s0 + $0x310] sm:$0xff]   ;;  %v7208_v13 = vld [vmem:[%s10705_s0 + $0x318] sm:$0xff]   ;;  %v7209_v14 = vld [vmem:[%s10705_s0 + $0x120] sm:$0xff]  }
  0x1a   :  { %v7210_v15 = vld [vmem:[%s10705_s0 + $0x320] sm:$0xff]  }
  0x1d   :  { %6883 = vmatmul.mubr.msk.bf16.gmra.mxu0 %vm933_vm2, %v7147_v16  ;;  %7011 = vmatmul.mubr.msk.bf16.gmra.mxu1 %vm933_vm2, %v7148_v17  ;;  %v7211_v16 = vld [vmem:[%s10705_s0 + $0x128] sm:$0xff]  }
  0x1e   :  { %6886 = vmatprep.mubr.msk.bf16.mxu0 %vm933_vm2, %v7149_v18  ;;  %7014 = vmatprep.mubr.msk.bf16.mxu1 %vm933_vm2, %v7150_v19  ;;  %v7212_v17 = vld [vmem:[%s10705_s0 + $0x328] sm:$0xff]   ;;  %v7213_v18 = vld [vmem:[%s10705_s0 + $0x130] sm:$0xff]  }
  0x1f   :  { %v7214_v19 = vld [vmem:[%s10705_s0 + $0x330] sm:$0xff]  }
  0x25   :  { %6887 = vmatmul.mubr.msk.bf16.gmra.mxu0 %vm933_vm2, %v7151_v20  ;;  %7015 = vmatmul.mubr.msk.bf16.gmra.mxu1 %vm933_vm2, %v7152_v21  ;;  %v7215_v20 = vld [vmem:[%s10705_s0 + $0x138] sm:$0xff]  }
  0x26   :  { %6890 = vmatprep.mubr.msk.bf16.mxu0 %vm933_vm2, %v7153_v22  ;;  %7018 = vmatprep.mubr.msk.bf16.mxu1 %vm933_vm2, %v7154_v23  ;;  %v7216_v21 = vld [vmem:[%s10705_s0 + $0x338] sm:$0xff]   ;;  %v7217_v22 = vld [vmem:[%s10705_s0 + $0x140] sm:$0xff]  }
  0x27   :  { %v7218_v23 = vld [vmem:[%s10705_s0 + $0x340] sm:$0xff]  }
  0x2d   :  { %6891 = vmatmul.mubr.msk.bf16.gmra.mxu0 %vm933_vm2, %v7155_v24  ;;  %7019 = vmatmul.mubr.msk.bf16.gmra.mxu1 %vm933_vm2, %v7156_v25  ;;  %v7219_v24 = vld [vmem:[%s10705_s0 + $0x148] sm:$0xff]  }
  0x2e   :  { %6894 = vmatprep.mubr.msk.bf16.mxu0 %vm933_vm2, %v7157_v26  ;;  %7022 = vmatprep.mubr.msk.bf16.mxu1 %vm933_vm2, %v7158_v27  ;;  %v7220_v25 = vld [vmem:[%s10705_s0 + $0x348] sm:$0xff]   ;;  %v7221_v26 = vld [vmem:[%s10705_s0 + $0x150] sm:$0xff]  }
  0x2f   :  { %v7222_v27 = vld [vmem:[%s10705_s0 + $0x350] sm:$0xff]  }
  0x35   :  { %6895 = vmatmul.mubr.msk.bf16.gmra.mxu0 %vm933_vm2, %v7159_v28  ;;  %7023 = vmatmul.mubr.msk.bf16.gmra.mxu1 %vm933_vm2, %v7160_v29  ;;  %v7223_v28 = vld [vmem:[%s10705_s0 + $0x158] sm:$0xff]  }
  0x36   :  { %6898 = vmatprep.mubr.msk.bf16.mxu0 %vm933_vm2, %v7161_v30  ;;  %7026 = vmatprep.mubr.msk.bf16.mxu1 %vm933_vm2, %v7162_v31  ;;  %v7224_v29 = vld [vmem:[%s10705_s0 + $0x358] sm:$0xff]   ;;  %v7225_v30 = vld [vmem:[%s10705_s0 + $0x160] sm:$0xff]  }
  0x37   :  { %v7226_v31 = vld [vmem:[%s10705_s0 + $0x360] sm:$0xff]  }
  0x3d   :  { %6899 = vmatmul.mubr.msk.bf16.gmra.mxu0 %vm933_vm2, %v7163_v32  ;;  %7027 = vmatmul.mubr.msk.bf16.gmra.mxu1 %vm933_vm2, %v7164_v33  ;;  %v7227_v32 = vld [vmem:[%s10705_s0 + $0x168] sm:$0xff]  }
  0x3e   :  { %6902 = vmatprep.mubr.msk.bf16.mxu0 %vm933_vm2, %v7165_v34  ;;  %7030 = vmatprep.mubr.msk.bf16.mxu1 %vm933_vm2, %v7166_v35  ;;  %v7228_v33 = vld [vmem:[%s10705_s0 + $0x368] sm:$0xff]   ;;  %v7229_v34 = vld [vmem:[%s10705_s0 + $0x170] sm:$0xff]  }
  0x3f   :  { %v7230_v35 = vld [vmem:[%s10705_s0 + $0x370] sm:$0xff]  }
  0x45   :  { %6903 = vmatmul.mubr.msk.bf16.gmra.mxu0 %vm933_vm2, %v7167_v36  ;;  %7031 = vmatmul.mubr.msk.bf16.gmra.mxu1 %vm933_vm2, %v7168_v37  ;;  %v7231_v36 = vld [vmem:[%s10705_s0 + $0x178] sm:$0xff]  }
  0x46   :  { %6906 = vmatprep.mubr.msk.bf16.mxu0 %vm933_vm2, %v7169_v38  ;;  %7034 = vmatprep.mubr.msk.bf16.mxu1 %vm933_vm2, %v7170_v39  ;;  %v7232_v37 = vld [vmem:[%s10705_s0 + $0x378] sm:$0xff]   ;;  %v7233_v38 = vld [vmem:[%s10705_s0 + $0x180] sm:$0xff]  }
  0x47   :  { %v7234_v39 = vld [vmem:[%s10705_s0 + $0x380] sm:$0xff]  }
  0x4d   :  { %6907 = vmatmul.mubr.msk.bf16.gmra.mxu0 %vm933_vm2, %v7171_v40  ;;  %7035 = vmatmul.mubr.msk.bf16.gmra.mxu1 %vm933_vm2, %v7172_v41  ;;  %v7235_v40 = vld [vmem:[%s10705_s0 + $0x188] sm:$0xff]  }
  0x4e   :  { %6910 = vmatprep.mubr.msk.bf16.mxu0 %vm933_vm2, %v7173_v42  ;;  %7038 = vmatprep.mubr.msk.bf16.mxu1 %vm933_vm2, %v7174_v43  ;;  %v7236_v41 = vld [vmem:[%s10705_s0 + $0x388] sm:$0xff]   ;;  %v7237_v42 = vld [vmem:[%s10705_s0 + $0x190] sm:$0xff]  }
  0x4f   :  { %v7238_v43 = vld [vmem:[%s10705_s0 + $0x390] sm:$0xff]  }
  0x55   :  { %6911 = vmatmul.mubr.msk.bf16.gmra.mxu0 %vm933_vm2, %v7175_v44  ;;  %7039 = vmatmul.mubr.msk.bf16.gmra.mxu1 %vm933_vm2, %v7176_v45  ;;  %v8728_v44 = vld [vmem:[%s10706_s2] ss:$0 sm:$0xff] }
  0x56   :  { %6914 = vmatprep.mubr.msk.bf16.mxu0 %vm933_vm2, %v7177_v46  ;;  %7042 = vmatprep.mubr.msk.bf16.mxu1 %vm933_vm2, %v7178_v47 }
  0x5d   :  { %6915 = vmatmul.mubr.msk.bf16.gmra.mxu0 %vm933_vm2, %v7179_v48  ;;  %7043 = vmatmul.mubr.msk.bf16.gmra.mxu1 %vm933_vm2, %v7180_v49 }
  0x5e   :  { %6918 = vmatprep.mubr.msk.bf16.mxu0 %vm933_vm2, %v7181_v50  ;;  %7046 = vmatprep.mubr.msk.bf16.mxu1 %vm933_vm2, %v7182_v51 }
  0x65   :  { %6919 = vmatmul.mubr.msk.bf16.gmra.mxu0 %vm933_vm2, %v7183_v52  ;;  %7047 = vmatmul.mubr.msk.bf16.gmra.mxu1 %vm933_vm2, %v7184_v53 }
  0x66   :  { %6922 = vmatprep.mubr.msk.bf16.mxu0 %vm933_vm2, %v7185_v54  ;;  %7050 = vmatprep.mubr.msk.bf16.mxu1 %vm933_vm2, %v7186_v55  ;;  %v7239_v55 = vld [vmem:[%s10705_s0 + $0x198] sm:$0xff]  }
  0x6d   :  { %6923 = vmatmul.mubr.msk.bf16.gmra.mxu0 %vm933_vm2, %v7187_v56  ;;  %7051 = vmatmul.mubr.msk.bf16.gmra.mxu1 %vm933_vm2, %v7188_v57 }
  0x6e   :  { %6926 = vmatprep.mubr.msk.bf16.mxu0 %vm933_vm2, %v7189_v58  ;;  %7054 = vmatprep.mubr.msk.bf16.mxu1 %vm933_vm2, %v7190_v59  ;;  %v7240_v58 = vld [vmem:[%s10705_s0 + $0x398] sm:$0xff]   ;;  %v7241_v59 = vld [vmem:[%s10705_s0 + $0x1a0] sm:$0xff]  }
  0x75   :  { %6927 = vmatmul.mubr.msk.bf16.gmra.mxu0 %vm933_vm2, %v7191_v60  ;;  %7055 = vmatmul.mubr.msk.bf16.gmra.mxu1 %vm933_vm2, %v7192_v61  ;;  %v7242_v60 = vld [vmem:[%s10705_s0 + $0x3a0] sm:$0xff]  }
  0x76   :  { %6930 = vmatprep.mubr.msk.bf16.mxu0 %vm933_vm2, %v7193_v62  ;;  %7058 = vmatprep.mubr.msk.bf16.mxu1 %vm933_vm2, %v7194_v63 }
  0x7d   :  { %6931 = vmatmul.mubr.msk.bf16.gmra.mxu0 %vm933_vm2, %v7195_v0  ;;  %7059 = vmatmul.mubr.msk.bf16.gmra.mxu1 %vm933_vm2, %v7196_v1 }
  0x7e   :  { %6934 = vmatprep.mubr.msk.bf16.mxu0 %vm933_vm2, %v7197_v2  ;;  %7062 = vmatprep.mubr.msk.bf16.mxu1 %vm933_vm2, %v7198_v3 }
  0x85   :  { %6935 = vmatmul.mubr.msk.bf16.gmra.mxu0 %vm933_vm2, %v7199_v4  ;;  %7063 = vmatmul.mubr.msk.bf16.gmra.mxu1 %vm933_vm2, %v7200_v5 }
  0x86   :  { %6938 = vmatprep.mubr.msk.bf16.mxu0 %vm933_vm2, %v7201_v6  ;;  %7066 = vmatprep.mubr.msk.bf16.mxu1 %vm933_vm2, %v7202_v7 }
  0x8d   :  { %6939 = vmatmul.mubr.msk.bf16.gmra.mxu0 %vm933_vm2, %v7203_v8  ;;  %7067 = vmatmul.mubr.msk.bf16.gmra.mxu1 %vm933_vm2, %v7204_v9 }
  0x8e   :  { %6942 = vmatprep.mubr.msk.bf16.mxu0 %vm933_vm2, %v7205_v10  ;;  %7070 = vmatprep.mubr.msk.bf16.mxu1 %vm933_vm2, %v7206_v11 }
  0x95   :  { %6943 = vmatmul.mubr.msk.bf16.gmra.mxu0 %vm933_vm2, %v7207_v12  ;;  %7071 = vmatmul.mubr.msk.bf16.gmra.mxu1 %vm933_vm2, %v7208_v13 }
  0x96   :  { %6946 = vmatprep.mubr.msk.bf16.mxu0 %vm933_vm2, %v7209_v14  ;;  %7074 = vmatprep.mubr.msk.bf16.mxu1 %vm933_vm2, %v7210_v15 }
  0x9d   :  { %6947 = vmatmul.mubr.msk.bf16.gmra.mxu0 %vm933_vm2, %v7211_v16  ;;  %7075 = vmatmul.mubr.msk.bf16.gmra.mxu1 %vm933_vm2, %v7212_v17 }
  0x9e   :  { %6950 = vmatprep.mubr.msk.bf16.mxu0 %vm933_vm2, %v7213_v18  ;;  %7078 = vmatprep.mubr.msk.bf16.mxu1 %vm933_vm2, %v7214_v19 }
  0xa5   :  { %6951 = vmatmul.mubr.msk.bf16.gmra.mxu0 %vm933_vm2, %v7215_v20  ;;  %7079 = vmatmul.mubr.msk.bf16.gmra.mxu1 %vm933_vm2, %v7216_v21 }
  0xa6   :  { %6954 = vmatprep.mubr.msk.bf16.mxu0 %vm933_vm2, %v7217_v22  ;;  %7082 = vmatprep.mubr.msk.bf16.mxu1 %vm933_vm2, %v7218_v23 }
  0xad   :  { %6955 = vmatmul.mubr.msk.bf16.gmra.mxu0 %vm933_vm2, %v7219_v24  ;;  %7083 = vmatmul.mubr.msk.bf16.gmra.mxu1 %vm933_vm2, %v7220_v25 }
  0xae   :  { %6958 = vmatprep.mubr.msk.bf16.mxu0 %vm933_vm2, %v7221_v26  ;;  %7086 = vmatprep.mubr.msk.bf16.mxu1 %vm933_vm2, %v7222_v27 }
  0xb5   :  { %6959 = vmatmul.mubr.msk.bf16.gmra.mxu0 %vm933_vm2, %v7223_v28  ;;  %7087 = vmatmul.mubr.msk.bf16.gmra.mxu1 %vm933_vm2, %v7224_v29  ;;  %v7243_v29 = vld [vmem:[%s10705_s0 + $0x1a8] sm:$0xff]  }
  0xb6   :  { %6962 = vmatprep.mubr.msk.bf16.mxu0 %vm933_vm2, %v7225_v30  ;;  %7090 = vmatprep.mubr.msk.bf16.mxu1 %vm933_vm2, %v7226_v31  ;;  %v7244_v30 = vld [vmem:[%s10705_s0 + $0x3a8] sm:$0xff]   ;;  %v7245_v31 = vld [vmem:[%s10705_s0 + $0x1b0] sm:$0xff]  }
  0xbd   :  { %6963 = vmatmul.mubr.msk.bf16.gmra.mxu0 %vm933_vm2, %v7227_v32  ;;  %7091 = vmatmul.mubr.msk.bf16.gmra.mxu1 %vm933_vm2, %v7228_v33 }
  0xbe   :  { %6966 = vmatprep.mubr.msk.bf16.mxu0 %vm933_vm2, %v7229_v34  ;;  %7094 = vmatprep.mubr.msk.bf16.mxu1 %vm933_vm2, %v7230_v35  ;;  %v7246_v35 = vld [vmem:[%s10705_s0 + $0x3b0] sm:$0xff]  }
  0xc5   :  { %6967 = vmatmul.mubr.msk.bf16.gmra.mxu0 %vm933_vm2, %v7231_v36  ;;  %7095 = vmatmul.mubr.msk.bf16.gmra.mxu1 %vm933_vm2, %v7232_v37 }
  0xc6   :  { %6970 = vmatprep.mubr.msk.bf16.mxu0 %vm933_vm2, %v7233_v38  ;;  %7098 = vmatprep.mubr.msk.bf16.mxu1 %vm933_vm2, %v7234_v39 }
  0xcd   :  { %v6876_v45 = vpop.f32.mrf.mxu0  ;;  %6971 = vmatmul.mubr.msk.bf16.gmra.mxu0 %vm933_vm2, %v7235_v40  ;;  %v7004_v46 = vpop.f32.mrf.mxu1  ;;  %7099 = vmatmul.mubr.msk.bf16.gmra.mxu1 %vm933_vm2, %v7236_v41 }
  0xce   :  { %v8733_v47 = vadd.f32 %v6876_v45, %v8728_v44  ;;  %v8736_v48 = vadd.f32 %v7004_v46, %v8728_v44  ;;  %6974 = vmatprep.mubr.msk.bf16.mxu0 %vm933_vm2, %v7237_v42  ;;  %7102 = vmatprep.mubr.msk.bf16.mxu1 %vm933_vm2, %v7238_v43 }
  0xcf   :  { %v1359_v49 = vpop.f32.mrf.mxu0  ;;  %v1871_v50 = vpop.f32.mrf.mxu1 }
  0xd0   :  { %v2384_v51 = vsub.f32 0.0, %v8733_v47  ;;  %v2512_v52 = vsub.f32 0.0, %v8736_v48  ;;  %v8743_v53 = vadd.f32 %v8728_v44, %v1359_v49  ;;  %v8746_v54 = vadd.f32 %v8728_v44, %v1871_v50 }
  0xd1   :  { %v6877_v56 = vpop.f32.mrf.mxu0  ;;  %v7005_v57 = vpop.f32.mrf.mxu1 }
  0xd2   :  { %v2642_v61 = vmul.f32 1.442695, %v2384_v51  ;;  %v2898_v62 = vmul.f32 1.442695, %v2512_v52  ;;  %v2382_v63 = vsub.f32 0.0, %v8743_v53  ;;  %v2510_v0 = vsub.f32 0.0, %v8746_v54 }
  0xd3   :  { %v8763_v1 = vadd.f32 %v6877_v56, %v8728_v44  ;;  %v8766_v2 = vadd.f32 %v7005_v57, %v8728_v44  ;;  %v1362_v3 = vpop.f32.mrf.mxu0  ;;  %v1874_v4 = vpop.f32.mrf.mxu1 }
  0xd4   :  { %7265 = vpow2.f32 %v2642_v61  ;;  %v2638_v5 = vmul.f32 1.442695, %v2382_v63  ;;  %v2894_v6 = vmul.f32 1.442695, %v2510_v0  ;;  %v8769_v7 = vadd.f32 %v8728_v44, %v1362_v3  ;;  %v7247_v3 = vld [vmem:[%s10705_s0 + $0x1b8] sm:$0xff]  }
  0xd5   :  { %7267 = vpow2.f32 %v2898_v62  ;;  %v2385_v8 = vsub.f32 0.0, %v8763_v1  ;;  %v2513_v9 = vsub.f32 0.0, %v8766_v2  ;;  %v8774_v10 = vadd.f32 %v8728_v44, %v1874_v4  ;;  %v6880_v11 = vpop.f32.mrf.mxu0  ;;  %6975 = vmatmul.mubr.msk.bf16.gmra.mxu0 %vm933_vm2, %v7239_v55  ;;  %v7008_v12 = vpop.f32.mrf.mxu1  ;;  %7103 = vmatmul.mubr.msk.bf16.gmra.mxu1 %vm933_vm2, %v7240_v58  ;;  %v7248_v4 = vld [vmem:[%s10705_s0 + $0x3b8] sm:$0xff]  }
  0xd6   :  { %7269 = vpow2.f32 %v2638_v5  ;;  %v2383_v13 = vsub.f32 0.0, %v8769_v7  ;;  %v8780_v14 = vadd.f32 %v6880_v11, %v8728_v44  ;;  %v8783_v15 = vadd.f32 %v7008_v12, %v8728_v44  ;;  %6978 = vmatprep.mubr.msk.bf16.mxu0 %vm933_vm2, %v7241_v59  ;;  %7106 = vmatprep.mubr.msk.bf16.mxu1 %vm933_vm2, %v7242_v60  ;;  %v7250_v11 = vld [vmem:[%s10705_s0 + $0x3c0] sm:$0xff]  }
  0xd7   :  { %7271 = vpow2.f32 %v2894_v6  ;;  %v2644_v16 = vmul.f32 1.442695, %v2385_v8  ;;  %v2900_v17 = vmul.f32 1.442695, %v2513_v9  ;;  %v2511_v18 = vsub.f32 0.0, %v8774_v10  ;;  %v1375_v19 = vpop.f32.mrf.mxu0  ;;  %v1887_v20 = vpop.f32.mrf.mxu1  ;;  %v7249_v9 = vld [vmem:[%s10705_s0 + $0x1c0] sm:$0xff]  }
  0xd8   :  { %v2640_v21 = vmul.f32 1.442695, %v2383_v13  ;;  %v2388_v22 = vsub.f32 0.0, %v8780_v14  ;;  %v2516_v23 = vsub.f32 0.0, %v8783_v15  ;;  %v8791_v24 = vadd.f32 %v8728_v44, %v1375_v19 }
  0xd9   :  { %7273 = vpow2.f32 %v2644_v16  ;;  %v2896_v25 = vmul.f32 1.442695, %v2511_v18  ;;  %v8794_v26 = vadd.f32 %v8728_v44, %v1887_v20  ;;  %v6881_v27 = vpop.f32.mrf.mxu0  ;;  %v7009_v28 = vpop.f32.mrf.mxu1 }
  0xda   :  { %7275 = vpow2.f32 %v2900_v17  ;;  %v2650_v32 = vmul.f32 1.442695, %v2388_v22  ;;  %v2906_v33 = vmul.f32 1.442695, %v2516_v23  ;;  %v2386_v34 = vsub.f32 0.0, %v8791_v24 }
  0xdb   :  { %7277 = vpow2.f32 %v2640_v21  ;;  %v2514_v36 = vsub.f32 0.0, %v8794_v26  ;;  %v8811_v37 = vadd.f32 %v6881_v27, %v8728_v44  ;;  %v8814_v38 = vadd.f32 %v7009_v28, %v8728_v44  ;;  %v1378_v39 = vpop.f32.mrf.mxu0  ;;  %v1890_v40 = vpop.f32.mrf.mxu1 }
  0xdc   :  { %7279 = vpow2.f32 %v2896_v25  ;;  %v2646_v41 = vmul.f32 1.442695, %v2386_v34  ;;  %v8817_v42 = vadd.f32 %v8728_v44, %v1378_v39  ;;  %v8820_v43 = vadd.f32 %v8728_v44, %v1890_v40 }
  0xdd   :  { %7281 = vpow2.f32 %v2650_v32  ;;  %v2902_v45 = vmul.f32 1.442695, %v2514_v36  ;;  %v2389_v46 = vsub.f32 0.0, %v8811_v37  ;;  %v2517_v49 = vsub.f32 0.0, %v8814_v38  ;;  %v6884_v50 = vpop.f32.mrf.mxu0  ;;  %6979 = vmatmul.mubr.msk.bf16.gmra.mxu0 %vm933_vm2, %v7243_v29  ;;  %v7012_v51 = vpop.f32.mrf.mxu1  ;;  %7107 = vmatmul.mubr.msk.bf16.gmra.mxu1 %vm933_vm2, %v7244_v30 }
  0xde   :  { %7283 = vpow2.f32 %v2906_v33  ;;  %v2387_v52 = vsub.f32 0.0, %v8817_v42  ;;  %6982 = vmatprep.mubr.msk.bf16.mxu0 %vm933_vm2, %v7245_v31  ;;  %7110 = vmatprep.mubr.msk.bf16.mxu1 %vm933_vm2, %v7246_v35  ;;  %v2515_v60 = vsub.f32 0.0, %v8820_v43  ;;  %v8831_v62 = vadd.f32 %v6884_v50, %v8728_v44 }
  0xdf   :  { %7285 = vpow2.f32 %v2646_v41  ;;  %v2652_v55 = vmul.f32 1.442695, %v2389_v46  ;;  %v2908_v56 = vmul.f32 1.442695, %v2517_v49  ;;  %v1391_v57 = vpop.f32.mrf.mxu0  ;;  %v1903_v58 = vpop.f32.mrf.mxu1  ;;  %v8840_v8 = vadd.f32 %v7012_v51, %v8728_v44  ;;  %v7251_v41 = vld [vmem:[%s10705_s0 + $0x1c8] sm:$0xff]  }
  0xe0   :  { %7287 = vpow2.f32 %v2902_v45  ;;  %v2648_v59 = vmul.f32 1.442695, %v2387_v52  ;;  %v2904_v20 = vmul.f32 1.442695, %v2515_v60  ;;  %v2392_v22 = vsub.f32 0.0, %v8831_v62  ;;  %v7252_v45 = vld [vmem:[%s10705_s0 + $0x3c8] sm:$0xff]  }
  0xe1   :  { %v7266_v61 = vpop.eup %7265  ;;  %7289 = vpow2.f32 %v2652_v55  ;;  %v6885_v63 = vpop.f32.mrf.mxu0  ;;  %v2520_v27 = vsub.f32 0.0, %v8840_v8  ;;  %v8855_v33 = vadd.f32 %v8728_v44, %v1391_v57  ;;  %v8860_v39 = vadd.f32 %v8728_v44, %v1903_v58  ;;  %v7253_v52 = vld [vmem:[%s10705_s0 + $0x1d0] sm:$0xff]  }
  0xe2   :  { %v7013_v0 = vpop.f32.mrf.mxu1  ;;  %v7268_v5 = vpop.eup %7267  ;;  %v3152_v6 = vadd.f32 1.0, %v7266_v61  ;;  %7291 = vpow2.f32 %v2908_v56  ;;  %v8857_v36 = vmul.f32 1.442695, %v2392_v22  ;;  %v8871_v51 = vadd.f32 %v6885_v63, %v8728_v44  ;;  %v7254_v55 = vld [vmem:[%s10705_s0 + $0x3d0] sm:$0xff]  }
  0xe3   :  { %v7270_v12 = vpop.eup %7269  ;;  %v3280_v13 = vadd.f32 1.0, %v7268_v5  ;;  %7293 = vpow2.f32 %v2648_v59  ;;  %v1394_v16 = vpop.f32.mrf.mxu0  ;;  %v8868_v50 = vmul.f32 1.442695, %v2520_v27  ;;  %v8880_v58 = vadd.f32 %v7013_v0, %v8728_v44 }
  0xe4   :  { %v1906_v17 = vpop.f32.mrf.mxu1  ;;  %v7272_v18 = vpop.eup %7271  ;;  %7295 = vrcp.f32 %v3152_v6  ;;  %v3150_v19 = vadd.f32 1.0, %v7270_v12  ;;  %v8883_v59 = vadd.f32 %v8728_v44, %v1394_v16  ;;  %v2518_v16 = vsub.f32 0.0, %v8860_v39 }
  0xe5   :  { %7297 = vrcp.f32 %v3280_v13  ;;  %v3278_v21 = vadd.f32 1.0, %v7272_v18  ;;  %v6888_v23 = vpop.f32.mrf.mxu0  ;;  %6983 = vmatmul.mubr.msk.bf16.gmra.mxu0 %vm933_vm2, %v7247_v3  ;;  %7111 = vmatmul.mubr.msk.bf16.gmra.mxu1 %vm933_vm2, %v7248_v4  ;;  %v8886_v3 = vadd.f32 %v8728_v44, %v1906_v17  ;;  %v2393_v17 = vsub.f32 0.0, %v8871_v51 }
  0xe6   :  { %v7274_v25 = vpop.eup %7273  ;;  %7299 = vrcp.f32 %v3150_v19  ;;  %6986 = vmatprep.mubr.msk.bf16.mxu0 %vm933_vm2, %v7249_v9  ;;  %7114 = vmatprep.mubr.msk.bf16.mxu1 %vm933_vm2, %v7250_v11  ;;  %v7016_v30 = vpop.f32.mrf.mxu1  ;;  %v8889_v4 = vadd.f32 %v6888_v23, %v8728_v44  ;;  %v2390_v9 = vsub.f32 0.0, %v8855_v33 }
  0xe7   :  { %v7276_v28 = vpop.eup %7275  ;;  %7301 = vrcp.f32 %v3278_v21  ;;  %v3153_v29 = vadd.f32 1.0, %v7274_v25  ;;  %v1407_v40 = vpop.f32.mrf.mxu0  ;;  %v8893_v0 = vadd.f32 %v7016_v30, %v8728_v44  ;;  %v2391_v21 = vsub.f32 0.0, %v8883_v59 }
  0xe8   :  { %v7278_v31 = vpop.eup %7277  ;;  %v3281_v32 = vadd.f32 1.0, %v7276_v28  ;;  %7303 = vpow2.f32 %v2904_v20  ;;  %v1919_v60 = vpop.f32.mrf.mxu1  ;;  %v2521_v20 = vsub.f32 0.0, %v8880_v58  ;;  %v2519_v27 = vsub.f32 0.0, %v8886_v3 }
  0xe9   :  { %v7280_v34 = vpop.eup %7279  ;;  %7305 = vrcp.f32 %v3153_v29  ;;  %v3151_v35 = vadd.f32 1.0, %v7278_v31  ;;  %v6889_v11 = vpop.f32.mrf.mxu0  ;;  %v2396_v28 = vsub.f32 0.0, %v8889_v4  ;;  %v2524_v31 = vsub.f32 0.0, %v8893_v0 }
  0xea   :  { %v7282_v46 = vpop.eup %7281  ;;  %7307 = vrcp.f32 %v3281_v32  ;;  %v3279_v49 = vadd.f32 1.0, %v7280_v34  ;;  %v7017_v22 = vpop.f32.mrf.mxu1  ;;  %v8907_v32 = vadd.f32 %v8728_v44, %v1407_v40  ;;  %v7257_v40 = vld [vmem:[%s10705_s0 + $0x1e0] sm:$0xff]  }
  0xeb   :  { %v7284_v56 = vpop.eup %7283  ;;  %7309 = vrcp.f32 %v3151_v35  ;;  %v3156_v57 = vadd.f32 1.0, %v7282_v46  ;;  %v1410_v34 = vpop.f32.mrf.mxu0  ;;  %v7255_v35 = vld [vmem:[%s10705_s0 + $0x1d8] sm:$0xff]   ;;  %v2654_v46 = vmul.f32 1.442695, %v2390_v9  ;;  %v2912_v9 = vmul.f32 1.442695, %v2519_v27 }
  0xec   :  { %v7286_v61 = vpop.eup %7285  ;;  %7311 = vrcp.f32 %v3279_v49  ;;  %v3284_v63 = vadd.f32 1.0, %v7284_v56  ;;  %v8916_v49 = vadd.f32 %v8728_v44, %v1919_v60  ;;  %v2656_v60 = vmul.f32 1.442695, %v2391_v21 }
  0xed   :  { %v7288_v5 = vpop.eup %7287  ;;  %7313 = vrcp.f32 %v3156_v57  ;;  %v3154_v6 = vadd.f32 1.0, %v7286_v61  ;;  %6987 = vmatmul.mubr.msk.bf16.gmra.mxu0 %vm933_vm2, %v7251_v41  ;;  %7115 = vmatmul.mubr.msk.bf16.gmra.mxu1 %vm933_vm2, %v7252_v45  ;;  %v7256_v41 = vld [vmem:[%s10705_s0 + $0x3d8] sm:$0xff]   ;;  %v2910_v57 = vmul.f32 1.442695, %v2518_v16  ;;  %v2660_v61 = vmul.f32 1.442695, %v2393_v17 }
  0xee   :  { %v7290_v12 = vpop.eup %7289  ;;  %7315 = vrcp.f32 %v3284_v63  ;;  %v3282_v13 = vadd.f32 1.0, %v7288_v5  ;;  %6990 = vmatprep.mubr.msk.bf16.mxu0 %vm933_vm2, %v7253_v52  ;;  %7118 = vmatprep.mubr.msk.bf16.mxu1 %vm933_vm2, %v7254_v55  ;;  %v8919_v52 = vadd.f32 %v6889_v11, %v8728_v44  ;;  %v7258_v55 = vld [vmem:[%s10705_s0 + $0x3e0] sm:$0xff]   ;;  %v2916_v63 = vmul.f32 1.442695, %v2521_v20  ;;  %v1922_v5 = vpop.f32.mrf.mxu1 }
  0xef   :  { %v7292_v18 = vpop.eup %7291  ;;  %7317 = vrcp.f32 %v3154_v6  ;;  %v3157_v19 = vadd.f32 1.0, %v7290_v12  ;;  %v8929_v11 = vadd.f32 %v7017_v22, %v8728_v44 }
  0xf0   :  { %v7294_v23 = vpop.eup %7293  ;;  %7319 = vrcp.f32 %v3282_v13  ;;  %v3285_v25 = vadd.f32 1.0, %v7292_v18  ;;  %v2666_v13 = vmul.f32 1.442695, %v2396_v28  ;;  %v2922_v18 = vmul.f32 1.442695, %v2524_v31  ;;  %v8944_v27 = vpop.f32.mrf.mxu1 }
  0xf1   :  { %v7296_v29 = vpop.eup %7295  ;;  %7321 = vrcp.f32 %v3157_v19  ;;  %v3155_v30 = vadd.f32 1.0, %v7294_v23  ;;  %v2394_v19 = vsub.f32 0.0, %v8907_v32  ;;  %v6892_v23 = vpop.f32.mrf.mxu0  ;;  %v2397_v20 = vsub.f32 0.0, %v8919_v52 }
  0xf2   :  { %v7298_v45 = vpop.eup %7297  ;;  %7323 = vrcp.f32 %v3285_v25  ;;  %v3664_v21 = vmul.f32 %v7296_v29, %v8733_v47  ;;  %v8942_v25 = vadd.f32 %v8728_v44, %v1410_v34  ;;  %v7259_v34 = vld [vmem:[%s10705_s0 + $0x1e8] sm:$0xff]  }
  0xf3   :  { %v7300_v56 = vpop.eup %7299  ;;  %7325 = vrcp.f32 %v3155_v30  ;;  %v3792_v30 = vmul.f32 %v7298_v45, %v8736_v48  ;;  %v8951_v29 = vpop.f32.mrf.mxu0  ;;  %v7260_v48 = vld [vmem:[%s10705_s0 + $0x3e8] sm:$0xff]  }
  0xf4   :  { %v7302_v6 = vpop.eup %7301  ;;  %7327 = vpow2.f32 %v8857_v36  ;;  %v2522_v36 = vsub.f32 0.0, %v8916_v49 }
  0xf5   :  { %v7304_v12 = vpop.eup %7303  ;;  %7329 = vpow2.f32 %v8868_v50  ;;  %6991 = vmatmul.mubr.msk.bf16.gmra.mxu0 %vm933_vm2, %v7255_v35  ;;  %7119 = vmatmul.mubr.msk.bf16.gmra.mxu1 %vm933_vm2, %v7256_v41  ;;  %v2525_v35 = vsub.f32 0.0, %v8929_v11  ;;  %v3790_v45 = vmul.f32 %v7302_v6, %v8746_v54  ;;  %v2662_v54 = vmul.f32 1.442695, %v2394_v19  ;;  %v8982_v19 = vpop.f32.mrf.mxu0 }
  0xf6   :  { %v7306_v16 = vpop.eup %7305  ;;  %v3283_v17 = vadd.f32 1.0, %v7304_v12  ;;  %7331 = vpow2.f32 %v2654_v46  ;;  %6994 = vmatprep.mubr.msk.bf16.mxu0 %vm933_vm2, %v7257_v40  ;;  %7122 = vmatprep.mubr.msk.bf16.mxu1 %vm933_vm2, %v7258_v55  ;;  %v3662_v46 = vmul.f32 %v7300_v56, %v8743_v53  ;;  %v7262_v55 = vld [vmem:[%s10705_s0 + $0x3f0] sm:$0xff]   ;;  %v2918_v12 = vmul.f32 1.442695, %v2522_v36 }
  0xf7   :  { %v7308_v50 = vpop.eup %7307  ;;  %v3665_v22 = vmul.f32 %v7306_v16, %v8763_v1  ;;  %7333 = vpow2.f32 %v2910_v57  ;;  %v8977_v16 = vadd.f32 %v8728_v44, %v1922_v5  ;;  %v2924_v5 = vmul.f32 1.442695, %v2525_v35 }
  0xf8   :  { %v7310_v28 = vpop.eup %7309  ;;  %v3793_v31 = vmul.f32 %v7308_v50, %v8766_v2  ;;  %7335 = vrcp.f32 %v3283_v17 }
  0xf9   :  { %v7312_v41 = vpop.eup %7311  ;;  %v5981_v47 = vpack.c.bf16 %v3665_v22, %v3664_v21  ;;  %v3663_v1 = vmul.f32 %v7310_v28, %v8769_v7  ;;  %7337 = vpow2.f32 %v2660_v61  ;;  %v7261_v7 = vld [vmem:[%s10705_s0 + $0x1f0] sm:$0xff]   ;;  %v2395_v61 = vsub.f32 0.0, %v8942_v25 }
  0xfa   :  { %v7314_v2 = vpop.eup %7313  ;;  %v6301_v40 = vpack.c.bf16 %v3793_v31, %v3792_v30  ;;  %v3791_v53 = vmul.f32 %v7312_v41, %v8774_v10  ;;  %7339 = vpow2.f32 %v2916_v63  ;;  %v8971_v10 = vpop.f32.mrf.mxu1 }
  0xfb   :  { %v7316_v56 = vpop.eup %7315  ;;  %6613 = vst [vmem:[%s10707_s3 + $0x8] sm:$0xff] %v5981_v47   ;;  %v5976_v57 = vpack.c.bf16 %v3663_v1, %v3662_v46  ;;  %7341 = vpow2.f32 %v2656_v60  ;;  %v2668_v60 = vmul.f32 1.442695, %v2397_v20  ;;  %v3668_v36 = vmul.f32 %v7314_v2, %v8780_v14  ;;  %v7263_v46 = vld [vmem:[%s10705_s0 + $0x1f8] sm:$0xff]  }
  0xfc   :  { %v7318_v63 = vpop.eup %7317  ;;  %6677 = vst [vmem:[%s10707_s3 + $0x208] sm:$0xff] %v6301_v40   ;;  %v6296_v6 = vpack.c.bf16 %v3791_v53, %v3790_v45  ;;  %7343 = vpow2.f32 %v2912_v9  ;;  %v8990_v9 = vadd.f32 %v6892_v23, %v8728_v44  ;;  %v2664_v21 = vmul.f32 1.442695, %v2395_v61  ;;  %v8996_v22 = vpop.f32.mrf.mxu1 }
  0xfd   :  { %v7320_v17 = vpop.eup %7319  ;;  %5977 = vst [vmem:[%s10707_s3] sm:$0xff] %v5976_v57   ;;  %7345 = vpow2.f32 %v2666_v13  ;;  %6995 = vmatmul.mubr.msk.bf16.gmra.mxu0 %vm933_vm2, %v7259_v34  ;;  %7123 = vmatmul.mubr.msk.bf16.gmra.mxu1 %vm933_vm2, %v7260_v48  ;;  %v2523_v23 = vsub.f32 0.0, %v8977_v16  ;;  %v3666_v35 = vmul.f32 %v7318_v63, %v8791_v24  ;;  %v9017_v53 = vadd.f32 %v8944_v27, %v8728_v44 }
  0xfe   :  { %v7322_v50 = vpop.eup %7321  ;;  %6676 = vst [vmem:[%s10707_s3 + $0x200] sm:$0xff] %v6296_v6   ;;  %7347 = vpow2.f32 %v2922_v18  ;;  %6998 = vmatprep.mubr.msk.bf16.mxu0 %vm933_vm2, %v7261_v7  ;;  %7126 = vmatprep.mubr.msk.bf16.mxu1 %vm933_vm2, %v7262_v55  ;;  %v3796_v18 = vmul.f32 %v7316_v56, %v8783_v15  ;;  %v7264_v15 = vld [vmem:[%s10705_s0 + $0x3f8] sm:$0xff]   ;;  %v1938_v48 = vpop.f32.mrf.mxu1  ;;  %v2400_v56 = vsub.f32 0.0, %v8990_v9  ;;  %v9025_v57 = vadd.f32 %v8728_v44, %v8951_v29 }
  0xff   :  { %v7324_v13 = vpop.eup %7323  ;;  %v3669_v20 = vmul.f32 %v7322_v50, %v8811_v37  ;;  %7349 = vpow2.f32 %v2662_v54  ;;  %v1426_v37 = vpop.f32.mrf.mxu0  ;;  %v2920_v40 = vmul.f32 1.442695, %v2523_v23  ;;  %v3794_v61 = vmul.f32 %v7320_v17, %v8794_v26 }
 0x100   :  { %v7326_v28 = vpop.eup %7325  ;;  %v3797_v30 = vmul.f32 %v7324_v13, %v8814_v38  ;;  %7351 = vpow2.f32 %v2918_v12  ;;  %v2528_v29 = vsub.f32 0.0, %v9017_v53 }
 0x101   :  { %v7328_v31 = vpop.eup %7327  ;;  %v5991_v41 = vpack.c.bf16 %v3669_v20, %v3668_v36  ;;  %v3667_v14 = vmul.f32 %v7326_v28, %v8817_v42  ;;  %7353 = vpow2.f32 %v2668_v60  ;;  %v6896_v54 = vpop.f32.mrf.mxu0  ;;  %v2398_v28 = vsub.f32 0.0, %v9025_v57 }
 0x102   :  { %v7330_v38 = vpop.eup %7329  ;;  %v6311_v47 = vpack.c.bf16 %v3797_v30, %v3796_v18  ;;  %v3160_v1 = vadd.f32 1.0, %v7328_v31  ;;  %7355 = vpow2.f32 %v2924_v5  ;;  %v7024_v60 = vpop.f32.mrf.mxu1  ;;  %v9038_v18 = vadd.f32 %v8728_v44, %v8971_v10 }
 0x103   :  { %v7332_v34 = vpop.eup %7331  ;;  %6615 = vst [vmem:[%s10707_s3 + $0x18] sm:$0xff] %v5991_v41   ;;  %v5986_v24 = vpack.c.bf16 %v3667_v14, %v3666_v35  ;;  %v3288_v42 = vadd.f32 1.0, %v7330_v38  ;;  %7357 = vpow2.f32 %v2664_v21  ;;  %v2674_v21 = vmul.f32 1.442695, %v2400_v56  ;;  %v1439_v26 = vpop.f32.mrf.mxu0 }
 0x104   :  { %v7334_v2 = vpop.eup %7333  ;;  %6679 = vst [vmem:[%s10707_s3 + $0x218] sm:$0xff] %v6311_v47   ;;  %7359 = vrcp.f32 %v3160_v1  ;;  %v3158_v45 = vadd.f32 1.0, %v7332_v34  ;;  %v9042_v30 = vadd.f32 %v8982_v19, %v8728_v44  ;;  %v9046_v35 = vadd.f32 %v8996_v22, %v8728_v44  ;;  %v1951_v14 = vpop.f32.mrf.mxu1 }
 0x105   :  { %v7336_v7 = vpop.eup %7335  ;;  %6614 = vst [vmem:[%s10707_s3 + $0x10] sm:$0xff] %v5986_v24   ;;  %7361 = vrcp.f32 %v3288_v42  ;;  %v3286_v55 = vadd.f32 1.0, %v7334_v2  ;;  %6999 = vmatmul.mubr.msk.bf16.gmra.mxu0 %vm933_vm2, %v7263_v46  ;;  %7127 = vmatmul.mubr.msk.bf16.gmra.mxu1 %vm933_vm2, %v7264_v15  ;;  %v9049_v41 = vadd.f32 %v8728_v44, %v1426_v37  ;;  %v2930_v10 = vmul.f32 1.442695, %v2528_v29  ;;  %v6897_v34 = vpop.f32.mrf.mxu0 }
 0x106   :  { %v7338_v27 = vpop.eup %7337  ;;  %v3795_v63 = vmul.f32 %v7336_v7, %v8820_v43  ;;  %7363 = vrcp.f32 %v3158_v45  ;;  %v9052_v38 = vadd.f32 %v8728_v44, %v1938_v48  ;;  %v9055_v1 = vadd.f32 %v6896_v54, %v8728_v44 }
 0x107   :  { %v7340_v6 = vpop.eup %7339  ;;  %7365 = vrcp.f32 %v3286_v55  ;;  %v3161_v12 = vadd.f32 1.0, %v7338_v27  ;;  %v9058_v22 = vadd.f32 %v7024_v60, %v8728_v44  ;;  %v2526_v42 = vsub.f32 0.0, %v9038_v18  ;;  %v7025_v55 = vpop.f32.mrf.mxu1 }
 0x108   :  { %v7342_v50 = vpop.eup %7341  ;;  %v6306_v5 = vpack.c.bf16 %v3795_v63, %v3794_v61  ;;  %v3289_v13 = vadd.f32 1.0, %v7340_v6  ;;  %7367 = vpow2.f32 %v2920_v40  ;;  %v2401_v2 = vsub.f32 0.0, %v9042_v30 }
 0x109   :  { %v7344_v36 = vpop.eup %7343  ;;  %7369 = vrcp.f32 %v3161_v12  ;;  %v3159_v20 = vadd.f32 1.0, %v7342_v50  ;;  %v2529_v40 = vsub.f32 0.0, %v9046_v35  ;;  %v2399_v7 = vsub.f32 0.0, %v9049_v41  ;;  %v1442_v50 = vpop.f32.mrf.mxu0 }
 0x10a   :  { %v7346_v17 = vpop.eup %7345  ;;  %6678 = vst [vmem:[%s10707_s3 + $0x210] sm:$0xff] %v6306_v5   ;;  %7371 = vrcp.f32 %v3289_v13  ;;  %v3287_v43 = vadd.f32 1.0, %v7344_v36  ;;  %v2527_v27 = vsub.f32 0.0, %v9052_v38  ;;  %v9066_v61 = vadd.f32 %v8728_v44, %v1439_v26 }
 0x10b   :  { %v7348_v23 = vpop.eup %7347  ;;  %7373 = vrcp.f32 %v3159_v20  ;;  %v3164_v31 = vadd.f32 1.0, %v7346_v17  ;;  %v2404_v12 = vsub.f32 0.0, %v9055_v1  ;;  %v2532_v60 = vsub.f32 0.0, %v9058_v22 }
 0x10c   :  { %v7350_v46 = vpop.eup %7349  ;;  %7375 = vrcp.f32 %v3287_v43  ;;  %v3292_v15 = vadd.f32 1.0, %v7348_v23  ;;  %v2670_v13 = vmul.f32 1.442695, %v2398_v28  ;;  %v9071_v29 = vadd.f32 %v8728_v44, %v1951_v14  ;;  %v1954_v23 = vpop.f32.mrf.mxu1 }
 0x10d   :  { %v7352_v19 = vpop.eup %7351  ;;  %7377 = vrcp.f32 %v3164_v31  ;;  %v3162_v47 = vadd.f32 1.0, %v7350_v46  ;;  %v9074_v36 = vadd.f32 %v6897_v34, %v8728_v44  ;;  %v2926_v26 = vmul.f32 1.442695, %v2526_v42 }
 0x10e   :  { %v7354_v37 = vpop.eup %7353  ;;  %7379 = vrcp.f32 %v3292_v15  ;;  %v3290_v24 = vadd.f32 1.0, %v7352_v19  ;;  %v2676_v17 = vmul.f32 1.442695, %v2401_v2  ;;  %v2932_v43 = vmul.f32 1.442695, %v2529_v40 }
 0x10f   :  { %v7356_v45 = vpop.eup %7355  ;;  %7381 = vrcp.f32 %v3162_v47  ;;  %v3165_v48 = vadd.f32 1.0, %v7354_v37  ;;  %v2672_v46 = vmul.f32 1.442695, %v2399_v7  ;;  %v2928_v15 = vmul.f32 1.442695, %v2527_v27  ;;  %v6900_v37 = vpop.f32.mrf.mxu0 }
 0x110   :  { %v7358_v56 = vpop.eup %7357  ;;  %7383 = vrcp.f32 %v3290_v24  ;;  %v3293_v54 = vadd.f32 1.0, %v7356_v45  ;;  %v9077_v19 = vadd.f32 %v7025_v55, %v8728_v44  ;;  %v2682_v14 = vmul.f32 1.442695, %v2404_v12  ;;  %v7028_v7 = vpop.f32.mrf.mxu1 }
 0x111   :  { %v7360_v63 = vpop.eup %7359  ;;  %7385 = vrcp.f32 %v3165_v48  ;;  %v3163_v6 = vadd.f32 1.0, %v7358_v56  ;;  %v2938_v47 = vmul.f32 1.442695, %v2532_v60  ;;  %v2402_v34 = vsub.f32 0.0, %v9066_v61 }
 0x112   :  { %v7362_v5 = vpop.eup %7361  ;;  %7387 = vrcp.f32 %v3293_v54  ;;  %v2530_v42 = vsub.f32 0.0, %v9071_v29  ;;  %v2405_v2 = vsub.f32 0.0, %v9074_v36  ;;  %v3672_v48 = vmul.f32 %v7360_v63, %v8831_v62 }
 0x113   :  { %v7364_v20 = vpop.eup %7363  ;;  %7389 = vrcp.f32 %v3163_v6  ;;  %v3800_v56 = vmul.f32 %v7362_v5, %v8840_v8  ;;  %v2533_v27 = vsub.f32 0.0, %v9077_v19 }
 0x114   :  { %v7366_v31 = vpop.eup %7365  ;;  %7391 = vpow2.f32 %v2674_v21  ;;  %v3670_v12 = vmul.f32 %v7364_v20, %v8855_v33  ;;  %v2678_v33 = vmul.f32 1.442695, %v2402_v34  ;;  %v9100_v20 = vpop.f32.mrf.mxu1  ;;  %v9117_v34 = vadd.f32 %v6900_v37, %v8728_v44 }
 0x115   :  { %v7368_v28 = vpop.eup %7367  ;;  %7393 = vpow2.f32 %v2930_v10  ;;  %v9085_v10 = vadd.f32 %v8728_v44, %v1442_v50  ;;  %v3798_v50 = vmul.f32 %v7366_v31, %v8860_v39  ;;  %v2684_v31 = vmul.f32 1.442695, %v2405_v2 }
 0x116   :  { %v7370_v24 = vpop.eup %7369  ;;  %v3291_v45 = vadd.f32 1.0, %v7368_v28  ;;  %7395 = vpow2.f32 %v2670_v13  ;;  %v9124_v2 = vpop.f32.mrf.mxu1 }
 0x117   :  { %v7372_v21 = vpop.eup %7371  ;;  %v3673_v40 = vmul.f32 %v7370_v24, %v8871_v51  ;;  %7397 = vpow2.f32 %v2926_v26  ;;  %v9092_v51 = vpop.f32.mrf.mxu0 }
 0x118   :  { %v7374_v55 = vpop.eup %7373  ;;  %v3801_v54 = vmul.f32 %v7372_v21, %v8880_v58  ;;  %7399 = vrcp.f32 %v3291_v45 }
 0x119   :  { %v7376_v6 = vpop.eup %7375  ;;  %v6001_v60 = vpack.c.bf16 %v3673_v40, %v3672_v48  ;;  %v3671_v62 = vmul.f32 %v7374_v55, %v8883_v59  ;;  %7401 = vpow2.f32 %v2676_v17  ;;  %v2403_v59 = vsub.f32 0.0, %v9085_v10 }
 0x11a   :  { %v7378_v63 = vpop.eup %7377  ;;  %v6321_v13 = vpack.c.bf16 %v3801_v54, %v3800_v56  ;;  %v3799_v8 = vmul.f32 %v7376_v6, %v8886_v3  ;;  %7403 = vpow2.f32 %v2932_v43  ;;  %v2934_v3 = vmul.f32 1.442695, %v2530_v42  ;;  %v1970_v6 = vpop.f32.mrf.mxu1 }
 0x11b   :  { %v7380_v58 = vpop.eup %7379  ;;  %6617 = vst [vmem:[%s10707_s3 + $0x28] sm:$0xff] %v6001_v60   ;;  %v5996_v5 = vpack.c.bf16 %v3671_v62, %v3670_v12  ;;  %7405 = vpow2.f32 %v2672_v46  ;;  %v9106_v17 = vadd.f32 %v8728_v44, %v1954_v23  ;;  %v9111_v46 = vpop.f32.mrf.mxu0  ;;  %v9120_v23 = vadd.f32 %v7028_v7, %v8728_v44 }
 0x11c   :  { %v7382_v26 = vpop.eup %7381  ;;  %6681 = vst [vmem:[%s10707_s3 + $0x228] sm:$0xff] %v6321_v13   ;;  %v6316_v39 = vpack.c.bf16 %v3799_v8, %v3798_v50  ;;  %7407 = vpow2.f32 %v2928_v15  ;;  %v2940_v15 = vmul.f32 1.442695, %v2533_v27  ;;  %v3676_v45 = vmul.f32 %v7378_v63, %v8889_v4 }
 0x11d   :  { %v7384_v43 = vpop.eup %7383  ;;  %6616 = vst [vmem:[%s10707_s3 + $0x20] sm:$0xff] %v5996_v5   ;;  %7409 = vpow2.f32 %v2682_v14  ;;  %v2680_v42 = vmul.f32 1.442695, %v2403_v59  ;;  %v3804_v48 = vmul.f32 %v7380_v58, %v8893_v0  ;;  %v2531_v37 = vsub.f32 0.0, %v9106_v17 }
 0x11e   :  { %v7386_v28 = vpop.eup %7385  ;;  %6680 = vst [vmem:[%s10707_s3 + $0x220] sm:$0xff] %v6316_v39   ;;  %7411 = vpow2.f32 %v2938_v47  ;;  %v3674_v44 = vmul.f32 %v7382_v26, %v8907_v32  ;;  %v2408_v63 = vsub.f32 0.0, %v9117_v34  ;;  %v2536_v50 = vsub.f32 0.0, %v9120_v23  ;;  %v7032_v26 = vpop.f32.mrf.mxu1 }
 0x11f   :  { %v7388_v24 = vpop.eup %7387  ;;  %v3677_v14 = vmul.f32 %v7386_v28, %v8919_v52  ;;  %7413 = vpow2.f32 %v2678_v33  ;;  %v1458_v52 = vpop.f32.mrf.mxu0  ;;  %v3802_v58 = vmul.f32 %v7384_v43, %v8916_v49  ;;  %v9147_v28 = vld [vmem:[%s10706_s2] ss:$0 sm:$0xff] }
 0x120   :  { %v7390_v21 = vpop.eup %7389  ;;  %v3805_v47 = vmul.f32 %v7388_v24, %v8929_v11  ;;  %7415 = vpow2.f32 %v2934_v3  ;;  %v2690_v43 = vmul.f32 1.442695, %v2408_v63  ;;  %v9153_v24 = vmul.f32 1.442695, %v2536_v50 }
 0x121   :  { %v7392_v40 = vpop.eup %7391  ;;  %v6011_v7 = vpack.c.bf16 %v3677_v14, %v3676_v45  ;;  %v3675_v4 = vmul.f32 %v7390_v21, %v8942_v25  ;;  %7417 = vpow2.f32 %v2684_v31  ;;  %v2936_v25 = vmul.f32 1.442695, %v2531_v37  ;;  %v6904_v13 = vpop.f32.mrf.mxu0 }
 0x122   :  { %v7394_v55 = vpop.eup %7393  ;;  %v6331_v56 = vpack.c.bf16 %v3805_v47, %v3804_v48  ;;  %v3168_v54 = vadd.f32 1.0, %v7392_v40  ;;  %7419 = vpow2.f32 %v2940_v15  ;;  %v9151_v15 = vadd.f32 %v9147_v28, %v9092_v51 }
 0x123   :  { %v7396_v27 = vpop.eup %7395  ;;  %6619 = vst [vmem:[%s10707_s3 + $0x38] sm:$0xff] %v6011_v7   ;;  %v6006_v0 = vpack.c.bf16 %v3675_v4, %v3674_v44  ;;  %v3296_v11 = vadd.f32 1.0, %v7394_v55  ;;  %7421 = vpow2.f32 %v2680_v42  ;;  %v1471_v45 = vpop.f32.mrf.mxu0  ;;  %v9160_v21 = vadd.f32 %v9147_v28, %v9100_v20 }
 0x124   :  { %v7398_v12 = vpop.eup %7397  ;;  %6683 = vst [vmem:[%s10707_s3 + $0x238] sm:$0xff] %v6331_v56   ;;  %7423 = vrcp.f32 %v3168_v54  ;;  %v3166_v32 = vadd.f32 1.0, %v7396_v27  ;;  %v9164_v51 = vadd.f32 %v9147_v28, %v9111_v46  ;;  %v9168_v37 = vadd.f32 %v9147_v28, %v9124_v2  ;;  %v1983_v44 = vpop.f32.mrf.mxu1 }
 0x125   :  { %v7400_v60 = vpop.eup %7399  ;;  %6618 = vst [vmem:[%s10707_s3 + $0x30] sm:$0xff] %v6006_v0   ;;  %7425 = vrcp.f32 %v3296_v11  ;;  %v3294_v62 = vadd.f32 1.0, %v7398_v12  ;;  %v9171_v40 = vadd.f32 %v9147_v28, %v1458_v52  ;;  %v9174_v20 = vadd.f32 %v9147_v28, %v1970_v6  ;;  %v6905_v52 = vpop.f32.mrf.mxu0 }
 0x126   :  { %v7402_v8 = vpop.eup %7401  ;;  %v3803_v5 = vmul.f32 %v7400_v60, %v8977_v16  ;;  %7427 = vrcp.f32 %v3166_v32  ;;  %v9177_v46 = vadd.f32 %v9147_v28, %v6904_v13  ;;  %v2406_v54 = vsub.f32 0.0, %v9151_v15 }
 0x127   :  { %v7404_v33 = vpop.eup %7403  ;;  %7429 = vrcp.f32 %v3294_v62  ;;  %v3169_v59 = vadd.f32 1.0, %v7402_v8  ;;  %v9181_v2 = vadd.f32 %v9147_v28, %v7032_v26  ;;  %v2534_v11 = vsub.f32 0.0, %v9160_v21  ;;  %v7033_v62 = vpop.f32.mrf.mxu1 }
 0x128   :  { %v7406_v39 = vpop.eup %7405  ;;  %v6326_v3 = vpack.c.bf16 %v3803_v5, %v3802_v58  ;;  %v3297_v31 = vadd.f32 1.0, %v7404_v33  ;;  %7431 = vpow2.f32 %v2936_v25  ;;  %v2409_v6 = vsub.f32 0.0, %v9164_v51  ;;  %v1474_v26 = vpop.f32.mrf.mxu0 }
 0x129   :  { %v7408_v49 = vpop.eup %7407  ;;  %7433 = vrcp.f32 %v3169_v59  ;;  %v3167_v16 = vadd.f32 1.0, %v7406_v39  ;;  %v2537_v25 = vsub.f32 0.0, %v9168_v37  ;;  %v2407_v60 = vsub.f32 0.0, %v9171_v40 }
 0x12a   :  { %v7410_v14 = vpop.eup %7409  ;;  %6682 = vst [vmem:[%s10707_s3 + $0x230] sm:$0xff] %v6326_v3   ;;  %7435 = vrcp.f32 %v3297_v31  ;;  %v3295_v42 = vadd.f32 1.0, %v7408_v49  ;;  %v2535_v13 = vsub.f32 0.0, %v9174_v20  ;;  %v2412_v8 = vsub.f32 0.0, %v9177_v46 }
 0x12b   :  { %v7412_v48 = vpop.eup %7411  ;;  %7437 = vrcp.f32 %v3167_v16  ;;  %v3172_v47 = vadd.f32 1.0, %v7410_v14  ;;  %v2540_v33 = vsub.f32 0.0, %v9181_v2  ;;  %v9191_v59 = vadd.f32 %v9147_v28, %v1471_v45 }
 0x12c   :  { %v7414_v7 = vpop.eup %7413  ;;  %7439 = vrcp.f32 %v3295_v42  ;;  %v3300_v4 = vadd.f32 1.0, %v7412_v48  ;;  %v2686_v3 = vmul.f32 1.442695, %v2406_v54  ;;  %v9194_v31 = vadd.f32 %v9147_v28, %v1983_v44 }
 0x12d   :  { %v7416_v55 = vpop.eup %7415  ;;  %7441 = vrcp.f32 %v3172_v47  ;;  %v3170_v56 = vadd.f32 1.0, %v7414_v7  ;;  %v9197_v49 = vadd.f32 %v9147_v28, %v6905_v52  ;;  %v2942_v14 = vmul.f32 1.442695, %v2534_v11  ;;  %v1986_v47 = vpop.f32.mrf.mxu1 }
 0x12e   :  { %v7418_v27 = vpop.eup %7417  ;;  %7443 = vrcp.f32 %v3300_v4  ;;  %v3298_v0 = vadd.f32 1.0, %v7416_v55  ;;  %v2692_v42 = vmul.f32 1.442695, %v2409_v6  ;;  %v2948_v48 = vmul.f32 1.442695, %v2537_v25 }
 0x12f   :  { %v7420_v12 = vpop.eup %7419  ;;  %7445 = vrcp.f32 %v3170_v56  ;;  %v3173_v32 = vadd.f32 1.0, %v7418_v27  ;;  %v2688_v45 = vmul.f32 1.442695, %v2407_v60  ;;  %v2944_v4 = vmul.f32 1.442695, %v2535_v13  ;;  %v6908_v27 = vpop.f32.mrf.mxu0 }
 0x130   :  { %v7422_v63 = vpop.eup %7421  ;;  %7447 = vrcp.f32 %v3298_v0  ;;  %v3301_v50 = vadd.f32 1.0, %v7420_v12  ;;  %v9200_v55 = vadd.f32 %v9147_v28, %v7033_v62  ;;  %v2698_v44 = vmul.f32 1.442695, %v2412_v8  ;;  %v9211_v60 = vpop.f32.mrf.mxu1 }
 0x131   :  { %v7424_v58 = vpop.eup %7423  ;;  %7449 = vrcp.f32 %v3173_v32  ;;  %v3171_v5 = vadd.f32 1.0, %v7422_v63  ;;  %v2954_v54 = vmul.f32 1.442695, %v2540_v33  ;;  %v2410_v52 = vsub.f32 0.0, %v9191_v59 }
 0x132   :  { %v7426_v39 = vpop.eup %7425  ;;  %7451 = vrcp.f32 %v3301_v50  ;;  %v2538_v6 = vsub.f32 0.0, %v9194_v31  ;;  %v3680_v32 = vmul.f32 %v7424_v58, %v8990_v9  ;;  %v2541_v13 = vsub.f32 0.0, %v9200_v55  ;;  %v9218_v58 = vpop.f32.mrf.mxu0 }
 0x133   :  { %v7428_v16 = vpop.eup %7427  ;;  %7453 = vrcp.f32 %v3171_v5  ;;  %v3808_v63 = vmul.f32 %v7426_v39, %v9017_v53 }
 0x134   :  { %v7430_v7 = vpop.eup %7429  ;;  %7455 = vpow2.f32 %v2690_v43  ;;  %v2413_v43 = vsub.f32 0.0, %v9197_v49  ;;  %v3678_v5 = vmul.f32 %v7428_v16, %v9025_v57  ;;  %v2694_v57 = vmul.f32 1.442695, %v2410_v52  ;;  %v9226_v16 = vpop.f32.mrf.mxu1 }
 0x135   :  { %v7432_v56 = vpop.eup %7431  ;;  %7457 = vpow2.f32 %v9153_v24  ;;  %v9209_v24 = vadd.f32 %v9147_v28, %v1474_v26  ;;  %v3806_v26 = vmul.f32 %v7430_v7, %v9038_v18  ;;  %v9243_v52 = vadd.f32 %v9147_v28, %v6908_v27 }
 0x136   :  { %v7434_v0 = vpop.eup %7433  ;;  %v3299_v11 = vadd.f32 1.0, %v7432_v56  ;;  %7459 = vpow2.f32 %v2686_v3  ;;  %v2700_v7 = vmul.f32 1.442695, %v2413_v43 }
 0x137   :  { %v7436_v12 = vpop.eup %7435  ;;  %v3681_v25 = vmul.f32 %v7434_v0, %v9042_v30  ;;  %7461 = vpow2.f32 %v2942_v14 }
 0x138   :  { %v7438_v62 = vpop.eup %7437  ;;  %v3809_v50 = vmul.f32 %v7436_v12, %v9046_v35  ;;  %7463 = vrcp.f32 %v3299_v11 }
 0x139   :  { %v7440_v8 = vpop.eup %7439  ;;  %v6021_v9 = vpack.c.bf16 %v3681_v25, %v3680_v32  ;;  %v3679_v30 = vmul.f32 %v7438_v62, %v9049_v41  ;;  %7465 = vpow2.f32 %v2692_v42  ;;  %v2411_v41 = vsub.f32 0.0, %v9209_v24 }
 0x13a   :  { %v7442_v33 = vpop.eup %7441  ;;  %v6341_v3 = vpack.c.bf16 %v3809_v50, %v3808_v63  ;;  %v3807_v53 = vmul.f32 %v7440_v8, %v9052_v38  ;;  %7467 = vpow2.f32 %v2948_v48  ;;  %v2950_v38 = vmul.f32 1.442695, %v2538_v6  ;;  %v7037_v6 = vpop.f32.mrf.mxu1 }
 0x13b   :  { %v7444_v35 = vpop.eup %7443  ;;  %6621 = vst [vmem:[%s10707_s3 + $0x48] sm:$0xff] %v6021_v9   ;;  %v6016_v39 = vpack.c.bf16 %v3679_v30, %v3678_v5  ;;  %7469 = vpow2.f32 %v2688_v45  ;;  %v9232_v42 = vadd.f32 %v9147_v28, %v1986_v47  ;;  %v9237_v45 = vpop.f32.mrf.mxu0  ;;  %v3684_v0 = vmul.f32 %v7442_v33, %v9055_v1 }
 0x13c   :  { %v7446_v14 = vpop.eup %7445  ;;  %6685 = vst [vmem:[%s10707_s3 + $0x248] sm:$0xff] %v6341_v3   ;;  %v6336_v18 = vpack.c.bf16 %v3807_v53, %v3806_v26  ;;  %7471 = vpow2.f32 %v2944_v4  ;;  %v2956_v4 = vmul.f32 1.442695, %v2541_v13  ;;  %v3812_v12 = vmul.f32 %v7444_v35, %v9058_v22 }
 0x13d   :  { %v7448_v48 = vpop.eup %7447  ;;  %6620 = vst [vmem:[%s10707_s3 + $0x40] sm:$0xff] %v6016_v39   ;;  %7473 = vpow2.f32 %v2698_v44  ;;  %v2696_v44 = vmul.f32 1.442695, %v2411_v41  ;;  %v3682_v27 = vmul.f32 %v7446_v14, %v9066_v61  ;;  %v1490_v1 = vpop.f32.mrf.mxu0  ;;  %v2416_v5 = vsub.f32 0.0, %v9243_v52 }
 0x13e   :  { %v7450_v56 = vpop.eup %7449  ;;  %6684 = vst [vmem:[%s10707_s3 + $0x240] sm:$0xff] %v6336_v18   ;;  %7475 = vpow2.f32 %v2954_v54  ;;  %v2539_v54 = vsub.f32 0.0, %v9232_v42  ;;  %v2002_v61 = vpop.f32.mrf.mxu1  ;;  %v9264_v3 = vadd.f32 %v9147_v28, %v9211_v60  ;;  %v3810_v39 = vmul.f32 %v7448_v48, %v9071_v29 }
 0x13f   :  { %v7452_v47 = vpop.eup %7451  ;;  %v3685_v11 = vmul.f32 %v7450_v56, %v9074_v36  ;;  %7477 = vpow2.f32 %v2694_v57  ;;  %v6912_v53 = vpop.f32.mrf.mxu0  ;;  %v9270_v41 = vadd.f32 %v9147_v28, %v9218_v58  ;;  %v9276_v29 = vadd.f32 %v9147_v28, %v9226_v16 }
 0x140   :  { %v7454_v43 = vpop.eup %7453  ;;  %v3813_v32 = vmul.f32 %v7452_v47, %v9077_v19  ;;  %7479 = vpow2.f32 %v2950_v38  ;;  %v2952_v30 = vmul.f32 1.442695, %v2539_v54  ;;  %v9272_v38 = vmul.f32 1.442695, %v2416_v5 }
 0x141   :  { %v7456_v25 = vpop.eup %7455  ;;  %v6031_v62 = vpack.c.bf16 %v3685_v11, %v3684_v0  ;;  %v3683_v63 = vmul.f32 %v7454_v43, %v9085_v10  ;;  %7481 = vpow2.f32 %v2700_v7  ;;  %v7040_v7 = vpop.f32.mrf.mxu1  ;;  %v2544_v58 = vsub.f32 0.0, %v9264_v3 }
 0x142   :  { %v7458_v36 = vpop.eup %7457  ;;  %v6351_v50 = vpack.c.bf16 %v3813_v32, %v3812_v12  ;;  %v3176_v13 = vadd.f32 1.0, %v7456_v25  ;;  %7483 = vpow2.f32 %v2956_v4  ;;  %v9281_v47 = vadd.f32 %v9147_v28, %v9237_v45  ;;  %v1503_v0 = vpop.f32.mrf.mxu0 }
 0x143   :  { %v7460_v8 = vpop.eup %7459  ;;  %6623 = vst [vmem:[%s10707_s3 + $0x58] sm:$0xff] %v6031_v62   ;;  %v6026_v22 = vpack.c.bf16 %v3683_v63, %v3682_v27  ;;  %v3304_v19 = vadd.f32 1.0, %v7458_v36  ;;  %7485 = vpow2.f32 %v2696_v44  ;;  %v2414_v16 = vsub.f32 0.0, %v9270_v41  ;;  %v2015_v25 = vpop.f32.mrf.mxu1 }
 0x144   :  { %v7462_v9 = vpop.eup %7461  ;;  %6687 = vst [vmem:[%s10707_s3 + $0x258] sm:$0xff] %v6351_v50   ;;  %7487 = vrcp.f32 %v3176_v13  ;;  %v3174_v10 = vadd.f32 1.0, %v7460_v8  ;;  %v9288_v43 = vadd.f32 %v9147_v28, %v7037_v6  ;;  %v9291_v54 = vadd.f32 %v9147_v28, %v1490_v1  ;;  %v6913_v8 = vpop.f32.mrf.mxu0 }
 0x145   :  { %v7464_v33 = vpop.eup %7463  ;;  %6622 = vst [vmem:[%s10707_s3 + $0x50] sm:$0xff] %v6026_v22   ;;  %7489 = vrcp.f32 %v3304_v19  ;;  %v3302_v26 = vadd.f32 1.0, %v7462_v9  ;;  %v9294_v45 = vadd.f32 %v9147_v28, %v2002_v61  ;;  %v2542_v63 = vsub.f32 0.0, %v9276_v29 }
 0x146   :  { %v7466_v35 = vpop.eup %7465  ;;  %v3811_v57 = vmul.f32 %v7464_v33, %v9106_v17  ;;  %7491 = vrcp.f32 %v3174_v10  ;;  %v9298_v36 = vadd.f32 %v9147_v28, %v6912_v53  ;;  %v2417_v13 = vsub.f32 0.0, %v9281_v47 }
 0x147   :  { %v7468_v14 = vpop.eup %7467  ;;  %7493 = vrcp.f32 %v3302_v26  ;;  %v3177_v18 = vadd.f32 1.0, %v7466_v35  ;;  %v9302_v1 = vadd.f32 %v9147_v28, %v7040_v7  ;;  %v2962_v5 = vmul.f32 1.442695, %v2544_v58  ;;  %v7041_v26 = vpop.f32.mrf.mxu1 }
 0x148   :  { %v7470_v56 = vpop.eup %7469  ;;  %v6346_v60 = vpack.c.bf16 %v3811_v57, %v3810_v39  ;;  %v3305_v4 = vadd.f32 1.0, %v7468_v14  ;;  %7495 = vpow2.f32 %v2952_v30  ;;  %v2545_v61 = vsub.f32 0.0, %v9288_v43 }
 0x149   :  { %v7472_v17 = vpop.eup %7471  ;;  %7497 = vrcp.f32 %v3177_v18  ;;  %v3175_v48 = vadd.f32 1.0, %v7470_v56  ;;  %v2415_v30 = vsub.f32 0.0, %v9291_v54  ;;  %v2543_v33 = vsub.f32 0.0, %v9294_v45 }
 0x14a   :  { %v7474_v11 = vpop.eup %7473  ;;  %6686 = vst [vmem:[%s10707_s3 + $0x250] sm:$0xff] %v6346_v60   ;;  %7499 = vrcp.f32 %v3305_v4  ;;  %v3303_v44 = vadd.f32 1.0, %v7472_v17  ;;  %v2420_v39 = vsub.f32 0.0, %v9298_v36  ;;  %v9309_v57 = vadd.f32 %v9147_v28, %v1503_v0  ;;  %v1506_v60 = vpop.f32.mrf.mxu0 }
 0x14b   :  { %v7476_v12 = vpop.eup %7475  ;;  %7501 = vrcp.f32 %v3175_v48  ;;  %v3180_v32 = vadd.f32 1.0, %v7474_v11  ;;  %v2548_v7 = vsub.f32 0.0, %v9302_v1  ;;  %v9313_v56 = vadd.f32 %v9147_v28, %v2015_v25 }
 0x14c   :  { %v7478_v27 = vpop.eup %7477  ;;  %7503 = vrcp.f32 %v3303_v44  ;;  %v3308_v62 = vadd.f32 1.0, %v7476_v12  ;;  %v2702_v17 = vmul.f32 1.442695, %v2414_v16  ;;  %v2958_v48 = vmul.f32 1.442695, %v2542_v63 }
 0x14d   :  { %v7480_v6 = vpop.eup %7479  ;;  %7505 = vrcp.f32 %v3180_v32  ;;  %v3178_v50 = vadd.f32 1.0, %v7478_v27  ;;  %v2708_v58 = vmul.f32 1.442695, %v2417_v13  ;;  %v2964_v44 = vmul.f32 1.442695, %v2545_v61  ;;  %v2018_v32 = vpop.f32.mrf.mxu1 }
 0x14e   :  { %v7482_v22 = vpop.eup %7481  ;;  %7507 = vrcp.f32 %v3308_v62  ;;  %v3306_v19 = vadd.f32 1.0, %v7480_v6  ;;  %v2704_v12 = vmul.f32 1.442695, %v2415_v30  ;;  %v9316_v0 = vadd.f32 %v9147_v28, %v6913_v8 }
 0x14f   :  { %v7484_v9 = vpop.eup %7483  ;;  %7509 = vrcp.f32 %v3178_v50  ;;  %v3181_v10 = vadd.f32 1.0, %v7482_v22  ;;  %v2960_v62 = vmul.f32 1.442695, %v2543_v33  ;;  %v2714_v25 = vmul.f32 1.442695, %v2420_v39  ;;  %v6916_v22 = vpop.f32.mrf.mxu0 }
 0x150   :  { %v7486_v53 = vpop.eup %7485  ;;  %7511 = vrcp.f32 %v3306_v19  ;;  %v3309_v35 = vadd.f32 1.0, %v7484_v9  ;;  %v9320_v6 = vadd.f32 %v9147_v28, %v7041_v26  ;;  %v2970_v16 = vmul.f32 1.442695, %v2548_v7  ;;  %v9333_v33 = vpop.f32.mrf.mxu1 }
 0x151   :  { %v7488_v14 = vpop.eup %7487  ;;  %7513 = vrcp.f32 %v3181_v10  ;;  %v3179_v18 = vadd.f32 1.0, %v7486_v53  ;;  %v2418_v63 = vsub.f32 0.0, %v9309_v57  ;;  %v2546_v13 = vsub.f32 0.0, %v9313_v56 }
 0x152   :  { %v7490_v4 = vpop.eup %7489  ;;  %7515 = vrcp.f32 %v3309_v35  ;;  %v9325_v61 = vadd.f32 %v9147_v28, %v1506_v60  ;;  %v3688_v10 = vmul.f32 %v7488_v14, %v9117_v34  ;;  %v2421_v30 = vsub.f32 0.0, %v9316_v0 }
 0x153   :  { %v7492_v11 = vpop.eup %7491  ;;  %7517 = vrcp.f32 %v3179_v18  ;;  %v3816_v53 = vmul.f32 %v7490_v4, %v9120_v23  ;;  %v2549_v39 = vsub.f32 0.0, %v9320_v6 }
 0x154   :  { %v7494_v27 = vpop.eup %7493  ;;  %7519 = vpow2.f32 %v9272_v38  ;;  %v9328_v38 = vadd.f32 %v9147_v28, %v2018_v32  ;;  %v3686_v7 = vmul.f32 %v7492_v11, %v9151_v15  ;;  %v2710_v15 = vmul.f32 1.442695, %v2418_v63 }
 0x155   :  { %v7496_v50 = vpop.eup %7495  ;;  %7521 = vpow2.f32 %v2962_v5  ;;  %v2716_v32 = vmul.f32 1.442695, %v2421_v30 }
 0x156   :  { %v7498_v19 = vpop.eup %7497  ;;  %v3307_v8 = vadd.f32 1.0, %v7496_v50  ;;  %7523 = vpow2.f32 %v2702_v17  ;;  %v3814_v17 = vmul.f32 %v7494_v27, %v9160_v21  ;;  %v2972_v50 = vmul.f32 1.442695, %v2549_v39 }
 0x157   :  { %v7500_v9 = vpop.eup %7499  ;;  %v3689_v5 = vmul.f32 %v7498_v19, %v9164_v51  ;;  %7525 = vpow2.f32 %v2958_v48  ;;  %v9340_v51 = vpop.f32.mrf.mxu0  ;;  %v2547_v63 = vsub.f32 0.0, %v9328_v38 }
 0x158   :  { %v7502_v26 = vpop.eup %7501  ;;  %v3817_v35 = vmul.f32 %v7500_v9, %v9168_v37  ;;  %7527 = vrcp.f32 %v3307_v8 }
 0x159   :  { %v7504_v18 = vpop.eup %7503  ;;  %v6041_v60 = vpack.c.bf16 %v3689_v5, %v3688_v10  ;;  %v3687_v34 = vmul.f32 %v7502_v26, %v9171_v40  ;;  %7529 = vpow2.f32 %v2708_v58  ;;  %v2419_v40 = vsub.f32 0.0, %v9325_v61  ;;  %v2031_v58 = vpop.f32.mrf.mxu1 }
 0x15a   :  { %v7506_v14 = vpop.eup %7505  ;;  %v6361_v48 = vpack.c.bf16 %v3817_v35, %v3816_v53  ;;  %v3815_v23 = vmul.f32 %v7504_v18, %v9174_v20  ;;  %7531 = vpow2.f32 %v2964_v44  ;;  %v2966_v20 = vmul.f32 1.442695, %v2546_v13 }
 0x15b   :  { %v7508_v37 = vpop.eup %7507  ;;  %6625 = vst [vmem:[%s10707_s3 + $0x68] sm:$0xff] %v6041_v60   ;;  %v6036_v4 = vpack.c.bf16 %v3687_v34, %v3686_v7  ;;  %7533 = vpow2.f32 %v2704_v12  ;;  %v9354_v12 = vpop.f32.mrf.mxu0  ;;  %v3692_v13 = vmul.f32 %v7506_v14, %v9177_v46  ;;  %v2712_v8 = vmul.f32 1.442695, %v2419_v40 }
 0x15c   :  { %v7510_v11 = vpop.eup %7509  ;;  %6689 = vst [vmem:[%s10707_s3 + $0x268] sm:$0xff] %v6361_v48   ;;  %v6356_v21 = vpack.c.bf16 %v3815_v23, %v3814_v17  ;;  %7535 = vpow2.f32 %v2960_v62  ;;  %v3820_v10 = vmul.f32 %v7508_v37, %v9181_v2  ;;  %v9379_v34 = vadd.f32 %v9147_v28, %v9333_v33 }
 0x15d   :  { %v7512_v44 = vpop.eup %7511  ;;  %6624 = vst [vmem:[%s10707_s3 + $0x60] sm:$0xff] %v6036_v4   ;;  %7537 = vpow2.f32 %v2714_v25  ;;  %v9362_v25 = vpop.f32.mrf.mxu1  ;;  %v3690_v26 = vmul.f32 %v7510_v11, %v9191_v59  ;;  %v9387_v23 = vadd.f32 %v9147_v28, %v9340_v51  ;;  %v9392_v40 = vadd.f32 %v9147_v28, %v2031_v58 }
 0x15e   :  { %v7514_v27 = vpop.eup %7513  ;;  %6688 = vst [vmem:[%s10707_s3 + $0x260] sm:$0xff] %v6356_v21   ;;  %7539 = vpow2.f32 %v2970_v16  ;;  %v9367_v16 = vadd.f32 %v9147_v28, %v6916_v22  ;;  %v2552_v51 = vsub.f32 0.0, %v9379_v34 }
 0x15f   :  { %v7516_v62 = vpop.eup %7515  ;;  %v3693_v19 = vmul.f32 %v7514_v27, %v9197_v49  ;;  %7541 = vpow2.f32 %v2710_v15  ;;  %v1522_v49 = vpop.f32.mrf.mxu0  ;;  %v3818_v15 = vmul.f32 %v7512_v44, %v9194_v31 }
 0x160   :  { %v7518_v9 = vpop.eup %7517  ;;  %v3821_v5 = vmul.f32 %v7516_v62, %v9200_v55  ;;  %7543 = vpow2.f32 %v2966_v20  ;;  %v2034_v22 = vpop.f32.mrf.mxu1  ;;  %v2424_v48 = vsub.f32 0.0, %v9367_v16 }
 0x161   :  { %v7520_v30 = vpop.eup %7519  ;;  %v6051_v53 = vpack.c.bf16 %v3693_v19, %v3692_v13  ;;  %v3691_v46 = vmul.f32 %v7518_v9, %v9209_v24  ;;  %7545 = vpow2.f32 %v2716_v32  ;;  %v2968_v24 = vmul.f32 1.442695, %v2547_v63  ;;  %v6920_v37 = vpop.f32.mrf.mxu0 }
 0x162   :  { %v7522_v35 = vpop.eup %7521  ;;  %v6371_v39 = vpack.c.bf16 %v3821_v5, %v3820_v10  ;;  %v3184_v18 = vadd.f32 1.0, %v7520_v30  ;;  %7547 = vpow2.f32 %v2972_v50  ;;  %v7048_v20 = vpop.f32.mrf.mxu1  ;;  %v2722_v31 = vmul.f32 1.442695, %v2424_v48 }
 0x163   :  { %v7524_v7 = vpop.eup %7523  ;;  %6627 = vst [vmem:[%s10707_s3 + $0x78] sm:$0xff] %v6051_v53   ;;  %v6046_v2 = vpack.c.bf16 %v3691_v46, %v3690_v26  ;;  %v3312_v55 = vadd.f32 1.0, %v7522_v35  ;;  %7549 = vpow2.f32 %v2712_v8  ;;  %v1535_v44 = vpop.f32.mrf.mxu0  ;;  %v2550_v19 = vsub.f32 0.0, %v9392_v40 }
 0x164   :  { %v7526_v60 = vpop.eup %7525  ;;  %6691 = vst [vmem:[%s10707_s3 + $0x278] sm:$0xff] %v6371_v39   ;;  %7551 = vrcp.f32 %v3184_v18  ;;  %v3182_v59 = vadd.f32 1.0, %v7524_v7  ;;  %v9402_v8 = vadd.f32 %v9147_v28, %v9354_v12  ;;  %v9406_v5 = vadd.f32 %v9147_v28, %v9362_v25  ;;  %v2047_v26 = vpop.f32.mrf.mxu1 }
 0x165   :  { %v7528_v14 = vpop.eup %7527  ;;  %6626 = vst [vmem:[%s10707_s3 + $0x70] sm:$0xff] %v6046_v2   ;;  %7553 = vrcp.f32 %v3312_v55  ;;  %v3310_v17 = vadd.f32 1.0, %v7526_v60  ;;  %v9409_v30 = vadd.f32 %v9147_v28, %v1522_v49  ;;  %v2978_v35 = vmul.f32 1.442695, %v2552_v51  ;;  %v6921_v2 = vpop.f32.mrf.mxu0 }
 0x166   :  { %v7530_v4 = vpop.eup %7529  ;;  %v3819_v33 = vmul.f32 %v7528_v14, %v9232_v42  ;;  %7555 = vrcp.f32 %v3182_v59  ;;  %v2422_v42 = vsub.f32 0.0, %v9387_v23  ;;  %v9412_v39 = vadd.f32 %v9147_v28, %v2034_v22  ;;  %v7049_v48 = vpop.f32.mrf.mxu1 }
 0x167   :  { %v7532_v11 = vpop.eup %7531  ;;  %7557 = vrcp.f32 %v3310_v17  ;;  %v3185_v21 = vadd.f32 1.0, %v7530_v4  ;;  %v9415_v7 = vadd.f32 %v9147_v28, %v6920_v37  ;;  %v9418_v25 = vadd.f32 %v9147_v28, %v7048_v20 }
 0x168   :  { %v7534_v32 = vpop.eup %7533  ;;  %v6366_v27 = vpack.c.bf16 %v3819_v33, %v3818_v15  ;;  %v3313_v50 = vadd.f32 1.0, %v7532_v11  ;;  %7559 = vpow2.f32 %v2968_v24  ;;  %v2718_v60 = vmul.f32 1.442695, %v2422_v42 }
 0x169   :  { %v7536_v63 = vpop.eup %7535  ;;  %7561 = vrcp.f32 %v3185_v21  ;;  %v3183_v62 = vadd.f32 1.0, %v7534_v32  ;;  %v2425_v59 = vsub.f32 0.0, %v9402_v8  ;;  %v2553_v14 = vsub.f32 0.0, %v9406_v5 }
 0x16a   :  { %v7538_v13 = vpop.eup %7537  ;;  %6690 = vst [vmem:[%s10707_s3 + $0x270] sm:$0xff] %v6366_v27   ;;  %7563 = vrcp.f32 %v3313_v50  ;;  %v3311_v58 = vadd.f32 1.0, %v7536_v63  ;;  %v2423_v17 = vsub.f32 0.0, %v9409_v30  ;;  %v2551_v15 = vsub.f32 0.0, %v9412_v39  ;;  %v1538_v27 = vpop.f32.mrf.mxu0 }
 0x16b   :  { %v7540_v9 = vpop.eup %7539  ;;  %7565 = vrcp.f32 %v3183_v62  ;;  %v3188_v10 = vadd.f32 1.0, %v7538_v13  ;;  %v9425_v33 = vadd.f32 %v9147_v28, %v1535_v44  ;;  %v2428_v20 = vsub.f32 0.0, %v9415_v7 }
 0x16c   :  { %v7542_v53 = vpop.eup %7541  ;;  %7567 = vrcp.f32 %v3311_v58  ;;  %v3316_v46 = vadd.f32 1.0, %v7540_v9  ;;  %v2556_v32 = vsub.f32 0.0, %v9418_v25  ;;  %v2974_v51 = vmul.f32 1.442695, %v2550_v19  ;;  %v2050_v9 = vpop.f32.mrf.mxu1 }
 0x16d   :  { %v7544_v12 = vpop.eup %7543  ;;  %7569 = vrcp.f32 %v3188_v10  ;;  %v3186_v18 = vadd.f32 1.0, %v7542_v53  ;;  %v9430_v63 = vadd.f32 %v9147_v28, %v2047_v26  ;;  %v9433_v62 = vadd.f32 %v9147_v28, %v6921_v2 }
 0x16e   :  { %v7546_v49 = vpop.eup %7545  ;;  %7571 = vrcp.f32 %v3316_v46  ;;  %v3314_v55 = vadd.f32 1.0, %v7544_v12  ;;  %v2724_v44 = vmul.f32 1.442695, %v2425_v59  ;;  %v2980_v13 = vmul.f32 1.442695, %v2553_v14 }
 0x16f   :  { %v7548_v24 = vpop.eup %7547  ;;  %7573 = vrcp.f32 %v3186_v18  ;;  %v3189_v22 = vadd.f32 1.0, %v7546_v49  ;;  %v9436_v58 = vadd.f32 %v9147_v28, %v7049_v48  ;;  %v2720_v53 = vmul.f32 1.442695, %v2423_v17  ;;  %v6924_v49 = vpop.f32.mrf.mxu0 }
 0x170   :  { %v7550_v37 = vpop.eup %7549  ;;  %7575 = vrcp.f32 %v3314_v55  ;;  %v3317_v4 = vadd.f32 1.0, %v7548_v24  ;;  %v2976_v46 = vmul.f32 1.442695, %v2551_v15  ;;  %v9439_v19 = vadd.f32 %v9147_v28, %v1538_v27  ;;  %v7052_v48 = vpop.f32.mrf.mxu1 }
 0x171   :  { %v7552_v11 = vpop.eup %7551  ;;  %7577 = vrcp.f32 %v3189_v22  ;;  %v3187_v21 = vadd.f32 1.0, %v7550_v37  ;;  %v2730_v12 = vmul.f32 1.442695, %v2428_v20  ;;  %v2986_v18 = vmul.f32 1.442695, %v2556_v32 }
 0x172   :  { %v7554_v50 = vpop.eup %7553  ;;  %7579 = vrcp.f32 %v3317_v4  ;;  %v2426_v2 = vsub.f32 0.0, %v9425_v33  ;;  %v2554_v24 = vsub.f32 0.0, %v9430_v63  ;;  %v2429_v22 = vsub.f32 0.0, %v9433_v62 }
 0x173   :  { %v7556_v42 = vpop.eup %7555  ;;  %7581 = vrcp.f32 %v3187_v21  ;;  %v3696_v14 = vmul.f32 %v7552_v11, %v9243_v52  ;;  %v3824_v4 = vmul.f32 %v7554_v50, %v9264_v3 }
 0x174   :  { %v7558_v10 = vpop.eup %7557  ;;  %7583 = vpow2.f32 %v2722_v31  ;;  %v3694_v20 = vmul.f32 %v7556_v42, %v9270_v41  ;;  %v2726_v41 = vmul.f32 1.442695, %v2426_v2  ;;  %v9459_v42 = vpop.f32.mrf.mxu1 }
 0x175   :  { %v7560_v26 = vpop.eup %7559  ;;  %7585 = vpow2.f32 %v2978_v35  ;;  %v2557_v35 = vsub.f32 0.0, %v9436_v58  ;;  %v3822_v27 = vmul.f32 %v7558_v10, %v9276_v29  ;;  %v2732_v10 = vmul.f32 1.442695, %v2429_v22 }
 0x176   :  { %v7562_v55 = vpop.eup %7561  ;;  %v3315_v59 = vadd.f32 1.0, %v7560_v26  ;;  %7587 = vpow2.f32 %v2718_v60  ;;  %v2427_v60 = vsub.f32 0.0, %v9439_v19  ;;  %v9483_v22 = vpop.f32.mrf.mxu1 }
 0x177   :  { %v7564_v31 = vpop.eup %7563  ;;  %v3697_v17 = vmul.f32 %v7562_v55, %v9281_v47  ;;  %7589 = vpow2.f32 %v2974_v51  ;;  %v9452_v47 = vpop.f32.mrf.mxu0 }
 0x178   :  { %v7566_v37 = vpop.eup %7565  ;;  %v3825_v15 = vmul.f32 %v7564_v31, %v9288_v43  ;;  %7591 = vrcp.f32 %v3315_v59  ;;  %v2728_v2 = vmul.f32 1.442695, %v2427_v60  ;;  %v2066_v60 = vpop.f32.mrf.mxu1 }
 0x179   :  { %v7568_v21 = vpop.eup %7567  ;;  %v6061_v32 = vpack.c.bf16 %v3697_v17, %v3696_v14  ;;  %v3695_v52 = vmul.f32 %v7566_v37, %v9291_v54  ;;  %7593 = vpow2.f32 %v2724_v44  ;;  %v2982_v44 = vmul.f32 1.442695, %v2554_v24 }
 0x17a   :  { %v7570_v11 = vpop.eup %7569  ;;  %v6381_v51 = vpack.c.bf16 %v3825_v15, %v3824_v4  ;;  %v3823_v3 = vmul.f32 %v7568_v21, %v9294_v45  ;;  %7595 = vpow2.f32 %v2980_v13  ;;  %v9465_v45 = vadd.f32 %v9147_v28, %v2050_v9 }
 0x17b   :  { %v7572_v43 = vpop.eup %7571  ;;  %6629 = vst [vmem:[%s10707_s3 + $0x88] sm:$0xff] %v6061_v32   ;;  %v6056_v50 = vpack.c.bf16 %v3695_v52, %v3694_v20  ;;  %7597 = vpow2.f32 %v2720_v53  ;;  %v9470_v53 = vpop.f32.mrf.mxu0  ;;  %v9476_v9 = vadd.f32 %v9147_v28, %v6924_v49  ;;  %v3700_v59 = vmul.f32 %v7570_v11, %v9298_v36 }
 0x17c   :  { %v7574_v54 = vpop.eup %7573  ;;  %6693 = vst [vmem:[%s10707_s3 + $0x288] sm:$0xff] %v6381_v51   ;;  %v6376_v29 = vpack.c.bf16 %v3823_v3, %v3822_v27  ;;  %7599 = vpow2.f32 %v2976_v46  ;;  %v2988_v46 = vmul.f32 1.442695, %v2557_v35  ;;  %v3828_v14 = vmul.f32 %v7572_v43, %v9302_v1 }
 0x17d   :  { %v7576_v13 = vpop.eup %7575  ;;  %6628 = vst [vmem:[%s10707_s3 + $0x80] sm:$0xff] %v6056_v50   ;;  %7601 = vpow2.f32 %v2730_v12  ;;  %v9481_v12 = vadd.f32 %v9147_v28, %v7052_v48  ;;  %v2555_v49 = vsub.f32 0.0, %v9465_v45  ;;  %v3698_v35 = vmul.f32 %v7574_v54, %v9309_v57  ;;  %v1554_v37 = vpop.f32.mrf.mxu0 }
 0x17e   :  { %v7578_v26 = vpop.eup %7577  ;;  %6692 = vst [vmem:[%s10707_s3 + $0x280] sm:$0xff] %v6376_v29   ;;  %7603 = vpow2.f32 %v2986_v18  ;;  %v2432_v52 = vsub.f32 0.0, %v9476_v9  ;;  %v3826_v3 = vmul.f32 %v7576_v13, %v9313_v56  ;;  %v7056_v54 = vpop.f32.mrf.mxu1 }
 0x17f   :  { %v7580_v55 = vpop.eup %7579  ;;  %v3701_v24 = vmul.f32 %v7578_v26, %v9316_v0  ;;  %7605 = vpow2.f32 %v2726_v41  ;;  %v2560_v11 = vsub.f32 0.0, %v9481_v12  ;;  %v6928_v27 = vpop.f32.mrf.mxu0  ;;  %v9506_v26 = vld [vmem:[%s10706_s2] ss:$0 sm:$0xff] }
 0x180   :  { %v7582_v31 = vpop.eup %7581  ;;  %v3829_v18 = vmul.f32 %v7580_v55, %v9320_v6  ;;  %7607 = vpow2.f32 %v2982_v44  ;;  %v2738_v13 = vmul.f32 1.442695, %v2432_v52 }
 0x181   :  { %v7584_v17 = vpop.eup %7583  ;;  %v6071_v36 = vpack.c.bf16 %v3701_v24, %v3700_v59  ;;  %v3699_v0 = vmul.f32 %v7582_v31, %v9325_v61  ;;  %7609 = vpow2.f32 %v2732_v10  ;;  %v2984_v61 = vmul.f32 1.442695, %v2555_v49  ;;  %v1567_v55 = vpop.f32.mrf.mxu0 }
 0x182   :  { %v7586_v28 = vpop.eup %7585  ;;  %v6391_v48 = vpack.c.bf16 %v3829_v18, %v3828_v14  ;;  %v3192_v4 = vadd.f32 1.0, %v7584_v17  ;;  %7611 = vpow2.f32 %v2988_v46  ;;  %v9510_v46 = vadd.f32 %v9506_v26, %v9452_v47 }
 0x183   :  { %v7588_v15 = vpop.eup %7587  ;;  %6631 = vst [vmem:[%s10707_s3 + $0x98] sm:$0xff] %v6071_v36   ;;  %v6066_v1 = vpack.c.bf16 %v3699_v0, %v3698_v35  ;;  %v3320_v6 = vadd.f32 1.0, %v7586_v28  ;;  %7613 = vpow2.f32 %v2728_v2  ;;  %v9512_v2 = vmul.f32 1.442695, %v2560_v11  ;;  %v2079_v35 = vpop.f32.mrf.mxu1 }
 0x184   :  { %v7590_v21 = vpop.eup %7589  ;;  %6695 = vst [vmem:[%s10707_s3 + $0x298] sm:$0xff] %v6391_v48   ;;  %7615 = vrcp.f32 %v3192_v4  ;;  %v3190_v57 = vadd.f32 1.0, %v7588_v15  ;;  %v9519_v31 = vadd.f32 %v9506_v26, %v9459_v42  ;;  %v9523_v47 = vadd.f32 %v9506_v26, %v9470_v53 }
 0x185   :  { %v7592_v20 = vpop.eup %7591  ;;  %6630 = vst [vmem:[%s10707_s3 + $0x90] sm:$0xff] %v6066_v1   ;;  %7617 = vrcp.f32 %v3320_v6  ;;  %v3318_v32 = vadd.f32 1.0, %v7590_v21  ;;  %v9527_v49 = vadd.f32 %v9506_v26, %v9483_v22  ;;  %v9530_v17 = vadd.f32 %v9506_v26, %v1554_v37  ;;  %v6929_v37 = vpop.f32.mrf.mxu0 }
 0x186   :  { %v7594_v51 = vpop.eup %7593  ;;  %v3827_v43 = vmul.f32 %v7592_v20, %v9328_v38  ;;  %7619 = vrcp.f32 %v3190_v57  ;;  %v9533_v42 = vadd.f32 %v9506_v26, %v2066_v60  ;;  %v9536_v53 = vadd.f32 %v9506_v26, %v6928_v27 }
 0x187   :  { %v7596_v50 = vpop.eup %7595  ;;  %7621 = vrcp.f32 %v3318_v32  ;;  %v3193_v41 = vadd.f32 1.0, %v7594_v51  ;;  %v2430_v4 = vsub.f32 0.0, %v9510_v46  ;;  %v9540_v22 = vadd.f32 %v9506_v26, %v7056_v54  ;;  %v7057_v32 = vpop.f32.mrf.mxu1 }
 0x188   :  { %v7598_v29 = vpop.eup %7597  ;;  %v6386_v44 = vpack.c.bf16 %v3827_v43, %v3826_v3  ;;  %v3321_v10 = vadd.f32 1.0, %v7596_v50  ;;  %7623 = vpow2.f32 %v2984_v61  ;;  %v2558_v6 = vsub.f32 0.0, %v9519_v31  ;;  %v1570_v54 = vpop.f32.mrf.mxu0 }
 0x189   :  { %v7600_v56 = vpop.eup %7599  ;;  %7625 = vrcp.f32 %v3193_v41  ;;  %v3191_v38 = vadd.f32 1.0, %v7598_v29  ;;  %v2433_v60 = vsub.f32 0.0, %v9523_v47  ;;  %v2561_v61 = vsub.f32 0.0, %v9527_v49 }
 0x18a   :  { %v7602_v59 = vpop.eup %7601  ;;  %6694 = vst [vmem:[%s10707_s3 + $0x290] sm:$0xff] %v6386_v44   ;;  %7627 = vrcp.f32 %v3321_v10  ;;  %v3319_v24 = vadd.f32 1.0, %v7600_v56  ;;  %v2431_v20 = vsub.f32 0.0, %v9530_v17  ;;  %v2559_v27 = vsub.f32 0.0, %v9533_v42 }
 0x18b   :  { %v7604_v14 = vpop.eup %7603  ;;  %7629 = vrcp.f32 %v3191_v38  ;;  %v3196_v18 = vadd.f32 1.0, %v7602_v59  ;;  %v2436_v51 = vsub.f32 0.0, %v9536_v53  ;;  %v2564_v50 = vsub.f32 0.0, %v9540_v22 }
 0x18c   :  { %v7606_v36 = vpop.eup %7605  ;;  %7631 = vrcp.f32 %v3319_v24  ;;  %v3324_v0 = vadd.f32 1.0, %v7604_v14  ;;  %v9550_v41 = vadd.f32 %v9506_v26, %v1567_v55  ;;  %v2734_v44 = vmul.f32 1.442695, %v2430_v4 }
 0x18d   :  { %v7608_v28 = vpop.eup %7607  ;;  %7633 = vrcp.f32 %v3196_v18  ;;  %v3194_v48 = vadd.f32 1.0, %v7606_v36  ;;  %v9553_v10 = vadd.f32 %v9506_v26, %v2079_v35  ;;  %v9556_v56 = vadd.f32 %v9506_v26, %v6929_v37  ;;  %v2082_v18 = vpop.f32.mrf.mxu1 }
 0x18e   :  { %v7610_v15 = vpop.eup %7609  ;;  %7635 = vrcp.f32 %v3324_v0  ;;  %v3322_v1 = vadd.f32 1.0, %v7608_v28  ;;  %v2990_v59 = vmul.f32 1.442695, %v2558_v6  ;;  %v2740_v24 = vmul.f32 1.442695, %v2433_v60 }
 0x18f   :  { %v7612_v21 = vpop.eup %7611  ;;  %7637 = vrcp.f32 %v3194_v48  ;;  %v3197_v57 = vadd.f32 1.0, %v7610_v15  ;;  %v2996_v14 = vmul.f32 1.442695, %v2561_v61  ;;  %v2736_v55 = vmul.f32 1.442695, %v2431_v20  ;;  %v6932_v15 = vpop.f32.mrf.mxu0 }
 0x190   :  { %v7614_v52 = vpop.eup %7613  ;;  %7639 = vrcp.f32 %v3322_v1  ;;  %v3325_v11 = vadd.f32 1.0, %v7612_v21  ;;  %v2992_v0 = vmul.f32 1.442695, %v2559_v27  ;;  %v9559_v28 = vadd.f32 %v9506_v26, %v7057_v32  ;;  %v7060_v20 = vpop.f32.mrf.mxu1 }
 0x191   :  { %v7616_v3 = vpop.eup %7615  ;;  %7641 = vrcp.f32 %v3197_v57  ;;  %v3195_v43 = vadd.f32 1.0, %v7614_v52  ;;  %v2746_v35 = vmul.f32 1.442695, %v2436_v51  ;;  %v3002_v4 = vmul.f32 1.442695, %v2564_v50 }
 0x192   :  { %v7618_v29 = vpop.eup %7617  ;;  %7643 = vrcp.f32 %v3325_v11  ;;  %v2434_v37 = vsub.f32 0.0, %v9550_v41  ;;  %v2562_v60 = vsub.f32 0.0, %v9553_v10  ;;  %v3704_v57 = vmul.f32 %v7616_v3, %v9367_v16 }
 0x193   :  { %v7620_v38 = vpop.eup %7619  ;;  %7645 = vrcp.f32 %v3195_v43  ;;  %v3832_v52 = vmul.f32 %v7618_v29, %v9379_v34  ;;  %v2565_v27 = vsub.f32 0.0, %v9559_v28 }
 0x194   :  { %v7622_v36 = vpop.eup %7621  ;;  %7647 = vpow2.f32 %v2738_v13  ;;  %v2437_v13 = vsub.f32 0.0, %v9556_v56  ;;  %v3702_v43 = vmul.f32 %v7620_v38, %v9387_v23  ;;  %v2742_v23 = vmul.f32 1.442695, %v2434_v37  ;;  %v9583_v38 = vpop.f32.mrf.mxu1 }
 0x195   :  { %v7624_v48 = vpop.eup %7623  ;;  %7649 = vpow2.f32 %v9512_v2  ;;  %v9568_v2 = vadd.f32 %v9506_v26, %v1570_v54  ;;  %v3830_v54 = vmul.f32 %v7622_v36, %v9392_v40  ;;  %v9600_v37 = vadd.f32 %v9506_v26, %v6932_v15 }
 0x196   :  { %v7626_v1 = vpop.eup %7625  ;;  %v3323_v6 = vadd.f32 1.0, %v7624_v48  ;;  %7651 = vpow2.f32 %v2734_v44  ;;  %v2748_v36 = vmul.f32 1.442695, %v2437_v13 }
 0x197   :  { %v7628_v21 = vpop.eup %7627  ;;  %v3705_v61 = vmul.f32 %v7626_v1, %v9402_v8  ;;  %7653 = vpow2.f32 %v2990_v59  ;;  %v9575_v8 = vpop.f32.mrf.mxu0 }
 0x198   :  { %v7630_v32 = vpop.eup %7629  ;;  %v3833_v11 = vmul.f32 %v7628_v21, %v9406_v5  ;;  %7655 = vrcp.f32 %v3323_v6 }
 0x199   :  { %v7632_v51 = vpop.eup %7631  ;;  %v6081_v50 = vpack.c.bf16 %v3705_v61, %v3704_v57  ;;  %v3703_v16 = vmul.f32 %v7630_v32, %v9409_v30  ;;  %7657 = vpow2.f32 %v2740_v24  ;;  %v2435_v30 = vsub.f32 0.0, %v9568_v2 }
 0x19a   :  { %v7634_v3 = vpop.eup %7633  ;;  %v6401_v44 = vpack.c.bf16 %v3833_v11, %v3832_v52  ;;  %v3831_v34 = vmul.f32 %v7632_v51, %v9412_v39  ;;  %7659 = vpow2.f32 %v2996_v14  ;;  %v2998_v39 = vmul.f32 1.442695, %v2562_v60  ;;  %v9604_v60 = vpop.f32.mrf.mxu1 }
 0x19b   :  { %v7636_v5 = vpop.eup %7635  ;;  %6633 = vst [vmem:[%s10707_s3 + $0xa8] sm:$0xff] %v6081_v50   ;;  %v6076_v29 = vpack.c.bf16 %v3703_v16, %v3702_v43  ;;  %7661 = vpow2.f32 %v2736_v55  ;;  %v9589_v24 = vadd.f32 %v9506_v26, %v2082_v18  ;;  %v9594_v55 = vpop.f32.mrf.mxu0  ;;  %v3708_v1 = vmul.f32 %v7634_v3, %v9415_v7 }
 0x19c   :  { %v7638_v59 = vpop.eup %7637  ;;  %6697 = vst [vmem:[%s10707_s3 + $0x2a8] sm:$0xff] %v6401_v44   ;;  %v6396_v40 = vpack.c.bf16 %v3831_v34, %v3830_v54  ;;  %7663 = vpow2.f32 %v2992_v0  ;;  %v3004_v0 = vmul.f32 1.442695, %v2565_v27  ;;  %v3836_v21 = vmul.f32 %v7636_v5, %v9418_v25 }
 0x19d   :  { %v7640_v14 = vpop.eup %7639  ;;  %6632 = vst [vmem:[%s10707_s3 + $0xa0] sm:$0xff] %v6076_v29   ;;  %7665 = vpow2.f32 %v2746_v35  ;;  %v2744_v35 = vmul.f32 1.442695, %v2435_v30  ;;  %v3706_v15 = vmul.f32 %v7638_v59, %v9425_v33  ;;  %v9612_v51 = vadd.f32 %v9506_v26, %v7060_v20  ;;  %v2098_v33 = vpop.f32.mrf.mxu1 }
 0x19e   :  { %v7642_v48 = vpop.eup %7641  ;;  %6696 = vst [vmem:[%s10707_s3 + $0x2a0] sm:$0xff] %v6396_v40   ;;  %7667 = vpow2.f32 %v3002_v4  ;;  %v2563_v4 = vsub.f32 0.0, %v9589_v24  ;;  %v2440_v20 = vsub.f32 0.0, %v9600_v37  ;;  %v3834_v5 = vmul.f32 %v7640_v14, %v9430_v63 }
 0x19f   :  { %v7644_v18 = vpop.eup %7643  ;;  %v3709_v6 = vmul.f32 %v7642_v48, %v9433_v62  ;;  %7669 = vpow2.f32 %v2742_v23  ;;  %v1586_v62 = vpop.f32.mrf.mxu0  ;;  %v2568_v23 = vsub.f32 0.0, %v9612_v51  ;;  %v9631_v63 = vadd.f32 %v9506_v26, %v9575_v8 }
 0x1a0   :  { %v7646_v13 = vpop.eup %7645  ;;  %v3837_v57 = vmul.f32 %v7644_v18, %v9436_v58  ;;  %7671 = vpow2.f32 %v2998_v39  ;;  %v3000_v16 = vmul.f32 1.442695, %v2563_v4  ;;  %v7064_v40 = vpop.f32.mrf.mxu1  ;;  %v9649_v4 = vadd.f32 %v9506_v26, %v1586_v62 }
 0x1a1   :  { %v7648_v61 = vpop.eup %7647  ;;  %v6091_v32 = vpack.c.bf16 %v3709_v6, %v3708_v1  ;;  %v3707_v7 = vmul.f32 %v7646_v13, %v9439_v19  ;;  %7673 = vpow2.f32 %v2748_v36  ;;  %v6936_v44 = vpop.f32.mrf.mxu0  ;;  %v3010_v13 = vmul.f32 1.442695, %v2568_v23 }
 0x1a2   :  { %v7650_v52 = vpop.eup %7649  ;;  %v6411_v11 = vpack.c.bf16 %v3837_v57, %v3836_v21  ;;  %v3200_v27 = vadd.f32 1.0, %v7648_v61  ;;  %7675 = vpow2.f32 %v3004_v0  ;;  %v9627_v0 = vmul.f32 1.442695, %v2440_v20  ;;  %v2111_v61 = vpop.f32.mrf.mxu1 }
 0x1a3   :  { %v7652_v25 = vpop.eup %7651  ;;  %6635 = vst [vmem:[%s10707_s3 + $0xb8] sm:$0xff] %v6091_v32   ;;  %v6086_v58 = vpack.c.bf16 %v3707_v7, %v3706_v15  ;;  %v3328_v43 = vadd.f32 1.0, %v7650_v52  ;;  %7677 = vpow2.f32 %v2744_v35  ;;  %v1599_v14 = vpop.f32.mrf.mxu0  ;;  %v9642_v21 = vadd.f32 %v9506_v26, %v9594_v55 }
 0x1a4   :  { %v7654_v50 = vpop.eup %7653  ;;  %6699 = vst [vmem:[%s10707_s3 + $0x2b8] sm:$0xff] %v6411_v11   ;;  %7679 = vrcp.f32 %v3200_v27  ;;  %v3198_v19 = vadd.f32 1.0, %v7652_v25  ;;  %v9652_v7 = vadd.f32 %v9506_v26, %v2098_v33  ;;  %v9655_v55 = vadd.f32 %v9506_v26, %v6936_v44 }
 0x1a5   :  { %v7656_v3 = vpop.eup %7655  ;;  %6634 = vst [vmem:[%s10707_s3 + $0xb0] sm:$0xff] %v6086_v58   ;;  %7681 = vrcp.f32 %v3328_v43  ;;  %v3326_v54 = vadd.f32 1.0, %v7654_v50  ;;  %v2438_v27 = vsub.f32 0.0, %v9631_v63  ;;  %v6937_v25 = vpop.f32.mrf.mxu0  ;;  %v2441_v43 = vsub.f32 0.0, %v9642_v21 }
 0x1a6   :  { %v7658_v34 = vpop.eup %7657  ;;  %v3835_v29 = vmul.f32 %v7656_v3, %v9465_v45  ;;  %7683 = vrcp.f32 %v3198_v19  ;;  %v9635_v45 = vadd.f32 %v9506_v26, %v9583_v38  ;;  %v9646_v38 = vadd.f32 %v9506_v26, %v9604_v60  ;;  %v7065_v3 = vpop.f32.mrf.mxu1 }
 0x1a7   :  { %v7660_v30 = vpop.eup %7659  ;;  %7685 = vrcp.f32 %v3326_v54  ;;  %v3201_v59 = vadd.f32 1.0, %v7658_v34  ;;  %v9661_v50 = vadd.f32 %v9506_v26, %v7064_v40  ;;  %v2439_v20 = vsub.f32 0.0, %v9649_v4  ;;  %v1602_v40 = vpop.f32.mrf.mxu0 }
 0x1a8   :  { %v7662_v39 = vpop.eup %7661  ;;  %v6406_v36 = vpack.c.bf16 %v3835_v29, %v3834_v5  ;;  %v3329_v48 = vadd.f32 1.0, %v7660_v30  ;;  %7687 = vpow2.f32 %v3000_v16  ;;  %v2566_v60 = vsub.f32 0.0, %v9635_v45 }
 0x1a9   :  { %v7664_v18 = vpop.eup %7663  ;;  %7689 = vrcp.f32 %v3201_v59  ;;  %v3199_v1 = vadd.f32 1.0, %v7662_v39  ;;  %v2569_v16 = vsub.f32 0.0, %v9646_v38  ;;  %v2567_v34 = vsub.f32 0.0, %v9652_v7 }
 0x1aa   :  { %v7666_v6 = vpop.eup %7665  ;;  %6698 = vst [vmem:[%s10707_s3 + $0x2b0] sm:$0xff] %v6406_v36   ;;  %7691 = vrcp.f32 %v3329_v48  ;;  %v3327_v35 = vadd.f32 1.0, %v7664_v18  ;;  %v2444_v5 = vsub.f32 0.0, %v9655_v55  ;;  %v9668_v30 = vadd.f32 %v9506_v26, %v1599_v14 }
 0x1ab   :  { %v7668_v57 = vpop.eup %7667  ;;  %7693 = vrcp.f32 %v3199_v1  ;;  %v3204_v8 = vadd.f32 1.0, %v7666_v6  ;;  %v9671_v59 = vadd.f32 %v9506_v26, %v2111_v61  ;;  %v2750_v36 = vmul.f32 1.442695, %v2438_v27 }
 0x1ac   :  { %v7670_v15 = vpop.eup %7669  ;;  %7695 = vrcp.f32 %v3327_v35  ;;  %v3332_v32 = vadd.f32 1.0, %v7668_v57  ;;  %v2572_v48 = vsub.f32 0.0, %v9661_v50  ;;  %v9675_v18 = vadd.f32 %v9506_v26, %v6937_v25 }
 0x1ad   :  { %v7672_v52 = vpop.eup %7671  ;;  %7697 = vrcp.f32 %v3204_v8  ;;  %v3202_v11 = vadd.f32 1.0, %v7670_v15  ;;  %v3006_v6 = vmul.f32 1.442695, %v2566_v60  ;;  %v2756_v35 = vmul.f32 1.442695, %v2441_v43  ;;  %v2114_v8 = vpop.f32.mrf.mxu1 }
 0x1ae   :  { %v7674_v62 = vpop.eup %7673  ;;  %7699 = vrcp.f32 %v3332_v32  ;;  %v3330_v58 = vadd.f32 1.0, %v7672_v52  ;;  %v3012_v57 = vmul.f32 1.442695, %v2569_v16  ;;  %v2752_v61 = vmul.f32 1.442695, %v2439_v20 }
 0x1af   :  { %v7676_v33 = vpop.eup %7675  ;;  %7701 = vrcp.f32 %v3202_v11  ;;  %v3205_v19 = vadd.f32 1.0, %v7674_v62  ;;  %v3008_v15 = vmul.f32 1.442695, %v2567_v34  ;;  %v9679_v32 = vadd.f32 %v9506_v26, %v7065_v3  ;;  %v6940_v62 = vpop.f32.mrf.mxu0 }
 0x1b0   :  { %v7678_v54 = vpop.eup %7677  ;;  %7703 = vrcp.f32 %v3330_v58  ;;  %v3333_v44 = vadd.f32 1.0, %v7676_v33  ;;  %v2762_v11 = vmul.f32 1.442695, %v2444_v5  ;;  %v2442_v27 = vsub.f32 0.0, %v9668_v30  ;;  %v9689_v20 = vpop.f32.mrf.mxu1 }
 0x1b1   :  { %v7680_v29 = vpop.eup %7679  ;;  %7705 = vrcp.f32 %v3205_v19  ;;  %v3203_v23 = vadd.f32 1.0, %v7678_v54  ;;  %v2570_v25 = vsub.f32 0.0, %v9671_v59  ;;  %v3018_v43 = vmul.f32 1.442695, %v2572_v48 }
 0x1b2   :  { %v7682_v39 = vpop.eup %7681  ;;  %7707 = vrcp.f32 %v3333_v44  ;;  %v2445_v33 = vsub.f32 0.0, %v9675_v18  ;;  %v3712_v19 = vmul.f32 %v7680_v29, %v9476_v9  ;;  %v2573_v34 = vsub.f32 0.0, %v9679_v32  ;;  %v9696_v29 = vpop.f32.mrf.mxu0 }
 0x1b3   :  { %v7684_v1 = vpop.eup %7683  ;;  %7709 = vrcp.f32 %v3203_v23  ;;  %v3840_v54 = vmul.f32 %v7682_v39, %v9481_v12 }
 0x1b4   :  { %v7686_v14 = vpop.eup %7685  ;;  %7711 = vpow2.f32 %v9627_v0  ;;  %v3710_v23 = vmul.f32 %v7684_v1, %v9510_v46  ;;  %v2758_v46 = vmul.f32 1.442695, %v2442_v27  ;;  %v9704_v1 = vpop.f32.mrf.mxu1  ;;  %v9721_v27 = vadd.f32 %v9506_v26, %v6940_v62 }
 0x1b5   :  { %v7688_v52 = vpop.eup %7687  ;;  %7713 = vpow2.f32 %v3010_v13  ;;  %v9687_v13 = vadd.f32 %v9506_v26, %v1602_v40 }
 0x1b6   :  { %v7690_v60 = vpop.eup %7689  ;;  %v3331_v58 = vadd.f32 1.0, %v7688_v52  ;;  %7715 = vpow2.f32 %v2750_v36  ;;  %v3838_v36 = vmul.f32 %v7686_v14, %v9519_v31  ;;  %v2764_v14 = vmul.f32 1.442695, %v2445_v33 }
 0x1b7   :  { %v7692_v0 = vpop.eup %7691  ;;  %v3713_v16 = vmul.f32 %v7690_v60, %v9523_v47  ;;  %7717 = vpow2.f32 %v3006_v6 }
 0x1b8   :  { %v7694_v3 = vpop.eup %7693  ;;  %v3841_v44 = vmul.f32 %v7692_v0, %v9527_v49  ;;  %7719 = vrcp.f32 %v3331_v58  ;;  %v7069_v58 = vpop.f32.mrf.mxu1 }
 0x1b9   :  { %v7696_v5 = vpop.eup %7695  ;;  %v6101_v9 = vpack.c.bf16 %v3713_v16, %v3712_v19  ;;  %v3711_v47 = vmul.f32 %v7694_v3, %v9530_v17  ;;  %7721 = vpow2.f32 %v2756_v35  ;;  %v2443_v17 = vsub.f32 0.0, %v9687_v13 }
 0x1ba   :  { %v7698_v40 = vpop.eup %7697  ;;  %v6421_v48 = vpack.c.bf16 %v3841_v44, %v3840_v54  ;;  %v3839_v12 = vmul.f32 %v7696_v5, %v9533_v42  ;;  %7723 = vpow2.f32 %v3012_v57  ;;  %v3014_v42 = vmul.f32 1.442695, %v2570_v25 }
 0x1bb   :  { %v7700_v49 = vpop.eup %7699  ;;  %6637 = vst [vmem:[%s10707_s3 + $0xc8] sm:$0xff] %v6101_v9   ;;  %v6096_v39 = vpack.c.bf16 %v3711_v47, %v3710_v23  ;;  %7725 = vpow2.f32 %v2752_v61  ;;  %v9710_v35 = vadd.f32 %v9506_v26, %v2114_v8  ;;  %v9715_v61 = vpop.f32.mrf.mxu0  ;;  %v3716_v25 = vmul.f32 %v7698_v40, %v9536_v53 }
 0x1bc   :  { %v7702_v6 = vpop.eup %7701  ;;  %6701 = vst [vmem:[%s10707_s3 + $0x2c8] sm:$0xff] %v6421_v48   ;;  %v6416_v31 = vpack.c.bf16 %v3839_v12, %v3838_v36  ;;  %7727 = vpow2.f32 %v3008_v15  ;;  %v3020_v15 = vmul.f32 1.442695, %v2573_v34  ;;  %v3844_v0 = vmul.f32 %v7700_v49, %v9540_v22  ;;  %v2130_v23 = vpop.f32.mrf.mxu1 }
 0x1bd   :  { %v7704_v57 = vpop.eup %7703  ;;  %6636 = vst [vmem:[%s10707_s3 + $0xc0] sm:$0xff] %v6096_v39   ;;  %7729 = vpow2.f32 %v2762_v11  ;;  %v2760_v11 = vmul.f32 1.442695, %v2443_v17  ;;  %v3714_v62 = vmul.f32 %v7702_v6, %v9550_v41  ;;  %v1618_v53 = vpop.f32.mrf.mxu0  ;;  %v2448_v47 = vsub.f32 0.0, %v9721_v27 }
 0x1be   :  { %v7706_v52 = vpop.eup %7705  ;;  %6700 = vst [vmem:[%s10707_s3 + $0x2c0] sm:$0xff] %v6416_v31   ;;  %7731 = vpow2.f32 %v3018_v43  ;;  %v2571_v43 = vsub.f32 0.0, %v9710_v35  ;;  %v9742_v48 = vadd.f32 %v9506_v26, %v9689_v20  ;;  %v9746_v12 = vadd.f32 %v9506_v26, %v9696_v29  ;;  %v7072_v20 = vpop.f32.mrf.mxu1 }
 0x1bf   :  { %v7708_v8 = vpop.eup %7707  ;;  %v3717_v60 = vmul.f32 %v7706_v52, %v9556_v56  ;;  %7733 = vpow2.f32 %v2758_v46  ;;  %v6944_v49 = vpop.f32.mrf.mxu0  ;;  %v3842_v46 = vmul.f32 %v7704_v57, %v9553_v10  ;;  %v9754_v29 = vmul.f32 1.442695, %v2448_v47 }
 0x1c0   :  { %v7710_v33 = vpop.eup %7709  ;;  %v3845_v19 = vmul.f32 %v7708_v8, %v9559_v28  ;;  %7735 = vpow2.f32 %v3014_v42  ;;  %v9752_v42 = vadd.f32 %v9506_v26, %v9704_v1  ;;  %v2446_v57 = vsub.f32 0.0, %v9746_v12 }
 0x1c1   :  { %v7712_v16 = vpop.eup %7711  ;;  %v6111_v3 = vpack.c.bf16 %v3717_v60, %v3716_v25  ;;  %v3715_v54 = vmul.f32 %v7710_v33, %v9568_v2  ;;  %7737 = vpow2.f32 %v2764_v14  ;;  %v3016_v2 = vmul.f32 1.442695, %v2571_v43  ;;  %v1631_v25 = vpop.f32.mrf.mxu0 }
 0x1c2   :  { %v7714_v56 = vpop.eup %7713  ;;  %v6431_v44 = vpack.c.bf16 %v3845_v19, %v3844_v0  ;;  %v3208_v34 = vadd.f32 1.0, %v7712_v16  ;;  %7739 = vpow2.f32 %v3020_v15  ;;  %v9766_v33 = vadd.f32 %v9506_v26, %v7069_v58 }
 0x1c3   :  { %v7716_v5 = vpop.eup %7715  ;;  %6639 = vst [vmem:[%s10707_s3 + $0xd8] sm:$0xff] %v6111_v3   ;;  %v6106_v22 = vpack.c.bf16 %v3715_v54, %v3714_v62  ;;  %v3336_v28 = vadd.f32 1.0, %v7714_v56  ;;  %7741 = vpow2.f32 %v2760_v11  ;;  %v9763_v11 = vadd.f32 %v9506_v26, %v9715_v61  ;;  %v2143_v62 = vpop.f32.mrf.mxu1 }
 0x1c4   :  { %v7718_v9 = vpop.eup %7717  ;;  %6703 = vst [vmem:[%s10707_s3 + $0x2d8] sm:$0xff] %v6431_v44   ;;  %7743 = vrcp.f32 %v3208_v34  ;;  %v3206_v41 = vadd.f32 1.0, %v7716_v5  ;;  %v9769_v43 = vadd.f32 %v9506_v26, %v1618_v53  ;;  %v9772_v16 = vadd.f32 %v9506_v26, %v2130_v23  ;;  %v6945_v53 = vpop.f32.mrf.mxu0 }
 0x1c5   :  { %v7720_v40 = vpop.eup %7719  ;;  %6638 = vst [vmem:[%s10707_s3 + $0xd0] sm:$0xff] %v6106_v22   ;;  %7745 = vrcp.f32 %v3336_v28  ;;  %v3334_v36 = vadd.f32 1.0, %v7718_v9  ;;  %v2574_v56 = vsub.f32 0.0, %v9752_v42  ;;  %v9776_v61 = vadd.f32 %v9506_v26, %v6944_v49 }
 0x1c6   :  { %v7722_v39 = vpop.eup %7721  ;;  %v3843_v17 = vmul.f32 %v7720_v40, %v9589_v24  ;;  %7747 = vrcp.f32 %v3206_v41  ;;  %v2576_v24 = vsub.f32 0.0, %v9742_v48  ;;  %v9779_v5 = vadd.f32 %v9506_v26, %v7072_v20 }
 0x1c7   :  { %v7724_v6 = vpop.eup %7723  ;;  %7749 = vrcp.f32 %v3334_v36  ;;  %v3209_v31 = vadd.f32 1.0, %v7722_v39  ;;  %v2449_v23 = vsub.f32 0.0, %v9763_v11  ;;  %v2577_v9 = vsub.f32 0.0, %v9766_v33  ;;  %v7073_v36 = vpop.f32.mrf.mxu1 }
 0x1c8   :  { %v7726_v14 = vpop.eup %7725  ;;  %v6426_v52 = vpack.c.bf16 %v3843_v17, %v3842_v46  ;;  %v3337_v15 = vadd.f32 1.0, %v7724_v6  ;;  %7751 = vpow2.f32 %v3016_v2  ;;  %v3026_v34 = vmul.f32 1.442695, %v2576_v24 }
 0x1c9   :  { %v7728_v8 = vpop.eup %7727  ;;  %7753 = vrcp.f32 %v3209_v31  ;;  %v3207_v10 = vadd.f32 1.0, %v7726_v14  ;;  %v2447_v47 = vsub.f32 0.0, %v9769_v43  ;;  %v2575_v40 = vsub.f32 0.0, %v9772_v16 }
 0x1ca   :  { %v7730_v60 = vpop.eup %7729  ;;  %6702 = vst [vmem:[%s10707_s3 + $0x2d0] sm:$0xff] %v6426_v52   ;;  %7755 = vrcp.f32 %v3337_v15  ;;  %v3335_v1 = vadd.f32 1.0, %v7728_v8  ;;  %v2452_v46 = vsub.f32 0.0, %v9776_v61  ;;  %v9787_v17 = vadd.f32 %v9506_v26, %v1631_v25  ;;  %v1634_v52 = vpop.f32.mrf.mxu0 }
 0x1cb   :  { %v7732_v0 = vpop.eup %7731  ;;  %7757 = vrcp.f32 %v3207_v10  ;;  %v3212_v19 = vadd.f32 1.0, %v7730_v60  ;;  %v2580_v20 = vsub.f32 0.0, %v9779_v5  ;;  %v9791_v14 = vadd.f32 %v9506_v26, %v2143_v62 }
 0x1cc   :  { %v7734_v3 = vpop.eup %7733  ;;  %7759 = vrcp.f32 %v3335_v1  ;;  %v3340_v54 = vadd.f32 1.0, %v7732_v0  ;;  %v2766_v8 = vmul.f32 1.442695, %v2446_v57  ;;  %v3022_v10 = vmul.f32 1.442695, %v2574_v56 }
 0x1cd   :  { %v7736_v58 = vpop.eup %7735  ;;  %7761 = vrcp.f32 %v3212_v19  ;;  %v3210_v44 = vadd.f32 1.0, %v7734_v3  ;;  %v9794_v24 = vadd.f32 %v9506_v26, %v6945_v53  ;;  %v2772_v25 = vmul.f32 1.442695, %v2449_v23  ;;  %v2146_v19 = vpop.f32.mrf.mxu1 }
 0x1ce   :  { %v7738_v22 = vpop.eup %7737  ;;  %7763 = vrcp.f32 %v3340_v54  ;;  %v3338_v28 = vadd.f32 1.0, %v7736_v58  ;;  %v3028_v1 = vmul.f32 1.442695, %v2577_v9  ;;  %v2768_v0 = vmul.f32 1.442695, %v2447_v47 }
 0x1cf   :  { %v7740_v41 = vpop.eup %7739  ;;  %7765 = vrcp.f32 %v3210_v44  ;;  %v3213_v2 = vadd.f32 1.0, %v7738_v22  ;;  %v3024_v54 = vmul.f32 1.442695, %v2575_v40  ;;  %v2450_v62 = vsub.f32 0.0, %v9787_v17  ;;  %v6948_v22 = vpop.f32.mrf.mxu0 }
 0x1d0   :  { %v7742_v49 = vpop.eup %7741  ;;  %7767 = vrcp.f32 %v3338_v28  ;;  %v3341_v39 = vadd.f32 1.0, %v7740_v41  ;;  %v9799_v58 = vadd.f32 %v9506_v26, %v7073_v36  ;;  %v2778_v56 = vmul.f32 1.442695, %v2452_v46  ;;  %v7076_v40 = vpop.f32.mrf.mxu1 }
 0x1d1   :  { %v7744_v6 = vpop.eup %7743  ;;  %7769 = vrcp.f32 %v3213_v2  ;;  %v3211_v31 = vadd.f32 1.0, %v7742_v49  ;;  %v3034_v44 = vmul.f32 1.442695, %v2580_v20  ;;  %v2578_v53 = vsub.f32 0.0, %v9791_v14 }
 0x1d2   :  { %v7746_v15 = vpop.eup %7745  ;;  %7771 = vrcp.f32 %v3341_v39  ;;  %v2453_v9 = vsub.f32 0.0, %v9794_v24  ;;  %v3720_v2 = vmul.f32 %v7744_v6, %v9600_v37  ;;  %v2581_v46 = vsub.f32 0.0, %v9799_v58 }
 0x1d3   :  { %v7748_v60 = vpop.eup %7747  ;;  %7773 = vrcp.f32 %v3211_v31  ;;  %v3848_v49 = vmul.f32 %v7746_v15, %v9612_v51 }
 0x1d4   :  { %v7750_v3 = vpop.eup %7749  ;;  %7775 = vpow2.f32 %v9754_v29  ;;  %v9804_v29 = vadd.f32 %v9506_v26, %v1634_v52  ;;  %v3718_v20 = vmul.f32 %v7748_v60, %v9631_v63  ;;  %v2774_v63 = vmul.f32 1.442695, %v2450_v62  ;;  %v9824_v60 = vpop.f32.mrf.mxu1 }
 0x1d5   :  { %v7752_v57 = vpop.eup %7751  ;;  %7777 = vpow2.f32 %v3026_v34  ;;  %v9809_v34 = vadd.f32 %v9506_v26, %v2146_v19  ;;  %v3036_v62 = vmul.f32 1.442695, %v2581_v46 }
 0x1d6   :  { %v7754_v28 = vpop.eup %7753  ;;  %v3339_v23 = vadd.f32 1.0, %v7752_v57  ;;  %7779 = vpow2.f32 %v2766_v8  ;;  %v3846_v8 = vmul.f32 %v7750_v3, %v9635_v45 }
 0x1d7   :  { %v7756_v41 = vpop.eup %7755  ;;  %v3721_v47 = vmul.f32 %v7754_v28, %v9642_v21  ;;  %7781 = vpow2.f32 %v3022_v10  ;;  %v9816_v21 = vpop.f32.mrf.mxu0  ;;  %v2579_v57 = vsub.f32 0.0, %v9809_v34 }
 0x1d8   :  { %v7758_v36 = vpop.eup %7757  ;;  %v3849_v39 = vmul.f32 %v7756_v41, %v9646_v38  ;;  %7783 = vrcp.f32 %v3339_v23 }
 0x1d9   :  { %v7760_v31 = vpop.eup %7759  ;;  %v6121_v52 = vpack.c.bf16 %v3721_v47, %v3720_v2  ;;  %v3719_v37 = vmul.f32 %v7758_v36, %v9649_v4  ;;  %7785 = vpow2.f32 %v2772_v25  ;;  %v2451_v4 = vsub.f32 0.0, %v9804_v29  ;;  %v9832_v19 = vpop.f32.mrf.mxu0 }
 0x1da   :  { %v7762_v6 = vpop.eup %7761  ;;  %v6441_v10 = vpack.c.bf16 %v3849_v39, %v3848_v49  ;;  %v3847_v51 = vmul.f32 %v7760_v31, %v9652_v7  ;;  %7787 = vpow2.f32 %v3028_v1  ;;  %v3030_v7 = vmul.f32 1.442695, %v2578_v53 }
 0x1db   :  { %v7764_v38 = vpop.eup %7763  ;;  %6641 = vst [vmem:[%s10707_s3 + $0xe8] sm:$0xff] %v6121_v52   ;;  %v6116_v15 = vpack.c.bf16 %v3719_v37, %v3718_v20  ;;  %7789 = vpow2.f32 %v2768_v0  ;;  %v2780_v0 = vmul.f32 1.442695, %v2453_v9  ;;  %v3724_v53 = vmul.f32 %v7762_v6, %v9655_v55 }
 0x1dc   :  { %v7766_v25 = vpop.eup %7765  ;;  %6705 = vst [vmem:[%s10707_s3 + $0x2e8] sm:$0xff] %v6441_v10   ;;  %v6436_v45 = vpack.c.bf16 %v3847_v51, %v3846_v8  ;;  %7791 = vpow2.f32 %v3024_v54  ;;  %v2776_v23 = vmul.f32 1.442695, %v2451_v4  ;;  %v3852_v41 = vmul.f32 %v7764_v38, %v9661_v50 }
 0x1dd   :  { %v7768_v1 = vpop.eup %7767  ;;  %6640 = vst [vmem:[%s10707_s3 + $0xe0] sm:$0xff] %v6116_v15   ;;  %7793 = vpow2.f32 %v2778_v56  ;;  %v9840_v56 = vpop.f32.mrf.mxu1  ;;  %v3722_v36 = vmul.f32 %v7766_v25, %v9668_v30  ;;  %v9850_v50 = vadd.f32 %v9506_v26, %v7076_v40  ;;  %v3032_v37 = vmul.f32 1.442695, %v2579_v57 }
 0x1de   :  { %v7770_v3 = vpop.eup %7769  ;;  %6704 = vst [vmem:[%s10707_s3 + $0x2e0] sm:$0xff] %v6436_v45   ;;  %7795 = vpow2.f32 %v3034_v44  ;;  %v9845_v44 = vadd.f32 %v9506_v26, %v6948_v22  ;;  %v3850_v51 = vmul.f32 %v7768_v1, %v9671_v59 }
 0x1df   :  { %v7772_v54 = vpop.eup %7771  ;;  %v3725_v28 = vmul.f32 %v7770_v3, %v9675_v18  ;;  %7797 = vpow2.f32 %v2774_v63  ;;  %v1650_v18 = vpop.f32.mrf.mxu0  ;;  %v2584_v15 = vsub.f32 0.0, %v9850_v50  ;;  %v9868_v3 = vld [vmem:[%s10706_s2] ss:$0 sm:$0xff] }
 0x1e0   :  { %v7774_v9 = vpop.eup %7773  ;;  %v3853_v2 = vmul.f32 %v7772_v54, %v9679_v32  ;;  %7799 = vpow2.f32 %v3030_v7  ;;  %v2162_v30 = vpop.f32.mrf.mxu1  ;;  %v2456_v40 = vsub.f32 0.0, %v9845_v44  ;;  %v9872_v59 = vadd.f32 %v9868_v3, %v9816_v21 }
 0x1e1   :  { %v7776_v47 = vpop.eup %7775  ;;  %v6131_v49 = vpack.c.bf16 %v3725_v28, %v3724_v53  ;;  %v3723_v55 = vmul.f32 %v7774_v9, %v9687_v13  ;;  %7801 = vpow2.f32 %v2780_v0  ;;  %v6952_v8 = vpop.f32.mrf.mxu0  ;;  %v9876_v57 = vadd.f32 %v9868_v3, %v9824_v60 }
 0x1e2   :  { %v7778_v39 = vpop.eup %7777  ;;  %v6451_v46 = vpack.c.bf16 %v3853_v2, %v3852_v41  ;;  %v3216_v31 = vadd.f32 1.0, %v7776_v47  ;;  %7803 = vpow2.f32 %v3036_v62  ;;  %v7080_v25 = vpop.f32.mrf.mxu1  ;;  %v2786_v62 = vmul.f32 1.442695, %v2456_v40 }
 0x1e3   :  { %v7780_v32 = vpop.eup %7779  ;;  %6643 = vst [vmem:[%s10707_s3 + $0xf8] sm:$0xff] %v6131_v49   ;;  %v6126_v22 = vpack.c.bf16 %v3723_v55, %v3722_v36  ;;  %v3344_v20 = vadd.f32 1.0, %v7778_v39  ;;  %7805 = vpow2.f32 %v2776_v23  ;;  %v1663_v54 = vpop.f32.mrf.mxu0  ;;  %v3042_v23 = vmul.f32 1.442695, %v2584_v15 }
 0x1e4   :  { %v7782_v52 = vpop.eup %7781  ;;  %6707 = vst [vmem:[%s10707_s3 + $0x2f8] sm:$0xff] %v6451_v46   ;;  %7807 = vrcp.f32 %v3216_v31  ;;  %v3214_v13 = vadd.f32 1.0, %v7780_v32  ;;  %v9883_v21 = vadd.f32 %v9868_v3, %v9832_v19  ;;  %v9887_v60 = vadd.f32 %v9868_v3, %v9840_v56  ;;  %v2175_v47 = vpop.f32.mrf.mxu1 }
 0x1e5   :  { %v7784_v6 = vpop.eup %7783  ;;  %6642 = vst [vmem:[%s10707_s3 + $0xf0] sm:$0xff] %v6126_v22   ;;  %7809 = vrcp.f32 %v3344_v20  ;;  %v3342_v26 = vadd.f32 1.0, %v7782_v52  ;;  %v9890_v2 = vadd.f32 %v9868_v3, %v1650_v18  ;;  %v9893_v55 = vadd.f32 %v9868_v3, %v2162_v30  ;;  %v6953_v18 = vpop.f32.mrf.mxu0 }
 0x1e6   :  { %v7786_v10 = vpop.eup %7785  ;;  %v3851_v38 = vmul.f32 %v7784_v6, %v9710_v35  ;;  %7811 = vrcp.f32 %v3214_v13  ;;  %v9896_v19 = vadd.f32 %v9868_v3, %v6952_v8  ;;  %v2454_v31 = vsub.f32 0.0, %v9872_v59 }
 0x1e7   :  { %v7788_v63 = vpop.eup %7787  ;;  %7813 = vrcp.f32 %v3342_v26  ;;  %v3217_v4 = vadd.f32 1.0, %v7786_v10  ;;  %v9900_v56 = vadd.f32 %v9868_v3, %v7080_v25  ;;  %v2582_v20 = vsub.f32 0.0, %v9876_v57  ;;  %v7081_v26 = vpop.f32.mrf.mxu1 }
 0x1e8   :  { %v7790_v45 = vpop.eup %7789  ;;  %v6446_v7 = vpack.c.bf16 %v3851_v38, %v3850_v51  ;;  %v3345_v0 = vadd.f32 1.0, %v7788_v63  ;;  %7815 = vpow2.f32 %v3032_v37  ;;  %v2457_v30 = vsub.f32 0.0, %v9883_v21  ;;  %v1666_v25 = vpop.f32.mrf.mxu0 }
 0x1e9   :  { %v7792_v35 = vpop.eup %7791  ;;  %7817 = vrcp.f32 %v3217_v4  ;;  %v3215_v1 = vadd.f32 1.0, %v7790_v45  ;;  %v2585_v37 = vsub.f32 0.0, %v9887_v60  ;;  %v2455_v6 = vsub.f32 0.0, %v9890_v2 }
 0x1ea   :  { %v7794_v53 = vpop.eup %7793  ;;  %6706 = vst [vmem:[%s10707_s3 + $0x2f0] sm:$0xff] %v6446_v7   ;;  %7819 = vrcp.f32 %v3345_v0  ;;  %v3343_v28 = vadd.f32 1.0, %v7792_v35  ;;  %v2583_v10 = vsub.f32 0.0, %v9893_v55  ;;  %v2460_v51 = vsub.f32 0.0, %v9896_v19 }
 0x1eb   :  { %v7796_v9 = vpop.eup %7795  ;;  %7821 = vrcp.f32 %v3215_v1  ;;  %v3220_v41 = vadd.f32 1.0, %v7794_v53  ;;  %v2588_v63 = vsub.f32 0.0, %v9900_v56  ;;  %v9910_v4 = vadd.f32 %v9868_v3, %v1663_v54 }
 0x1ec   :  { %v7798_v36 = vpop.eup %7797  ;;  %7823 = vrcp.f32 %v3343_v28  ;;  %v3348_v49 = vadd.f32 1.0, %v7796_v9  ;;  %v2782_v7 = vmul.f32 1.442695, %v2454_v31  ;;  %v9913_v0 = vadd.f32 %v9868_v3, %v2175_v47 }
 0x1ed   :  { %v7800_v39 = vpop.eup %7799  ;;  %7825 = vrcp.f32 %v3220_v41  ;;  %v3218_v46 = vadd.f32 1.0, %v7798_v36  ;;  %v9916_v35 = vadd.f32 %v9868_v3, %v6953_v18  ;;  %v3038_v53 = vmul.f32 1.442695, %v2582_v20  ;;  %v2178_v41 = vpop.f32.mrf.mxu1 }
 0x1ee   :  { %v7802_v32 = vpop.eup %7801  ;;  %7827 = vrcp.f32 %v3348_v49  ;;  %v3346_v22 = vadd.f32 1.0, %v7800_v39  ;;  %v2788_v28 = vmul.f32 1.442695, %v2457_v30  ;;  %v3044_v9 = vmul.f32 1.442695, %v2585_v37 }
 0x1ef   :  { %v7804_v52 = vpop.eup %7803  ;;  %7829 = vrcp.f32 %v3218_v46  ;;  %v3221_v13 = vadd.f32 1.0, %v7802_v32  ;;  %v2784_v54 = vmul.f32 1.442695, %v2455_v6  ;;  %v3040_v49 = vmul.f32 1.442695, %v2583_v10  ;;  %v6956_v32 = vpop.f32.mrf.mxu0 }
 0x1f0   :  { %v7806_v40 = vpop.eup %7805  ;;  %7831 = vrcp.f32 %v3346_v22  ;;  %v3349_v8 = vadd.f32 1.0, %v7804_v52  ;;  %v9919_v39 = vadd.f32 %v9868_v3, %v7081_v26  ;;  %v2794_v47 = vmul.f32 1.442695, %v2460_v51  ;;  %v7084_v6 = vpop.f32.mrf.mxu1 }
 0x1f1   :  { %v7808_v38 = vpop.eup %7807  ;;  %7833 = vrcp.f32 %v3221_v13  ;;  %v3219_v15 = vadd.f32 1.0, %v7806_v40  ;;  %v3050_v31 = vmul.f32 1.442695, %v2588_v63  ;;  %v2458_v18 = vsub.f32 0.0, %v9910_v4 }
 0x1f2   :  { %v7810_v45 = vpop.eup %7809  ;;  %7835 = vrcp.f32 %v3349_v8  ;;  %v2586_v20 = vsub.f32 0.0, %v9913_v0  ;;  %v2461_v30 = vsub.f32 0.0, %v9916_v35  ;;  %v3728_v13 = vmul.f32 %v7808_v38, %v9721_v27 }
 0x1f3   :  { %v7812_v1 = vpop.eup %7811  ;;  %7837 = vrcp.f32 %v3219_v15  ;;  %v3856_v40 = vmul.f32 %v7810_v45, %v9742_v48  ;;  %v2589_v10 = vsub.f32 0.0, %v9919_v39 }
 0x1f4   :  { %v7814_v36 = vpop.eup %7813  ;;  %7839 = vpow2.f32 %v2786_v62  ;;  %v3726_v15 = vmul.f32 %v7812_v1, %v9746_v12  ;;  %v2790_v12 = vmul.f32 1.442695, %v2458_v18  ;;  %v9942_v1 = vpop.f32.mrf.mxu1  ;;  %v9959_v18 = vadd.f32 %v9868_v3, %v6956_v32 }
 0x1f5   :  { %v7816_v46 = vpop.eup %7815  ;;  %7841 = vpow2.f32 %v3042_v23  ;;  %v9927_v23 = vadd.f32 %v9868_v3, %v1666_v25  ;;  %v3854_v25 = vmul.f32 %v7814_v36, %v9752_v42  ;;  %v2796_v36 = vmul.f32 1.442695, %v2461_v30 }
 0x1f6   :  { %v7818_v22 = vpop.eup %7817  ;;  %v3347_v52 = vadd.f32 1.0, %v7816_v46  ;;  %7843 = vpow2.f32 %v2782_v7  ;;  %v7085_v30 = vpop.f32.mrf.mxu1 }
 0x1f7   :  { %v7820_v62 = vpop.eup %7819  ;;  %v3729_v37 = vmul.f32 %v7818_v22, %v9763_v11  ;;  %7845 = vpow2.f32 %v3038_v53  ;;  %v9934_v11 = vpop.f32.mrf.mxu0 }
 0x1f8   :  { %v7822_v26 = vpop.eup %7821  ;;  %v3857_v8 = vmul.f32 %v7820_v62, %v9766_v33  ;;  %7847 = vrcp.f32 %v3347_v52 }
 0x1f9   :  { %v7824_v51 = vpop.eup %7823  ;;  %v6141_v63 = vpack.c.bf16 %v3729_v37, %v3728_v13  ;;  %v3727_v27 = vmul.f32 %v7822_v26, %v9769_v43  ;;  %7849 = vpow2.f32 %v2788_v28  ;;  %v2459_v43 = vsub.f32 0.0, %v9927_v23 }
 0x1fa   :  { %v7826_v38 = vpop.eup %7825  ;;  %v6461_v7 = vpack.c.bf16 %v3857_v8, %v3856_v40  ;;  %v3855_v48 = vmul.f32 %v7824_v51, %v9772_v16  ;;  %7851 = vpow2.f32 %v3044_v9  ;;  %v3046_v16 = vmul.f32 1.442695, %v2586_v20 }
 0x1fb   :  { %v7828_v33 = vpop.eup %7827  ;;  %6645 = vst [vmem:[%s10707_s3 + $0x108] sm:$0xff] %v6141_v63   ;;  %v6136_v45 = vpack.c.bf16 %v3727_v27, %v3726_v15  ;;  %7853 = vpow2.f32 %v2784_v54  ;;  %v9948_v28 = vadd.f32 %v9868_v3, %v2178_v41  ;;  %v9953_v54 = vpop.f32.mrf.mxu0  ;;  %v9962_v41 = vadd.f32 %v9868_v3, %v7084_v6 }
 0x1fc   :  { %v7830_v53 = vpop.eup %7829  ;;  %6709 = vst [vmem:[%s10707_s3 + $0x308] sm:$0xff] %v6461_v7   ;;  %v6456_v42 = vpack.c.bf16 %v3855_v48, %v3854_v25  ;;  %7855 = vpow2.f32 %v3040_v49  ;;  %v3052_v49 = vmul.f32 1.442695, %v2589_v10  ;;  %v3732_v52 = vmul.f32 %v7826_v38, %v9776_v61  ;;  %v2194_v15 = vpop.f32.mrf.mxu1 }
 0x1fd   :  { %v7832_v9 = vpop.eup %7831  ;;  %6644 = vst [vmem:[%s10707_s3 + $0x100] sm:$0xff] %v6136_v45   ;;  %7857 = vpow2.f32 %v2794_v47  ;;  %v2792_v20 = vmul.f32 1.442695, %v2459_v43  ;;  %v3860_v13 = vmul.f32 %v7828_v33, %v9779_v5  ;;  %v2587_v32 = vsub.f32 0.0, %v9948_v28  ;;  %v1682_v61 = vpop.f32.mrf.mxu0 }
 0x1fe   :  { %v7834_v46 = vpop.eup %7833  ;;  %6708 = vst [vmem:[%s10707_s3 + $0x300] sm:$0xff] %v6456_v42   ;;  %7859 = vpow2.f32 %v3050_v31  ;;  %v3730_v6 = vmul.f32 %v7830_v53, %v9787_v17  ;;  %v2464_v25 = vsub.f32 0.0, %v9959_v18  ;;  %v2592_v7 = vsub.f32 0.0, %v9962_v41  ;;  %v7088_v42 = vpop.f32.mrf.mxu1 }
 0x1ff   :  { %v7836_v22 = vpop.eup %7835  ;;  %v3733_v47 = vmul.f32 %v7834_v46, %v9794_v24  ;;  %7861 = vpow2.f32 %v2790_v12  ;;  %v6960_v48 = vpop.f32.mrf.mxu0  ;;  %v3858_v45 = vmul.f32 %v7832_v9, %v9791_v14 }
 0x200   :  { %v7838_v62 = vpop.eup %7837  ;;  %v3861_v31 = vmul.f32 %v7836_v22, %v9799_v58  ;;  %7863 = vpow2.f32 %v3046_v16  ;;  %v9988_v14 = vmul.f32 1.442695, %v2592_v7 }
 0x201   :  { %v7840_v37 = vpop.eup %7839  ;;  %v6151_v26 = vpack.c.bf16 %v3733_v47, %v3732_v52  ;;  %v3731_v40 = vmul.f32 %v7838_v62, %v9804_v29  ;;  %7865 = vpow2.f32 %v2796_v36  ;;  %v3048_v29 = vmul.f32 1.442695, %v2587_v32 }
 0x202   :  { %v7842_v24 = vpop.eup %7841  ;;  %v6471_v8 = vpack.c.bf16 %v3861_v31, %v3860_v13  ;;  %v3224_v10 = vadd.f32 1.0, %v7840_v37  ;;  %7867 = vpow2.f32 %v3052_v49  ;;  %v9986_v49 = vadd.f32 %v9868_v3, %v9934_v11 }
 0x203   :  { %v7844_v51 = vpop.eup %7843  ;;  %6647 = vst [vmem:[%s10707_s3 + $0x118] sm:$0xff] %v6151_v26   ;;  %v6146_v5 = vpack.c.bf16 %v3731_v40, %v3730_v6  ;;  %v3352_v58 = vadd.f32 1.0, %v7842_v24  ;;  %7869 = vpow2.f32 %v2792_v20  ;;  %v2802_v47 = vmul.f32 1.442695, %v2464_v25  ;;  %v2207_v6 = vpop.f32.mrf.mxu1 }
 0x204   :  { %v7846_v63 = vpop.eup %7845  ;;  %6711 = vst [vmem:[%s10707_s3 + $0x318] sm:$0xff] %v6471_v8   ;;  %7871 = vrcp.f32 %v3224_v10  ;;  %v3222_v17 = vadd.f32 1.0, %v7844_v51  ;;  %v9995_v62 = vadd.f32 %v9868_v3, %v9942_v1  ;;  %v9999_v11 = vadd.f32 %v9868_v3, %v9953_v54 }
 0x205   :  { %v7848_v27 = vpop.eup %7847  ;;  %6646 = vst [vmem:[%s10707_s3 + $0x110] sm:$0xff] %v6146_v5   ;;  %7873 = vrcp.f32 %v3352_v58  ;;  %v3350_v38 = vadd.f32 1.0, %v7846_v63  ;;  %v10002_v32 = vadd.f32 %v9868_v3, %v7085_v30  ;;  %v10005_v37 = vadd.f32 %v9868_v3, %v1682_v61 }
 0x206   :  { %v7850_v33 = vpop.eup %7849  ;;  %v3859_v12 = vmul.f32 %v7848_v27, %v9809_v34  ;;  %7875 = vrcp.f32 %v3222_v17  ;;  %v1695_v34 = vpop.f32.mrf.mxu0  ;;  %v10008_v1 = vadd.f32 %v9868_v3, %v2194_v15  ;;  %v10011_v24 = vadd.f32 %v9868_v3, %v6960_v48 }
 0x207   :  { %v7852_v43 = vpop.eup %7851  ;;  %7877 = vrcp.f32 %v3350_v38  ;;  %v3225_v53 = vadd.f32 1.0, %v7850_v33  ;;  %v2462_v10 = vsub.f32 0.0, %v9986_v49  ;;  %v10015_v30 = vadd.f32 %v9868_v3, %v7088_v42  ;;  %v7089_v38 = vpop.f32.mrf.mxu1 }
 0x208   :  { %v7854_v16 = vpop.eup %7853  ;;  %v6466_v36 = vpack.c.bf16 %v3859_v12, %v3858_v45  ;;  %v3353_v46 = vadd.f32 1.0, %v7852_v43  ;;  %7879 = vpow2.f32 %v3048_v29  ;;  %v6961_v61 = vpop.f32.mrf.mxu0  ;;  %v2590_v58 = vsub.f32 0.0, %v9995_v62 }
 0x209   :  { %v7856_v22 = vpop.eup %7855  ;;  %7881 = vrcp.f32 %v3225_v53  ;;  %v3223_v52 = vadd.f32 1.0, %v7854_v16  ;;  %v2465_v15 = vsub.f32 0.0, %v9999_v11  ;;  %v2593_v29 = vsub.f32 0.0, %v10002_v32 }
 0x20a   :  { %v7858_v9 = vpop.eup %7857  ;;  %6710 = vst [vmem:[%s10707_s3 + $0x310] sm:$0xff] %v6466_v36   ;;  %7883 = vrcp.f32 %v3353_v46  ;;  %v3351_v20 = vadd.f32 1.0, %v7856_v22  ;;  %v2463_v27 = vsub.f32 0.0, %v10005_v37  ;;  %v2591_v48 = vsub.f32 0.0, %v10008_v1  ;;  %v1698_v42 = vpop.f32.mrf.mxu0 }
 0x20b   :  { %v7860_v13 = vpop.eup %7859  ;;  %7885 = vrcp.f32 %v3223_v52  ;;  %v3228_v31 = vadd.f32 1.0, %v7858_v9  ;;  %v2468_v33 = vsub.f32 0.0, %v10011_v24  ;;  %v2596_v43 = vsub.f32 0.0, %v10015_v30 }
 0x20c   :  { %v7862_v26 = vpop.eup %7861  ;;  %7887 = vrcp.f32 %v3351_v20  ;;  %v3356_v40 = vadd.f32 1.0, %v7860_v13  ;;  %v10025_v53 = vadd.f32 %v9868_v3, %v1695_v34  ;;  %v2798_v36 = vmul.f32 1.442695, %v2462_v10 }
 0x20d   :  { %v7864_v54 = vpop.eup %7863  ;;  %7889 = vrcp.f32 %v3228_v31  ;;  %v3226_v8 = vadd.f32 1.0, %v7862_v26  ;;  %v10028_v46 = vadd.f32 %v9868_v3, %v2207_v6  ;;  %v10031_v22 = vadd.f32 %v9868_v3, %v6961_v61  ;;  %v2210_v31 = vpop.f32.mrf.mxu1 }
 0x20e   :  { %v7866_v51 = vpop.eup %7865  ;;  %7891 = vrcp.f32 %v3356_v40  ;;  %v3354_v5 = vadd.f32 1.0, %v7864_v54  ;;  %v3054_v9 = vmul.f32 1.442695, %v2590_v58  ;;  %v2804_v20 = vmul.f32 1.442695, %v2465_v15 }
 0x20f   :  { %v7868_v63 = vpop.eup %7867  ;;  %7893 = vrcp.f32 %v3226_v8  ;;  %v3229_v17 = vadd.f32 1.0, %v7866_v51  ;;  %v3060_v13 = vmul.f32 1.442695, %v2593_v29  ;;  %v2800_v34 = vmul.f32 1.442695, %v2463_v27  ;;  %v6964_v51 = vpop.f32.mrf.mxu0 }
 0x210   :  { %v7870_v25 = vpop.eup %7869  ;;  %7895 = vrcp.f32 %v3354_v5  ;;  %v3357_v7 = vadd.f32 1.0, %v7868_v63  ;;  %v3056_v40 = vmul.f32 1.442695, %v2591_v48  ;;  %v10034_v54 = vadd.f32 %v9868_v3, %v7089_v38  ;;  %v10045_v27 = vpop.f32.mrf.mxu1 }
 0x211   :  { %v7872_v45 = vpop.eup %7871  ;;  %7897 = vrcp.f32 %v3229_v17  ;;  %v3227_v12 = vadd.f32 1.0, %v7870_v25  ;;  %v2810_v6 = vmul.f32 1.442695, %v2468_v33  ;;  %v3066_v10 = vmul.f32 1.442695, %v2596_v43 }
 0x212   :  { %v7874_v16 = vpop.eup %7873  ;;  %7899 = vrcp.f32 %v3357_v7  ;;  %v2466_v61 = vsub.f32 0.0, %v10025_v53  ;;  %v2594_v15 = vsub.f32 0.0, %v10028_v46  ;;  %v3736_v17 = vmul.f32 %v7872_v45, %v9845_v44  ;;  %v10052_v45 = vpop.f32.mrf.mxu0 }
 0x213   :  { %v7876_v52 = vpop.eup %7875  ;;  %7901 = vrcp.f32 %v3227_v12  ;;  %v3864_v25 = vmul.f32 %v7874_v16, %v9850_v50  ;;  %v2597_v48 = vsub.f32 0.0, %v10034_v54 }
 0x214   :  { %v7878_v26 = vpop.eup %7877  ;;  %7903 = vpow2.f32 %v2802_v47  ;;  %v2469_v47 = vsub.f32 0.0, %v10031_v22  ;;  %v3734_v12 = vmul.f32 %v7876_v52, %v9872_v59  ;;  %v2806_v59 = vmul.f32 1.442695, %v2466_v61  ;;  %v10060_v52 = vpop.f32.mrf.mxu1 }
 0x215   :  { %v7880_v8 = vpop.eup %7879  ;;  %7905 = vpow2.f32 %v9988_v14  ;;  %v10043_v14 = vadd.f32 %v9868_v3, %v1698_v42  ;;  %v3862_v42 = vmul.f32 %v7878_v26, %v9876_v57  ;;  %v10077_v61 = vadd.f32 %v9868_v3, %v6964_v51 }
 0x216   :  { %v7882_v5 = vpop.eup %7881  ;;  %v3355_v58 = vadd.f32 1.0, %v7880_v8  ;;  %7907 = vpow2.f32 %v2798_v36  ;;  %v2812_v26 = vmul.f32 1.442695, %v2469_v47 }
 0x217   :  { %v7884_v63 = vpop.eup %7883  ;;  %v3737_v29 = vmul.f32 %v7882_v5, %v9883_v21  ;;  %7909 = vpow2.f32 %v3054_v9 }
 0x218   :  { %v7886_v38 = vpop.eup %7885  ;;  %v3865_v7 = vmul.f32 %v7884_v63, %v9887_v60  ;;  %7911 = vrcp.f32 %v3355_v58 }
 0x219   :  { %v7888_v33 = vpop.eup %7887  ;;  %v6161_v44 = vpack.c.bf16 %v3737_v29, %v3736_v17  ;;  %v3735_v21 = vmul.f32 %v7886_v38, %v9890_v2  ;;  %7913 = vpow2.f32 %v2804_v20  ;;  %v2467_v2 = vsub.f32 0.0, %v10043_v14 }
 0x21a   :  { %v7890_v43 = vpop.eup %7889  ;;  %v6481_v36 = vpack.c.bf16 %v3865_v7, %v3864_v25  ;;  %v3863_v50 = vmul.f32 %v7888_v33, %v9893_v55  ;;  %7915 = vpow2.f32 %v3060_v13  ;;  %v3062_v55 = vmul.f32 1.442695, %v2594_v15  ;;  %v7093_v15 = vpop.f32.mrf.mxu1 }
 0x21b   :  { %v7892_v60 = vpop.eup %7891  ;;  %6649 = vst [vmem:[%s10707_s3 + $0x128] sm:$0xff] %v6161_v44   ;;  %v6156_v16 = vpack.c.bf16 %v3735_v21, %v3734_v12  ;;  %7917 = vpow2.f32 %v2800_v34  ;;  %v10066_v20 = vadd.f32 %v9868_v3, %v2210_v31  ;;  %v10071_v34 = vpop.f32.mrf.mxu0  ;;  %v3740_v5 = vmul.f32 %v7890_v43, %v9896_v19 }
 0x21c   :  { %v7894_v9 = vpop.eup %7893  ;;  %6713 = vst [vmem:[%s10707_s3 + $0x328] sm:$0xff] %v6481_v36   ;;  %v6476_v57 = vpack.c.bf16 %v3863_v50, %v3862_v42  ;;  %7919 = vpow2.f32 %v3056_v40  ;;  %v3068_v40 = vmul.f32 1.442695, %v2597_v48  ;;  %v3868_v63 = vmul.f32 %v7892_v60, %v9900_v56 }
 0x21d   :  { %v7896_v13 = vpop.eup %7895  ;;  %6648 = vst [vmem:[%s10707_s3 + $0x120] sm:$0xff] %v6156_v16   ;;  %7921 = vpow2.f32 %v2810_v6  ;;  %v2808_v6 = vmul.f32 1.442695, %v2467_v2  ;;  %v3738_v51 = vmul.f32 %v7894_v9, %v9910_v4  ;;  %v1714_v19 = vpop.f32.mrf.mxu0  ;;  %v2472_v12 = vsub.f32 0.0, %v10077_v61 }
 0x21e   :  { %v7898_v8 = vpop.eup %7897  ;;  %6712 = vst [vmem:[%s10707_s3 + $0x320] sm:$0xff] %v6476_v57   ;;  %7923 = vpow2.f32 %v3066_v10  ;;  %v2595_v10 = vsub.f32 0.0, %v10066_v20  ;;  %v2226_v4 = vpop.f32.mrf.mxu1  ;;  %v10098_v36 = vadd.f32 %v9868_v3, %v10045_v27  ;;  %v3866_v16 = vmul.f32 %v7896_v13, %v9913_v0 }
 0x21f   :  { %v7900_v31 = vpop.eup %7899  ;;  %v3741_v58 = vmul.f32 %v7898_v8, %v9916_v35  ;;  %7925 = vpow2.f32 %v2806_v59  ;;  %v6968_v50 = vpop.f32.mrf.mxu0  ;;  %v10104_v2 = vadd.f32 %v9868_v3, %v10052_v45  ;;  %v10110_v0 = vadd.f32 %v9868_v3, %v10060_v52 }
 0x220   :  { %v7902_v47 = vpop.eup %7901  ;;  %v3869_v17 = vmul.f32 %v7900_v31, %v9919_v39  ;;  %7927 = vpow2.f32 %v3062_v55  ;;  %v3064_v21 = vmul.f32 1.442695, %v2595_v10  ;;  %v10106_v55 = vmul.f32 1.442695, %v2472_v12 }
 0x221   :  { %v7904_v29 = vpop.eup %7903  ;;  %v6171_v38 = vpack.c.bf16 %v3741_v58, %v3740_v5  ;;  %v3739_v25 = vmul.f32 %v7902_v47, %v9927_v23  ;;  %7929 = vpow2.f32 %v2812_v26  ;;  %v7096_v26 = vpop.f32.mrf.mxu1  ;;  %v2600_v45 = vsub.f32 0.0, %v10098_v36 }
 0x222   :  { %v7906_v35 = vpop.eup %7905  ;;  %v6491_v7 = vpack.c.bf16 %v3869_v17, %v3868_v63  ;;  %v3232_v48 = vadd.f32 1.0, %v7904_v29  ;;  %7931 = vpow2.f32 %v3068_v40  ;;  %v10115_v31 = vadd.f32 %v9868_v3, %v10071_v34  ;;  %v1727_v5 = vpop.f32.mrf.mxu0 }
 0x223   :  { %v7908_v33 = vpop.eup %7907  ;;  %6651 = vst [vmem:[%s10707_s3 + $0x138] sm:$0xff] %v6171_v38   ;;  %v6166_v56 = vpack.c.bf16 %v3739_v25, %v3738_v51  ;;  %v3360_v39 = vadd.f32 1.0, %v7906_v35  ;;  %7933 = vpow2.f32 %v2808_v6  ;;  %v2470_v52 = vsub.f32 0.0, %v10104_v2  ;;  %v2239_v29 = vpop.f32.mrf.mxu1 }
 0x224   :  { %v7910_v44 = vpop.eup %7909  ;;  %6715 = vst [vmem:[%s10707_s3 + $0x338] sm:$0xff] %v6491_v7   ;;  %7935 = vrcp.f32 %v3232_v48  ;;  %v3230_v23 = vadd.f32 1.0, %v7908_v33  ;;  %v10122_v47 = vadd.f32 %v9868_v3, %v7093_v15  ;;  %v10125_v10 = vadd.f32 %v9868_v3, %v1714_v19  ;;  %v6969_v33 = vpop.f32.mrf.mxu0 }
 0x225   :  { %v7912_v43 = vpop.eup %7911  ;;  %6650 = vst [vmem:[%s10707_s3 + $0x130] sm:$0xff] %v6166_v56   ;;  %7937 = vrcp.f32 %v3360_v39  ;;  %v3358_v42 = vadd.f32 1.0, %v7910_v44  ;;  %v10128_v34 = vadd.f32 %v9868_v3, %v2226_v4  ;;  %v2598_v25 = vsub.f32 0.0, %v10110_v0 }
 0x226   :  { %v7914_v60 = vpop.eup %7913  ;;  %v3867_v59 = vmul.f32 %v7912_v43, %v9948_v28  ;;  %7939 = vrcp.f32 %v3230_v23  ;;  %v10132_v35 = vadd.f32 %v9868_v3, %v6968_v50  ;;  %v2473_v48 = vsub.f32 0.0, %v10115_v31 }
 0x227   :  { %v7916_v9 = vpop.eup %7915  ;;  %7941 = vrcp.f32 %v3358_v42  ;;  %v3233_v57 = vadd.f32 1.0, %v7914_v60  ;;  %v10136_v19 = vadd.f32 %v9868_v3, %v7096_v26  ;;  %v3074_v12 = vmul.f32 1.442695, %v2600_v45  ;;  %v7097_v42 = vpop.f32.mrf.mxu1 }
 0x228   :  { %v7918_v8 = vpop.eup %7917  ;;  %v6486_v27 = vpack.c.bf16 %v3867_v59, %v3866_v16  ;;  %v3361_v40 = vadd.f32 1.0, %v7916_v9  ;;  %7943 = vpow2.f32 %v3064_v21  ;;  %v2601_v4 = vsub.f32 0.0, %v10122_v47 }
 0x229   :  { %v7920_v28 = vpop.eup %7919  ;;  %7945 = vrcp.f32 %v3233_v57  ;;  %v3231_v13 = vadd.f32 1.0, %v7918_v8  ;;  %v2471_v21 = vsub.f32 0.0, %v10125_v10  ;;  %v2599_v43 = vsub.f32 0.0, %v10128_v34 }
 0x22a   :  { %v7922_v58 = vpop.eup %7921  ;;  %6714 = vst [vmem:[%s10707_s3 + $0x330] sm:$0xff] %v6486_v27   ;;  %7947 = vrcp.f32 %v3361_v40  ;;  %v3359_v6 = vadd.f32 1.0, %v7920_v28  ;;  %v2476_v16 = vsub.f32 0.0, %v10132_v35  ;;  %v10143_v59 = vadd.f32 %v9868_v3, %v1727_v5  ;;  %v1730_v27 = vpop.f32.mrf.mxu0 }
 0x22b   :  { %v7924_v63 = vpop.eup %7923  ;;  %7949 = vrcp.f32 %v3231_v13  ;;  %v3236_v17 = vadd.f32 1.0, %v7922_v58  ;;  %v2604_v26 = vsub.f32 0.0, %v10136_v19  ;;  %v10147_v8 = vadd.f32 %v9868_v3, %v2239_v29 }
 0x22c   :  { %v7926_v51 = vpop.eup %7925  ;;  %7951 = vrcp.f32 %v3359_v6  ;;  %v3364_v38 = vadd.f32 1.0, %v7924_v63  ;;  %v2814_v28 = vmul.f32 1.442695, %v2470_v52  ;;  %v3070_v13 = vmul.f32 1.442695, %v2598_v25 }
 0x22d   :  { %v7928_v15 = vpop.eup %7927  ;;  %7953 = vrcp.f32 %v3236_v17  ;;  %v3234_v7 = vadd.f32 1.0, %v7926_v51  ;;  %v2820_v45 = vmul.f32 1.442695, %v2473_v48  ;;  %v3076_v6 = vmul.f32 1.442695, %v2601_v4  ;;  %v2242_v17 = vpop.f32.mrf.mxu1 }
 0x22e   :  { %v7930_v56 = vpop.eup %7929  ;;  %7955 = vrcp.f32 %v3364_v38  ;;  %v3362_v39 = vadd.f32 1.0, %v7928_v15  ;;  %v2816_v63 = vmul.f32 1.442695, %v2471_v21  ;;  %v10150_v5 = vadd.f32 %v9868_v3, %v6969_v33 }
 0x22f   :  { %v7932_v44 = vpop.eup %7931  ;;  %7957 = vrcp.f32 %v3234_v7  ;;  %v3237_v23 = vadd.f32 1.0, %v7930_v56  ;;  %v3072_v38 = vmul.f32 1.442695, %v2599_v43  ;;  %v2826_v29 = vmul.f32 1.442695, %v2476_v16  ;;  %v6972_v56 = vpop.f32.mrf.mxu0 }
 0x230   :  { %v7934_v50 = vpop.eup %7933  ;;  %7959 = vrcp.f32 %v3362_v39  ;;  %v3365_v60 = vadd.f32 1.0, %v7932_v44  ;;  %v10154_v15 = vadd.f32 %v9868_v3, %v7097_v42  ;;  %v3082_v52 = vmul.f32 1.442695, %v2604_v26  ;;  %v10170_v16 = vpop.f32.mrf.mxu1 }
 0x231   :  { %v7936_v9 = vpop.eup %7935  ;;  %7961 = vrcp.f32 %v3237_v23  ;;  %v3235_v57 = vadd.f32 1.0, %v7934_v50  ;;  %v2474_v25 = vsub.f32 0.0, %v10143_v59  ;;  %v2602_v48 = vsub.f32 0.0, %v10147_v8 }
 0x232   :  { %v7938_v40 = vpop.eup %7937  ;;  %7963 = vrcp.f32 %v3365_v60  ;;  %v10159_v4 = vadd.f32 %v9868_v3, %v1730_v27  ;;  %v3744_v23 = vmul.f32 %v7936_v9, %v9959_v18  ;;  %v2477_v21 = vsub.f32 0.0, %v10150_v5 }
 0x233   :  { %v7940_v58 = vpop.eup %7939  ;;  %7965 = vrcp.f32 %v3235_v57  ;;  %v3872_v42 = vmul.f32 %v7938_v40, %v9962_v41  ;;  %v2605_v60 = vsub.f32 0.0, %v10154_v15 }
 0x234   :  { %v7942_v51 = vpop.eup %7941  ;;  %7967 = vpow2.f32 %v10106_v55  ;;  %v10162_v55 = vadd.f32 %v9868_v3, %v2242_v17  ;;  %v3742_v26 = vmul.f32 %v7940_v58, %v9986_v49  ;;  %v2822_v49 = vmul.f32 1.442695, %v2474_v25 }
 0x235   :  { %v7944_v7 = vpop.eup %7943  ;;  %7969 = vpow2.f32 %v3074_v12  ;;  %v3078_v58 = vmul.f32 1.442695, %v2602_v48  ;;  %v2828_v17 = vmul.f32 1.442695, %v2477_v21 }
 0x236   :  { %v7946_v39 = vpop.eup %7945  ;;  %v3363_v33 = vadd.f32 1.0, %v7944_v7  ;;  %7971 = vpow2.f32 %v2814_v28  ;;  %v3870_v28 = vmul.f32 %v7942_v51, %v9995_v62  ;;  %v3084_v7 = vmul.f32 1.442695, %v2605_v60 }
 0x237   :  { %v7948_v44 = vpop.eup %7947  ;;  %v3745_v12 = vmul.f32 %v7946_v39, %v9999_v11  ;;  %7973 = vpow2.f32 %v3070_v13  ;;  %v10174_v11 = vpop.f32.mrf.mxu0 }
 0x238   :  { %v7950_v43 = vpop.eup %7949  ;;  %v3873_v50 = vmul.f32 %v7948_v44, %v10002_v32  ;;  %7975 = vrcp.f32 %v3363_v33 }
 0x239   :  { %v7952_v57 = vpop.eup %7951  ;;  %v6181_v27 = vpack.c.bf16 %v3745_v12, %v3744_v23  ;;  %v3743_v18 = vmul.f32 %v7950_v43, %v10005_v37  ;;  %7977 = vpow2.f32 %v2820_v45  ;;  %v2475_v37 = vsub.f32 0.0, %v10159_v4 }
 0x23a   :  { %v7954_v9 = vpop.eup %7953  ;;  %v6501_v41 = vpack.c.bf16 %v3873_v50, %v3872_v42  ;;  %v3871_v32 = vmul.f32 %v7952_v57, %v10008_v1  ;;  %7979 = vpow2.f32 %v3076_v6  ;;  %v2255_v1 = vpop.f32.mrf.mxu1  ;;  %v10199_v12 = vadd.f32 %v9868_v3, %v6972_v56 }
 0x23b   :  { %v7956_v40 = vpop.eup %7955  ;;  %6653 = vst [vmem:[%s10707_s3 + $0x148] sm:$0xff] %v6181_v27   ;;  %v6176_v13 = vpack.c.bf16 %v3743_v18, %v3742_v26  ;;  %7981 = vpow2.f32 %v2816_v63  ;;  %v10188_v63 = vpop.f32.mrf.mxu0  ;;  %v3748_v48 = vmul.f32 %v7954_v9, %v10011_v24  ;;  %v2824_v33 = vmul.f32 1.442695, %v2475_v37 }
 0x23c   :  { %v7958_v45 = vpop.eup %7957  ;;  %6717 = vst [vmem:[%s10707_s3 + $0x348] sm:$0xff] %v6501_v41   ;;  %v6496_v62 = vpack.c.bf16 %v3871_v32, %v3870_v28  ;;  %7983 = vpow2.f32 %v3072_v38  ;;  %v2603_v38 = vsub.f32 0.0, %v10162_v55  ;;  %v3876_v44 = vmul.f32 %v7956_v40, %v10015_v30  ;;  %v10220_v32 = vld [vmem:[%s10706_s2] ss:$0 sm:$0xff] }
 0x23d   :  { %v7960_v6 = vpop.eup %7959  ;;  %6652 = vst [vmem:[%s10707_s3 + $0x140] sm:$0xff] %v6176_v13   ;;  %7985 = vpow2.f32 %v2826_v29  ;;  %v3746_v43 = vmul.f32 %v7958_v45, %v10025_v53  ;;  %v10211_v27 = vadd.f32 %v9868_v3, %v10170_v16  ;;  %v2480_v41 = vsub.f32 0.0, %v10199_v12 }
 0x23e   :  { %v7962_v51 = vpop.eup %7961  ;;  %6716 = vst [vmem:[%s10707_s3 + $0x340] sm:$0xff] %v6496_v62   ;;  %7987 = vpow2.f32 %v3082_v52  ;;  %v7101_v52 = vpop.f32.mrf.mxu1  ;;  %v10224_v40 = vadd.f32 %v10220_v32, %v10174_v11  ;;  %v3874_v13 = vmul.f32 %v7960_v6, %v10028_v46  ;;  %v10229_v37 = vadd.f32 %v10220_v32, %v2255_v1 }
 0x23f   :  { %v7964_v25 = vpop.eup %7963  ;;  %v3749_v39 = vmul.f32 %v7962_v51, %v10031_v22  ;;  %7989 = vpow2.f32 %v2822_v49  ;;  %v1746_v22 = vpop.f32.mrf.mxu0  ;;  %v2608_v11 = vsub.f32 0.0, %v10211_v27  ;;  %v2834_v46 = vmul.f32 1.442695, %v2480_v41 }
 0x240   :  { %v7966_v29 = vpop.eup %7965  ;;  %v3877_v23 = vmul.f32 %v7964_v25, %v10034_v54  ;;  %7991 = vpow2.f32 %v3078_v58  ;;  %v2258_v18 = vpop.f32.mrf.mxu1 }
 0x241   :  { %v7968_v21 = vpop.eup %7967  ;;  %v6191_v42 = vpack.c.bf16 %v3749_v39, %v3748_v48  ;;  %v3747_v24 = vmul.f32 %v7966_v29, %v10043_v14  ;;  %7993 = vpow2.f32 %v2828_v17  ;;  %v3080_v14 = vmul.f32 1.442695, %v2603_v38  ;;  %v6976_v3 = vpop.f32.mrf.mxu0 }
 0x242   :  { %v7970_v50 = vpop.eup %7969  ;;  %v6511_v60 = vpack.c.bf16 %v3877_v23, %v3876_v44  ;;  %v3240_v57 = vadd.f32 1.0, %v7968_v21  ;;  %7995 = vpow2.f32 %v3084_v7  ;;  %v7104_v7 = vpop.f32.mrf.mxu1  ;;  %v2606_v39 = vsub.f32 0.0, %v10229_v37 }
 0x243   :  { %v7972_v30 = vpop.eup %7971  ;;  %6655 = vst [vmem:[%s10707_s3 + $0x158] sm:$0xff] %v6191_v42   ;;  %v6186_v54 = vpack.c.bf16 %v3747_v24, %v3746_v43  ;;  %v3368_v56 = vadd.f32 1.0, %v7970_v50  ;;  %7997 = vpow2.f32 %v2824_v33  ;;  %v1759_v6 = vpop.f32.mrf.mxu0  ;;  %v10239_v33 = vadd.f32 %v10220_v32, %v10188_v63 }
 0x244   :  { %v7974_v26 = vpop.eup %7973  ;;  %6719 = vst [vmem:[%s10707_s3 + $0x358] sm:$0xff] %v6511_v60   ;;  %7999 = vrcp.f32 %v3240_v57  ;;  %v3238_v53 = vadd.f32 1.0, %v7972_v30  ;;  %v10242_v23 = vadd.f32 %v10220_v32, %v7101_v52  ;;  %v10245_v21 = vadd.f32 %v10220_v32, %v1746_v22  ;;  %v2271_v60 = vpop.f32.mrf.mxu1 }
 0x245   :  { %v7976_v9 = vpop.eup %7975  ;;  %6654 = vst [vmem:[%s10707_s3 + $0x150] sm:$0xff] %v6186_v54   ;;  %8001 = vrcp.f32 %v3368_v56  ;;  %v3366_v28 = vadd.f32 1.0, %v7974_v26  ;;  %v3090_v24 = vmul.f32 1.442695, %v2608_v11  ;;  %v10248_v50 = vadd.f32 %v10220_v32, %v2258_v18  ;;  %v6977_v54 = vpop.f32.mrf.mxu0 }
 0x246   :  { %v7978_v16 = vpop.eup %7977  ;;  %v3875_v49 = vmul.f32 %v7976_v9, %v10066_v20  ;;  %8003 = vrcp.f32 %v3238_v53  ;;  %v2478_v20 = vsub.f32 0.0, %v10224_v40  ;;  %v10251_v30 = vadd.f32 %v10220_v32, %v6976_v3 }
 0x247   :  { %v7980_v45 = vpop.eup %7979  ;;  %8005 = vrcp.f32 %v3366_v28  ;;  %v3241_v62 = vadd.f32 1.0, %v7978_v16  ;;  %v10254_v52 = vadd.f32 %v10220_v32, %v7104_v7  ;;  %v2481_v53 = vsub.f32 0.0, %v10239_v33 }
 0x248   :  { %v7982_v58 = vpop.eup %7981  ;;  %v6506_v17 = vpack.c.bf16 %v3875_v49, %v3874_v13  ;;  %v3369_v51 = vadd.f32 1.0, %v7980_v45  ;;  %8007 = vpow2.f32 %v3080_v14  ;;  %v2830_v26 = vmul.f32 1.442695, %v2478_v20  ;;  %v7105_v49 = vpop.f32.mrf.mxu1 }
 0x249   :  { %v7984_v38 = vpop.eup %7983  ;;  %8009 = vrcp.f32 %v3241_v62  ;;  %v3239_v25 = vadd.f32 1.0, %v7982_v58  ;;  %v2609_v9 = vsub.f32 0.0, %v10242_v23  ;;  %v2479_v28 = vsub.f32 0.0, %v10245_v21 }
 0x24a   :  { %v7986_v48 = vpop.eup %7985  ;;  %6718 = vst [vmem:[%s10707_s3 + $0x350] sm:$0xff] %v6506_v17   ;;  %8011 = vrcp.f32 %v3369_v51  ;;  %v3367_v1 = vadd.f32 1.0, %v7984_v38  ;;  %v2607_v16 = vsub.f32 0.0, %v10248_v50  ;;  %v10261_v13 = vadd.f32 %v10220_v32, %v1759_v6  ;;  %v1762_v51 = vpop.f32.mrf.mxu0 }
 0x24b   :  { %v7988_v29 = vpop.eup %7987  ;;  %8013 = vrcp.f32 %v3239_v25  ;;  %v3244_v44 = vadd.f32 1.0, %v7986_v48  ;;  %v2484_v58 = vsub.f32 0.0, %v10251_v30  ;;  %v2612_v17 = vsub.f32 0.0, %v10254_v52 }
 0x24c   :  { %v7990_v43 = vpop.eup %7989  ;;  %8015 = vrcp.f32 %v3367_v1  ;;  %v3372_v42 = vadd.f32 1.0, %v7988_v29  ;;  %v3086_v7 = vmul.f32 1.442695, %v2606_v39  ;;  %v10266_v38 = vadd.f32 %v10220_v32, %v2271_v60 }
 0x24d   :  { %v7992_v57 = vpop.eup %7991  ;;  %8017 = vrcp.f32 %v3244_v44  ;;  %v3242_v63 = vadd.f32 1.0, %v7990_v43  ;;  %v10269_v25 = vadd.f32 %v10220_v32, %v6977_v54  ;;  %v2836_v6 = vmul.f32 1.442695, %v2481_v53  ;;  %v2274_v54 = vpop.f32.mrf.mxu1 }
 0x24e   :  { %v7994_v22 = vpop.eup %7993  ;;  %8019 = vrcp.f32 %v3372_v42  ;;  %v3370_v56 = vadd.f32 1.0, %v7992_v57  ;;  %v3092_v48 = vmul.f32 1.442695, %v2609_v9  ;;  %v10272_v1 = vadd.f32 %v10220_v32, %v7105_v49 }
 0x24f   :  { %v7996_v14 = vpop.eup %7995  ;;  %8021 = vrcp.f32 %v3242_v63  ;;  %v3245_v18 = vadd.f32 1.0, %v7994_v22  ;;  %v2832_v44 = vmul.f32 1.442695, %v2479_v28  ;;  %v3088_v43 = vmul.f32 1.442695, %v2607_v16  ;;  %v6980_v28 = vpop.f32.mrf.mxu0 }
 0x250   :  { %v7998_v41 = vpop.eup %7997  ;;  %8023 = vrcp.f32 %v3370_v56  ;;  %v3373_v3 = vadd.f32 1.0, %v7996_v14  ;;  %v10275_v42 = vadd.f32 %v10220_v32, %v1762_v51  ;;  %v2842_v60 = vmul.f32 1.442695, %v2484_v58 }
 0x251   :  { %v8000_v45 = vpop.eup %7999  ;;  %8025 = vrcp.f32 %v3245_v18  ;;  %v3243_v62 = vadd.f32 1.0, %v7998_v41  ;;  %v3098_v57 = vmul.f32 1.442695, %v2612_v17  ;;  %v2482_v63 = vsub.f32 0.0, %v10261_v13 }
 0x252   :  { %v8002_v11 = vpop.eup %8001  ;;  %8027 = vrcp.f32 %v3373_v3  ;;  %v2610_v53 = vsub.f32 0.0, %v10266_v38  ;;  %v2485_v14 = vsub.f32 0.0, %v10269_v25  ;;  %v3752_v18 = vmul.f32 %v8000_v45, %v10077_v61 }
 0x253   :  { %v8004_v20 = vpop.eup %8003  ;;  %8029 = vrcp.f32 %v3243_v62  ;;  %v3880_v3 = vmul.f32 %v8002_v11, %v10098_v36  ;;  %v10293_v11 = vpop.f32.mrf.mxu0 }
 0x254   :  { %v8006_v29 = vpop.eup %8005  ;;  %8031 = vpow2.f32 %v2834_v46  ;;  %v3750_v62 = vmul.f32 %v8004_v20, %v10104_v2  ;;  %v2838_v2 = vmul.f32 1.442695, %v2482_v63  ;;  %v3094_v20 = vmul.f32 1.442695, %v2610_v53 }
 0x255   :  { %v8008_v39 = vpop.eup %8007  ;;  %8033 = vpow2.f32 %v3090_v24  ;;  %v2613_v24 = vsub.f32 0.0, %v10272_v1  ;;  %v3878_v17 = vmul.f32 %v8006_v29, %v10110_v0  ;;  %v10310_v63 = vadd.f32 %v10220_v32, %v6980_v28  ;;  %v6981_v53 = vpop.f32.mrf.mxu0 }
 0x256   :  { %v8010_v22 = vpop.eup %8009  ;;  %v3371_v56 = vadd.f32 1.0, %v8008_v39  ;;  %8035 = vpow2.f32 %v2830_v26  ;;  %v2483_v26 = vsub.f32 0.0, %v10275_v42 }
 0x257   :  { %v8012_v46 = vpop.eup %8011  ;;  %v3753_v9 = vmul.f32 %v8010_v22, %v10115_v31  ;;  %8037 = vpow2.f32 %v3086_v7  ;;  %v7108_v31 = vpop.f32.mrf.mxu1 }
 0x258   :  { %v8014_v41 = vpop.eup %8013  ;;  %v3881_v16 = vmul.f32 %v8012_v46, %v10122_v47  ;;  %8039 = vrcp.f32 %v3371_v56  ;;  %v2840_v39 = vmul.f32 1.442695, %v2483_v26 }
 0x259   :  { %v8016_v49 = vpop.eup %8015  ;;  %v6201_v58 = vpack.c.bf16 %v3753_v9, %v3752_v18  ;;  %v3751_v61 = vmul.f32 %v8014_v41, %v10125_v10  ;;  %8041 = vpow2.f32 %v2836_v6  ;;  %v10304_v29 = vpop.f32.mrf.mxu1 }
 0x25a   :  { %v8018_v45 = vpop.eup %8017  ;;  %v6521_v51 = vpack.c.bf16 %v3881_v16, %v3880_v3  ;;  %v3879_v7 = vmul.f32 %v8016_v49, %v10128_v34  ;;  %8043 = vpow2.f32 %v3092_v48  ;;  %v10299_v34 = vadd.f32 %v10220_v32, %v2274_v54  ;;  %v1778_v49 = vpop.f32.mrf.mxu0 }
 0x25b   :  { %v8020_v36 = vpop.eup %8019  ;;  %6657 = vst [vmem:[%s10707_s3 + $0x168] sm:$0xff] %v6201_v58   ;;  %v6196_v47 = vpack.c.bf16 %v3751_v61, %v3750_v62  ;;  %8045 = vpow2.f32 %v2832_v44  ;;  %v2844_v48 = vmul.f32 1.442695, %v2485_v14  ;;  %v3756_v22 = vmul.f32 %v8018_v45, %v10132_v35 }
 0x25c   :  { %v8022_v10 = vpop.eup %8021  ;;  %6721 = vst [vmem:[%s10707_s3 + $0x368] sm:$0xff] %v6521_v51   ;;  %v6516_v0 = vpack.c.bf16 %v3879_v7, %v3878_v17  ;;  %8047 = vpow2.f32 %v3088_v43  ;;  %v3100_v43 = vmul.f32 1.442695, %v2613_v24  ;;  %v3884_v46 = vmul.f32 %v8020_v36, %v10136_v19 }
 0x25d   :  { %v8024_v6 = vpop.eup %8023  ;;  %6656 = vst [vmem:[%s10707_s3 + $0x160] sm:$0xff] %v6196_v47   ;;  %8049 = vpow2.f32 %v2842_v60  ;;  %v10315_v60 = vadd.f32 %v10220_v32, %v7108_v31  ;;  %v2611_v18 = vsub.f32 0.0, %v10299_v34  ;;  %v3754_v24 = vmul.f32 %v8022_v10, %v10143_v59  ;;  %v6984_v10 = vpop.f32.mrf.mxu0 }
 0x25e   :  { %v8026_v44 = vpop.eup %8025  ;;  %6720 = vst [vmem:[%s10707_s3 + $0x360] sm:$0xff] %v6516_v0   ;;  %8051 = vpow2.f32 %v3098_v57  ;;  %v2488_v31 = vsub.f32 0.0, %v10310_v63  ;;  %v3882_v7 = vmul.f32 %v8024_v6, %v10147_v8 }
 0x25f   :  { %v8028_v54 = vpop.eup %8027  ;;  %v3757_v56 = vmul.f32 %v8026_v44, %v10150_v5  ;;  %8053 = vpow2.f32 %v2838_v2  ;;  %v7109_v5 = vpop.f32.mrf.mxu1  ;;  %v2616_v45 = vsub.f32 0.0, %v10315_v60  ;;  %v10337_v44 = vadd.f32 %v10220_v32, %v10293_v11 }
 0x260   :  { %v8030_v14 = vpop.eup %8029  ;;  %v3885_v57 = vmul.f32 %v8028_v54, %v10154_v15  ;;  %8055 = vpow2.f32 %v3094_v20  ;;  %v2850_v54 = vmul.f32 1.442695, %v2488_v31  ;;  %v10349_v11 = vadd.f32 %v10220_v32, %v6981_v53 }
 0x261   :  { %v8032_v9 = vpop.eup %8031  ;;  %v6211_v28 = vpack.c.bf16 %v3757_v56, %v3756_v22  ;;  %v3755_v35 = vmul.f32 %v8030_v14, %v10159_v4  ;;  %8057 = vpow2.f32 %v2844_v48  ;;  %v3096_v4 = vmul.f32 1.442695, %v2611_v18  ;;  %v2290_v17 = vpop.f32.mrf.mxu1 }
 0x262   :  { %v8034_v41 = vpop.eup %8033  ;;  %v6531_v3 = vpack.c.bf16 %v3885_v57, %v3884_v46  ;;  %v3248_v16 = vadd.f32 1.0, %v8032_v9  ;;  %8059 = vpow2.f32 %v3100_v43  ;;  %v10339_v8 = vmul.f32 1.442695, %v2616_v45  ;;  %v1791_v9 = vpop.f32.mrf.mxu0 }
 0x263   :  { %v8036_v26 = vpop.eup %8035  ;;  %6659 = vst [vmem:[%s10707_s3 + $0x178] sm:$0xff] %v6211_v28   ;;  %v6206_v19 = vpack.c.bf16 %v3755_v35, %v3754_v24  ;;  %v3376_v15 = vadd.f32 1.0, %v8034_v41  ;;  %8061 = vpow2.f32 %v2840_v39  ;;  %v10346_v56 = vadd.f32 %v10220_v32, %v10304_v29 }
 0x264   :  { %v8038_v62 = vpop.eup %8037  ;;  %6723 = vst [vmem:[%s10707_s3 + $0x378] sm:$0xff] %v6531_v3   ;;  %8063 = vrcp.f32 %v3248_v16  ;;  %v3246_v59 = vadd.f32 1.0, %v8036_v26  ;;  %v10352_v57 = vadd.f32 %v10220_v32, %v7109_v5  ;;  %v10355_v18 = vadd.f32 %v10220_v32, %v1778_v49 }
 0x265   :  { %v8040_v58 = vpop.eup %8039  ;;  %6658 = vst [vmem:[%s10707_s3 + $0x170] sm:$0xff] %v6206_v19   ;;  %8065 = vrcp.f32 %v3376_v15  ;;  %v3374_v61 = vadd.f32 1.0, %v8038_v62  ;;  %v10358_v35 = vadd.f32 %v10220_v32, %v2290_v17  ;;  %v10361_v29 = vadd.f32 %v10220_v32, %v6984_v10 }
 0x266   :  { %v8042_v51 = vpop.eup %8041  ;;  %v3883_v36 = vmul.f32 %v8040_v58, %v10162_v55  ;;  %8067 = vrcp.f32 %v3246_v59  ;;  %v7112_v55 = vpop.f32.mrf.mxu1  ;;  %v2486_v3 = vsub.f32 0.0, %v10337_v44  ;;  %v2614_v15 = vsub.f32 0.0, %v10346_v56 }
 0x267   :  { %v8044_v47 = vpop.eup %8043  ;;  %8069 = vrcp.f32 %v3374_v61  ;;  %v3249_v2 = vadd.f32 1.0, %v8042_v51  ;;  %v10365_v5 = vadd.f32 %v10220_v32, %v7112_v55  ;;  %v2489_v49 = vsub.f32 0.0, %v10349_v11  ;;  %v6985_v61 = vpop.f32.mrf.mxu0 }
 0x268   :  { %v8046_v0 = vpop.eup %8045  ;;  %v6526_v20 = vpack.c.bf16 %v3883_v36, %v3882_v7  ;;  %v3377_v48 = vadd.f32 1.0, %v8044_v47  ;;  %8071 = vpow2.f32 %v3096_v4  ;;  %v2303_v16 = vpop.f32.mrf.mxu1  ;;  %v2617_v4 = vsub.f32 0.0, %v10352_v57 }
 0x269   :  { %v8048_v43 = vpop.eup %8047  ;;  %8073 = vrcp.f32 %v3249_v2  ;;  %v3247_v39 = vadd.f32 1.0, %v8046_v0  ;;  %v2487_v58 = vsub.f32 0.0, %v10355_v18  ;;  %v2615_v17 = vsub.f32 0.0, %v10358_v35 }
 0x26a   :  { %v8050_v6 = vpop.eup %8049  ;;  %6722 = vst [vmem:[%s10707_s3 + $0x370] sm:$0xff] %v6526_v20   ;;  %8075 = vrcp.f32 %v3377_v48  ;;  %v3375_v22 = vadd.f32 1.0, %v8048_v43  ;;  %v2492_v51 = vsub.f32 0.0, %v10361_v29  ;;  %v2620_v47 = vsub.f32 0.0, %v10365_v5  ;;  %v7113_v10 = vpop.f32.mrf.mxu1 }
 0x26b   :  { %v8052_v14 = vpop.eup %8051  ;;  %8077 = vrcp.f32 %v3247_v39  ;;  %v3252_v46 = vadd.f32 1.0, %v8050_v6  ;;  %v10375_v2 = vadd.f32 %v10220_v32, %v1791_v9  ;;  %v2846_v20 = vmul.f32 1.442695, %v2486_v3 }
 0x26c   :  { %v8054_v24 = vpop.eup %8053  ;;  %8079 = vrcp.f32 %v3375_v22  ;;  %v3380_v28 = vadd.f32 1.0, %v8052_v14  ;;  %v10378_v48 = vadd.f32 %v10220_v32, %v2303_v16  ;;  %v10381_v43 = vadd.f32 %v10220_v32, %v6985_v61  ;;  %v1794_v14 = vpop.f32.mrf.mxu0 }
 0x26d   :  { %v8056_v53 = vpop.eup %8055  ;;  %8081 = vrcp.f32 %v3252_v46  ;;  %v3250_v41 = vadd.f32 1.0, %v8054_v24  ;;  %v3102_v55 = vmul.f32 1.442695, %v2614_v15  ;;  %v2852_v6 = vmul.f32 1.442695, %v2489_v49 }
 0x26e   :  { %v8058_v26 = vpop.eup %8057  ;;  %8083 = vrcp.f32 %v3380_v28  ;;  %v3378_v19 = vadd.f32 1.0, %v8056_v53  ;;  %v3108_v22 = vmul.f32 1.442695, %v2617_v4  ;;  %v2848_v9 = vmul.f32 1.442695, %v2487_v58  ;;  %v6988_v58 = vpop.f32.mrf.mxu0 }
 0x26f   :  { %v8060_v62 = vpop.eup %8059  ;;  %8085 = vrcp.f32 %v3250_v41  ;;  %v3253_v59 = vadd.f32 1.0, %v8058_v26  ;;  %v3104_v24 = vmul.f32 1.442695, %v2615_v17  ;;  %v10384_v28 = vadd.f32 %v10220_v32, %v7113_v10  ;;  %v2306_v26 = vpop.f32.mrf.mxu1 }
 0x270   :  { %v8062_v31 = vpop.eup %8061  ;;  %8087 = vrcp.f32 %v3378_v19  ;;  %v3381_v45 = vadd.f32 1.0, %v8060_v62  ;;  %v2858_v41 = vmul.f32 1.442695, %v2492_v51  ;;  %v3114_v3 = vmul.f32 1.442695, %v2620_v47 }
 0x271   :  { %v8064_v7 = vpop.eup %8063  ;;  %8089 = vrcp.f32 %v3253_v59  ;;  %v3251_v36 = vadd.f32 1.0, %v8062_v31  ;;  %v2490_v16 = vsub.f32 0.0, %v10375_v2  ;;  %v2618_v49 = vsub.f32 0.0, %v10378_v48 }
 0x272   :  { %v8066_v0 = vpop.eup %8065  ;;  %8091 = vrcp.f32 %v3381_v45  ;;  %v3760_v59 = vmul.f32 %v8064_v7, %v10199_v12  ;;  %v2621_v17 = vsub.f32 0.0, %v10384_v28 }
 0x273   :  { %v8068_v39 = vpop.eup %8067  ;;  %8093 = vrcp.f32 %v3251_v36  ;;  %v3888_v31 = vmul.f32 %v8066_v0, %v10211_v27 }
 0x274   :  { %v8070_v46 = vpop.eup %8069  ;;  %8095 = vpow2.f32 %v2850_v54  ;;  %v2493_v54 = vsub.f32 0.0, %v10381_v43  ;;  %v3758_v36 = vmul.f32 %v8068_v39, %v10224_v40  ;;  %v2854_v40 = vmul.f32 1.442695, %v2490_v16 }
 0x275   :  { %v8072_v53 = vpop.eup %8071  ;;  %8097 = vpow2.f32 %v10339_v8  ;;  %v10393_v8 = vadd.f32 %v10220_v32, %v1794_v14  ;;  %v3886_v10 = vmul.f32 %v8070_v46, %v10229_v37 }
 0x276   :  { %v8074_v19 = vpop.eup %8073  ;;  %v3379_v15 = vadd.f32 1.0, %v8072_v53  ;;  %8099 = vpow2.f32 %v2846_v20  ;;  %v2860_v14 = vmul.f32 1.442695, %v2493_v54  ;;  %v10423_v53 = vadd.f32 %v10220_v32, %v6988_v58 }
 0x277   :  { %v8076_v62 = vpop.eup %8075  ;;  %v3761_v4 = vmul.f32 %v8074_v19, %v10239_v33  ;;  %8101 = vpow2.f32 %v3102_v55  ;;  %v7116_v33 = vpop.f32.mrf.mxu1  ;;  %v2491_v0 = vsub.f32 0.0, %v10393_v8 }
 0x278   :  { %v8078_v61 = vpop.eup %8077  ;;  %v3889_v45 = vmul.f32 %v8076_v62, %v10242_v23  ;;  %8103 = vrcp.f32 %v3379_v15 }
 0x279   :  { %v8080_v51 = vpop.eup %8079  ;;  %v6221_v47 = vpack.c.bf16 %v3761_v4, %v3760_v59  ;;  %v3759_v12 = vmul.f32 %v8078_v61, %v10245_v21  ;;  %8105 = vpow2.f32 %v2852_v6  ;;  %v10406_v21 = vpop.f32.mrf.mxu0  ;;  %v10412_v6 = vadd.f32 %v10220_v32, %v2306_v26 }
 0x27a   :  { %v8082_v7 = vpop.eup %8081  ;;  %v6541_v20 = vpack.c.bf16 %v3889_v45, %v3888_v31  ;;  %v3887_v55 = vmul.f32 %v8080_v51, %v10248_v50  ;;  %8107 = vpow2.f32 %v3108_v22  ;;  %v3110_v50 = vmul.f32 1.442695, %v2618_v49  ;;  %v10417_v46 = vpop.f32.mrf.mxu1 }
 0x27b   :  { %v8084_v27 = vpop.eup %8083  ;;  %6661 = vst [vmem:[%s10707_s3 + $0x188] sm:$0xff] %v6221_v47   ;;  %v6216_v23 = vpack.c.bf16 %v3759_v12, %v3758_v36  ;;  %8109 = vpow2.f32 %v2848_v9  ;;  %v3764_v26 = vmul.f32 %v8082_v7, %v10251_v30  ;;  %v6989_v15 = vpop.f32.mrf.mxu0  ;;  %v2496_v12 = vsub.f32 0.0, %v10423_v53 }
 0x27c   :  { %v8086_v39 = vpop.eup %8085  ;;  %6725 = vst [vmem:[%s10707_s3 + $0x388] sm:$0xff] %v6541_v20   ;;  %v6536_v37 = vpack.c.bf16 %v3887_v55, %v3886_v10  ;;  %8111 = vpow2.f32 %v3104_v24  ;;  %v3116_v24 = vmul.f32 1.442695, %v2621_v17  ;;  %v3892_v54 = vmul.f32 %v8084_v27, %v10254_v52  ;;  %v7117_v30 = vpop.f32.mrf.mxu1 }
 0x27d   :  { %v8088_v22 = vpop.eup %8087  ;;  %6660 = vst [vmem:[%s10707_s3 + $0x180] sm:$0xff] %v6216_v23   ;;  %8113 = vpow2.f32 %v2858_v41  ;;  %v2856_v41 = vmul.f32 1.442695, %v2491_v0  ;;  %v3762_v4 = vmul.f32 %v8086_v39, %v10261_v13  ;;  %v10433_v17 = vadd.f32 %v10220_v32, %v7116_v33  ;;  %v1810_v13 = vpop.f32.mrf.mxu0 }
 0x27e   :  { %v8090_v9 = vpop.eup %8089  ;;  %6724 = vst [vmem:[%s10707_s3 + $0x380] sm:$0xff] %v6536_v37   ;;  %8115 = vpow2.f32 %v3114_v3  ;;  %v2619_v3 = vsub.f32 0.0, %v10412_v6  ;;  %v2322_v10 = vpop.f32.mrf.mxu1  ;;  %v3890_v55 = vmul.f32 %v8088_v22, %v10266_v38  ;;  %v10452_v38 = vadd.f32 %v10220_v32, %v10406_v21 }
 0x27f   :  { %v8092_v16 = vpop.eup %8091  ;;  %v3765_v19 = vmul.f32 %v8090_v9, %v10269_v25  ;;  %8117 = vpow2.f32 %v2854_v40  ;;  %v2624_v23 = vsub.f32 0.0, %v10433_v17  ;;  %v6992_v39 = vpop.f32.mrf.mxu0  ;;  %v10448_v9 = vmul.f32 1.442695, %v2496_v12 }
 0x280   :  { %v8094_v49 = vpop.eup %8093  ;;  %v3893_v62 = vmul.f32 %v8092_v16, %v10272_v1  ;;  %8119 = vpow2.f32 %v3110_v50  ;;  %v3112_v47 = vmul.f32 1.442695, %v2619_v3  ;;  %v7120_v22 = vpop.f32.mrf.mxu1 }
 0x281   :  { %v8096_v59 = vpop.eup %8095  ;;  %v6231_v58 = vpack.c.bf16 %v3765_v19, %v3764_v26  ;;  %v3763_v61 = vmul.f32 %v8094_v49, %v10275_v42  ;;  %8121 = vpow2.f32 %v2860_v14  ;;  %v10462_v49 = vadd.f32 %v10220_v32, %v6989_v15  ;;  %v1823_v3 = vpop.f32.mrf.mxu0 }
 0x282   :  { %v8098_v25 = vpop.eup %8097  ;;  %v6551_v31 = vpack.c.bf16 %v3893_v62, %v3892_v54  ;;  %v3256_v45 = vadd.f32 1.0, %v8096_v59  ;;  %8123 = vpow2.f32 %v3116_v24  ;;  %v10465_v62 = vadd.f32 %v10220_v32, %v7117_v30 }
 0x283   :  { %v8100_v52 = vpop.eup %8099  ;;  %6663 = vst [vmem:[%s10707_s3 + $0x198] sm:$0xff] %v6231_v58   ;;  %v6226_v1 = vpack.c.bf16 %v3763_v61, %v3762_v4  ;;  %v3384_v51 = vadd.f32 1.0, %v8098_v25  ;;  %8125 = vpow2.f32 %v2856_v41  ;;  %v3122_v41 = vmul.f32 1.442695, %v2624_v23 }
 0x284   :  { %v8102_v36 = vpop.eup %8101  ;;  %6727 = vst [vmem:[%s10707_s3 + $0x398] sm:$0xff] %v6551_v31   ;;  %8127 = vrcp.f32 %v3256_v45  ;;  %v3254_v42 = vadd.f32 1.0, %v8100_v52  ;;  %v10471_v58 = vadd.f32 %v10220_v32, %v2322_v10  ;;  %v10474_v61 = vadd.f32 %v10220_v32, %v6992_v39  ;;  %v2335_v45 = vpop.f32.mrf.mxu1 }
 0x285   :  { %v8104_v33 = vpop.eup %8103  ;;  %6662 = vst [vmem:[%s10707_s3 + $0x190] sm:$0xff] %v6226_v1   ;;  %8129 = vrcp.f32 %v3384_v51  ;;  %v3382_v7 = vadd.f32 1.0, %v8102_v36  ;;  %v2494_v31 = vsub.f32 0.0, %v10452_v38  ;;  %v2497_v51 = vsub.f32 0.0, %v10462_v49 }
 0x286   :  { %v8106_v20 = vpop.eup %8105  ;;  %v3891_v27 = vmul.f32 %v8104_v33, %v10299_v34  ;;  %8131 = vrcp.f32 %v3254_v42  ;;  %v10456_v34 = vadd.f32 %v10220_v32, %v10417_v46  ;;  %v10468_v46 = vadd.f32 %v10220_v32, %v1810_v13  ;;  %v6993_v33 = vpop.f32.mrf.mxu0 }
 0x287   :  { %v8108_v40 = vpop.eup %8107  ;;  %8133 = vrcp.f32 %v3382_v7  ;;  %v3257_v0 = vadd.f32 1.0, %v8106_v20  ;;  %v10480_v13 = vadd.f32 %v10220_v32, %v7120_v22  ;;  %v2623_v20 = vsub.f32 0.0, %v10471_v58  ;;  %v7121_v39 = vpop.f32.mrf.mxu1 }
 0x288   :  { %v8110_v37 = vpop.eup %8109  ;;  %v6546_v50 = vpack.c.bf16 %v3891_v27, %v3890_v55  ;;  %v3385_v14 = vadd.f32 1.0, %v8108_v40  ;;  %8135 = vpow2.f32 %v3112_v47  ;;  %v2622_v30 = vsub.f32 0.0, %v10456_v34 }
 0x289   :  { %v8112_v24 = vpop.eup %8111  ;;  %8137 = vrcp.f32 %v3257_v0  ;;  %v3255_v16 = vadd.f32 1.0, %v8110_v37  ;;  %v2625_v47 = vsub.f32 0.0, %v10465_v62  ;;  %v2495_v12 = vsub.f32 0.0, %v10468_v46 }
 0x28a   :  { %v8114_v26 = vpop.eup %8113  ;;  %6726 = vst [vmem:[%s10707_s3 + $0x390] sm:$0xff] %v6546_v50   ;;  %8139 = vrcp.f32 %v3385_v14  ;;  %v3383_v19 = vadd.f32 1.0, %v8112_v24  ;;  %v2500_v55 = vsub.f32 0.0, %v10474_v61  ;;  %v10487_v40 = vadd.f32 %v10220_v32, %v1823_v3 }
 0x28b   :  { %v8116_v54 = vpop.eup %8115  ;;  %8141 = vrcp.f32 %v3255_v16  ;;  %v3260_v21 = vadd.f32 1.0, %v8114_v26  ;;  %v10490_v0 = vadd.f32 %v10220_v32, %v2335_v45  ;;  %v2862_v50 = vmul.f32 1.442695, %v2494_v31 }
 0x28c   :  { %v8118_v59 = vpop.eup %8117  ;;  %8143 = vrcp.f32 %v3383_v19  ;;  %v3388_v4 = vadd.f32 1.0, %v8116_v54  ;;  %v2628_v14 = vsub.f32 0.0, %v10480_v13  ;;  %v10494_v24 = vadd.f32 %v10220_v32, %v6993_v33  ;;  %v1826_v54 = vpop.f32.mrf.mxu0 }
 0x28d   :  { %v8120_v15 = vpop.eup %8119  ;;  %8145 = vrcp.f32 %v3260_v21  ;;  %v3258_v25 = vadd.f32 1.0, %v8118_v59  ;;  %v3118_v22 = vmul.f32 1.442695, %v2622_v30  ;;  %v2868_v26 = vmul.f32 1.442695, %v2497_v51 }
 0x28e   :  { %v8122_v52 = vpop.eup %8121  ;;  %8147 = vrcp.f32 %v3388_v4  ;;  %v3386_v1 = vadd.f32 1.0, %v8120_v15  ;;  %v3124_v19 = vmul.f32 1.442695, %v2625_v47  ;;  %v2864_v3 = vmul.f32 1.442695, %v2495_v12  ;;  %v6996_v12 = vpop.f32.mrf.mxu0 }
 0x28f   :  { %v8124_v36 = vpop.eup %8123  ;;  %8149 = vrcp.f32 %v3258_v25  ;;  %v3261_v42 = vadd.f32 1.0, %v8122_v52  ;;  %v3120_v59 = vmul.f32 1.442695, %v2623_v20  ;;  %v10498_v4 = vadd.f32 %v10220_v32, %v7121_v39  ;;  %v2338_v52 = vpop.f32.mrf.mxu1 }
 0x290   :  { %v8126_v7 = vpop.eup %8125  ;;  %8151 = vrcp.f32 %v3386_v1  ;;  %v3389_v10 = vadd.f32 1.0, %v8124_v36  ;;  %v2874_v25 = vmul.f32 1.442695, %v2500_v55  ;;  %v2498_v31 = vsub.f32 0.0, %v10487_v40 }
 0x291   :  { %v8128_v27 = vpop.eup %8127  ;;  %8153 = vrcp.f32 %v3261_v42  ;;  %v3259_v23 = vadd.f32 1.0, %v8126_v7  ;;  %v2626_v45 = vsub.f32 0.0, %v10490_v0  ;;  %v3130_v51 = vmul.f32 1.442695, %v2628_v14 }
 0x292   :  { %v8130_v37 = vpop.eup %8129  ;;  %8155 = vrcp.f32 %v3389_v10  ;;  %v2501_v36 = vsub.f32 0.0, %v10494_v24  ;;  %v3768_v42 = vmul.f32 %v8128_v27, %v10310_v63  ;;  %v2629_v20 = vsub.f32 0.0, %v10498_v4 }
 0x293   :  { %v8132_v16 = vpop.eup %8131  ;;  %8157 = vrcp.f32 %v3259_v23  ;;  %v3896_v7 = vmul.f32 %v8130_v37, %v10315_v60 }
 0x294   :  { %v8134_v21 = vpop.eup %8133  ;;  %8159 = vpow2.f32 %v10448_v9  ;;  %v3766_v23 = vmul.f32 %v8132_v16, %v10337_v44  ;;  %v2870_v44 = vmul.f32 1.442695, %v2498_v31  ;;  %v1839_v16 = vpop.f32.mrf.mxu0 }
 0x295   :  { %v8136_v15 = vpop.eup %8135  ;;  %8161 = vpow2.f32 %v3122_v41  ;;  %v10506_v41 = vadd.f32 %v10220_v32, %v1826_v54  ;;  %v2876_v54 = vmul.f32 1.442695, %v2501_v36 }
 0x296   :  { %v8138_v30 = vpop.eup %8137  ;;  %v3387_v1 = vadd.f32 1.0, %v8136_v15  ;;  %8163 = vpow2.f32 %v2862_v50  ;;  %v3894_v50 = vmul.f32 %v8134_v21, %v10346_v56  ;;  %v3132_v15 = vmul.f32 1.442695, %v2629_v20 }
 0x297   :  { %v8140_v9 = vpop.eup %8139  ;;  %v3769_v47 = vmul.f32 %v8138_v30, %v10349_v11  ;;  %8165 = vpow2.f32 %v3118_v22  ;;  %v10513_v11 = vpop.f32.mrf.mxu1 }
 0x298   :  { %v8142_v33 = vpop.eup %8141  ;;  %v3897_v10 = vmul.f32 %v8140_v9, %v10352_v57  ;;  %8167 = vrcp.f32 %v3387_v1 }
 0x299   :  { %v8144_v55 = vpop.eup %8143  ;;  %v6241_v39 = vpack.c.bf16 %v3769_v47, %v3768_v42  ;;  %v3767_v63 = vmul.f32 %v8142_v33, %v10355_v18  ;;  %8169 = vpow2.f32 %v2868_v26  ;;  %v2499_v18 = vsub.f32 0.0, %v10506_v41  ;;  %v2351_v21 = vpop.f32.mrf.mxu1 }
 0x29a   :  { %v8146_v27 = vpop.eup %8145  ;;  %v6561_v14 = vpack.c.bf16 %v3897_v10, %v3896_v7  ;;  %v3895_v60 = vmul.f32 %v8144_v55, %v10358_v35  ;;  %8171 = vpow2.f32 %v3124_v19  ;;  %v3126_v35 = vmul.f32 1.442695, %v2626_v45 }
 0x29b   :  { %v8148_v57 = vpop.eup %8147  ;;  %6665 = vst [vmem:[%s10707_s3 + $0x1a8] sm:$0xff] %v6241_v39   ;;  %v6236_v37 = vpack.c.bf16 %v3767_v63, %v3766_v23  ;;  %8173 = vpow2.f32 %v2864_v3  ;;  %v10525_v26 = vadd.f32 %v10220_v32, %v2338_v52  ;;  %v3772_v45 = vmul.f32 %v8146_v27, %v10361_v29  ;;  %v7125_v29 = vpop.f32.mrf.mxu1  ;;  %v10556_v27 = vld [vmem:[%s10706_s2] ss:$0 sm:$0xff] }
 0x29c   :  { %v8150_v22 = vpop.eup %8149  ;;  %6729 = vst [vmem:[%s10707_s3 + $0x3a8] sm:$0xff] %v6561_v14   ;;  %v6556_v56 = vpack.c.bf16 %v3895_v60, %v3894_v50  ;;  %8175 = vpow2.f32 %v3120_v59  ;;  %v10534_v59 = vadd.f32 %v10220_v32, %v6996_v12  ;;  %v2872_v30 = vmul.f32 1.442695, %v2499_v18 }
 0x29d   :  { %v8152_v19 = vpop.eup %8151  ;;  %6664 = vst [vmem:[%s10707_s3 + $0x1a0] sm:$0xff] %v6236_v37   ;;  %8177 = vpow2.f32 %v2874_v25  ;;  %v6997_v25 = vpop.f32.mrf.mxu0  ;;  %v3900_v36 = vmul.f32 %v8148_v57, %v10365_v5  ;;  %v3770_v32 = vmul.f32 %v8150_v22, %v10375_v2  ;;  %v10560_v50 = vadd.f32 %v10556_v27, %v10513_v11 }
 0x29e   :  { %v8154_v3 = vpop.eup %8153  ;;  %6728 = vst [vmem:[%s10707_s3 + $0x3a0] sm:$0xff] %v6556_v56   ;;  %8179 = vpow2.f32 %v3130_v51  ;;  %v2627_v51 = vsub.f32 0.0, %v10525_v26  ;;  %v2504_v63 = vsub.f32 0.0, %v10534_v59  ;;  %v2354_v14 = vpop.f32.mrf.mxu1  ;;  %v3898_v57 = vmul.f32 %v8152_v19, %v10378_v48 }
 0x29f   :  { %v8156_v31 = vpop.eup %8155  ;;  %v3773_v52 = vmul.f32 %v8154_v3, %v10381_v43  ;;  %8181 = vpow2.f32 %v2870_v44  ;;  %v1842_v20 = vpop.f32.mrf.mxu0  ;;  %v10565_v44 = vadd.f32 %v10556_v27, %v1839_v16  ;;  %v10568_v11 = vadd.f32 %v10556_v27, %v2351_v21 }
 0x2a0   :  { %v8158_v1 = vpop.eup %8157  ;;  %v3901_v9 = vmul.f32 %v8156_v31, %v10384_v28  ;;  %8183 = vpow2.f32 %v3126_v35  ;;  %v2882_v19 = vmul.f32 1.442695, %v2504_v63  ;;  %v7128_v31 = vpop.f32.mrf.mxu1 }
 0x2a1   :  { %v8160_v42 = vpop.eup %8159  ;;  %v6251_v47 = vpack.c.bf16 %v3773_v52, %v3772_v45  ;;  %v3771_v12 = vmul.f32 %v8158_v1, %v10393_v8  ;;  %8185 = vpow2.f32 %v2876_v54  ;;  %v3128_v8 = vmul.f32 1.442695, %v2627_v51  ;;  %v7000_v56 = vpop.f32.mrf.mxu0 }
 0x2a2   :  { %v8162_v43 = vpop.eup %8161  ;;  %v6571_v33 = vpack.c.bf16 %v3901_v9, %v3900_v36  ;;  %v3264_v7 = vadd.f32 1.0, %v8160_v42  ;;  %8187 = vpow2.f32 %v3132_v15  ;;  %v2502_v52 = vsub.f32 0.0, %v10565_v44 }
 0x2a3   :  { %v8164_v10 = vpop.eup %8163  ;;  %6667 = vst [vmem:[%s10707_s3 + $0x1b8] sm:$0xff] %v6251_v47   ;;  %v6246_v5 = vpack.c.bf16 %v3771_v12, %v3770_v32  ;;  %v3392_v28 = vadd.f32 1.0, %v8162_v43  ;;  %8189 = vpow2.f32 %v2872_v30  ;;  %v10576_v30 = vadd.f32 %v10556_v27, %v6997_v25  ;;  %v1855_v51 = vpop.f32.mrf.mxu0 }
 0x2a4   :  { %v8166_v55 = vpop.eup %8165  ;;  %6731 = vst [vmem:[%s10707_s3 + $0x3b8] sm:$0xff] %v6571_v33   ;;  %8191 = vrcp.f32 %v3264_v7  ;;  %v3262_v2 = vadd.f32 1.0, %v8164_v10  ;;  %v10579_v36 = vadd.f32 %v10556_v27, %v7125_v29  ;;  %v10582_v9 = vadd.f32 %v10556_v27, %v1842_v20  ;;  %v2367_v29 = vpop.f32.mrf.mxu1 }
 0x2a5   :  { %v8168_v23 = vpop.eup %8167  ;;  %6666 = vst [vmem:[%s10707_s3 + $0x1b0] sm:$0xff] %v6246_v5   ;;  %8193 = vrcp.f32 %v3392_v28  ;;  %v3390_v39 = vadd.f32 1.0, %v8166_v55  ;;  %v2630_v47 = vsub.f32 0.0, %v10568_v11  ;;  %v10586_v12 = vadd.f32 %v10556_v27, %v2354_v14 }
 0x2a6   :  { %v8170_v60 = vpop.eup %8169  ;;  %v3899_v37 = vmul.f32 %v8168_v23, %v10412_v6  ;;  %8195 = vrcp.f32 %v3262_v2  ;;  %v2632_v6 = vsub.f32 0.0, %v10560_v50  ;;  %v10589_v7 = vadd.f32 %v10556_v27, %v7000_v56 }
 0x2a7   :  { %v8172_v18 = vpop.eup %8171  ;;  %8197 = vrcp.f32 %v3390_v39  ;;  %v3265_v22 = vadd.f32 1.0, %v8170_v60  ;;  %v2505_v28 = vsub.f32 0.0, %v10576_v30  ;;  %v10593_v20 = vadd.f32 %v10556_v27, %v7128_v31  ;;  %v7001_v39 = vpop.f32.mrf.mxu0 }
 0x2a8   :  { %v8174_v35 = vpop.eup %8173  ;;  %v6566_v54 = vpack.c.bf16 %v3899_v37, %v3898_v57  ;;  %v3393_v3 = vadd.f32 1.0, %v8172_v18  ;;  %8199 = vpow2.f32 %v3128_v8  ;;  %v3138_v33 = vmul.f32 1.442695, %v2632_v6 }
 0x2a9   :  { %v8176_v15 = vpop.eup %8175  ;;  %8201 = vrcp.f32 %v3265_v22  ;;  %v3263_v48 = vadd.f32 1.0, %v8174_v35  ;;  %v2633_v8 = vsub.f32 0.0, %v10579_v36  ;;  %v2503_v23 = vsub.f32 0.0, %v10582_v9  ;;  %v7129_v35 = vpop.f32.mrf.mxu1 }
 0x2aa   :  { %v8178_v16 = vpop.eup %8177  ;;  %6730 = vst [vmem:[%s10707_s3 + $0x3b0] sm:$0xff] %v6566_v54   ;;  %8203 = vrcp.f32 %v3393_v3  ;;  %v3391_v45 = vadd.f32 1.0, %v8176_v15  ;;  %v2631_v60 = vsub.f32 0.0, %v10586_v12  ;;  %v10599_v57 = vadd.f32 %v10556_v27, %v1855_v51 }
 0x2ab   :  { %v8180_v21 = vpop.eup %8179  ;;  %8205 = vrcp.f32 %v3263_v48  ;;  %v3268_v1 = vadd.f32 1.0, %v8178_v16  ;;  %v2508_v22 = vsub.f32 0.0, %v10589_v7  ;;  %v10603_v56 = vadd.f32 %v10556_v27, %v2367_v29 }
 0x2ac   :  { %v8182_v42 = vpop.eup %8181  ;;  %8207 = vrcp.f32 %v3391_v45  ;;  %v3396_v32 = vadd.f32 1.0, %v8180_v21  ;;  %v2878_v3 = vmul.f32 1.442695, %v2502_v52  ;;  %v3134_v15 = vmul.f32 1.442695, %v2630_v47  ;;  %v1858_v21 = vpop.f32.mrf.mxu0 }
 0x2ad   :  { %v8184_v25 = vpop.eup %8183  ;;  %8209 = vrcp.f32 %v3268_v1  ;;  %v3266_v43 = vadd.f32 1.0, %v8182_v42  ;;  %v2636_v48 = vsub.f32 0.0, %v10593_v20  ;;  %v2884_v31 = vmul.f32 1.442695, %v2505_v28 }
 0x2ae   :  { %v8186_v10 = vpop.eup %8185  ;;  %8211 = vrcp.f32 %v3396_v32  ;;  %v3394_v5 = vadd.f32 1.0, %v8184_v25  ;;  %v3140_v16 = vmul.f32 1.442695, %v2633_v8  ;;  %v10607_v45 = vadd.f32 %v10556_v27, %v7001_v39 }
 0x2af   :  { %v8188_v55 = vpop.eup %8187  ;;  %8213 = vrcp.f32 %v3266_v43  ;;  %v3269_v2 = vadd.f32 1.0, %v8186_v10  ;;  %v2880_v51 = vmul.f32 1.442695, %v2503_v23  ;;  %v3136_v42 = vmul.f32 1.442695, %v2631_v60 }
 0x2b0   :  { %v8190_v63 = vpop.eup %8189  ;;  %8215 = vrcp.f32 %v3394_v5  ;;  %v3397_v14 = vadd.f32 1.0, %v8188_v55  ;;  %v10610_v32 = vadd.f32 %v10556_v27, %v7129_v35  ;;  %v2890_v52 = vmul.f32 1.442695, %v2508_v22 }
 0x2b1   :  { %v8192_v37 = vpop.eup %8191  ;;  %8217 = vrcp.f32 %v3269_v2  ;;  %v3267_v18 = vadd.f32 1.0, %v8190_v63  ;;  %v2506_v47 = vsub.f32 0.0, %v10599_v57  ;;  %v2634_v43 = vsub.f32 0.0, %v10603_v56 }
 0x2b2   :  { %v8194_v54 = vpop.eup %8193  ;;  %8219 = vrcp.f32 %v3397_v14  ;;  %v3146_v5 = vmul.f32 1.442695, %v2636_v48  ;;  %v10615_v28 = vadd.f32 %v10556_v27, %v1858_v21  ;;  %v3776_v55 = vmul.f32 %v8192_v37, %v10423_v53  ;;  %v2370_v53 = vpop.f32.mrf.mxu1 }
 0x2b3   :  { %v8196_v6 = vpop.eup %8195  ;;  %8221 = vrcp.f32 %v3267_v18  ;;  %v3904_v23 = vmul.f32 %v8194_v54, %v10433_v17  ;;  %v2637_v63 = vsub.f32 0.0, %v10610_v32 }
 0x2b4   :  { %v8198_v1 = vpop.eup %8197  ;;  %8223 = vpow2.f32 %v2882_v19  ;;  %v3774_v60 = vmul.f32 %v8196_v6, %v10452_v38  ;;  %v2886_v38 = vmul.f32 1.442695, %v2506_v47  ;;  %v2507_v54 = vsub.f32 0.0, %v10615_v28 }
 0x2b5   :  { %v8200_v25 = vpop.eup %8199  ;;  %8225 = vpow2.f32 %v3138_v33  ;;  %v2509_v33 = vsub.f32 0.0, %v10607_v45  ;;  %v3902_v37 = vmul.f32 %v8198_v1, %v10456_v34 }
 0x2b6   :  { %v8202_v29 = vpop.eup %8201  ;;  %v3395_v10 = vadd.f32 1.0, %v8200_v25  ;;  %8227 = vpow2.f32 %v2878_v3 }
 0x2b7   :  { %v8204_v19 = vpop.eup %8203  ;;  %v3777_v2 = vmul.f32 %v8202_v29, %v10462_v49  ;;  %8229 = vpow2.f32 %v3134_v15  ;;  %v3142_v15 = vmul.f32 1.442695, %v2634_v43  ;;  %v2892_v6 = vmul.f32 1.442695, %v2509_v33 }
 0x2b8   :  { %v8206_v8 = vpop.eup %8205  ;;  %v3905_v39 = vmul.f32 %v8204_v19, %v10465_v62  ;;  %8231 = vrcp.f32 %v3395_v10 }
 0x2b9   :  { %v8208_v14 = vpop.eup %8207  ;;  %v6261_v18 = vpack.c.bf16 %v3777_v2, %v3776_v55  ;;  %v3775_v22 = vmul.f32 %v8206_v8, %v10468_v46  ;;  %8233 = vpow2.f32 %v2884_v31 }
 0x2ba   :  { %v8210_v49 = vpop.eup %8209  ;;  %v6581_v35 = vpack.c.bf16 %v3905_v39, %v3904_v23  ;;  %v3903_v3 = vmul.f32 %v8208_v14, %v10471_v58  ;;  %8235 = vpow2.f32 %v3140_v16  ;;  %v10635_v58 = vadd.f32 %v10556_v27, %v2370_v53 }
 0x2bb   :  { %v8212_v17 = vpop.eup %8211  ;;  %6669 = vst [vmem:[%s10707_s3 + $0x1c8] sm:$0xff] %v6261_v18   ;;  %v6256_v62 = vpack.c.bf16 %v3775_v22, %v3774_v60  ;;  %8237 = vpow2.f32 %v2880_v51  ;;  %v3148_v16 = vmul.f32 1.442695, %v2637_v63  ;;  %v3780_v1 = vmul.f32 %v8210_v49, %v10474_v61 }
 0x2bc   :  { %v8214_v46 = vpop.eup %8213  ;;  %6733 = vst [vmem:[%s10707_s3 + $0x3c8] sm:$0xff] %v6581_v35   ;;  %v6576_v34 = vpack.c.bf16 %v3903_v3, %v3902_v37  ;;  %8239 = vpow2.f32 %v3136_v42  ;;  %v2888_v51 = vmul.f32 1.442695, %v2507_v54  ;;  %v3908_v25 = vmul.f32 %v8212_v17, %v10480_v13 }
 0x2bd   :  { %v8216_v48 = vpop.eup %8215  ;;  %6668 = vst [vmem:[%s10707_s3 + $0x1c0] sm:$0xff] %v6256_v62   ;;  %8241 = vpow2.f32 %v2890_v52  ;;  %v2635_v47 = vsub.f32 0.0, %v10635_v58  ;;  %v3778_v29 = vmul.f32 %v8214_v46, %v10487_v40 }
 0x2be   :  { %v8218_v31 = vpop.eup %8217  ;;  %6732 = vst [vmem:[%s10707_s3 + $0x3c0] sm:$0xff] %v6576_v34   ;;  %8243 = vpow2.f32 %v3146_v5  ;;  %v3906_v39 = vmul.f32 %v8216_v48, %v10490_v0 }
 0x2bf   :  { %v8220_v21 = vpop.eup %8219  ;;  %v3781_v27 = vmul.f32 %v8218_v31, %v10494_v24  ;;  %8245 = vpow2.f32 %v2886_v38 }
 0x2c0   :  { %v8222_v42 = vpop.eup %8221  ;;  %v3909_v52 = vmul.f32 %v8220_v21, %v10498_v4  ;;  %8247 = vpow2.f32 %v3142_v15 }
 0x2c1   :  { %v8224_v43 = vpop.eup %8223  ;;  %v6271_v10 = vpack.c.bf16 %v3781_v27, %v3780_v1  ;;  %v3779_v5 = vmul.f32 %v8222_v42, %v10506_v41  ;;  %8249 = vpow2.f32 %v2892_v6  ;;  %v3144_v41 = vmul.f32 1.442695, %v2635_v47 }
 0x2c2   :  { %v8226_v61 = vpop.eup %8225  ;;  %v6591_v19 = vpack.c.bf16 %v3909_v52, %v3908_v25  ;;  %v3272_v24 = vadd.f32 1.0, %v8224_v43  ;;  %8251 = vpow2.f32 %v3148_v16 }
 0x2c3   :  { %v8228_v55 = vpop.eup %8227  ;;  %6671 = vst [vmem:[%s10707_s3 + $0x1d8] sm:$0xff] %v6271_v10   ;;  %v6266_v13 = vpack.c.bf16 %v3779_v5, %v3778_v29  ;;  %v3400_v4 = vadd.f32 1.0, %v8226_v61  ;;  %8253 = vpow2.f32 %v2888_v51 }
 0x2c4   :  { %v8230_v2 = vpop.eup %8229  ;;  %6735 = vst [vmem:[%s10707_s3 + $0x3d8] sm:$0xff] %v6591_v19   ;;  %8255 = vrcp.f32 %v3272_v24  ;;  %v3270_v40 = vadd.f32 1.0, %v8228_v55 }
 0x2c5   :  { %v8232_v33 = vpop.eup %8231  ;;  %6670 = vst [vmem:[%s10707_s3 + $0x1d0] sm:$0xff] %v6266_v13   ;;  %8257 = vrcp.f32 %v3400_v4  ;;  %v3398_v8 = vadd.f32 1.0, %v8230_v2 }
 0x2c6   :  { %v8234_v23 = vpop.eup %8233  ;;  %v3907_v63 = vmul.f32 %v8232_v33, %v10525_v26  ;;  %8259 = vrcp.f32 %v3270_v40 }
 0x2c7   :  { %v8236_v14 = vpop.eup %8235  ;;  %8261 = vrcp.f32 %v3398_v8  ;;  %v3273_v60 = vadd.f32 1.0, %v8234_v23 }
 0x2c8   :  { %v8238_v18 = vpop.eup %8237  ;;  %v6586_v22 = vpack.c.bf16 %v3907_v63, %v3906_v39  ;;  %v3401_v53 = vadd.f32 1.0, %v8236_v14  ;;  %8263 = vpow2.f32 %v3144_v41 }
 0x2c9   :  { %v8240_v49 = vpop.eup %8239  ;;  %8265 = vrcp.f32 %v3273_v60  ;;  %v3271_v37 = vadd.f32 1.0, %v8238_v18 }
 0x2ca   :  { %v8242_v35 = vpop.eup %8241  ;;  %6734 = vst [vmem:[%s10707_s3 + $0x3d0] sm:$0xff] %v6586_v22   ;;  %8267 = vrcp.f32 %v3401_v53  ;;  %v3399_v0 = vadd.f32 1.0, %v8240_v49 }
 0x2cb   :  { %v8244_v3 = vpop.eup %8243  ;;  %8269 = vrcp.f32 %v3271_v37  ;;  %v3276_v26 = vadd.f32 1.0, %v8242_v35 }
 0x2cc   :  { %v8246_v17 = vpop.eup %8245  ;;  %8271 = vrcp.f32 %v3399_v0  ;;  %v3404_v62 = vadd.f32 1.0, %v8244_v3 }
 0x2cd   :  { %v8248_v38 = vpop.eup %8247  ;;  %v3274_v54 = vadd.f32 1.0, %v8246_v17  ;;  %8273 = vrcp.f32 %v3276_v26 }
 0x2ce   :  { %v8250_v46 = vpop.eup %8249  ;;  %8275 = vrcp.f32 %v3404_v62  ;;  %v3402_v1 = vadd.f32 1.0, %v8248_v38 }
 0x2cf   :  { %v8252_v34 = vpop.eup %8251  ;;  %v3277_v15 = vadd.f32 1.0, %v8250_v46  ;;  %8277 = vrcp.f32 %v3274_v54 }
 0x2d0   :  { %v8254_v48 = vpop.eup %8253  ;;  %v3405_v6 = vadd.f32 1.0, %v8252_v34 }
 0x2d1   :  { %v8256_v31 = vpop.eup %8255  ;;  %8279 = vrcp.f32 %v3277_v15  ;;  %v3275_v16 = vadd.f32 1.0, %v8254_v48 }
 0x2d2   :  { %v8258_v21 = vpop.eup %8257  ;;  %8281 = vrcp.f32 %v3405_v6  ;;  %v3784_v43 = vmul.f32 %v8256_v31, %v10534_v59 }
 0x2d3   :  { %v8260_v27 = vpop.eup %8259  ;;  %8283 = vrcp.f32 %v3275_v16  ;;  %v3912_v5 = vmul.f32 %v8258_v21, %v10560_v50 }
 0x2d4   :  { %v8262_v51 = vpop.eup %8261  ;;  %8285 = vrcp.f32 %v3402_v1  ;;  %v3782_v24 = vmul.f32 %v8260_v27, %v10565_v44 }
 0x2d5   :  { %v8264_v42 = vpop.eup %8263  ;;  %v3910_v4 = vmul.f32 %v8262_v51, %v10568_v11 }
 0x2d6   :  { %v8266_v25 = vpop.eup %8265  ;;  %v3403_v52 = vadd.f32 1.0, %v8264_v42 }
 0x2d7   :  { %v8268_v47 = vpop.eup %8267  ;;  %v3785_v29 = vmul.f32 %v8266_v25, %v10576_v30 }
 0x2d8   :  { %v8270_v10 = vpop.eup %8269  ;;  %v3913_v61 = vmul.f32 %v8268_v47, %v10579_v36  ;;  %8287 = vrcp.f32 %v3403_v52 }
 0x2d9   :  { %v8272_v19 = vpop.eup %8271  ;;  %v6281_v55 = vpack.c.bf16 %v3785_v29, %v3784_v43  ;;  %v3783_v13 = vmul.f32 %v8270_v10, %v10582_v9 }
 0x2da   :  { %v6601_v2 = vpack.c.bf16 %v3913_v61, %v3912_v5  ;;  %v3911_v40 = vmul.f32 %v8272_v19, %v10586_v12  ;;  %v8274_v59 = vpop.eup %8273 }
 0x2db   :  { %6673 = vst [vmem:[%s10707_s3 + $0x1e8] sm:$0xff] %v6281_v55   ;;  %v6276_v50 = vpack.c.bf16 %v3783_v13, %v3782_v24  ;;  %v8276_v30 = vpop.eup %8275  ;;  %v3788_v12 = vmul.f32 %v8274_v59, %v10589_v7 }
 0x2dc   :  { %6737 = vst [vmem:[%s10707_s3 + $0x3e8] sm:$0xff] %v6601_v2   ;;  %v6596_v44 = vpack.c.bf16 %v3911_v40, %v3910_v4  ;;  %v8278_v36 = vpop.eup %8277  ;;  %v3916_v8 = vmul.f32 %v8276_v30, %v10593_v20 }
 0x2dd   :  { %6672 = vst [vmem:[%s10707_s3 + $0x1e0] sm:$0xff] %v6276_v50   ;;  %v3786_v39 = vmul.f32 %v8278_v36, %v10599_v57 }
 0x2de   :  { %v8280_v11 = vpop.eup %8279  ;;  %6736 = vst [vmem:[%s10707_s3 + $0x3e0] sm:$0xff] %v6596_v44  }
 0x2df   :  { %v8282_v9 = vpop.eup %8281  ;;  %v3789_v41 = vmul.f32 %v8280_v11, %v10607_v45 }
 0x2e0   :  { %v8284_v33 = vpop.eup %8283  ;;  %v3917_v23 = vmul.f32 %v8282_v9, %v10610_v32 }
 0x2e1   :  { %v6291_v63 = vpack.c.bf16 %v3789_v41, %v3788_v12  ;;  %v3787_v14 = vmul.f32 %v8284_v33, %v10615_v28  ;;  %v8286_v18 = vpop.eup %8285 }
 0x2e2   :  { %v6611_v60 = vpack.c.bf16 %v3917_v23, %v3916_v8  ;;  %v3914_v20 = vmul.f32 %v8286_v18, %v10603_v56 }
 0x2e3   :  { %6675 = vst [vmem:[%s10707_s3 + $0x1f8] sm:$0xff] %v6291_v63   ;;  %v6286_v22 = vpack.c.bf16 %v3787_v14, %v3786_v39 }
 0x2e4   :  { %6739 = vst [vmem:[%s10707_s3 + $0x3f8] sm:$0xff] %v6611_v60  }
 0x2e5   :  { %v8288_v7 = vpop.eup %8287  ;;  %6674 = vst [vmem:[%s10707_s3 + $0x1f0] sm:$0xff] %v6286_v22  }
 0x2e6   :  { %v3915_v57 = vmul.f32 %v8288_v7, %v10635_v58 }
 0x2e8   :  { %v6606_v45 = vpack.c.bf16 %v3915_v57, %v3914_v20 }
 0x2ea   :  { %6738 = vst [vmem:[%s10707_s3 + $0x3f0] sm:$0xff] %v6606_v45  }

// kernel: _lambda_.28
= control target key start
LH: loop header
LB: loop body
LE: loop exit
PB: predicated region body
PF: predicated region fallthrough
CT: control target
= control target key end

     0   :  { %vm379_vm0 = vcmask 1043456   ;;  %vm282_vm1 = vcmask 588800   ;;  %s2779_s1 = inlined_call_operand.vmem [shape: bf16[72,128], index: 1, kind: input, shape index: {}]   ;;  %s2780_s0 = inlined_call_operand.vmem [shape: bf16[512,72], index: 0, kind: input, shape index: {}]   ;;  %s2781_s2 = inlined_call_operand.vmem [shape: f32[1,128], index: 2, kind: input, shape index: {}]   ;;  %s2782_s3 = inlined_call_operand.vmem [shape: bf16[512,128], index: 3, kind: output, shape index: {}]  }
   0x1   :  { %v1892_v0 = vld [vmem:[%s2779_s1 + $0x20] ss:$0 sps:$4 sm:$0xff]   ;;  %v1893_v1 = vld [vmem:[%s2779_s1 + $0x18] sm:$0xff]   ;;  %v1894_v3 = vld [vmem:[%s2779_s1 + $0x10] sm:$0xff]  }
   0x2   :  { %1890 = vmatprep.subr.msk.bf16.mxu0 %vm379_vm0, %v1892_v0  ;;  %1891 = vmatprep.subr.msk.bf16.mxu1 %vm379_vm0, %v1892_v0  ;;  %v381_v2 = vsel %vm379_vm0, %v1892_v0, 0  ;;  %v1897_v4 = vld [vmem:[%s2780_s0] sm:$0xff]   ;;  %v1895_v6 = vld [vmem:[%s2779_s1 + $0x8] sm:$0xff]   ;;  %v1901_v10 = vld [vmem:[%s2780_s0 + $0x10] sm:$0xff]  }
   0x3   :  { %1807 = vmatpush3.bf16.msra.mxu0 %v381_v2  ;;  %1885 = vmatpush3.bf16.msra.mxu1 %v381_v2  ;;  %v1898_v5 = vld [vmem:[%s2780_s0 + $0x80] sm:$0xff]   ;;  %v1899_v8 = vld [vmem:[%s2780_s0 + $0x8] sm:$0xff]   ;;  %v1902_v11 = vld [vmem:[%s2780_s0 + $0x90] sm:$0xff]  }
   0x4   :  { %1808 = vmatprep.subr.bf16.mxu0 %v1893_v1  ;;  %1881 = vmatprep.subr.bf16.mxu1 %v1893_v1  ;;  %v1896_v7 = vld [vmem:[%s2779_s1] sm:$0xff]   ;;  %v1900_v9 = vld [vmem:[%s2780_s0 + $0x88] sm:$0xff]   ;;  %v1903_v12 = vld [vmem:[%s2780_s0 + $0x18] sm:$0xff]  }
   0x5   :  { %1816 = vmatprep.mubr.msk.bf16.mxu0 %vm282_vm1, %v1897_v4  ;;  %1848 = vmatprep.mubr.msk.bf16.mxu1 %vm282_vm1, %v1898_v5  ;;  %v1904_v13 = vld [vmem:[%s2780_s0 + $0x98] sm:$0xff]   ;;  %v1905_v14 = vld [vmem:[%s2780_s0 + $0x20] sm:$0xff]   ;;  %v1907_v16 = vld [vmem:[%s2780_s0 + $0x28] sm:$0xff]  }
   0x6   :  { %v1906_v15 = vld [vmem:[%s2780_s0 + $0xa0] sm:$0xff]   ;;  %v1908_v17 = vld [vmem:[%s2780_s0 + $0xa8] sm:$0xff]   ;;  %v1909_v18 = vld [vmem:[%s2780_s0 + $0x30] sm:$0xff]  }
   0x7   :  { %1809 = vmatpush3.bf16.msra.mxu0 %v1893_v1  ;;  %1886 = vmatpush3.bf16.msra.mxu1 %v1893_v1  ;;  %v1910_v19 = vld [vmem:[%s2780_s0 + $0xb0] sm:$0xff]   ;;  %v1911_v20 = vld [vmem:[%s2780_s0 + $0x38] sm:$0xff]   ;;  %v1913_v22 = vld [vmem:[%s2780_s0 + $0x40] sm:$0xff]  }
   0x8   :  { %1810 = vmatprep.subr.bf16.mxu0 %v1894_v3  ;;  %1882 = vmatprep.subr.bf16.mxu1 %v1894_v3  ;;  %v1912_v21 = vld [vmem:[%s2780_s0 + $0xb8] sm:$0xff]   ;;  %v1914_v23 = vld [vmem:[%s2780_s0 + $0xc0] sm:$0xff]   ;;  %v1915_v24 = vld [vmem:[%s2780_s0 + $0x48] sm:$0xff]  }
   0x9   :  { %v1916_v25 = vld [vmem:[%s2780_s0 + $0xc8] sm:$0xff]   ;;  %v1917_v26 = vld [vmem:[%s2780_s0 + $0x50] sm:$0xff]   ;;  %v1919_v28 = vld [vmem:[%s2780_s0 + $0x58] sm:$0xff]  }
   0xa   :  { %v1918_v27 = vld [vmem:[%s2780_s0 + $0xd0] sm:$0xff]   ;;  %v1920_v29 = vld [vmem:[%s2780_s0 + $0xd8] sm:$0xff]   ;;  %v1921_v30 = vld [vmem:[%s2780_s0 + $0x60] sm:$0xff]  }
   0xb   :  { %1811 = vmatpush3.bf16.msra.mxu0 %v1894_v3  ;;  %1887 = vmatpush3.bf16.msra.mxu1 %v1894_v3  ;;  %v1922_v31 = vld [vmem:[%s2780_s0 + $0xe0] sm:$0xff]   ;;  %v1923_v32 = vld [vmem:[%s2780_s0 + $0x68] sm:$0xff]   ;;  %v1925_v34 = vld [vmem:[%s2780_s0 + $0x70] sm:$0xff]  }
   0xc   :  { %1812 = vmatprep.subr.bf16.mxu0 %v1895_v6  ;;  %1883 = vmatprep.subr.bf16.mxu1 %v1895_v6  ;;  %v1924_v33 = vld [vmem:[%s2780_s0 + $0xe8] sm:$0xff]   ;;  %v1926_v35 = vld [vmem:[%s2780_s0 + $0xf0] sm:$0xff]   ;;  %v1927_v36 = vld [vmem:[%s2780_s0 + $0x78] sm:$0xff]  }
   0xd   :  { %v1928_v37 = vld [vmem:[%s2780_s0 + $0xf8] sm:$0xff]   ;;  %v2352_v38 = vld [vmem:[%s2781_s2] ss:$0 sm:$0xff] }
   0xf   :  { %1813 = vmatpush3.bf16.msra.mxu0 %v1895_v6  ;;  %1888 = vmatpush3.bf16.msra.mxu1 %v1895_v6 }
  0x10   :  { %1814 = vmatprep.subr.bf16.mxu0 %v1896_v7  ;;  %1884 = vmatprep.subr.bf16.mxu1 %v1896_v7 }
  0x13   :  { %1815 = vmatpush3.bf16.msra.mxu0 %v1896_v7  ;;  %1889 = vmatpush3.bf16.msra.mxu1 %v1896_v7 }
  0x16   :  { %1817 = vmatmul.mubr.msk.bf16.vlgmr.msra.gmra.mxu0 %vm282_vm1, %v1899_v8  ;;  %1849 = vmatmul.mubr.msk.bf16.vlgmr.msra.gmra.mxu1 %vm282_vm1, %v1900_v9 }
  0x17   :  { %1820 = vmatprep.mubr.msk.bf16.mxu0 %vm282_vm1, %v1901_v10  ;;  %1852 = vmatprep.mubr.msk.bf16.mxu1 %vm282_vm1, %v1902_v11 }
  0x1e   :  { %1821 = vmatmul.mubr.msk.bf16.gmra.mxu0 %vm282_vm1, %v1903_v12  ;;  %1853 = vmatmul.mubr.msk.bf16.gmra.mxu1 %vm282_vm1, %v1904_v13 }
  0x1f   :  { %1824 = vmatprep.mubr.msk.bf16.mxu0 %vm282_vm1, %v1905_v14  ;;  %1856 = vmatprep.mubr.msk.bf16.mxu1 %vm282_vm1, %v1906_v15 }
  0x26   :  { %1825 = vmatmul.mubr.msk.bf16.gmra.mxu0 %vm282_vm1, %v1907_v16  ;;  %1857 = vmatmul.mubr.msk.bf16.gmra.mxu1 %vm282_vm1, %v1908_v17 }
  0x27   :  { %1828 = vmatprep.mubr.msk.bf16.mxu0 %vm282_vm1, %v1909_v18  ;;  %1860 = vmatprep.mubr.msk.bf16.mxu1 %vm282_vm1, %v1910_v19 }
  0x2e   :  { %1829 = vmatmul.mubr.msk.bf16.gmra.mxu0 %vm282_vm1, %v1911_v20  ;;  %1861 = vmatmul.mubr.msk.bf16.gmra.mxu1 %vm282_vm1, %v1912_v21 }
  0x2f   :  { %1832 = vmatprep.mubr.msk.bf16.mxu0 %vm282_vm1, %v1913_v22  ;;  %1864 = vmatprep.mubr.msk.bf16.mxu1 %vm282_vm1, %v1914_v23 }
  0x36   :  { %1833 = vmatmul.mubr.msk.bf16.gmra.mxu0 %vm282_vm1, %v1915_v24  ;;  %1865 = vmatmul.mubr.msk.bf16.gmra.mxu1 %vm282_vm1, %v1916_v25 }
  0x37   :  { %1836 = vmatprep.mubr.msk.bf16.mxu0 %vm282_vm1, %v1917_v26  ;;  %1868 = vmatprep.mubr.msk.bf16.mxu1 %vm282_vm1, %v1918_v27 }
  0x3e   :  { %1837 = vmatmul.mubr.msk.bf16.gmra.mxu0 %vm282_vm1, %v1919_v28  ;;  %1869 = vmatmul.mubr.msk.bf16.gmra.mxu1 %vm282_vm1, %v1920_v29 }
  0x3f   :  { %1840 = vmatprep.mubr.msk.bf16.mxu0 %vm282_vm1, %v1921_v30  ;;  %1872 = vmatprep.mubr.msk.bf16.mxu1 %vm282_vm1, %v1922_v31 }
  0x46   :  { %1841 = vmatmul.mubr.msk.bf16.gmra.mxu0 %vm282_vm1, %v1923_v32  ;;  %1873 = vmatmul.mubr.msk.bf16.gmra.mxu1 %vm282_vm1, %v1924_v33 }
  0x47   :  { %1844 = vmatprep.mubr.msk.bf16.mxu0 %vm282_vm1, %v1925_v34  ;;  %1876 = vmatprep.mubr.msk.bf16.mxu1 %vm282_vm1, %v1926_v35 }
  0x4e   :  { %1845 = vmatmul.mubr.msk.bf16.gmra.mxu0 %vm282_vm1, %v1927_v36  ;;  %1877 = vmatmul.mubr.msk.bf16.gmra.mxu1 %vm282_vm1, %v1928_v37 }
  0xd6   :  { %v1818_v39 = vpop.f32.mrf.mxu0  ;;  %v1850_v40 = vpop.f32.mrf.mxu1 }
  0xd7   :  { %v2355_v41 = vadd.f32 %v1818_v39, %v2352_v38  ;;  %v2358_v42 = vadd.f32 %v1850_v40, %v2352_v38 }
  0xd8   :  { %v417_v43 = vpop.f32.mrf.mxu0  ;;  %v545_v44 = vpop.f32.mrf.mxu1 }
  0xd9   :  { %v674_v45 = vsub.f32 0.0, %v2355_v41  ;;  %v706_v46 = vsub.f32 0.0, %v2358_v42  ;;  %v2363_v47 = vadd.f32 %v2352_v38, %v417_v43  ;;  %v2366_v48 = vadd.f32 %v2352_v38, %v545_v44 }
  0xda   :  { %v1819_v49 = vpop.f32.mrf.mxu0  ;;  %v1851_v50 = vpop.f32.mrf.mxu1 }
  0xdb   :  { %v740_v51 = vmul.f32 1.442695, %v674_v45  ;;  %v804_v52 = vmul.f32 1.442695, %v706_v46  ;;  %v672_v53 = vsub.f32 0.0, %v2363_v47  ;;  %v704_v54 = vsub.f32 0.0, %v2366_v48 }
  0xdc   :  { %v2371_v55 = vadd.f32 %v1819_v49, %v2352_v38  ;;  %v2374_v56 = vadd.f32 %v1851_v50, %v2352_v38  ;;  %v420_v57 = vpop.f32.mrf.mxu0  ;;  %v548_v58 = vpop.f32.mrf.mxu1 }
  0xdd   :  { %1929 = vpow2.f32 %v740_v51  ;;  %v736_v59 = vmul.f32 1.442695, %v672_v53  ;;  %v800_v60 = vmul.f32 1.442695, %v704_v54  ;;  %v2377_v61 = vadd.f32 %v2352_v38, %v420_v57 }
  0xde   :  { %1931 = vpow2.f32 %v804_v52  ;;  %v675_v62 = vsub.f32 0.0, %v2371_v55  ;;  %v707_v63 = vsub.f32 0.0, %v2374_v56  ;;  %v2382_v0 = vadd.f32 %v2352_v38, %v548_v58  ;;  %v1822_v1 = vpop.f32.mrf.mxu0  ;;  %v1854_v2 = vpop.f32.mrf.mxu1 }
  0xdf   :  { %1933 = vpow2.f32 %v736_v59  ;;  %v673_v3 = vsub.f32 0.0, %v2377_v61  ;;  %v2386_v4 = vadd.f32 %v1822_v1, %v2352_v38  ;;  %v2389_v5 = vadd.f32 %v1854_v2, %v2352_v38 }
  0xe0   :  { %1935 = vpow2.f32 %v800_v60  ;;  %v742_v6 = vmul.f32 1.442695, %v675_v62  ;;  %v806_v7 = vmul.f32 1.442695, %v707_v63  ;;  %v705_v8 = vsub.f32 0.0, %v2382_v0  ;;  %v433_v9 = vpop.f32.mrf.mxu0  ;;  %v561_v10 = vpop.f32.mrf.mxu1 }
  0xe1   :  { %v738_v11 = vmul.f32 1.442695, %v673_v3  ;;  %v678_v12 = vsub.f32 0.0, %v2386_v4  ;;  %v710_v13 = vsub.f32 0.0, %v2389_v5  ;;  %v2395_v14 = vadd.f32 %v2352_v38, %v433_v9 }
  0xe2   :  { %1937 = vpow2.f32 %v742_v6  ;;  %v802_v15 = vmul.f32 1.442695, %v705_v8  ;;  %v2398_v16 = vadd.f32 %v2352_v38, %v561_v10  ;;  %v1823_v17 = vpop.f32.mrf.mxu0  ;;  %v1855_v18 = vpop.f32.mrf.mxu1 }
  0xe3   :  { %1939 = vpow2.f32 %v806_v7  ;;  %v748_v19 = vmul.f32 1.442695, %v678_v12  ;;  %v812_v20 = vmul.f32 1.442695, %v710_v13  ;;  %v676_v21 = vsub.f32 0.0, %v2395_v14 }
  0xe4   :  { %1941 = vpow2.f32 %v738_v11  ;;  %v708_v22 = vsub.f32 0.0, %v2398_v16  ;;  %v2403_v23 = vadd.f32 %v1823_v17, %v2352_v38  ;;  %v2406_v24 = vadd.f32 %v1855_v18, %v2352_v38  ;;  %v436_v25 = vpop.f32.mrf.mxu0  ;;  %v564_v26 = vpop.f32.mrf.mxu1 }
  0xe5   :  { %1943 = vpow2.f32 %v802_v15  ;;  %v744_v27 = vmul.f32 1.442695, %v676_v21  ;;  %v2409_v28 = vadd.f32 %v2352_v38, %v436_v25  ;;  %v2412_v29 = vadd.f32 %v2352_v38, %v564_v26 }
  0xe6   :  { %1945 = vpow2.f32 %v748_v19  ;;  %v808_v30 = vmul.f32 1.442695, %v708_v22  ;;  %v679_v31 = vsub.f32 0.0, %v2403_v23  ;;  %v711_v32 = vsub.f32 0.0, %v2406_v24  ;;  %v1826_v33 = vpop.f32.mrf.mxu0  ;;  %v1858_v34 = vpop.f32.mrf.mxu1 }
  0xe7   :  { %1947 = vpow2.f32 %v812_v20  ;;  %v677_v35 = vsub.f32 0.0, %v2409_v28  ;;  %v709_v44 = vsub.f32 0.0, %v2412_v29  ;;  %v2419_v46 = vadd.f32 %v1826_v33, %v2352_v38 }
  0xe8   :  { %1949 = vpow2.f32 %v744_v27  ;;  %v750_v36 = vmul.f32 1.442695, %v679_v31  ;;  %v814_v37 = vmul.f32 1.442695, %v711_v32  ;;  %v449_v39 = vpop.f32.mrf.mxu0  ;;  %v577_v40 = vpop.f32.mrf.mxu1  ;;  %v2422_v53 = vadd.f32 %v1858_v34, %v2352_v38 }
  0xe9   :  { %1951 = vpow2.f32 %v808_v30  ;;  %v746_v43 = vmul.f32 1.442695, %v677_v35  ;;  %v810_v62 = vmul.f32 1.442695, %v709_v44  ;;  %v682_v1 = vsub.f32 0.0, %v2419_v46 }
  0xea   :  { %v1930_v45 = vpop.eup %1929  ;;  %1953 = vpow2.f32 %v750_v36  ;;  %v1827_v49 = vpop.f32.mrf.mxu0  ;;  %v714_v6 = vsub.f32 0.0, %v2422_v53  ;;  %v2427_v12 = vadd.f32 %v2352_v38, %v449_v39  ;;  %v2430_v18 = vadd.f32 %v2352_v38, %v577_v40 }
  0xeb   :  { %v1859_v50 = vpop.f32.mrf.mxu1  ;;  %v1932_v51 = vpop.eup %1931  ;;  %v866_v52 = vadd.f32 1.0, %v1930_v45  ;;  %1955 = vpow2.f32 %v814_v37  ;;  %v756_v17 = vmul.f32 1.442695, %v682_v1  ;;  %v2433_v25 = vadd.f32 %v1827_v49, %v2352_v38 }
  0xec   :  { %v1934_v54 = vpop.eup %1933  ;;  %v898_v57 = vadd.f32 1.0, %v1932_v51  ;;  %1957 = vpow2.f32 %v746_v43  ;;  %v452_v58 = vpop.f32.mrf.mxu0  ;;  %v820_v22 = vmul.f32 1.442695, %v714_v6  ;;  %v2436_v30 = vadd.f32 %v1859_v50, %v2352_v38 }
  0xed   :  { %v1936_v59 = vpop.eup %1935  ;;  %1959 = vrcp.f32 %v866_v52  ;;  %v864_v60 = vadd.f32 1.0, %v1934_v54  ;;  %v580_v2 = vpop.f32.mrf.mxu1  ;;  %v2439_v31 = vadd.f32 %v2352_v38, %v452_v58  ;;  %v680_v40 = vsub.f32 0.0, %v2427_v12 }
  0xee   :  { %1961 = vrcp.f32 %v898_v57  ;;  %v896_v63 = vadd.f32 1.0, %v1936_v59  ;;  %v1830_v9 = vpop.f32.mrf.mxu0  ;;  %v2442_v35 = vadd.f32 %v2352_v38, %v580_v2  ;;  %v712_v50 = vsub.f32 0.0, %v2430_v18 }
  0xef   :  { %v1938_v3 = vpop.eup %1937  ;;  %1963 = vrcp.f32 %v864_v60  ;;  %v1862_v19 = vpop.f32.mrf.mxu1  ;;  %v2445_v36 = vadd.f32 %v1830_v9, %v2352_v38  ;;  %v683_v51 = vsub.f32 0.0, %v2433_v25  ;;  %v715_v57 = vsub.f32 0.0, %v2436_v30 }
  0xf0   :  { %v1940_v7 = vpop.eup %1939  ;;  %1965 = vrcp.f32 %v896_v63  ;;  %v867_v8 = vadd.f32 1.0, %v1938_v3  ;;  %v465_v32 = vpop.f32.mrf.mxu0  ;;  %v2449_v43 = vadd.f32 %v1862_v19, %v2352_v38  ;;  %v681_v58 = vsub.f32 0.0, %v2439_v31 }
  0xf1   :  { %v1942_v10 = vpop.eup %1941  ;;  %v899_v11 = vadd.f32 1.0, %v1940_v7  ;;  %1967 = vpow2.f32 %v810_v62  ;;  %v593_v44 = vpop.f32.mrf.mxu1  ;;  %v713_v63 = vsub.f32 0.0, %v2442_v35  ;;  %v686_v1 = vsub.f32 0.0, %v2445_v36 }
  0xf2   :  { %v1944_v13 = vpop.eup %1943  ;;  %1969 = vrcp.f32 %v867_v8  ;;  %v865_v15 = vadd.f32 1.0, %v1942_v10  ;;  %v1831_v59 = vpop.f32.mrf.mxu0  ;;  %v718_v6 = vsub.f32 0.0, %v2449_v43  ;;  %v2459_v7 = vadd.f32 %v2352_v38, %v465_v32 }
  0xf3   :  { %v1946_v20 = vpop.eup %1945  ;;  %1971 = vrcp.f32 %v899_v11  ;;  %v897_v21 = vadd.f32 1.0, %v1944_v13  ;;  %v1863_v8 = vpop.f32.mrf.mxu1  ;;  %v752_v10 = vmul.f32 1.442695, %v680_v40  ;;  %v2462_v11 = vadd.f32 %v2352_v38, %v593_v44 }
  0xf4   :  { %v1948_v26 = vpop.eup %1947  ;;  %1973 = vrcp.f32 %v865_v15  ;;  %v870_v27 = vadd.f32 1.0, %v1946_v20  ;;  %v2465_v13 = vadd.f32 %v1831_v59, %v2352_v38  ;;  %v816_v19 = vmul.f32 1.442695, %v712_v50 }
  0xf5   :  { %v1950_v33 = vpop.eup %1949  ;;  %1975 = vrcp.f32 %v897_v21  ;;  %v902_v34 = vadd.f32 1.0, %v1948_v26  ;;  %v758_v20 = vmul.f32 1.442695, %v683_v51  ;;  %v822_v21 = vmul.f32 1.442695, %v715_v57  ;;  %v468_v26 = vpop.f32.mrf.mxu0 }
  0xf6   :  { %v1952_v37 = vpop.eup %1951  ;;  %1977 = vrcp.f32 %v870_v27  ;;  %v868_v39 = vadd.f32 1.0, %v1950_v33  ;;  %v754_v32 = vmul.f32 1.442695, %v681_v58  ;;  %v818_v33 = vmul.f32 1.442695, %v713_v63 }
  0xf7   :  { %v1954_v45 = vpop.eup %1953  ;;  %1979 = vrcp.f32 %v902_v34  ;;  %v900_v49 = vadd.f32 1.0, %v1952_v37  ;;  %v2468_v34 = vadd.f32 %v1863_v8, %v2352_v38  ;;  %v828_v40 = vmul.f32 1.442695, %v718_v6  ;;  %v1834_v58 = vpop.f32.mrf.mxu0 }
  0xf8   :  { %v1956_v52 = vpop.eup %1955  ;;  %1981 = vrcp.f32 %v868_v39  ;;  %v871_v54 = vadd.f32 1.0, %v1954_v45  ;;  %v764_v39 = vmul.f32 1.442695, %v686_v1  ;;  %v684_v44 = vsub.f32 0.0, %v2459_v7  ;;  %v596_v45 = vpop.f32.mrf.mxu1 }
  0xf9   :  { %v1958_v60 = vpop.eup %1957  ;;  %1983 = vrcp.f32 %v900_v49  ;;  %v903_v62 = vadd.f32 1.0, %v1956_v52  ;;  %v716_v50 = vsub.f32 0.0, %v2462_v11  ;;  %v687_v51 = vsub.f32 0.0, %v2465_v13 }
  0xfa   :  { %v1960_v2 = vpop.eup %1959  ;;  %1985 = vrcp.f32 %v871_v54  ;;  %v869_v3 = vadd.f32 1.0, %v1958_v60  ;;  %v719_v63 = vsub.f32 0.0, %v2468_v34 }
  0xfb   :  { %v1962_v9 = vpop.eup %1961  ;;  %1987 = vrcp.f32 %v903_v62  ;;  %v994_v54 = vmul.f32 %v1960_v2, %v2355_v41 }
  0xfc   :  { %v1964_v15 = vpop.eup %1963  ;;  %1989 = vrcp.f32 %v869_v3  ;;  %v1026_v60 = vmul.f32 %v1962_v9, %v2358_v42 }
  0xfd   :  { %v1966_v27 = vpop.eup %1965  ;;  %1991 = vpow2.f32 %v756_v17  ;;  %v992_v3 = vmul.f32 %v1964_v15, %v2363_v47  ;;  %v760_v47 = vmul.f32 1.442695, %v684_v44 }
  0xfe   :  { %v1968_v37 = vpop.eup %1967  ;;  %1993 = vpow2.f32 %v820_v22  ;;  %v2476_v22 = vadd.f32 %v2352_v38, %v468_v26  ;;  %v1024_v8 = vmul.f32 %v1966_v27, %v2366_v48  ;;  %v766_v26 = vmul.f32 1.442695, %v687_v51 }
  0xff   :  { %v1970_v49 = vpop.eup %1969  ;;  %v901_v52 = vadd.f32 1.0, %v1968_v37  ;;  %1995 = vpow2.f32 %v752_v10  ;;  %v2504_v37 = vadd.f32 %v1834_v58, %v2352_v38 }
 0x100   :  { %v1972_v17 = vpop.eup %1971  ;;  %v995_v57 = vmul.f32 %v1970_v49, %v2371_v55  ;;  %1997 = vpow2.f32 %v816_v19  ;;  %v1866_v55 = vpop.f32.mrf.mxu1  ;;  %v685_v9 = vsub.f32 0.0, %v2476_v22 }
 0x101   :  { %v1974_v59 = vpop.eup %1973  ;;  %v1027_v62 = vmul.f32 %v1972_v17, %v2374_v56  ;;  %1999 = vrcp.f32 %v901_v52 }
 0x102   :  { %v1976_v1 = vpop.eup %1975  ;;  %v1586_v6 = vpack.c.bf16 %v995_v57, %v994_v54  ;;  %v993_v41 = vmul.f32 %v1974_v59, %v2377_v61  ;;  %2001 = vpow2.f32 %v758_v20  ;;  %v481_v61 = vpop.f32.mrf.mxu0  ;;  %v2493_v20 = vadd.f32 %v2352_v38, %v596_v45 }
 0x103   :  { %v1978_v2 = vpop.eup %1977  ;;  %v1666_v10 = vpack.c.bf16 %v1027_v62, %v1026_v60  ;;  %v1025_v19 = vmul.f32 %v1976_v1, %v2382_v0  ;;  %2003 = vpow2.f32 %v822_v21  ;;  %v824_v0 = vmul.f32 1.442695, %v716_v50  ;;  %v2498_v27 = vpop.f32.mrf.mxu1 }
 0x104   :  { %v1980_v42 = vpop.eup %1979  ;;  %1738 = vst [vmem:[%s2782_s3 + $0x8] sm:$0xff] %v1586_v6   ;;  %v1581_v56 = vpack.c.bf16 %v993_v41, %v992_v3  ;;  %2005 = vpow2.f32 %v754_v32  ;;  %v998_v45 = vmul.f32 %v1978_v2, %v2386_v4  ;;  %v1835_v52 = vpop.f32.mrf.mxu0  ;;  %v2520_v6 = vadd.f32 %v1866_v55, %v2352_v38 }
 0x105   :  { %v1982_v15 = vpop.eup %1981  ;;  %1754 = vst [vmem:[%s2782_s3 + $0x88] sm:$0xff] %v1666_v10   ;;  %v1661_v48 = vpack.c.bf16 %v1025_v19, %v1024_v8  ;;  %2007 = vpow2.f32 %v818_v33  ;;  %v830_v33 = vmul.f32 1.442695, %v719_v63  ;;  %v1030_v51 = vmul.f32 %v1980_v42, %v2389_v5  ;;  %v1867_v4 = vpop.f32.mrf.mxu1 }
 0x106   :  { %v1984_v21 = vpop.eup %1983  ;;  %1582 = vst [vmem:[%s2782_s3] sm:$0xff] %v1581_v56   ;;  %2009 = vpow2.f32 %v764_v39  ;;  %v762_v39 = vmul.f32 1.442695, %v685_v9  ;;  %v996_v57 = vmul.f32 %v1982_v15, %v2395_v14  ;;  %v484_v1 = vpop.f32.mrf.mxu0  ;;  %v690_v8 = vsub.f32 0.0, %v2504_v37 }
 0x107   :  { %v1986_v32 = vpop.eup %1985  ;;  %1753 = vst [vmem:[%s2782_s3 + $0x80] sm:$0xff] %v1661_v48   ;;  %2011 = vpow2.f32 %v828_v40  ;;  %v717_v40 = vsub.f32 0.0, %v2493_v20  ;;  %v2527_v10 = vadd.f32 %v2352_v38, %v481_v61  ;;  %v612_v19 = vpop.f32.mrf.mxu1  ;;  %v1028_v56 = vmul.f32 %v1984_v21, %v2398_v16 }
 0x108   :  { %v1988_v44 = vpop.eup %1987  ;;  %v999_v49 = vmul.f32 %v1986_v32, %v2403_v23  ;;  %2013 = vpow2.f32 %v760_v47  ;;  %v1838_v15 = vpop.f32.mrf.mxu0  ;;  %v722_v32 = vsub.f32 0.0, %v2520_v6 }
 0x109   :  { %v1990_v50 = vpop.eup %1989  ;;  %v1031_v17 = vmul.f32 %v1988_v44, %v2406_v24  ;;  %2015 = vpow2.f32 %v824_v0  ;;  %v772_v44 = vmul.f32 1.442695, %v690_v8  ;;  %v1870_v16 = vpop.f32.mrf.mxu1 }
 0x10a   :  { %v1992_v54 = vpop.eup %1991  ;;  %v1596_v58 = vpack.c.bf16 %v999_v49, %v998_v45  ;;  %v997_v59 = vmul.f32 %v1990_v50, %v2409_v28  ;;  %2017 = vpow2.f32 %v766_v26  ;;  %v826_v28 = vmul.f32 1.442695, %v717_v40 }
 0x10b   :  { %v1994_v23 = vpop.eup %1993  ;;  %v1676_v60 = vpack.c.bf16 %v1031_v17, %v1030_v51  ;;  %v874_v62 = vadd.f32 1.0, %v1992_v54  ;;  %2019 = vpow2.f32 %v830_v33  ;;  %v688_v45 = vsub.f32 0.0, %v2527_v10  ;;  %v497_v54 = vpop.f32.mrf.mxu0 }
 0x10c   :  { %v1996_v63 = vpop.eup %1995  ;;  %1740 = vst [vmem:[%s2782_s3 + $0x18] sm:$0xff] %v1596_v58   ;;  %v1591_v5 = vpack.c.bf16 %v997_v59, %v996_v57  ;;  %v906_v24 = vadd.f32 1.0, %v1994_v23  ;;  %2021 = vpow2.f32 %v762_v39  ;;  %v2538_v49 = vadd.f32 %v2352_v38, %v2498_v27 }
 0x10d   :  { %v1998_v3 = vpop.eup %1997  ;;  %1756 = vst [vmem:[%s2782_s3 + $0x98] sm:$0xff] %v1676_v60   ;;  %2023 = vrcp.f32 %v874_v62  ;;  %v872_v14 = vadd.f32 1.0, %v1996_v63  ;;  %v2541_v39 = vadd.f32 %v1835_v52, %v2352_v38  ;;  %v2544_v17 = vadd.f32 %v1867_v4, %v2352_v38  ;;  %v625_v62 = vpop.f32.mrf.mxu1 }
 0x10e   :  { %v2000_v41 = vpop.eup %1999  ;;  %1739 = vst [vmem:[%s2782_s3 + $0x10] sm:$0xff] %v1591_v5   ;;  %2025 = vrcp.f32 %v906_v24  ;;  %v904_v2 = vadd.f32 1.0, %v1998_v3  ;;  %v2547_v40 = vadd.f32 %v2352_v38, %v484_v1  ;;  %v836_v59 = vmul.f32 1.442695, %v722_v32 }
 0x10f   :  { %v2002_v42 = vpop.eup %2001  ;;  %v1029_v47 = vmul.f32 %v2000_v41, %v2412_v29  ;;  %2027 = vrcp.f32 %v872_v14  ;;  %v2550_v27 = vadd.f32 %v2352_v38, %v612_v19  ;;  %v2553_v60 = vadd.f32 %v1838_v15, %v2352_v38 }
 0x110   :  { %v2004_v55 = vpop.eup %2003  ;;  %2029 = vrcp.f32 %v904_v2  ;;  %v875_v9 = vadd.f32 1.0, %v2002_v42  ;;  %v2556_v4 = vadd.f32 %v1870_v16, %v2352_v38  ;;  %v720_v24 = vsub.f32 0.0, %v2538_v49  ;;  %v1839_v2 = vpop.f32.mrf.mxu0 }
 0x111   :  { %v2006_v48 = vpop.eup %2005  ;;  %v1671_v0 = vpack.c.bf16 %v1029_v47, %v1028_v56  ;;  %v907_v26 = vadd.f32 1.0, %v2004_v55  ;;  %2031 = vpow2.f32 %v826_v28  ;;  %v691_v1 = vsub.f32 0.0, %v2541_v39 }
 0x112   :  { %v2008_v33 = vpop.eup %2007  ;;  %2033 = vrcp.f32 %v875_v9  ;;  %v873_v61 = vadd.f32 1.0, %v2006_v48  ;;  %v723_v28 = vsub.f32 0.0, %v2544_v17  ;;  %v689_v41 = vsub.f32 0.0, %v2547_v40  ;;  %v1871_v48 = vpop.f32.mrf.mxu1 }
 0x113   :  { %v2010_v21 = vpop.eup %2009  ;;  %1755 = vst [vmem:[%s2782_s3 + $0x90] sm:$0xff] %v1671_v0   ;;  %2035 = vrcp.f32 %v907_v26  ;;  %v905_v29 = vadd.f32 1.0, %v2008_v33  ;;  %v721_v42 = vsub.f32 0.0, %v2550_v27  ;;  %v2564_v56 = vadd.f32 %v2352_v38, %v497_v54 }
 0x114   :  { %v2012_v50 = vpop.eup %2011  ;;  %2037 = vrcp.f32 %v873_v61  ;;  %v878_v51 = vadd.f32 1.0, %v2010_v21  ;;  %v694_v9 = vsub.f32 0.0, %v2553_v60  ;;  %v726_v15 = vsub.f32 0.0, %v2556_v4 }
 0x115   :  { %v2014_v57 = vpop.eup %2013  ;;  %2039 = vrcp.f32 %v905_v29  ;;  %v910_v58 = vadd.f32 1.0, %v2012_v50  ;;  %v768_v26 = vmul.f32 1.442695, %v688_v45  ;;  %v2569_v32 = vadd.f32 %v2352_v38, %v625_v62  ;;  %v500_v50 = vpop.f32.mrf.mxu0 }
 0x116   :  { %v2016_v23 = vpop.eup %2015  ;;  %2041 = vrcp.f32 %v878_v51  ;;  %v876_v52 = vadd.f32 1.0, %v2014_v57  ;;  %v2572_v33 = vadd.f32 %v1839_v2, %v2352_v38  ;;  %v832_v16 = vmul.f32 1.442695, %v720_v24 }
 0x117   :  { %v2018_v63 = vpop.eup %2017  ;;  %2043 = vrcp.f32 %v910_v58  ;;  %v908_v5 = vadd.f32 1.0, %v2016_v23  ;;  %v774_v21 = vmul.f32 1.442695, %v691_v1  ;;  %v838_v29 = vmul.f32 1.442695, %v723_v28 }
 0x118   :  { %v2020_v3 = vpop.eup %2019  ;;  %2045 = vrcp.f32 %v876_v52  ;;  %v879_v14 = vadd.f32 1.0, %v2018_v63  ;;  %v770_v54 = vmul.f32 1.442695, %v689_v41  ;;  %v834_v57 = vmul.f32 1.442695, %v721_v42  ;;  %v628_v63 = vpop.f32.mrf.mxu1 }
 0x119   :  { %v2022_v8 = vpop.eup %2021  ;;  %2047 = vrcp.f32 %v908_v5  ;;  %v911_v19 = vadd.f32 1.0, %v2020_v3  ;;  %v2575_v58 = vadd.f32 %v1871_v48, %v2352_v38  ;;  %v780_v23 = vmul.f32 1.442695, %v694_v9  ;;  %v1842_v41 = vpop.f32.mrf.mxu0 }
 0x11a   :  { %v2024_v47 = vpop.eup %2023  ;;  %2049 = vrcp.f32 %v879_v14  ;;  %v877_v55 = vadd.f32 1.0, %v2022_v8  ;;  %v844_v52 = vmul.f32 1.442695, %v726_v15  ;;  %v692_v62 = vsub.f32 0.0, %v2564_v56 }
 0x11b   :  { %v2026_v0 = vpop.eup %2025  ;;  %2051 = vrcp.f32 %v911_v19  ;;  %v724_v24 = vsub.f32 0.0, %v2569_v32  ;;  %v695_v1 = vsub.f32 0.0, %v2572_v33  ;;  %v1002_v14 = vmul.f32 %v2024_v47, %v2419_v46 }
 0x11c   :  { %v2028_v61 = vpop.eup %2027  ;;  %2053 = vrcp.f32 %v877_v55  ;;  %v1034_v8 = vmul.f32 %v2026_v0, %v2422_v53  ;;  %v727_v42 = vsub.f32 0.0, %v2575_v58 }
 0x11d   :  { %v2030_v51 = vpop.eup %2029  ;;  %2055 = vpow2.f32 %v772_v44  ;;  %v1000_v9 = vmul.f32 %v2028_v61, %v2427_v12  ;;  %v776_v12 = vmul.f32 1.442695, %v692_v62 }
 0x11e   :  { %v2032_v45 = vpop.eup %2031  ;;  %2057 = vpow2.f32 %v836_v59  ;;  %v2583_v59 = vadd.f32 %v2352_v38, %v500_v50  ;;  %v1032_v48 = vmul.f32 %v2030_v51, %v2430_v18  ;;  %v782_v50 = vmul.f32 1.442695, %v695_v1 }
 0x11f   :  { %v2034_v5 = vpop.eup %2033  ;;  %v909_v3 = vadd.f32 1.0, %v2032_v45  ;;  %2059 = vpow2.f32 %v768_v26  ;;  %v2613_v45 = vadd.f32 %v1842_v41, %v2352_v38 }
 0x120   :  { %v2036_v44 = vpop.eup %2035  ;;  %v1003_v28 = vmul.f32 %v2034_v5, %v2433_v25  ;;  %2061 = vpow2.f32 %v832_v16  ;;  %v1874_v25 = vpop.f32.mrf.mxu1  ;;  %v693_v0 = vsub.f32 0.0, %v2583_v59 }
 0x121   :  { %v2038_v2 = vpop.eup %2037  ;;  %v1035_v19 = vmul.f32 %v2036_v44, %v2436_v30  ;;  %2063 = vrcp.f32 %v909_v3  ;;  %v2616_v62 = vadd.f32 %v1874_v25, %v2352_v38 }
 0x122   :  { %v2040_v55 = vpop.eup %2039  ;;  %v1606_v15 = vpack.c.bf16 %v1003_v28, %v1002_v14  ;;  %v1001_v46 = vmul.f32 %v2038_v2, %v2439_v31  ;;  %2065 = vpow2.f32 %v774_v21  ;;  %v2596_v31 = vpop.f32.mrf.mxu0  ;;  %v2602_v21 = vadd.f32 %v2352_v38, %v628_v63 }
 0x123   :  { %v2042_v47 = vpop.eup %2041  ;;  %v1686_v26 = vpack.c.bf16 %v1035_v19, %v1034_v8  ;;  %v1033_v16 = vmul.f32 %v2040_v55, %v2442_v35  ;;  %2067 = vpow2.f32 %v838_v29  ;;  %v840_v35 = vmul.f32 1.442695, %v724_v24  ;;  %v2607_v51 = vpop.f32.mrf.mxu1 }
 0x124   :  { %v2044_v53 = vpop.eup %2043  ;;  %1742 = vst [vmem:[%s2782_s3 + $0x28] sm:$0xff] %v1606_v15   ;;  %v1601_v30 = vpack.c.bf16 %v1001_v46, %v1000_v9  ;;  %2069 = vpow2.f32 %v770_v54  ;;  %v1006_v5 = vmul.f32 %v2042_v47, %v2445_v36  ;;  %v778_v3 = vmul.f32 1.442695, %v693_v0  ;;  %v1843_v24 = vpop.f32.mrf.mxu0 }
 0x125   :  { %v2046_v61 = vpop.eup %2045  ;;  %1758 = vst [vmem:[%s2782_s3 + $0xa8] sm:$0xff] %v1686_v26   ;;  %v1681_v18 = vpack.c.bf16 %v1033_v16, %v1032_v48  ;;  %2071 = vpow2.f32 %v834_v57  ;;  %v846_v57 = vmul.f32 1.442695, %v727_v42  ;;  %v1038_v44 = vmul.f32 %v2044_v53, %v2449_v43  ;;  %v1875_v36 = vpop.f32.mrf.mxu1 }
 0x126   :  { %v2048_v29 = vpop.eup %2047  ;;  %1741 = vst [vmem:[%s2782_s3 + $0x20] sm:$0xff] %v1601_v30   ;;  %2073 = vpow2.f32 %v780_v23  ;;  %v725_v14 = vsub.f32 0.0, %v2602_v21  ;;  %v1004_v41 = vmul.f32 %v2046_v61, %v2459_v7  ;;  %v516_v9 = vpop.f32.mrf.mxu0  ;;  %v698_v47 = vsub.f32 0.0, %v2613_v45 }
 0x127   :  { %v2050_v54 = vpop.eup %2049  ;;  %1757 = vst [vmem:[%s2782_s3 + $0xa0] sm:$0xff] %v1681_v18   ;;  %2075 = vpow2.f32 %v844_v52  ;;  %v730_v48 = vsub.f32 0.0, %v2616_v62  ;;  %v644_v26 = vpop.f32.mrf.mxu1  ;;  %v1036_v53 = vmul.f32 %v2048_v29, %v2462_v11 }
 0x128   :  { %v2052_v63 = vpop.eup %2051  ;;  %v1007_v23 = vmul.f32 %v2050_v54, %v2465_v13  ;;  %2077 = vpow2.f32 %v776_v12  ;;  %v1846_v61 = vpop.f32.mrf.mxu0  ;;  %v2640_v54 = vadd.f32 %v2352_v38, %v2596_v31  ;;  %v2652_v31 = vadd.f32 %v1843_v24, %v2352_v38 }
 0x129   :  { %v2054_v1 = vpop.eup %2053  ;;  %v1039_v52 = vmul.f32 %v2052_v63, %v2468_v34  ;;  %2079 = vpow2.f32 %v840_v35  ;;  %v2642_v11 = vmul.f32 1.442695, %v730_v48 }
 0x12a   :  { %v2056_v28 = vpop.eup %2055  ;;  %v1616_v2 = vpack.c.bf16 %v1007_v23, %v1006_v5  ;;  %v1005_v8 = vmul.f32 %v2054_v1, %v2476_v22  ;;  %2081 = vpow2.f32 %v782_v50  ;;  %v842_v22 = vmul.f32 1.442695, %v725_v14 }
 0x12b   :  { %v2058_v13 = vpop.eup %2057  ;;  %v1696_v19 = vpack.c.bf16 %v1039_v52, %v1038_v44  ;;  %v882_v42 = vadd.f32 1.0, %v2056_v28  ;;  %2083 = vpow2.f32 %v846_v57  ;;  %v788_v5 = vmul.f32 1.442695, %v698_v47  ;;  %v529_v28 = vpop.f32.mrf.mxu0 }
 0x12c   :  { %v2060_v55 = vpop.eup %2059  ;;  %1744 = vst [vmem:[%s2782_s3 + $0x38] sm:$0xff] %v1616_v2   ;;  %v1611_v43 = vpack.c.bf16 %v1005_v8, %v1004_v41  ;;  %v914_v34 = vadd.f32 1.0, %v2058_v13  ;;  %2085 = vpow2.f32 %v778_v3  ;;  %v2649_v3 = vadd.f32 %v2352_v38, %v2607_v51 }
 0x12d   :  { %v2062_v15 = vpop.eup %2061  ;;  %1760 = vst [vmem:[%s2782_s3 + $0xb8] sm:$0xff] %v1696_v19   ;;  %2087 = vrcp.f32 %v882_v42  ;;  %v880_v7 = vadd.f32 1.0, %v2060_v55  ;;  %v2655_v52 = vadd.f32 %v1875_v36, %v2352_v38  ;;  %v2658_v14 = vadd.f32 %v2352_v38, %v516_v9 }
 0x12e   :  { %v2064_v46 = vpop.eup %2063  ;;  %1743 = vst [vmem:[%s2782_s3 + $0x30] sm:$0xff] %v1611_v43   ;;  %2089 = vrcp.f32 %v914_v34  ;;  %v912_v25 = vadd.f32 1.0, %v2062_v15  ;;  %v2661_v8 = vadd.f32 %v2352_v38, %v644_v26  ;;  %v2664_v51 = vadd.f32 %v1846_v61, %v2352_v38 }
 0x12f   :  { %v2066_v16 = vpop.eup %2065  ;;  %v1037_v30 = vmul.f32 %v2064_v46, %v2493_v20  ;;  %2091 = vrcp.f32 %v880_v7  ;;  %v1878_v20 = vpop.f32.mrf.mxu1  ;;  %v696_v19 = vsub.f32 0.0, %v2640_v54  ;;  %v728_v34 = vsub.f32 0.0, %v2649_v3 }
 0x130   :  { %v2068_v12 = vpop.eup %2067  ;;  %2093 = vrcp.f32 %v912_v25  ;;  %v883_v0 = vadd.f32 1.0, %v2066_v16  ;;  %v2668_v36 = vadd.f32 %v1878_v20, %v2352_v38  ;;  %v699_v9 = vsub.f32 0.0, %v2652_v31  ;;  %v1847_v25 = vpop.f32.mrf.mxu0 }
 0x131   :  { %v2070_v18 = vpop.eup %2069  ;;  %v1691_v35 = vpack.c.bf16 %v1037_v30, %v1036_v53  ;;  %v915_v50 = vadd.f32 1.0, %v2068_v12  ;;  %2095 = vpow2.f32 %v842_v22  ;;  %v657_v42 = vpop.f32.mrf.mxu1  ;;  %v731_v22 = vsub.f32 0.0, %v2655_v52  ;;  %v2185_v12 = vld [vmem:[%s2781_s2] ss:$0 sm:$0xff] }
 0x132   :  { %v2072_v57 = vpop.eup %2071  ;;  %2097 = vrcp.f32 %v883_v0  ;;  %v881_v63 = vadd.f32 1.0, %v2070_v18  ;;  %v697_v46 = vsub.f32 0.0, %v2658_v14  ;;  %v729_v48 = vsub.f32 0.0, %v2661_v8 }
 0x133   :  { %v2074_v29 = vpop.eup %2073  ;;  %1759 = vst [vmem:[%s2782_s3 + $0xb0] sm:$0xff] %v1691_v35   ;;  %2099 = vrcp.f32 %v915_v50  ;;  %v913_v23 = vadd.f32 1.0, %v2072_v57  ;;  %v702_v26 = vsub.f32 0.0, %v2664_v51  ;;  %v734_v30 = vsub.f32 0.0, %v2668_v36  ;;  %v1879_v61 = vpop.f32.mrf.mxu1 }
 0x134   :  { %v2076_v1 = vpop.eup %2075  ;;  %2101 = vrcp.f32 %v881_v63  ;;  %v886_v44 = vadd.f32 1.0, %v2074_v29  ;;  %v2680_v0 = vadd.f32 %v2185_v12, %v529_v28  ;;  %v784_v35 = vmul.f32 1.442695, %v696_v19  ;;  %v532_v28 = vpop.f32.mrf.mxu0 }
 0x135   :  { %v2078_v41 = vpop.eup %2077  ;;  %2103 = vrcp.f32 %v913_v23  ;;  %v918_v2 = vadd.f32 1.0, %v2076_v1  ;;  %v2682_v50 = vadd.f32 %v2185_v12, %v657_v42  ;;  %v2684_v57 = vadd.f32 %v2185_v12, %v1847_v25 }
 0x136   :  { %v2080_v24 = vpop.eup %2079  ;;  %2105 = vrcp.f32 %v886_v44  ;;  %v884_v13 = vadd.f32 1.0, %v2078_v41  ;;  %v848_v20 = vmul.f32 1.442695, %v728_v34  ;;  %v790_v29 = vmul.f32 1.442695, %v699_v9 }
 0x137   :  { %v2082_v55 = vpop.eup %2081  ;;  %2107 = vrcp.f32 %v918_v2  ;;  %v916_v43 = vadd.f32 1.0, %v2080_v24  ;;  %v854_v23 = vmul.f32 1.442695, %v731_v22  ;;  %v786_v44 = vmul.f32 1.442695, %v697_v46 }
 0x138   :  { %v2084_v15 = vpop.eup %2083  ;;  %2109 = vrcp.f32 %v884_v13  ;;  %v887_v7 = vadd.f32 1.0, %v2082_v55  ;;  %v850_v41 = vmul.f32 1.442695, %v729_v48  ;;  %v2686_v2 = vadd.f32 %v2185_v12, %v1879_v61 }
 0x139   :  { %v2086_v47 = vpop.eup %2085  ;;  %2111 = vrcp.f32 %v916_v43  ;;  %v919_v38 = vadd.f32 1.0, %v2084_v15  ;;  %v796_v13 = vmul.f32 1.442695, %v702_v26  ;;  %v860_v19 = vmul.f32 1.442695, %v734_v30 }
 0x13a   :  { %v2088_v16 = vpop.eup %2087  ;;  %2113 = vrcp.f32 %v887_v7  ;;  %v885_v53 = vadd.f32 1.0, %v2086_v47  ;;  %v700_v42 = vsub.f32 0.0, %v2680_v0  ;;  %v732_v34 = vsub.f32 0.0, %v2682_v50 }
 0x13b   :  { %v2090_v18 = vpop.eup %2089  ;;  %2115 = vrcp.f32 %v919_v38  ;;  %v703_v9 = vsub.f32 0.0, %v2684_v57  ;;  %v1010_v15 = vmul.f32 %v2088_v16, %v2504_v37  ;;  %v2694_v22 = vadd.f32 %v2185_v12, %v532_v28  ;;  %v660_v37 = vpop.f32.mrf.mxu1 }
 0x13c   :  { %v2092_v63 = vpop.eup %2091  ;;  %2117 = vrcp.f32 %v885_v53  ;;  %v1042_v46 = vmul.f32 %v2090_v18, %v2520_v6  ;;  %v735_v47 = vsub.f32 0.0, %v2686_v2 }
 0x13d   :  { %v2094_v1 = vpop.eup %2093  ;;  %2119 = vpow2.f32 %v788_v5  ;;  %v1008_v48 = vmul.f32 %v2092_v63, %v2527_v10  ;;  %v792_v10 = vmul.f32 1.442695, %v700_v42  ;;  %v701_v18 = vsub.f32 0.0, %v2694_v22 }
 0x13e   :  { %v2096_v24 = vpop.eup %2095  ;;  %2121 = vpow2.f32 %v2642_v11  ;;  %v1040_v16 = vmul.f32 %v2094_v1, %v2538_v49 }
 0x13f   :  { %v2098_v55 = vpop.eup %2097  ;;  %v917_v43 = vadd.f32 1.0, %v2096_v24  ;;  %2123 = vpow2.f32 %v784_v35  ;;  %v856_v35 = vmul.f32 1.442695, %v732_v34 }
 0x140   :  { %v2100_v5 = vpop.eup %2099  ;;  %v1011_v7 = vmul.f32 %v2098_v55, %v2541_v39  ;;  %2125 = vpow2.f32 %v848_v20  ;;  %v798_v20 = vmul.f32 1.442695, %v703_v9 }
 0x141   :  { %v2102_v11 = vpop.eup %2101  ;;  %v1043_v25 = vmul.f32 %v2100_v5, %v2544_v17  ;;  %2127 = vrcp.f32 %v917_v43 }
 0x142   :  { %v2104_v38 = vpop.eup %2103  ;;  %v1626_v26 = vpack.c.bf16 %v1011_v7, %v1010_v15  ;;  %v1009_v53 = vmul.f32 %v2102_v11, %v2547_v40  ;;  %2129 = vpow2.f32 %v790_v29 }
 0x143   :  { %v2106_v39 = vpop.eup %2105  ;;  %v1706_v30 = vpack.c.bf16 %v1043_v25, %v1042_v46  ;;  %v1041_v61 = vmul.f32 %v2104_v38, %v2550_v27  ;;  %2131 = vpow2.f32 %v854_v23  ;;  %v2710_v27 = vadd.f32 %v2185_v12, %v660_v37 }
 0x144   :  { %v2108_v6 = vpop.eup %2107  ;;  %1746 = vst [vmem:[%s2782_s3 + $0x48] sm:$0xff] %v1626_v26   ;;  %v1621_v17 = vpack.c.bf16 %v1009_v53, %v1008_v48  ;;  %2133 = vpow2.f32 %v786_v44  ;;  %v862_v23 = vmul.f32 1.442695, %v735_v47  ;;  %v1014_v44 = vmul.f32 %v2106_v39, %v2553_v60 }
 0x145   :  { %v2110_v40 = vpop.eup %2109  ;;  %1762 = vst [vmem:[%s2782_s3 + $0xc8] sm:$0xff] %v1706_v30   ;;  %v1701_v49 = vpack.c.bf16 %v1041_v61, %v1040_v16  ;;  %2135 = vpow2.f32 %v850_v41  ;;  %v794_v41 = vmul.f32 1.442695, %v701_v18  ;;  %v1046_v24 = vmul.f32 %v2108_v6, %v2556_v4 }
 0x146   :  { %v2112_v63 = vpop.eup %2111  ;;  %1745 = vst [vmem:[%s2782_s3 + $0x40] sm:$0xff] %v1621_v17   ;;  %2137 = vpow2.f32 %v796_v13  ;;  %v733_v42 = vsub.f32 0.0, %v2710_v27  ;;  %v1012_v43 = vmul.f32 %v2110_v40, %v2564_v56 }
 0x147   :  { %v2114_v29 = vpop.eup %2113  ;;  %1761 = vst [vmem:[%s2782_s3 + $0xc0] sm:$0xff] %v1701_v49   ;;  %2139 = vpow2.f32 %v860_v19  ;;  %v1044_v25 = vmul.f32 %v2112_v63, %v2569_v32 }
 0x148   :  { %v2116_v1 = vpop.eup %2115  ;;  %v1015_v12 = vmul.f32 %v2114_v29, %v2572_v33  ;;  %2141 = vpow2.f32 %v792_v10 }
 0x149   :  { %v2118_v28 = vpop.eup %2117  ;;  %v1047_v13 = vmul.f32 %v2116_v1, %v2575_v58  ;;  %2143 = vpow2.f32 %v856_v35 }
 0x14a   :  { %v2120_v55 = vpop.eup %2119  ;;  %v1636_v19 = vpack.c.bf16 %v1015_v12, %v1014_v44  ;;  %v1013_v34 = vmul.f32 %v2118_v28, %v2583_v59  ;;  %2145 = vpow2.f32 %v798_v20  ;;  %v858_v59 = vmul.f32 1.442695, %v733_v42 }
 0x14b   :  { %v2122_v60 = vpop.eup %2121  ;;  %v1716_v9 = vpack.c.bf16 %v1047_v13, %v1046_v24  ;;  %v890_v33 = vadd.f32 1.0, %v2120_v55  ;;  %2147 = vpow2.f32 %v862_v23 }
 0x14c   :  { %v2124_v5 = vpop.eup %2123  ;;  %1748 = vst [vmem:[%s2782_s3 + $0x58] sm:$0xff] %v1636_v19   ;;  %v1631_v4 = vpack.c.bf16 %v1013_v34, %v1012_v43  ;;  %v922_v58 = vadd.f32 1.0, %v2122_v60  ;;  %2149 = vpow2.f32 %v794_v41 }
 0x14d   :  { %v2126_v15 = vpop.eup %2125  ;;  %1764 = vst [vmem:[%s2782_s3 + $0xd8] sm:$0xff] %v1716_v9   ;;  %2151 = vrcp.f32 %v890_v33  ;;  %v888_v56 = vadd.f32 1.0, %v2124_v5 }
 0x14e   :  { %v2128_v7 = vpop.eup %2127  ;;  %1747 = vst [vmem:[%s2782_s3 + $0x50] sm:$0xff] %v1631_v4   ;;  %2153 = vrcp.f32 %v922_v58  ;;  %v920_v11 = vadd.f32 1.0, %v2126_v15 }
 0x14f   :  { %v2130_v46 = vpop.eup %2129  ;;  %v1045_v47 = vmul.f32 %v2128_v7, %v2602_v21  ;;  %2155 = vrcp.f32 %v888_v56 }
 0x150   :  { %v2132_v38 = vpop.eup %2131  ;;  %2157 = vrcp.f32 %v920_v11  ;;  %v891_v48 = vadd.f32 1.0, %v2130_v46 }
 0x151   :  { %v2134_v26 = vpop.eup %2133  ;;  %v1711_v53 = vpack.c.bf16 %v1045_v47, %v1044_v25  ;;  %v923_v37 = vadd.f32 1.0, %v2132_v38  ;;  %2159 = vpow2.f32 %v858_v59 }
 0x152   :  { %v2136_v39 = vpop.eup %2135  ;;  %2161 = vrcp.f32 %v891_v48  ;;  %v889_v16 = vadd.f32 1.0, %v2134_v26 }
 0x153   :  { %v2138_v30 = vpop.eup %2137  ;;  %1763 = vst [vmem:[%s2782_s3 + $0xd0] sm:$0xff] %v1711_v53   ;;  %2163 = vrcp.f32 %v923_v37  ;;  %v921_v32 = vadd.f32 1.0, %v2136_v39 }
 0x154   :  { %v2140_v61 = vpop.eup %2139  ;;  %2165 = vrcp.f32 %v889_v16  ;;  %v894_v21 = vadd.f32 1.0, %v2138_v30 }
 0x155   :  { %v2142_v6 = vpop.eup %2141  ;;  %2167 = vrcp.f32 %v921_v32  ;;  %v926_v17 = vadd.f32 1.0, %v2140_v61 }
 0x156   :  { %v2144_v10 = vpop.eup %2143  ;;  %v892_v18 = vadd.f32 1.0, %v2142_v6  ;;  %2169 = vrcp.f32 %v894_v21 }
 0x157   :  { %v2146_v40 = vpop.eup %2145  ;;  %2171 = vrcp.f32 %v926_v17  ;;  %v924_v44 = vadd.f32 1.0, %v2144_v10 }
 0x158   :  { %v2148_v49 = vpop.eup %2147  ;;  %v895_v35 = vadd.f32 1.0, %v2146_v40  ;;  %2173 = vrcp.f32 %v892_v18 }
 0x159   :  { %v2150_v63 = vpop.eup %2149  ;;  %v927_v20 = vadd.f32 1.0, %v2148_v49 }
 0x15a   :  { %v2152_v29 = vpop.eup %2151  ;;  %2175 = vrcp.f32 %v895_v35  ;;  %v893_v23 = vadd.f32 1.0, %v2150_v63 }
 0x15b   :  { %v2154_v1 = vpop.eup %2153  ;;  %2177 = vrcp.f32 %v927_v20  ;;  %v1018_v55 = vmul.f32 %v2152_v29, %v2613_v45 }
 0x15c   :  { %v2156_v12 = vpop.eup %2155  ;;  %2179 = vrcp.f32 %v893_v23  ;;  %v1050_v34 = vmul.f32 %v2154_v1, %v2616_v62 }
 0x15d   :  { %v2158_v41 = vpop.eup %2157  ;;  %2181 = vrcp.f32 %v924_v44  ;;  %v1016_v33 = vmul.f32 %v2156_v12, %v2640_v54 }
 0x15e   :  { %v2160_v28 = vpop.eup %2159  ;;  %v1048_v58 = vmul.f32 %v2158_v41, %v2649_v3 }
 0x15f   :  { %v2162_v24 = vpop.eup %2161  ;;  %v925_v13 = vadd.f32 1.0, %v2160_v28 }
 0x160   :  { %v2164_v42 = vpop.eup %2163  ;;  %v1019_v43 = vmul.f32 %v2162_v24, %v2652_v31 }
 0x161   :  { %v2166_v19 = vpop.eup %2165  ;;  %v1051_v60 = vmul.f32 %v2164_v42, %v2655_v52  ;;  %2183 = vrcp.f32 %v925_v13 }
 0x162   :  { %v2168_v9 = vpop.eup %2167  ;;  %v1646_v5 = vpack.c.bf16 %v1019_v43, %v1018_v55  ;;  %v1017_v4 = vmul.f32 %v2166_v19, %v2658_v14 }
 0x163   :  { %v1726_v15 = vpack.c.bf16 %v1051_v60, %v1050_v34  ;;  %v1049_v56 = vmul.f32 %v2168_v9, %v2661_v8  ;;  %v2170_v45 = vpop.eup %2169 }
 0x164   :  { %1750 = vst [vmem:[%s2782_s3 + $0x68] sm:$0xff] %v1646_v5   ;;  %v1641_v62 = vpack.c.bf16 %v1017_v4, %v1016_v33  ;;  %v2172_v31 = vpop.eup %2171  ;;  %v1022_v8 = vmul.f32 %v2170_v45, %v2664_v51 }
 0x165   :  { %1766 = vst [vmem:[%s2782_s3 + $0xe8] sm:$0xff] %v1726_v15   ;;  %v1721_v54 = vpack.c.bf16 %v1049_v56, %v1048_v58  ;;  %v2174_v52 = vpop.eup %2173  ;;  %v1054_v11 = vmul.f32 %v2172_v31, %v2668_v36 }
 0x166   :  { %1749 = vst [vmem:[%s2782_s3 + $0x60] sm:$0xff] %v1641_v62   ;;  %v1020_v25 = vmul.f32 %v2174_v52, %v2680_v0 }
 0x167   :  { %v2176_v3 = vpop.eup %2175  ;;  %1765 = vst [vmem:[%s2782_s3 + $0xe0] sm:$0xff] %v1721_v54  }
 0x168   :  { %v2178_v14 = vpop.eup %2177  ;;  %v1023_v59 = vmul.f32 %v2176_v3, %v2684_v57 }
 0x169   :  { %v2180_v7 = vpop.eup %2179  ;;  %v1055_v46 = vmul.f32 %v2178_v14, %v2686_v2 }
 0x16a   :  { %v1656_v47 = vpack.c.bf16 %v1023_v59, %v1022_v8  ;;  %v1021_v38 = vmul.f32 %v2180_v7, %v2694_v22  ;;  %v2182_v26 = vpop.eup %2181 }
 0x16b   :  { %v1736_v48 = vpack.c.bf16 %v1055_v46, %v1054_v11  ;;  %v1052_v36 = vmul.f32 %v2182_v26, %v2682_v50 }
 0x16c   :  { %1752 = vst [vmem:[%s2782_s3 + $0x78] sm:$0xff] %v1656_v47   ;;  %v1651_v53 = vpack.c.bf16 %v1021_v38, %v1020_v25 }
 0x16d   :  { %1768 = vst [vmem:[%s2782_s3 + $0xf8] sm:$0xff] %v1736_v48  }
 0x16e   :  { %v2184_v51 = vpop.eup %2183  ;;  %1751 = vst [vmem:[%s2782_s3 + $0x70] sm:$0xff] %v1651_v53  }
 0x16f   :  { %v1053_v0 = vmul.f32 %v2184_v51, %v2710_v27 }
 0x171   :  { %v1731_v57 = vpack.c.bf16 %v1053_v0, %v1052_v36 }
 0x173   :  { %1767 = vst [vmem:[%s2782_s3 + $0xf0] sm:$0xff] %v1731_v57  }

// kernel: _lambda_.29
= control target key start
LH: loop header
LB: loop body
LE: loop exit
PB: predicated region body
PF: predicated region fallthrough
CT: control target
= control target key end

     0   :  { %vm139_vm0 = vcmask 1043456   ;;  %vm114_vm1 = vcmask 588800   ;;  %s825_s1 = inlined_call_operand.vmem [shape: bf16[72,128], index: 1, kind: input, shape index: {}]   ;;  %s826_s0 = inlined_call_operand.vmem [shape: bf16[128,72], index: 0, kind: input, shape index: {}]   ;;  %s827_s2 = inlined_call_operand.vmem [shape: f32[1,128], index: 2, kind: input, shape index: {}]   ;;  %s828_s3 = inlined_call_operand.vmem [shape: bf16[128,128], index: 3, kind: output, shape index: {}]  }
   0x1   :  { %v572_v0 = vld [vmem:[%s825_s1 + $0x20] ss:$0 sps:$4 sm:$0xff]   ;;  %v573_v1 = vld [vmem:[%s825_s1 + $0x18] sm:$0xff]   ;;  %v574_v3 = vld [vmem:[%s825_s1 + $0x10] sm:$0xff]  }
   0x2   :  { %570 = vmatprep.subr.msk.bf16.mxu0 %vm139_vm0, %v572_v0  ;;  %571 = vmatprep.subr.msk.bf16.mxu1 %vm139_vm0, %v572_v0  ;;  %v141_v2 = vsel %vm139_vm0, %v572_v0, 0  ;;  %v577_v4 = vld [vmem:[%s826_s0] sm:$0xff]   ;;  %v575_v6 = vld [vmem:[%s825_s1 + $0x8] sm:$0xff]   ;;  %v581_v10 = vld [vmem:[%s826_s0 + $0x10] sm:$0xff]  }
   0x3   :  { %535 = vmatpush3.bf16.msra.mxu0 %v141_v2  ;;  %565 = vmatpush3.bf16.msra.mxu1 %v141_v2  ;;  %v578_v5 = vld [vmem:[%s826_s0 + $0x20] sm:$0xff]   ;;  %v579_v8 = vld [vmem:[%s826_s0 + $0x8] sm:$0xff]   ;;  %v582_v11 = vld [vmem:[%s826_s0 + $0x30] sm:$0xff]  }
   0x4   :  { %536 = vmatprep.subr.bf16.mxu0 %v573_v1  ;;  %561 = vmatprep.subr.bf16.mxu1 %v573_v1  ;;  %v576_v7 = vld [vmem:[%s825_s1] sm:$0xff]   ;;  %v580_v9 = vld [vmem:[%s826_s0 + $0x28] sm:$0xff]   ;;  %v583_v12 = vld [vmem:[%s826_s0 + $0x18] sm:$0xff]  }
   0x5   :  { %544 = vmatprep.mubr.msk.bf16.mxu0 %vm114_vm1, %v577_v4  ;;  %552 = vmatprep.mubr.msk.bf16.mxu1 %vm114_vm1, %v578_v5  ;;  %v584_v13 = vld [vmem:[%s826_s0 + $0x38] sm:$0xff]   ;;  %v719_v14 = vld [vmem:[%s827_s2] ss:$0 sm:$0xff] }
   0x7   :  { %537 = vmatpush3.bf16.msra.mxu0 %v573_v1  ;;  %566 = vmatpush3.bf16.msra.mxu1 %v573_v1 }
   0x8   :  { %538 = vmatprep.subr.bf16.mxu0 %v574_v3  ;;  %562 = vmatprep.subr.bf16.mxu1 %v574_v3 }
   0xb   :  { %539 = vmatpush3.bf16.msra.mxu0 %v574_v3  ;;  %567 = vmatpush3.bf16.msra.mxu1 %v574_v3 }
   0xc   :  { %540 = vmatprep.subr.bf16.mxu0 %v575_v6  ;;  %563 = vmatprep.subr.bf16.mxu1 %v575_v6 }
   0xf   :  { %541 = vmatpush3.bf16.msra.mxu0 %v575_v6  ;;  %568 = vmatpush3.bf16.msra.mxu1 %v575_v6 }
  0x10   :  { %542 = vmatprep.subr.bf16.mxu0 %v576_v7  ;;  %564 = vmatprep.subr.bf16.mxu1 %v576_v7 }
  0x13   :  { %543 = vmatpush3.bf16.msra.mxu0 %v576_v7  ;;  %569 = vmatpush3.bf16.msra.mxu1 %v576_v7 }
  0x16   :  { %545 = vmatmul.mubr.msk.bf16.vlgmr.msra.gmra.mxu0 %vm114_vm1, %v579_v8  ;;  %553 = vmatmul.mubr.msk.bf16.vlgmr.msra.gmra.mxu1 %vm114_vm1, %v580_v9 }
  0x17   :  { %548 = vmatprep.mubr.msk.bf16.mxu0 %vm114_vm1, %v581_v10  ;;  %556 = vmatprep.mubr.msk.bf16.mxu1 %vm114_vm1, %v582_v11 }
  0x1e   :  { %549 = vmatmul.mubr.msk.bf16.gmra.mxu0 %vm114_vm1, %v583_v12  ;;  %557 = vmatmul.mubr.msk.bf16.gmra.mxu1 %vm114_vm1, %v584_v13 }
  0xd6   :  { %v546_v15 = vpop.f32.mrf.mxu0  ;;  %v554_v16 = vpop.f32.mrf.mxu1 }
  0xd7   :  { %v722_v17 = vadd.f32 %v546_v15, %v719_v14  ;;  %v725_v18 = vadd.f32 %v554_v16, %v719_v14 }
  0xd8   :  { %v177_v19 = vpop.f32.mrf.mxu0  ;;  %v209_v20 = vpop.f32.mrf.mxu1 }
  0xd9   :  { %v242_v21 = vsub.f32 0.0, %v722_v17  ;;  %v250_v22 = vsub.f32 0.0, %v725_v18  ;;  %v730_v23 = vadd.f32 %v719_v14, %v177_v19  ;;  %v733_v24 = vadd.f32 %v719_v14, %v209_v20 }
  0xda   :  { %v547_v25 = vpop.f32.mrf.mxu0  ;;  %v555_v26 = vpop.f32.mrf.mxu1 }
  0xdb   :  { %v260_v27 = vmul.f32 1.442695, %v242_v21  ;;  %v276_v28 = vmul.f32 1.442695, %v250_v22  ;;  %v240_v29 = vsub.f32 0.0, %v730_v23  ;;  %v248_v30 = vsub.f32 0.0, %v733_v24 }
  0xdc   :  { %v738_v31 = vadd.f32 %v547_v25, %v719_v14  ;;  %v741_v32 = vadd.f32 %v555_v26, %v719_v14  ;;  %v180_v33 = vpop.f32.mrf.mxu0  ;;  %v212_v34 = vpop.f32.mrf.mxu1 }
  0xdd   :  { %585 = vpow2.f32 %v260_v27  ;;  %v256_v35 = vmul.f32 1.442695, %v240_v29  ;;  %v272_v36 = vmul.f32 1.442695, %v248_v30  ;;  %v744_v37 = vadd.f32 %v719_v14, %v180_v33 }
  0xde   :  { %587 = vpow2.f32 %v276_v28  ;;  %v243_v38 = vsub.f32 0.0, %v738_v31  ;;  %v251_v39 = vsub.f32 0.0, %v741_v32  ;;  %v749_v40 = vadd.f32 %v719_v14, %v212_v34  ;;  %v550_v41 = vpop.f32.mrf.mxu0  ;;  %v558_v42 = vpop.f32.mrf.mxu1 }
  0xdf   :  { %589 = vpow2.f32 %v256_v35  ;;  %v241_v43 = vsub.f32 0.0, %v744_v37  ;;  %v753_v44 = vadd.f32 %v550_v41, %v719_v14  ;;  %v756_v45 = vadd.f32 %v558_v42, %v719_v14 }
  0xe0   :  { %591 = vpow2.f32 %v272_v36  ;;  %v262_v46 = vmul.f32 1.442695, %v243_v38  ;;  %v278_v47 = vmul.f32 1.442695, %v251_v39  ;;  %v249_v48 = vsub.f32 0.0, %v749_v40  ;;  %v193_v49 = vpop.f32.mrf.mxu0  ;;  %v225_v50 = vpop.f32.mrf.mxu1 }
  0xe1   :  { %v258_v51 = vmul.f32 1.442695, %v241_v43  ;;  %v246_v52 = vsub.f32 0.0, %v753_v44  ;;  %v254_v53 = vsub.f32 0.0, %v756_v45  ;;  %v762_v54 = vadd.f32 %v719_v14, %v193_v49 }
  0xe2   :  { %593 = vpow2.f32 %v262_v46  ;;  %v274_v55 = vmul.f32 1.442695, %v249_v48  ;;  %v765_v56 = vadd.f32 %v719_v14, %v225_v50  ;;  %v551_v57 = vpop.f32.mrf.mxu0  ;;  %v559_v58 = vpop.f32.mrf.mxu1 }
  0xe3   :  { %595 = vpow2.f32 %v278_v47  ;;  %v268_v59 = vmul.f32 1.442695, %v246_v52  ;;  %v284_v60 = vmul.f32 1.442695, %v254_v53  ;;  %v244_v61 = vsub.f32 0.0, %v762_v54 }
  0xe4   :  { %597 = vpow2.f32 %v258_v51  ;;  %v252_v62 = vsub.f32 0.0, %v765_v56  ;;  %v770_v63 = vadd.f32 %v551_v57, %v719_v14  ;;  %v773_v0 = vadd.f32 %v559_v58, %v719_v14  ;;  %v196_v1 = vpop.f32.mrf.mxu0  ;;  %v228_v2 = vpop.f32.mrf.mxu1 }
  0xe5   :  { %599 = vpow2.f32 %v274_v55  ;;  %v264_v3 = vmul.f32 1.442695, %v244_v61  ;;  %v776_v4 = vadd.f32 %v719_v14, %v196_v1  ;;  %v779_v5 = vadd.f32 %v719_v14, %v228_v2 }
  0xe6   :  { %601 = vpow2.f32 %v268_v59  ;;  %v280_v6 = vmul.f32 1.442695, %v252_v62  ;;  %v247_v7 = vsub.f32 0.0, %v770_v63  ;;  %v255_v8 = vsub.f32 0.0, %v773_v0 }
  0xe7   :  { %603 = vpow2.f32 %v284_v60  ;;  %v245_v9 = vsub.f32 0.0, %v776_v4  ;;  %v253_v13 = vsub.f32 0.0, %v779_v5 }
  0xe8   :  { %605 = vpow2.f32 %v264_v3  ;;  %v270_v10 = vmul.f32 1.442695, %v247_v7  ;;  %v286_v11 = vmul.f32 1.442695, %v255_v8 }
  0xe9   :  { %607 = vpow2.f32 %v280_v6  ;;  %v266_v12 = vmul.f32 1.442695, %v245_v9  ;;  %v282_v25 = vmul.f32 1.442695, %v253_v13 }
  0xea   :  { %v586_v15 = vpop.eup %585  ;;  %609 = vpow2.f32 %v270_v10 }
  0xeb   :  { %v588_v14 = vpop.eup %587  ;;  %v290_v16 = vadd.f32 1.0, %v586_v15  ;;  %611 = vpow2.f32 %v286_v11 }
  0xec   :  { %v590_v19 = vpop.eup %589  ;;  %v298_v20 = vadd.f32 1.0, %v588_v14  ;;  %613 = vpow2.f32 %v266_v12 }
  0xed   :  { %v592_v21 = vpop.eup %591  ;;  %615 = vrcp.f32 %v290_v16  ;;  %v288_v22 = vadd.f32 1.0, %v590_v19 }
  0xee   :  { %617 = vrcp.f32 %v298_v20  ;;  %v296_v26 = vadd.f32 1.0, %v592_v21 }
  0xef   :  { %v594_v27 = vpop.eup %593  ;;  %619 = vrcp.f32 %v288_v22 }
  0xf0   :  { %v596_v28 = vpop.eup %595  ;;  %621 = vrcp.f32 %v296_v26  ;;  %v291_v29 = vadd.f32 1.0, %v594_v27 }
  0xf1   :  { %v598_v30 = vpop.eup %597  ;;  %v299_v33 = vadd.f32 1.0, %v596_v28  ;;  %623 = vpow2.f32 %v282_v25 }
  0xf2   :  { %v600_v34 = vpop.eup %599  ;;  %625 = vrcp.f32 %v291_v29  ;;  %v289_v35 = vadd.f32 1.0, %v598_v30 }
  0xf3   :  { %v602_v36 = vpop.eup %601  ;;  %627 = vrcp.f32 %v299_v33  ;;  %v297_v38 = vadd.f32 1.0, %v600_v34 }
  0xf4   :  { %v604_v39 = vpop.eup %603  ;;  %629 = vrcp.f32 %v289_v35  ;;  %v294_v41 = vadd.f32 1.0, %v602_v36 }
  0xf5   :  { %v606_v42 = vpop.eup %605  ;;  %631 = vrcp.f32 %v297_v38  ;;  %v302_v43 = vadd.f32 1.0, %v604_v39 }
  0xf6   :  { %v608_v46 = vpop.eup %607  ;;  %v292_v47 = vadd.f32 1.0, %v606_v42  ;;  %633 = vrcp.f32 %v294_v41 }
  0xf7   :  { %v610_v48 = vpop.eup %609  ;;  %635 = vrcp.f32 %v302_v43  ;;  %v300_v58 = vadd.f32 1.0, %v608_v46 }
  0xf8   :  { %v612_v49 = vpop.eup %611  ;;  %v295_v50 = vadd.f32 1.0, %v610_v48  ;;  %637 = vrcp.f32 %v292_v47 }
  0xf9   :  { %v614_v51 = vpop.eup %613  ;;  %v303_v52 = vadd.f32 1.0, %v612_v49 }
  0xfa   :  { %v616_v53 = vpop.eup %615  ;;  %639 = vrcp.f32 %v295_v50  ;;  %v293_v55 = vadd.f32 1.0, %v614_v51 }
  0xfb   :  { %v618_v57 = vpop.eup %617  ;;  %641 = vrcp.f32 %v303_v52  ;;  %v322_v3 = vmul.f32 %v616_v53, %v722_v17 }
  0xfc   :  { %v620_v59 = vpop.eup %619  ;;  %643 = vrcp.f32 %v293_v55  ;;  %v330_v8 = vmul.f32 %v618_v57, %v725_v18 }
  0xfd   :  { %v622_v60 = vpop.eup %621  ;;  %645 = vrcp.f32 %v300_v58  ;;  %v320_v11 = vmul.f32 %v620_v59, %v730_v23 }
  0xfe   :  { %v624_v61 = vpop.eup %623  ;;  %v328_v15 = vmul.f32 %v622_v60, %v733_v24 }
  0xff   :  { %v626_v62 = vpop.eup %625  ;;  %v301_v1 = vadd.f32 1.0, %v624_v61 }
 0x100   :  { %v628_v2 = vpop.eup %627  ;;  %v323_v6 = vmul.f32 %v626_v62, %v738_v31 }
 0x101   :  { %v630_v7 = vpop.eup %629  ;;  %v331_v9 = vmul.f32 %v628_v2, %v741_v32  ;;  %647 = vrcp.f32 %v301_v1 }
 0x102   :  { %v632_v10 = vpop.eup %631  ;;  %v482_v12 = vpack.c.bf16 %v323_v6, %v322_v3  ;;  %v321_v13 = vmul.f32 %v630_v7, %v744_v37 }
 0x103   :  { %v502_v14 = vpack.c.bf16 %v331_v9, %v330_v8  ;;  %v329_v16 = vmul.f32 %v632_v10, %v749_v40  ;;  %v634_v17 = vpop.eup %633 }
 0x104   :  { %514 = vst [vmem:[%s828_s3 + $0x8] sm:$0xff] %v482_v12   ;;  %v477_v18 = vpack.c.bf16 %v321_v13, %v320_v11  ;;  %v636_v31 = vpop.eup %635  ;;  %v326_v40 = vmul.f32 %v634_v17, %v753_v44 }
 0x105   :  { %518 = vst [vmem:[%s828_s3 + $0x28] sm:$0xff] %v502_v14   ;;  %v497_v23 = vpack.c.bf16 %v329_v16, %v328_v15  ;;  %v638_v32 = vpop.eup %637  ;;  %v334_v21 = vmul.f32 %v636_v31, %v756_v45 }
 0x106   :  { %478 = vst [vmem:[%s828_s3] sm:$0xff] %v477_v18   ;;  %v324_v25 = vmul.f32 %v638_v32, %v762_v54 }
 0x107   :  { %v640_v24 = vpop.eup %639  ;;  %517 = vst [vmem:[%s828_s3 + $0x20] sm:$0xff] %v497_v23  }
 0x108   :  { %v642_v37 = vpop.eup %641  ;;  %v327_v19 = vmul.f32 %v640_v24, %v770_v63 }
 0x109   :  { %v644_v20 = vpop.eup %643  ;;  %v335_v22 = vmul.f32 %v642_v37, %v773_v0 }
 0x10a   :  { %v492_v26 = vpack.c.bf16 %v327_v19, %v326_v40  ;;  %v325_v27 = vmul.f32 %v644_v20, %v776_v4  ;;  %v646_v29 = vpop.eup %645 }
 0x10b   :  { %v512_v28 = vpack.c.bf16 %v335_v22, %v334_v21  ;;  %v332_v45 = vmul.f32 %v646_v29, %v765_v56 }
 0x10c   :  { %516 = vst [vmem:[%s828_s3 + $0x18] sm:$0xff] %v492_v26   ;;  %v487_v30 = vpack.c.bf16 %v325_v27, %v324_v25 }
 0x10d   :  { %520 = vst [vmem:[%s828_s3 + $0x38] sm:$0xff] %v512_v28  }
 0x10e   :  { %v648_v44 = vpop.eup %647  ;;  %515 = vst [vmem:[%s828_s3 + $0x10] sm:$0xff] %v487_v30  }
 0x10f   :  { %v333_v54 = vmul.f32 %v648_v44, %v779_v5 }
 0x111   :  { %v507_v63 = vpack.c.bf16 %v333_v54, %v332_v45 }
 0x113   :  { %519 = vst [vmem:[%s828_s3 + $0x30] sm:$0xff] %v507_v63  }

// kernel: _lambda_.30
= control target key start
LH: loop header
LB: loop body
LE: loop exit
PB: predicated region body
PF: predicated region fallthrough
CT: control target
= control target key end

     0   :  { %vm158_vm0 = vcmask 1045504   ;;  %vm133_vm1 = vcmask 883712   ;;  %s864_s1 = inlined_call_operand.vmem [shape: bf16[108,128], index: 1, kind: input, shape index: {}]   ;;  %s865_s0 = inlined_call_operand.vmem [shape: bf16[128,108], index: 0, kind: input, shape index: {}]   ;;  %s866_s2 = inlined_call_operand.vmem [shape: f32[1,128], index: 2, kind: input, shape index: {}]   ;;  %s867_s3 = inlined_call_operand.vmem [shape: bf16[128,128], index: 3, kind: output, shape index: {}]  }
   0x1   :  { %v603_v0 = vld [vmem:[%s864_s1 + $0x30] sm:$0x3f]   ;;  %v604_v1 = vld [vmem:[%s864_s1 + $0x28] sm:$0xff]   ;;  %v605_v3 = vld [vmem:[%s864_s1 + $0x20] sm:$0xff]  }
   0x2   :  { %601 = vmatprep.subr.msk.bf16.mxu0 %vm158_vm0, %v603_v0  ;;  %602 = vmatprep.subr.msk.bf16.mxu1 %vm158_vm0, %v603_v0  ;;  %v160_v2 = vsel %vm158_vm0, %v603_v0, 0  ;;  %v606_v4 = vld [vmem:[%s864_s1 + $0x18] sm:$0xff]   ;;  %v610_v5 = vld [vmem:[%s865_s0] sm:$0xff]   ;;  %v607_v7 = vld [vmem:[%s864_s1 + $0x10] sm:$0xff]  }
   0x3   :  { %558 = vmatpush3.bf16.msra.mxu0 %v160_v2  ;;  %594 = vmatpush3.bf16.msra.mxu1 %v160_v2  ;;  %v611_v6 = vld [vmem:[%s865_s0 + $0x20] sm:$0xff]   ;;  %v608_v8 = vld [vmem:[%s864_s1 + $0x8] sm:$0xff]   ;;  %v614_v12 = vld [vmem:[%s865_s0 + $0x10] sm:$0xff]  }
   0x4   :  { %559 = vmatprep.subr.bf16.mxu0 %v604_v1  ;;  %588 = vmatprep.subr.bf16.mxu1 %v604_v1  ;;  %v609_v9 = vld [vmem:[%s864_s1] sm:$0xff]   ;;  %v612_v10 = vld [vmem:[%s865_s0 + $0x8] sm:$0xff]   ;;  %v615_v13 = vld [vmem:[%s865_s0 + $0x30] sm:$0xff]  }
   0x5   :  { %571 = vmatprep.mubr.msk.bf16.mxu0 %vm133_vm1, %v610_v5  ;;  %579 = vmatprep.mubr.msk.bf16.mxu1 %vm133_vm1, %v611_v6  ;;  %v613_v11 = vld [vmem:[%s865_s0 + $0x28] sm:$0xff]   ;;  %v616_v14 = vld [vmem:[%s865_s0 + $0x18] sm:$0xff]   ;;  %v758_v16 = vld [vmem:[%s866_s2] ss:$0 sm:$0xff] }
   0x6   :  { %v617_v15 = vld [vmem:[%s865_s0 + $0x38] sm:$0xff]  }
   0x7   :  { %560 = vmatpush3.bf16.msra.mxu0 %v604_v1  ;;  %595 = vmatpush3.bf16.msra.mxu1 %v604_v1 }
   0x8   :  { %561 = vmatprep.subr.bf16.mxu0 %v605_v3  ;;  %589 = vmatprep.subr.bf16.mxu1 %v605_v3 }
   0xb   :  { %562 = vmatpush3.bf16.msra.mxu0 %v605_v3  ;;  %596 = vmatpush3.bf16.msra.mxu1 %v605_v3 }
   0xc   :  { %563 = vmatprep.subr.bf16.mxu0 %v606_v4  ;;  %590 = vmatprep.subr.bf16.mxu1 %v606_v4 }
   0xf   :  { %564 = vmatpush3.bf16.msra.mxu0 %v606_v4  ;;  %597 = vmatpush3.bf16.msra.mxu1 %v606_v4 }
  0x10   :  { %565 = vmatprep.subr.bf16.mxu0 %v607_v7  ;;  %591 = vmatprep.subr.bf16.mxu1 %v607_v7 }
  0x13   :  { %566 = vmatpush3.bf16.msra.mxu0 %v607_v7  ;;  %598 = vmatpush3.bf16.msra.mxu1 %v607_v7 }
  0x14   :  { %567 = vmatprep.subr.bf16.mxu0 %v608_v8  ;;  %592 = vmatprep.subr.bf16.mxu1 %v608_v8 }
  0x17   :  { %568 = vmatpush3.bf16.msra.mxu0 %v608_v8  ;;  %599 = vmatpush3.bf16.msra.mxu1 %v608_v8 }
  0x18   :  { %569 = vmatprep.subr.bf16.mxu0 %v609_v9  ;;  %593 = vmatprep.subr.bf16.mxu1 %v609_v9 }
  0x1b   :  { %570 = vmatpush3.bf16.msra.mxu0 %v609_v9  ;;  %600 = vmatpush3.bf16.msra.mxu1 %v609_v9 }
  0x1e   :  { %572 = vmatmul.mubr.msk.bf16.vlgmr.msra.gmra.mxu0 %vm133_vm1, %v612_v10  ;;  %580 = vmatmul.mubr.msk.bf16.vlgmr.msra.gmra.mxu1 %vm133_vm1, %v613_v11 }
  0x1f   :  { %575 = vmatprep.mubr.msk.bf16.mxu0 %vm133_vm1, %v614_v12  ;;  %583 = vmatprep.mubr.msk.bf16.mxu1 %vm133_vm1, %v615_v13 }
  0x26   :  { %576 = vmatmul.mubr.msk.bf16.gmra.mxu0 %vm133_vm1, %v616_v14  ;;  %584 = vmatmul.mubr.msk.bf16.gmra.mxu1 %vm133_vm1, %v617_v15 }
  0xde   :  { %v573_v17 = vpop.f32.mrf.mxu0  ;;  %v581_v18 = vpop.f32.mrf.mxu1 }
  0xdf   :  { %v761_v19 = vadd.f32 %v573_v17, %v758_v16  ;;  %v764_v20 = vadd.f32 %v581_v18, %v758_v16 }
  0xe0   :  { %v196_v21 = vpop.f32.mrf.mxu0  ;;  %v228_v22 = vpop.f32.mrf.mxu1 }
  0xe1   :  { %v261_v23 = vsub.f32 0.0, %v761_v19  ;;  %v269_v24 = vsub.f32 0.0, %v764_v20  ;;  %v769_v25 = vadd.f32 %v758_v16, %v196_v21  ;;  %v772_v26 = vadd.f32 %v758_v16, %v228_v22 }
  0xe2   :  { %v574_v27 = vpop.f32.mrf.mxu0  ;;  %v582_v28 = vpop.f32.mrf.mxu1 }
  0xe3   :  { %v279_v29 = vmul.f32 1.442695, %v261_v23  ;;  %v295_v30 = vmul.f32 1.442695, %v269_v24  ;;  %v259_v31 = vsub.f32 0.0, %v769_v25  ;;  %v267_v32 = vsub.f32 0.0, %v772_v26 }
  0xe4   :  { %v777_v33 = vadd.f32 %v574_v27, %v758_v16  ;;  %v780_v34 = vadd.f32 %v582_v28, %v758_v16  ;;  %v199_v35 = vpop.f32.mrf.mxu0  ;;  %v231_v36 = vpop.f32.mrf.mxu1 }
  0xe5   :  { %618 = vpow2.f32 %v279_v29  ;;  %v275_v37 = vmul.f32 1.442695, %v259_v31  ;;  %v291_v38 = vmul.f32 1.442695, %v267_v32  ;;  %v783_v39 = vadd.f32 %v758_v16, %v199_v35 }
  0xe6   :  { %620 = vpow2.f32 %v295_v30  ;;  %v262_v40 = vsub.f32 0.0, %v777_v33  ;;  %v270_v41 = vsub.f32 0.0, %v780_v34  ;;  %v788_v42 = vadd.f32 %v758_v16, %v231_v36  ;;  %v577_v43 = vpop.f32.mrf.mxu0  ;;  %v585_v44 = vpop.f32.mrf.mxu1 }
  0xe7   :  { %622 = vpow2.f32 %v275_v37  ;;  %v260_v45 = vsub.f32 0.0, %v783_v39  ;;  %v792_v46 = vadd.f32 %v577_v43, %v758_v16  ;;  %v795_v47 = vadd.f32 %v585_v44, %v758_v16 }
  0xe8   :  { %624 = vpow2.f32 %v291_v38  ;;  %v281_v48 = vmul.f32 1.442695, %v262_v40  ;;  %v297_v49 = vmul.f32 1.442695, %v270_v41  ;;  %v268_v50 = vsub.f32 0.0, %v788_v42  ;;  %v212_v51 = vpop.f32.mrf.mxu0  ;;  %v244_v52 = vpop.f32.mrf.mxu1 }
  0xe9   :  { %v277_v53 = vmul.f32 1.442695, %v260_v45  ;;  %v265_v54 = vsub.f32 0.0, %v792_v46  ;;  %v273_v55 = vsub.f32 0.0, %v795_v47  ;;  %v801_v56 = vadd.f32 %v758_v16, %v212_v51 }
  0xea   :  { %626 = vpow2.f32 %v281_v48  ;;  %v293_v57 = vmul.f32 1.442695, %v268_v50  ;;  %v804_v58 = vadd.f32 %v758_v16, %v244_v52  ;;  %v578_v59 = vpop.f32.mrf.mxu0  ;;  %v586_v60 = vpop.f32.mrf.mxu1 }
  0xeb   :  { %628 = vpow2.f32 %v297_v49  ;;  %v287_v61 = vmul.f32 1.442695, %v265_v54  ;;  %v303_v62 = vmul.f32 1.442695, %v273_v55  ;;  %v263_v63 = vsub.f32 0.0, %v801_v56 }
  0xec   :  { %630 = vpow2.f32 %v277_v53  ;;  %v271_v0 = vsub.f32 0.0, %v804_v58  ;;  %v809_v1 = vadd.f32 %v578_v59, %v758_v16  ;;  %v812_v2 = vadd.f32 %v586_v60, %v758_v16  ;;  %v215_v3 = vpop.f32.mrf.mxu0  ;;  %v247_v4 = vpop.f32.mrf.mxu1 }
  0xed   :  { %632 = vpow2.f32 %v293_v57  ;;  %v283_v5 = vmul.f32 1.442695, %v263_v63  ;;  %v815_v6 = vadd.f32 %v758_v16, %v215_v3  ;;  %v818_v7 = vadd.f32 %v758_v16, %v247_v4 }
  0xee   :  { %634 = vpow2.f32 %v287_v61  ;;  %v299_v8 = vmul.f32 1.442695, %v271_v0  ;;  %v266_v9 = vsub.f32 0.0, %v809_v1  ;;  %v274_v10 = vsub.f32 0.0, %v812_v2 }
  0xef   :  { %636 = vpow2.f32 %v303_v62  ;;  %v264_v11 = vsub.f32 0.0, %v815_v6  ;;  %v272_v15 = vsub.f32 0.0, %v818_v7 }
  0xf0   :  { %638 = vpow2.f32 %v283_v5  ;;  %v289_v12 = vmul.f32 1.442695, %v266_v9  ;;  %v305_v13 = vmul.f32 1.442695, %v274_v10 }
  0xf1   :  { %640 = vpow2.f32 %v299_v8  ;;  %v285_v14 = vmul.f32 1.442695, %v264_v11  ;;  %v301_v27 = vmul.f32 1.442695, %v272_v15 }
  0xf2   :  { %v619_v17 = vpop.eup %618  ;;  %642 = vpow2.f32 %v289_v12 }
  0xf3   :  { %v621_v16 = vpop.eup %620  ;;  %v309_v18 = vadd.f32 1.0, %v619_v17  ;;  %644 = vpow2.f32 %v305_v13 }
  0xf4   :  { %v623_v21 = vpop.eup %622  ;;  %v317_v22 = vadd.f32 1.0, %v621_v16  ;;  %646 = vpow2.f32 %v285_v14 }
  0xf5   :  { %v625_v23 = vpop.eup %624  ;;  %648 = vrcp.f32 %v309_v18  ;;  %v307_v24 = vadd.f32 1.0, %v623_v21 }
  0xf6   :  { %650 = vrcp.f32 %v317_v22  ;;  %v315_v28 = vadd.f32 1.0, %v625_v23 }
  0xf7   :  { %v627_v29 = vpop.eup %626  ;;  %652 = vrcp.f32 %v307_v24 }
  0xf8   :  { %v629_v30 = vpop.eup %628  ;;  %654 = vrcp.f32 %v315_v28  ;;  %v310_v31 = vadd.f32 1.0, %v627_v29 }
  0xf9   :  { %v631_v32 = vpop.eup %630  ;;  %v318_v35 = vadd.f32 1.0, %v629_v30  ;;  %656 = vpow2.f32 %v301_v27 }
  0xfa   :  { %v633_v36 = vpop.eup %632  ;;  %658 = vrcp.f32 %v310_v31  ;;  %v308_v37 = vadd.f32 1.0, %v631_v32 }
  0xfb   :  { %v635_v38 = vpop.eup %634  ;;  %660 = vrcp.f32 %v318_v35  ;;  %v316_v40 = vadd.f32 1.0, %v633_v36 }
  0xfc   :  { %v637_v41 = vpop.eup %636  ;;  %662 = vrcp.f32 %v308_v37  ;;  %v313_v43 = vadd.f32 1.0, %v635_v38 }
  0xfd   :  { %v639_v44 = vpop.eup %638  ;;  %664 = vrcp.f32 %v316_v40  ;;  %v321_v45 = vadd.f32 1.0, %v637_v41 }
  0xfe   :  { %v641_v48 = vpop.eup %640  ;;  %v311_v49 = vadd.f32 1.0, %v639_v44  ;;  %666 = vrcp.f32 %v313_v43 }
  0xff   :  { %v643_v50 = vpop.eup %642  ;;  %668 = vrcp.f32 %v321_v45  ;;  %v319_v60 = vadd.f32 1.0, %v641_v48 }
 0x100   :  { %v645_v51 = vpop.eup %644  ;;  %v314_v52 = vadd.f32 1.0, %v643_v50  ;;  %670 = vrcp.f32 %v311_v49 }
 0x101   :  { %v647_v53 = vpop.eup %646  ;;  %v322_v54 = vadd.f32 1.0, %v645_v51 }
 0x102   :  { %v649_v55 = vpop.eup %648  ;;  %672 = vrcp.f32 %v314_v52  ;;  %v312_v57 = vadd.f32 1.0, %v647_v53 }
 0x103   :  { %v651_v59 = vpop.eup %650  ;;  %674 = vrcp.f32 %v322_v54  ;;  %v341_v5 = vmul.f32 %v649_v55, %v761_v19 }
 0x104   :  { %v653_v61 = vpop.eup %652  ;;  %676 = vrcp.f32 %v312_v57  ;;  %v349_v10 = vmul.f32 %v651_v59, %v764_v20 }
 0x105   :  { %v655_v62 = vpop.eup %654  ;;  %678 = vrcp.f32 %v319_v60  ;;  %v339_v13 = vmul.f32 %v653_v61, %v769_v25 }
 0x106   :  { %v657_v63 = vpop.eup %656  ;;  %v347_v17 = vmul.f32 %v655_v62, %v772_v26 }
 0x107   :  { %v659_v0 = vpop.eup %658  ;;  %v320_v3 = vadd.f32 1.0, %v657_v63 }
 0x108   :  { %v661_v4 = vpop.eup %660  ;;  %v342_v8 = vmul.f32 %v659_v0, %v777_v33 }
 0x109   :  { %v663_v9 = vpop.eup %662  ;;  %v350_v11 = vmul.f32 %v661_v4, %v780_v34  ;;  %680 = vrcp.f32 %v320_v3 }
 0x10a   :  { %v665_v12 = vpop.eup %664  ;;  %v503_v14 = vpack.c.bf16 %v342_v8, %v341_v5  ;;  %v340_v15 = vmul.f32 %v663_v9, %v783_v39 }
 0x10b   :  { %v523_v16 = vpack.c.bf16 %v350_v11, %v349_v10  ;;  %v348_v18 = vmul.f32 %v665_v12, %v788_v42  ;;  %v667_v19 = vpop.eup %666 }
 0x10c   :  { %535 = vst [vmem:[%s867_s3 + $0x8] sm:$0xff] %v503_v14   ;;  %v498_v20 = vpack.c.bf16 %v340_v15, %v339_v13  ;;  %v669_v33 = vpop.eup %668  ;;  %v345_v42 = vmul.f32 %v667_v19, %v792_v46 }
 0x10d   :  { %539 = vst [vmem:[%s867_s3 + $0x28] sm:$0xff] %v523_v16   ;;  %v518_v25 = vpack.c.bf16 %v348_v18, %v347_v17  ;;  %v671_v34 = vpop.eup %670  ;;  %v353_v23 = vmul.f32 %v669_v33, %v795_v47 }
 0x10e   :  { %499 = vst [vmem:[%s867_s3] sm:$0xff] %v498_v20   ;;  %v343_v27 = vmul.f32 %v671_v34, %v801_v56 }
 0x10f   :  { %v673_v26 = vpop.eup %672  ;;  %538 = vst [vmem:[%s867_s3 + $0x20] sm:$0xff] %v518_v25  }
 0x110   :  { %v675_v39 = vpop.eup %674  ;;  %v346_v21 = vmul.f32 %v673_v26, %v809_v1 }
 0x111   :  { %v677_v22 = vpop.eup %676  ;;  %v354_v24 = vmul.f32 %v675_v39, %v812_v2 }
 0x112   :  { %v513_v28 = vpack.c.bf16 %v346_v21, %v345_v42  ;;  %v344_v29 = vmul.f32 %v677_v22, %v815_v6  ;;  %v679_v31 = vpop.eup %678 }
 0x113   :  { %v533_v30 = vpack.c.bf16 %v354_v24, %v353_v23  ;;  %v351_v47 = vmul.f32 %v679_v31, %v804_v58 }
 0x114   :  { %537 = vst [vmem:[%s867_s3 + $0x18] sm:$0xff] %v513_v28   ;;  %v508_v32 = vpack.c.bf16 %v344_v29, %v343_v27 }
 0x115   :  { %541 = vst [vmem:[%s867_s3 + $0x38] sm:$0xff] %v533_v30  }
 0x116   :  { %v681_v46 = vpop.eup %680  ;;  %536 = vst [vmem:[%s867_s3 + $0x10] sm:$0xff] %v508_v32  }
 0x117   :  { %v352_v56 = vmul.f32 %v681_v46, %v818_v7 }
 0x119   :  { %v528_v1 = vpack.c.bf16 %v352_v56, %v351_v47 }
 0x11b   :  { %540 = vst [vmem:[%s867_s3 + $0x30] sm:$0xff] %v528_v1  }

// kernel: _lambda_.32
= control target key start
LH: loop header
LB: loop body
LE: loop exit
PB: predicated region body
PF: predicated region fallthrough
CT: control target
= control target key end

     0   :  { %vm115_vm0 = vcmask 1043456   ;;  %vm90_vm1 = vcmask 195584   ;;  %s771_s1 = inlined_call_operand.vmem [shape: bf16[24,128], index: 1, kind: input, shape index: {}]   ;;  %s772_s0 = inlined_call_operand.vmem [shape: bf16[128,24], index: 0, kind: input, shape index: {}]   ;;  %s773_s2 = inlined_call_operand.vmem [shape: f32[1,128], index: 2, kind: input, shape index: {}]   ;;  %s774_s3 = inlined_call_operand.vmem [shape: bf16[128,128], index: 3, kind: output, shape index: {}]  }
   0x1   :  { %v530_v0 = vld [vmem:[%s771_s1 + $0x8] ss:$0 sps:$4 sm:$0xff]   ;;  %v531_v1 = vld [vmem:[%s771_s1] sm:$0xff]   ;;  %v536_v7 = vld [vmem:[%s772_s0 + $0x10] sm:$0xff]  }
   0x2   :  { %528 = vmatprep.subr.msk.bf16.mxu0 %vm115_vm0, %v530_v0  ;;  %529 = vmatprep.subr.msk.bf16.mxu1 %vm115_vm0, %v530_v0  ;;  %v117_v2 = vsel %vm115_vm0, %v530_v0, 0  ;;  %v532_v3 = vld [vmem:[%s772_s0] sm:$0xff]   ;;  %v534_v5 = vld [vmem:[%s772_s0 + $0x8] sm:$0xff]   ;;  %v537_v8 = vld [vmem:[%s772_s0 + $0x30] sm:$0xff]  }
   0x3   :  { %505 = vmatpush3.bf16.msra.mxu0 %v117_v2  ;;  %526 = vmatpush3.bf16.msra.mxu1 %v117_v2  ;;  %v533_v4 = vld [vmem:[%s772_s0 + $0x20] sm:$0xff]   ;;  %v535_v6 = vld [vmem:[%s772_s0 + $0x28] sm:$0xff]   ;;  %v538_v9 = vld [vmem:[%s772_s0 + $0x18] sm:$0xff]  }
   0x4   :  { %506 = vmatprep.subr.bf16.mxu0 %v531_v1  ;;  %525 = vmatprep.subr.bf16.mxu1 %v531_v1  ;;  %v539_v10 = vld [vmem:[%s772_s0 + $0x38] sm:$0xff]   ;;  %v665_v11 = vld [vmem:[%s773_s2] ss:$0 sm:$0xff] }
   0x5   :  { %508 = vmatprep.mubr.msk.bf16.mxu0 %vm90_vm1, %v532_v3  ;;  %516 = vmatprep.mubr.msk.bf16.mxu1 %vm90_vm1, %v533_v4 }
   0x7   :  { %507 = vmatpush3.bf16.msra.mxu0 %v531_v1  ;;  %527 = vmatpush3.bf16.msra.mxu1 %v531_v1 }
   0xa   :  { %509 = vmatmul.mubr.msk.bf16.vlgmr.msra.gmra.mxu0 %vm90_vm1, %v534_v5  ;;  %517 = vmatmul.mubr.msk.bf16.vlgmr.msra.gmra.mxu1 %vm90_vm1, %v535_v6 }
   0xb   :  { %512 = vmatprep.mubr.msk.bf16.mxu0 %vm90_vm1, %v536_v7  ;;  %520 = vmatprep.mubr.msk.bf16.mxu1 %vm90_vm1, %v537_v8 }
  0x12   :  { %513 = vmatmul.mubr.msk.bf16.gmra.mxu0 %vm90_vm1, %v538_v9  ;;  %521 = vmatmul.mubr.msk.bf16.gmra.mxu1 %vm90_vm1, %v539_v10 }
  0xca   :  { %v510_v12 = vpop.f32.mrf.mxu0  ;;  %v518_v13 = vpop.f32.mrf.mxu1 }
  0xcb   :  { %v668_v14 = vadd.f32 %v510_v12, %v665_v11  ;;  %v671_v15 = vadd.f32 %v518_v13, %v665_v11 }
  0xcc   :  { %v153_v16 = vpop.f32.mrf.mxu0  ;;  %v185_v17 = vpop.f32.mrf.mxu1 }
  0xcd   :  { %v218_v18 = vsub.f32 0.0, %v668_v14  ;;  %v226_v19 = vsub.f32 0.0, %v671_v15  ;;  %v676_v20 = vadd.f32 %v665_v11, %v153_v16  ;;  %v679_v21 = vadd.f32 %v665_v11, %v185_v17 }
  0xce   :  { %v511_v22 = vpop.f32.mrf.mxu0  ;;  %v519_v23 = vpop.f32.mrf.mxu1 }
  0xcf   :  { %v236_v24 = vmul.f32 1.442695, %v218_v18  ;;  %v252_v25 = vmul.f32 1.442695, %v226_v19  ;;  %v216_v26 = vsub.f32 0.0, %v676_v20  ;;  %v224_v27 = vsub.f32 0.0, %v679_v21 }
  0xd0   :  { %v684_v28 = vadd.f32 %v511_v22, %v665_v11  ;;  %v687_v29 = vadd.f32 %v519_v23, %v665_v11  ;;  %v156_v30 = vpop.f32.mrf.mxu0  ;;  %v188_v31 = vpop.f32.mrf.mxu1 }
  0xd1   :  { %540 = vpow2.f32 %v236_v24  ;;  %v232_v32 = vmul.f32 1.442695, %v216_v26  ;;  %v248_v33 = vmul.f32 1.442695, %v224_v27  ;;  %v690_v34 = vadd.f32 %v665_v11, %v156_v30 }
  0xd2   :  { %542 = vpow2.f32 %v252_v25  ;;  %v219_v35 = vsub.f32 0.0, %v684_v28  ;;  %v227_v36 = vsub.f32 0.0, %v687_v29  ;;  %v695_v37 = vadd.f32 %v665_v11, %v188_v31  ;;  %v514_v38 = vpop.f32.mrf.mxu0  ;;  %v522_v39 = vpop.f32.mrf.mxu1 }
  0xd3   :  { %544 = vpow2.f32 %v232_v32  ;;  %v217_v40 = vsub.f32 0.0, %v690_v34  ;;  %v699_v41 = vadd.f32 %v514_v38, %v665_v11  ;;  %v702_v42 = vadd.f32 %v522_v39, %v665_v11 }
  0xd4   :  { %546 = vpow2.f32 %v248_v33  ;;  %v238_v43 = vmul.f32 1.442695, %v219_v35  ;;  %v254_v44 = vmul.f32 1.442695, %v227_v36  ;;  %v225_v45 = vsub.f32 0.0, %v695_v37  ;;  %v169_v46 = vpop.f32.mrf.mxu0  ;;  %v201_v47 = vpop.f32.mrf.mxu1 }
  0xd5   :  { %v234_v48 = vmul.f32 1.442695, %v217_v40  ;;  %v222_v49 = vsub.f32 0.0, %v699_v41  ;;  %v230_v50 = vsub.f32 0.0, %v702_v42  ;;  %v708_v51 = vadd.f32 %v665_v11, %v169_v46 }
  0xd6   :  { %548 = vpow2.f32 %v238_v43  ;;  %v250_v52 = vmul.f32 1.442695, %v225_v45  ;;  %v711_v53 = vadd.f32 %v665_v11, %v201_v47  ;;  %v515_v54 = vpop.f32.mrf.mxu0  ;;  %v523_v55 = vpop.f32.mrf.mxu1 }
  0xd7   :  { %550 = vpow2.f32 %v254_v44  ;;  %v244_v56 = vmul.f32 1.442695, %v222_v49  ;;  %v260_v57 = vmul.f32 1.442695, %v230_v50  ;;  %v220_v58 = vsub.f32 0.0, %v708_v51 }
  0xd8   :  { %552 = vpow2.f32 %v234_v48  ;;  %v228_v59 = vsub.f32 0.0, %v711_v53  ;;  %v716_v60 = vadd.f32 %v515_v54, %v665_v11  ;;  %v719_v61 = vadd.f32 %v523_v55, %v665_v11  ;;  %v172_v62 = vpop.f32.mrf.mxu0  ;;  %v204_v63 = vpop.f32.mrf.mxu1 }
  0xd9   :  { %554 = vpow2.f32 %v250_v52  ;;  %v240_v0 = vmul.f32 1.442695, %v220_v58  ;;  %v722_v1 = vadd.f32 %v665_v11, %v172_v62  ;;  %v725_v2 = vadd.f32 %v665_v11, %v204_v63 }
  0xda   :  { %556 = vpow2.f32 %v244_v56  ;;  %v256_v3 = vmul.f32 1.442695, %v228_v59  ;;  %v223_v4 = vsub.f32 0.0, %v716_v60  ;;  %v231_v5 = vsub.f32 0.0, %v719_v61 }
  0xdb   :  { %558 = vpow2.f32 %v260_v57  ;;  %v221_v6 = vsub.f32 0.0, %v722_v1  ;;  %v229_v10 = vsub.f32 0.0, %v725_v2 }
  0xdc   :  { %560 = vpow2.f32 %v240_v0  ;;  %v246_v7 = vmul.f32 1.442695, %v223_v4  ;;  %v262_v8 = vmul.f32 1.442695, %v231_v5 }
  0xdd   :  { %562 = vpow2.f32 %v256_v3  ;;  %v242_v9 = vmul.f32 1.442695, %v221_v6  ;;  %v258_v22 = vmul.f32 1.442695, %v229_v10 }
  0xde   :  { %v541_v12 = vpop.eup %540  ;;  %564 = vpow2.f32 %v246_v7 }
  0xdf   :  { %v543_v11 = vpop.eup %542  ;;  %v266_v13 = vadd.f32 1.0, %v541_v12  ;;  %566 = vpow2.f32 %v262_v8 }
  0xe0   :  { %v545_v16 = vpop.eup %544  ;;  %v274_v17 = vadd.f32 1.0, %v543_v11  ;;  %568 = vpow2.f32 %v242_v9 }
  0xe1   :  { %v547_v18 = vpop.eup %546  ;;  %570 = vrcp.f32 %v266_v13  ;;  %v264_v19 = vadd.f32 1.0, %v545_v16 }
  0xe2   :  { %572 = vrcp.f32 %v274_v17  ;;  %v272_v23 = vadd.f32 1.0, %v547_v18 }
  0xe3   :  { %v549_v24 = vpop.eup %548  ;;  %574 = vrcp.f32 %v264_v19 }
  0xe4   :  { %v551_v25 = vpop.eup %550  ;;  %576 = vrcp.f32 %v272_v23  ;;  %v267_v26 = vadd.f32 1.0, %v549_v24 }
  0xe5   :  { %v553_v27 = vpop.eup %552  ;;  %v275_v30 = vadd.f32 1.0, %v551_v25  ;;  %578 = vpow2.f32 %v258_v22 }
  0xe6   :  { %v555_v31 = vpop.eup %554  ;;  %580 = vrcp.f32 %v267_v26  ;;  %v265_v32 = vadd.f32 1.0, %v553_v27 }
  0xe7   :  { %v557_v33 = vpop.eup %556  ;;  %582 = vrcp.f32 %v275_v30  ;;  %v273_v35 = vadd.f32 1.0, %v555_v31 }
  0xe8   :  { %v559_v36 = vpop.eup %558  ;;  %584 = vrcp.f32 %v265_v32  ;;  %v270_v38 = vadd.f32 1.0, %v557_v33 }
  0xe9   :  { %v561_v39 = vpop.eup %560  ;;  %586 = vrcp.f32 %v273_v35  ;;  %v278_v40 = vadd.f32 1.0, %v559_v36 }
  0xea   :  { %v563_v43 = vpop.eup %562  ;;  %v268_v44 = vadd.f32 1.0, %v561_v39  ;;  %588 = vrcp.f32 %v270_v38 }
  0xeb   :  { %v565_v45 = vpop.eup %564  ;;  %590 = vrcp.f32 %v278_v40  ;;  %v276_v55 = vadd.f32 1.0, %v563_v43 }
  0xec   :  { %v567_v46 = vpop.eup %566  ;;  %v271_v47 = vadd.f32 1.0, %v565_v45  ;;  %592 = vrcp.f32 %v268_v44 }
  0xed   :  { %v569_v48 = vpop.eup %568  ;;  %v279_v49 = vadd.f32 1.0, %v567_v46 }
  0xee   :  { %v571_v50 = vpop.eup %570  ;;  %594 = vrcp.f32 %v271_v47  ;;  %v269_v52 = vadd.f32 1.0, %v569_v48 }
  0xef   :  { %v573_v54 = vpop.eup %572  ;;  %596 = vrcp.f32 %v279_v49  ;;  %v298_v0 = vmul.f32 %v571_v50, %v668_v14 }
  0xf0   :  { %v575_v56 = vpop.eup %574  ;;  %598 = vrcp.f32 %v269_v52  ;;  %v306_v5 = vmul.f32 %v573_v54, %v671_v15 }
  0xf1   :  { %v577_v57 = vpop.eup %576  ;;  %600 = vrcp.f32 %v276_v55  ;;  %v296_v8 = vmul.f32 %v575_v56, %v676_v20 }
  0xf2   :  { %v579_v58 = vpop.eup %578  ;;  %v304_v12 = vmul.f32 %v577_v57, %v679_v21 }
  0xf3   :  { %v581_v59 = vpop.eup %580  ;;  %v277_v62 = vadd.f32 1.0, %v579_v58 }
  0xf4   :  { %v583_v63 = vpop.eup %582  ;;  %v299_v3 = vmul.f32 %v581_v59, %v684_v28 }
  0xf5   :  { %v585_v4 = vpop.eup %584  ;;  %v307_v6 = vmul.f32 %v583_v63, %v687_v29  ;;  %602 = vrcp.f32 %v277_v62 }
  0xf6   :  { %v587_v7 = vpop.eup %586  ;;  %v455_v9 = vpack.c.bf16 %v299_v3, %v298_v0  ;;  %v297_v10 = vmul.f32 %v585_v4, %v690_v34 }
  0xf7   :  { %v475_v11 = vpack.c.bf16 %v307_v6, %v306_v5  ;;  %v305_v13 = vmul.f32 %v587_v7, %v695_v37  ;;  %v589_v14 = vpop.eup %588 }
  0xf8   :  { %487 = vst [vmem:[%s774_s3 + $0x8] sm:$0xff] %v455_v9   ;;  %v450_v15 = vpack.c.bf16 %v297_v10, %v296_v8  ;;  %v591_v28 = vpop.eup %590  ;;  %v302_v37 = vmul.f32 %v589_v14, %v699_v41 }
  0xf9   :  { %491 = vst [vmem:[%s774_s3 + $0x28] sm:$0xff] %v475_v11   ;;  %v470_v20 = vpack.c.bf16 %v305_v13, %v304_v12  ;;  %v593_v29 = vpop.eup %592  ;;  %v310_v18 = vmul.f32 %v591_v28, %v702_v42 }
  0xfa   :  { %451 = vst [vmem:[%s774_s3] sm:$0xff] %v450_v15   ;;  %v300_v22 = vmul.f32 %v593_v29, %v708_v51 }
  0xfb   :  { %v595_v21 = vpop.eup %594  ;;  %490 = vst [vmem:[%s774_s3 + $0x20] sm:$0xff] %v470_v20  }
  0xfc   :  { %v597_v34 = vpop.eup %596  ;;  %v303_v16 = vmul.f32 %v595_v21, %v716_v60 }
  0xfd   :  { %v599_v17 = vpop.eup %598  ;;  %v311_v19 = vmul.f32 %v597_v34, %v719_v61 }
  0xfe   :  { %v465_v23 = vpack.c.bf16 %v303_v16, %v302_v37  ;;  %v301_v24 = vmul.f32 %v599_v17, %v722_v1  ;;  %v601_v26 = vpop.eup %600 }
  0xff   :  { %v485_v25 = vpack.c.bf16 %v311_v19, %v310_v18  ;;  %v308_v42 = vmul.f32 %v601_v26, %v711_v53 }
 0x100   :  { %489 = vst [vmem:[%s774_s3 + $0x18] sm:$0xff] %v465_v23   ;;  %v460_v27 = vpack.c.bf16 %v301_v24, %v300_v22 }
 0x101   :  { %493 = vst [vmem:[%s774_s3 + $0x38] sm:$0xff] %v485_v25  }
 0x102   :  { %v603_v41 = vpop.eup %602  ;;  %488 = vst [vmem:[%s774_s3 + $0x10] sm:$0xff] %v460_v27  }
 0x103   :  { %v309_v51 = vmul.f32 %v603_v41, %v725_v2 }
 0x105   :  { %v480_v60 = vpack.c.bf16 %v309_v51, %v308_v42 }
 0x107   :  { %492 = vst [vmem:[%s774_s3 + $0x30] sm:$0xff] %v480_v60  }

// kernel: _lambda_.31
= control target key start
LH: loop header
LB: loop body
LE: loop exit
PB: predicated region body
PF: predicated region fallthrough
CT: control target
= control target key end

     0   :  { %v744_v0 = vmov 0   ;;  %vm197_vm0 = vcmask 351232   ;;  %vm222_vm1 = vcmask 1044480   ;;  %vm223_vm2 = vcmask 1045504   ;;  %s986_s1 = inlined_call_operand.vmem [shape: bf16[171,128], index: 1, kind: input, shape index: {}]   ;;  %s987_s0 = inlined_call_operand.vmem [shape: bf16[128,171], index: 0, kind: input, shape index: {}]   ;;  %s988_s2 = inlined_call_operand.vmem [shape: f32[1,128], index: 2, kind: input, shape index: {}]   ;;  %s989_s3 = inlined_call_operand.vmem [shape: bf16[128,128], index: 3, kind: output, shape index: {}]  }
   0x1   :  { %229 = vmatprep.subr.bf16.mxu0 %v744_v0  ;;  %621 = vmatprep.subr.bf16.mxu1 %v744_v0  ;;  %v645_v1 = vld [vmem:[%s986_s1 + $0x38] sm:$0xff]   ;;  %v646_v2 = vld [vmem:[%s986_s1 + $0x30] sm:$0xff]   ;;  %v647_v3 = vld [vmem:[%s986_s1 + $0x28] sm:$0xff]   ;;  %v745_v10 = vmov 65535  }
   0x2   :  { %230 = vmatpush1.bf16.msra.mxu0 %v645_v1  ;;  %632 = vmatpush1.bf16.msra.mxu1 %v645_v1  ;;  %v648_v4 = vld [vmem:[%s986_s1 + $0x20] sm:$0xff]   ;;  %v649_v7 = vld [vmem:[%s986_s1 + $0x18] sm:$0xff]   ;;  %v650_v8 = vld [vmem:[%s986_s1 + $0x10] sm:$0xff]   ;;  %v224_v11 = vsel %vm222_vm1, 4294967295, %v745_v10 }
   0x3   :  { %231 = vmatprep.subr.bf16.mxu0 %v744_v0  ;;  %622 = vmatprep.subr.bf16.mxu1 %v744_v0  ;;  %v658_v5 = vld [vmem:[%s987_s0 + $0x4] ss:$8 sps:$4 sm:$0xff]   ;;  %v653_v13 = vld [vmem:[%s986_s1 + $0x50] sm:$0x3f]   ;;  %v225_v14 = vsel %vm223_vm2, %v224_v11, 0 }
   0x4   :  { %v661_v6 = vld [vmem:[%s987_s0 + $0x44] ss:$8 sps:$4 sm:$0xff]   ;;  %534 = vmatprep.mubr.msk.bf16.mxu0 %vm197_vm0, %v658_v5  ;;  %v227_v15 = vand.u32 %v653_v13, %v225_v14  ;;  %v656_v18 = vld [vmem:[%s987_s0] ss:$8 sps:$4 sm:$0xff]   ;;  %v662_v20 = vld [vmem:[%s987_s0 + $0x14] ss:$8 sps:$4 sm:$0xff]  }
   0x5   :  { %538 = vmatprep.mubr.msk.bf16.mxu1 %vm197_vm0, %v661_v6  ;;  %v651_v9 = vld [vmem:[%s986_s1 + $0x8] sm:$0xff]   ;;  %v652_v12 = vld [vmem:[%s986_s1] sm:$0xff]   ;;  %v664_v21 = vld [vmem:[%s987_s0 + $0x54] ss:$8 sps:$4 sm:$0xff]  }
   0x6   :  { %232 = vmatpush1.bf16.msra.mxu0 %v646_v2  ;;  %633 = vmatpush1.bf16.msra.mxu1 %v646_v2  ;;  %v654_v16 = vld [vmem:[%s986_s1 + $0x48] sm:$0xff]   ;;  %v655_v17 = vld [vmem:[%s986_s1 + $0x40] sm:$0xff]   ;;  %v666_v22 = vld [vmem:[%s987_s0 + $0x10] ss:$8 sps:$4 sm:$0xff]  }
   0x7   :  { %233 = vmatprep.subr.bf16.mxu0 %v744_v0  ;;  %623 = vmatprep.subr.bf16.mxu1 %v744_v0  ;;  %v659_v19 = vld [vmem:[%s987_s0 + $0x40] ss:$8 sps:$4 sm:$0xff]   ;;  %v667_v23 = vld [vmem:[%s987_s0 + $0x50] ss:$8 sps:$4 sm:$0xff]   ;;  %v668_v24 = vld [vmem:[%s987_s0 + $0x24] ss:$8 sps:$4 sm:$0xff]  }
   0x8   :  { %v670_v25 = vld [vmem:[%s987_s0 + $0x64] ss:$8 sps:$4 sm:$0xff]   ;;  %v672_v26 = vld [vmem:[%s987_s0 + $0x20] ss:$8 sps:$4 sm:$0xff]   ;;  %v674_v28 = vld [vmem:[%s987_s0 + $0x34] ss:$8 sps:$4 sm:$0xff]  }
   0x9   :  { %v673_v27 = vld [vmem:[%s987_s0 + $0x60] ss:$8 sps:$4 sm:$0xff]   ;;  %v676_v29 = vld [vmem:[%s987_s0 + $0x74] ss:$8 sps:$4 sm:$0xff]   ;;  %v678_v30 = vld [vmem:[%s987_s0 + $0x30] ss:$8 sps:$4 sm:$0xff]  }
   0xa   :  { %234 = vmatpush1.bf16.msra.mxu0 %v647_v3  ;;  %634 = vmatpush1.bf16.msra.mxu1 %v647_v3  ;;  %v679_v31 = vld [vmem:[%s987_s0 + $0x70] ss:$8 sps:$4 sm:$0xff]   ;;  %v880_v32 = vld [vmem:[%s988_s2] ss:$0 sm:$0xff] }
   0xb   :  { %235 = vmatprep.subr.bf16.mxu0 %v744_v0  ;;  %624 = vmatprep.subr.bf16.mxu1 %v744_v0 }
   0xe   :  { %236 = vmatpush1.bf16.msra.mxu0 %v648_v4  ;;  %635 = vmatpush1.bf16.msra.mxu1 %v648_v4 }
   0xf   :  { %237 = vmatprep.subr.bf16.mxu0 %v744_v0  ;;  %625 = vmatprep.subr.bf16.mxu1 %v744_v0 }
  0x12   :  { %238 = vmatpush1.bf16.msra.mxu0 %v649_v7  ;;  %636 = vmatpush1.bf16.msra.mxu1 %v649_v7 }
  0x13   :  { %239 = vmatprep.subr.bf16.mxu0 %v744_v0  ;;  %626 = vmatprep.subr.bf16.mxu1 %v744_v0 }
  0x16   :  { %240 = vmatpush1.bf16.msra.mxu0 %v650_v8  ;;  %637 = vmatpush1.bf16.msra.mxu1 %v650_v8 }
  0x17   :  { %241 = vmatprep.subr.bf16.mxu0 %v744_v0  ;;  %627 = vmatprep.subr.bf16.mxu1 %v744_v0 }
  0x1a   :  { %242 = vmatpush1.bf16.msra.mxu0 %v651_v9  ;;  %638 = vmatpush1.bf16.msra.mxu1 %v651_v9 }
  0x1b   :  { %243 = vmatprep.subr.bf16.mxu0 %v744_v0  ;;  %628 = vmatprep.subr.bf16.mxu1 %v744_v0 }
  0x1e   :  { %244 = vmatpush1.bf16.msra.mxu0 %v652_v12  ;;  %639 = vmatpush1.bf16.msra.mxu1 %v652_v12 }
  0x1f   :  { %255 = vmatprep.subr.bf16.mxu0 %v744_v0  ;;  %629 = vmatprep.subr.bf16.mxu1 %v744_v0 }
  0x22   :  { %256 = vmatpush2.bf16.msra.mxu0 %v227_v15  ;;  %640 = vmatpush2.bf16.msra.mxu1 %v227_v15 }
  0x23   :  { %257 = vmatprep.subr.bf16.mxu0 %v744_v0  ;;  %630 = vmatprep.subr.bf16.mxu1 %v744_v0 }
  0x26   :  { %258 = vmatpush2.bf16.msra.mxu0 %v654_v16  ;;  %641 = vmatpush2.bf16.msra.mxu1 %v654_v16 }
  0x27   :  { %259 = vmatprep.subr.bf16.mxu0 %v744_v0  ;;  %631 = vmatprep.subr.bf16.mxu1 %v744_v0 }
  0x2a   :  { %260 = vmatpush2.bf16.msra.mxu0 %v655_v17  ;;  %642 = vmatpush2.bf16.msra.mxu1 %v655_v17 }
  0x2d   :  { %262 = vmatmul.mubr.bf16.vlgmr.msra.gmra.mxu0 %v656_v18  ;;  %294 = vmatmul.mubr.bf16.vlgmr.msra.gmra.mxu1 %v659_v19 }
  0x2e   :  { %535 = vmatprep.mubr.msk.bf16.mxu0 %vm197_vm0, %v662_v20  ;;  %539 = vmatprep.mubr.msk.bf16.mxu1 %vm197_vm0, %v664_v21 }
  0x35   :  { %270 = vmatmul.mubr.bf16.gmra.mxu0 %v666_v22  ;;  %302 = vmatmul.mubr.bf16.gmra.mxu1 %v667_v23 }
  0x36   :  { %536 = vmatprep.mubr.msk.bf16.mxu0 %vm197_vm0, %v668_v24  ;;  %540 = vmatprep.mubr.msk.bf16.mxu1 %vm197_vm0, %v670_v25 }
  0x3d   :  { %278 = vmatmul.mubr.bf16.gmra.mxu0 %v672_v26  ;;  %310 = vmatmul.mubr.bf16.gmra.mxu1 %v673_v27 }
  0x3e   :  { %537 = vmatprep.mubr.msk.bf16.mxu0 %vm197_vm0, %v674_v28  ;;  %541 = vmatprep.mubr.msk.bf16.mxu1 %vm197_vm0, %v676_v29 }
  0x45   :  { %286 = vmatmul.mubr.bf16.gmra.mxu0 %v678_v30  ;;  %318 = vmatmul.mubr.bf16.gmra.mxu1 %v679_v31 }
  0xed   :  { %v263_v33 = vpop.f32.mrf.mxu0  ;;  %v295_v34 = vpop.f32.mrf.mxu1 }
  0xee   :  { %v883_v35 = vadd.f32 %v880_v32, %v263_v33  ;;  %v886_v36 = vadd.f32 %v880_v32, %v295_v34 }
  0xef   :  { %v265_v37 = vpop.f32.mrf.mxu0  ;;  %v297_v38 = vpop.f32.mrf.mxu1 }
  0xf0   :  { %v326_v39 = vsub.f32 0.0, %v883_v35  ;;  %v334_v40 = vsub.f32 0.0, %v886_v36 }
  0xf1   :  { %v266_v41 = vpop.f32.mrf.mxu0  ;;  %v298_v42 = vpop.f32.mrf.mxu1 }
  0xf2   :  { %v342_v43 = vmul.f32 1.442695, %v326_v39  ;;  %v358_v44 = vmul.f32 1.442695, %v334_v40  ;;  %v891_v45 = vadd.f32 %v880_v32, %v266_v41  ;;  %v894_v46 = vadd.f32 %v880_v32, %v298_v42 }
  0xf3   :  { %v268_v47 = vpop.f32.mrf.mxu0  ;;  %v300_v48 = vpop.f32.mrf.mxu1 }
  0xf4   :  { %680 = vpow2.f32 %v342_v43  ;;  %v327_v49 = vsub.f32 0.0, %v891_v45  ;;  %v335_v50 = vsub.f32 0.0, %v894_v46 }
  0xf5   :  { %682 = vpow2.f32 %v358_v44  ;;  %v271_v51 = vpop.f32.mrf.mxu0  ;;  %v303_v52 = vpop.f32.mrf.mxu1 }
  0xf6   :  { %v344_v53 = vmul.f32 1.442695, %v327_v49  ;;  %v360_v54 = vmul.f32 1.442695, %v335_v50  ;;  %v899_v55 = vadd.f32 %v880_v32, %v271_v51  ;;  %v902_v56 = vadd.f32 %v880_v32, %v303_v52 }
  0xf7   :  { %v273_v57 = vpop.f32.mrf.mxu0  ;;  %v305_v58 = vpop.f32.mrf.mxu1 }
  0xf8   :  { %684 = vpow2.f32 %v344_v53  ;;  %v328_v59 = vsub.f32 0.0, %v899_v55  ;;  %v336_v60 = vsub.f32 0.0, %v902_v56 }
  0xf9   :  { %686 = vpow2.f32 %v360_v54  ;;  %v274_v61 = vpop.f32.mrf.mxu0  ;;  %v306_v62 = vpop.f32.mrf.mxu1 }
  0xfa   :  { %v346_v63 = vmul.f32 1.442695, %v328_v59  ;;  %v362_v0 = vmul.f32 1.442695, %v336_v60  ;;  %v907_v1 = vadd.f32 %v880_v32, %v274_v61  ;;  %v910_v2 = vadd.f32 %v880_v32, %v306_v62 }
  0xfb   :  { %v276_v3 = vpop.f32.mrf.mxu0  ;;  %v308_v4 = vpop.f32.mrf.mxu1 }
  0xfc   :  { %688 = vpow2.f32 %v346_v63  ;;  %v329_v5 = vsub.f32 0.0, %v907_v1  ;;  %v337_v6 = vsub.f32 0.0, %v910_v2 }
  0xfd   :  { %690 = vpow2.f32 %v362_v0  ;;  %v279_v7 = vpop.f32.mrf.mxu0  ;;  %v311_v8 = vpop.f32.mrf.mxu1 }
  0xfe   :  { %v348_v9 = vmul.f32 1.442695, %v329_v5  ;;  %v364_v10 = vmul.f32 1.442695, %v337_v6  ;;  %v915_v11 = vadd.f32 %v880_v32, %v279_v7  ;;  %v918_v12 = vadd.f32 %v880_v32, %v311_v8 }
  0xff   :  { %v281_v13 = vpop.f32.mrf.mxu0  ;;  %v313_v14 = vpop.f32.mrf.mxu1 }
 0x100   :  { %692 = vpow2.f32 %v348_v9  ;;  %v330_v15 = vsub.f32 0.0, %v915_v11  ;;  %v338_v16 = vsub.f32 0.0, %v918_v12 }
 0x101   :  { %v681_v17 = vpop.eup %680  ;;  %694 = vpow2.f32 %v364_v10  ;;  %v282_v18 = vpop.f32.mrf.mxu0 }
 0x102   :  { %v314_v19 = vpop.f32.mrf.mxu1  ;;  %v683_v20 = vpop.eup %682  ;;  %v374_v21 = vadd.f32 1.0, %v681_v17  ;;  %v350_v22 = vmul.f32 1.442695, %v330_v15  ;;  %v923_v23 = vadd.f32 %v880_v32, %v282_v18  ;;  %v366_v25 = vmul.f32 1.442695, %v338_v16 }
 0x103   :  { %v382_v24 = vadd.f32 1.0, %v683_v20  ;;  %v926_v26 = vadd.f32 %v880_v32, %v314_v19  ;;  %v284_v27 = vpop.f32.mrf.mxu0 }
 0x104   :  { %v316_v28 = vpop.f32.mrf.mxu1  ;;  %696 = vrcp.f32 %v374_v21  ;;  %v331_v29 = vsub.f32 0.0, %v923_v23 }
 0x105   :  { %v685_v30 = vpop.eup %684  ;;  %698 = vrcp.f32 %v382_v24  ;;  %v339_v31 = vsub.f32 0.0, %v926_v26  ;;  %v287_v33 = vpop.f32.mrf.mxu0 }
 0x106   :  { %v319_v34 = vpop.f32.mrf.mxu1  ;;  %v687_v37 = vpop.eup %686  ;;  %v375_v38 = vadd.f32 1.0, %v685_v30  ;;  %700 = vpow2.f32 %v350_v22  ;;  %v352_v39 = vmul.f32 1.442695, %v331_v29  ;;  %v931_v40 = vadd.f32 %v880_v32, %v287_v33 }
 0x107   :  { %v383_v41 = vadd.f32 1.0, %v687_v37  ;;  %702 = vpow2.f32 %v366_v25  ;;  %v368_v42 = vmul.f32 1.442695, %v339_v31  ;;  %v934_v43 = vadd.f32 %v880_v32, %v319_v34  ;;  %v289_v44 = vpop.f32.mrf.mxu0 }
 0x108   :  { %v321_v47 = vpop.f32.mrf.mxu1  ;;  %704 = vrcp.f32 %v375_v38  ;;  %v332_v48 = vsub.f32 0.0, %v931_v40 }
 0x109   :  { %v689_v49 = vpop.eup %688  ;;  %706 = vrcp.f32 %v383_v41  ;;  %v340_v50 = vsub.f32 0.0, %v934_v43  ;;  %v290_v51 = vpop.f32.mrf.mxu0 }
 0x10a   :  { %v322_v52 = vpop.f32.mrf.mxu1  ;;  %v691_v53 = vpop.eup %690  ;;  %v376_v54 = vadd.f32 1.0, %v689_v49  ;;  %708 = vpow2.f32 %v352_v39  ;;  %v354_v57 = vmul.f32 1.442695, %v332_v48  ;;  %v939_v58 = vadd.f32 %v880_v32, %v290_v51 }
 0x10b   :  { %v384_v59 = vadd.f32 1.0, %v691_v53  ;;  %710 = vpow2.f32 %v368_v42  ;;  %v370_v60 = vmul.f32 1.442695, %v340_v50  ;;  %v942_v61 = vadd.f32 %v880_v32, %v322_v52  ;;  %v292_v62 = vpop.f32.mrf.mxu0 }
 0x10c   :  { %v324_v63 = vpop.f32.mrf.mxu1  ;;  %712 = vrcp.f32 %v376_v54  ;;  %v333_v0 = vsub.f32 0.0, %v939_v58 }
 0x10d   :  { %v693_v3 = vpop.eup %692  ;;  %714 = vrcp.f32 %v384_v59  ;;  %v341_v4 = vsub.f32 0.0, %v942_v61 }
 0x10e   :  { %v695_v5 = vpop.eup %694  ;;  %v377_v6 = vadd.f32 1.0, %v693_v3  ;;  %716 = vpow2.f32 %v354_v57  ;;  %v356_v7 = vmul.f32 1.442695, %v333_v0 }
 0x10f   :  { %v385_v8 = vadd.f32 1.0, %v695_v5  ;;  %718 = vpow2.f32 %v370_v60  ;;  %v372_v9 = vmul.f32 1.442695, %v341_v4 }
 0x110   :  { %720 = vrcp.f32 %v377_v6 }
 0x111   :  { %v697_v10 = vpop.eup %696  ;;  %722 = vrcp.f32 %v385_v8 }
 0x112   :  { %v699_v32 = vpop.eup %698  ;;  %724 = vpow2.f32 %v356_v7  ;;  %v406_v19 = vmul.f32 %v697_v10, %v883_v35 }
 0x113   :  { %v701_v13 = vpop.eup %700  ;;  %726 = vpow2.f32 %v372_v9  ;;  %v414_v22 = vmul.f32 %v699_v32, %v886_v36 }
 0x114   :  { %v703_v14 = vpop.eup %702  ;;  %v378_v15 = vadd.f32 1.0, %v701_v13 }
 0x115   :  { %v705_v16 = vpop.eup %704  ;;  %v386_v17 = vadd.f32 1.0, %v703_v14 }
 0x116   :  { %v707_v18 = vpop.eup %706  ;;  %v407_v20 = vmul.f32 %v705_v16, %v891_v45  ;;  %728 = vrcp.f32 %v378_v15 }
 0x117   :  { %v709_v21 = vpop.eup %708  ;;  %v415_v24 = vmul.f32 %v707_v18, %v894_v46  ;;  %730 = vrcp.f32 %v386_v17 }
 0x118   :  { %v711_v25 = vpop.eup %710  ;;  %v577_v27 = vpack.c.bf16 %v407_v20, %v406_v19  ;;  %v379_v28 = vadd.f32 1.0, %v709_v21 }
 0x119   :  { %v713_v29 = vpop.eup %712  ;;  %v597_v30 = vpack.c.bf16 %v415_v24, %v414_v22  ;;  %v387_v31 = vadd.f32 1.0, %v711_v25 }
 0x11a   :  { %v715_v33 = vpop.eup %714  ;;  %578 = vst [vmem:[%s989_s3] sm:$0xff] %v577_v27   ;;  %732 = vrcp.f32 %v379_v28  ;;  %v408_v38 = vmul.f32 %v713_v29, %v899_v55 }
 0x11b   :  { %v717_v35 = vpop.eup %716  ;;  %617 = vst [vmem:[%s989_s3 + $0x20] sm:$0xff] %v597_v30   ;;  %734 = vrcp.f32 %v387_v31  ;;  %v416_v42 = vmul.f32 %v715_v33, %v902_v56 }
 0x11c   :  { %v719_v36 = vpop.eup %718  ;;  %v380_v45 = vadd.f32 1.0, %v717_v35 }
 0x11d   :  { %v721_v46 = vpop.eup %720  ;;  %v388_v34 = vadd.f32 1.0, %v719_v36 }
 0x11e   :  { %v723_v37 = vpop.eup %722  ;;  %v409_v39 = vmul.f32 %v721_v46, %v907_v1  ;;  %736 = vrcp.f32 %v380_v45 }
 0x11f   :  { %v725_v41 = vpop.eup %724  ;;  %v417_v44 = vmul.f32 %v723_v37, %v910_v2  ;;  %738 = vrcp.f32 %v388_v34 }
 0x120   :  { %v727_v47 = vpop.eup %726  ;;  %v582_v48 = vpack.c.bf16 %v409_v39, %v408_v38  ;;  %v381_v49 = vadd.f32 1.0, %v725_v41 }
 0x121   :  { %v602_v50 = vpack.c.bf16 %v417_v44, %v416_v42  ;;  %v389_v51 = vadd.f32 1.0, %v727_v47 }
 0x122   :  { %614 = vst [vmem:[%s989_s3 + $0x8] sm:$0xff] %v582_v48   ;;  %740 = vrcp.f32 %v381_v49 }
 0x123   :  { %618 = vst [vmem:[%s989_s3 + $0x28] sm:$0xff] %v602_v50   ;;  %742 = vrcp.f32 %v389_v51  ;;  %v729_v55 = vpop.eup %728 }
 0x124   :  { %v731_v56 = vpop.eup %730  ;;  %v410_v52 = vmul.f32 %v729_v55, %v915_v11 }
 0x125   :  { %v418_v54 = vmul.f32 %v731_v56, %v918_v12 }
 0x127   :  { %v733_v1 = vpop.eup %732 }
 0x128   :  { %v735_v2 = vpop.eup %734  ;;  %v411_v53 = vmul.f32 %v733_v1, %v923_v23 }
 0x129   :  { %v419_v57 = vmul.f32 %v735_v2, %v926_v26 }
 0x12a   :  { %v587_v59 = vpack.c.bf16 %v411_v53, %v410_v52 }
 0x12b   :  { %v607_v60 = vpack.c.bf16 %v419_v57, %v418_v54  ;;  %v737_v62 = vpop.eup %736 }
 0x12c   :  { %615 = vst [vmem:[%s989_s3 + $0x10] sm:$0xff] %v587_v59   ;;  %v739_v63 = vpop.eup %738  ;;  %v412_v23 = vmul.f32 %v737_v62, %v931_v40 }
 0x12d   :  { %619 = vst [vmem:[%s989_s3 + $0x30] sm:$0xff] %v607_v60   ;;  %v420_v26 = vmul.f32 %v739_v63, %v934_v43 }
 0x12f   :  { %v741_v0 = vpop.eup %740 }
 0x130   :  { %v743_v11 = vpop.eup %742  ;;  %v413_v12 = vmul.f32 %v741_v0, %v939_v58 }
 0x131   :  { %v421_v3 = vmul.f32 %v743_v11, %v942_v61 }
 0x132   :  { %v592_v4 = vpack.c.bf16 %v413_v12, %v412_v23 }
 0x133   :  { %v612_v5 = vpack.c.bf16 %v421_v3, %v420_v26 }
 0x134   :  { %616 = vst [vmem:[%s989_s3 + $0x18] sm:$0xff] %v592_v4  }
 0x135   :  { %620 = vst [vmem:[%s989_s3 + $0x38] sm:$0xff] %v612_v5  }

// kernel: _lambda_.34
= control target key start
LH: loop header
LB: loop body
LE: loop exit
PB: predicated region body
PF: predicated region fallthrough
CT: control target
= control target key end

     0   :  { %vm118_vm0 = vcmask 1043456   ;;  %vm119_vm1 = vcmask 1044480   ;;  %v609_v1 = vmov 65535   ;;  %vm93_vm2 = vcmask 203776   ;;  %s777_s1 = inlined_call_operand.vmem [shape: bf16[25,128], index: 1, kind: input, shape index: {}]   ;;  %s778_s0 = inlined_call_operand.vmem [shape: bf16[128,25], index: 0, kind: input, shape index: {}]   ;;  %s779_s2 = inlined_call_operand.vmem [shape: f32[1,128], index: 2, kind: input, shape index: {}]   ;;  %s780_s3 = inlined_call_operand.vmem [shape: bf16[128,128], index: 3, kind: output, shape index: {}]  }
   0x1   :  { %v535_v0 = vld [vmem:[%s777_s1 + $0x8] sm:$0x1f]   ;;  %v120_v2 = vsel %vm118_vm0, 4294967295, %v609_v1  ;;  %v537_v4 = vld [vmem:[%s778_s0] sm:$0xff]   ;;  %v541_v10 = vld [vmem:[%s778_s0 + $0x10] sm:$0xff]  }
   0x2   :  { %v121_v3 = vsel %vm119_vm1, %v120_v2, 0  ;;  %v536_v6 = vld [vmem:[%s777_s1] sm:$0xff]   ;;  %514 = vmatprep.mubr.msk.bf16.mxu0 %vm93_vm2, %v537_v4  ;;  %v539_v8 = vld [vmem:[%s778_s0 + $0x8] sm:$0xff]   ;;  %v542_v11 = vld [vmem:[%s778_s0 + $0x30] sm:$0xff]  }
   0x3   :  { %v123_v5 = vand.u32 %v535_v0, %v121_v3  ;;  %v538_v7 = vld [vmem:[%s778_s0 + $0x20] sm:$0xff]   ;;  %v540_v9 = vld [vmem:[%s778_s0 + $0x28] sm:$0xff]   ;;  %v543_v12 = vld [vmem:[%s778_s0 + $0x18] sm:$0xff]  }
   0x4   :  { %522 = vmatprep.mubr.msk.bf16.mxu1 %vm93_vm2, %v538_v7  ;;  %v544_v13 = vld [vmem:[%s778_s0 + $0x38] sm:$0xff]   ;;  %v671_v14 = vld [vmem:[%s779_s2] ss:$0 sm:$0xff] }
   0x5   :  { %510 = vmatprep.subr.bf16.mxu0 %v123_v5  ;;  %530 = vmatprep.subr.bf16.mxu1 %v123_v5 }
   0x6   :  { %511 = vmatpush3.bf16.msra.mxu0 %v123_v5  ;;  %532 = vmatpush3.bf16.msra.mxu1 %v123_v5 }
   0x7   :  { %512 = vmatprep.subr.bf16.mxu0 %v536_v6  ;;  %531 = vmatprep.subr.bf16.mxu1 %v536_v6 }
   0xa   :  { %513 = vmatpush3.bf16.msra.mxu0 %v536_v6  ;;  %533 = vmatpush3.bf16.msra.mxu1 %v536_v6 }
   0xd   :  { %515 = vmatmul.mubr.msk.bf16.vlgmr.msra.gmra.mxu0 %vm93_vm2, %v539_v8  ;;  %523 = vmatmul.mubr.msk.bf16.vlgmr.msra.gmra.mxu1 %vm93_vm2, %v540_v9 }
   0xe   :  { %518 = vmatprep.mubr.msk.bf16.mxu0 %vm93_vm2, %v541_v10  ;;  %526 = vmatprep.mubr.msk.bf16.mxu1 %vm93_vm2, %v542_v11 }
  0x15   :  { %519 = vmatmul.mubr.msk.bf16.gmra.mxu0 %vm93_vm2, %v543_v12  ;;  %527 = vmatmul.mubr.msk.bf16.gmra.mxu1 %vm93_vm2, %v544_v13 }
  0xcd   :  { %v516_v15 = vpop.f32.mrf.mxu0  ;;  %v524_v16 = vpop.f32.mrf.mxu1 }
  0xce   :  { %v674_v17 = vadd.f32 %v516_v15, %v671_v14  ;;  %v677_v18 = vadd.f32 %v524_v16, %v671_v14 }
  0xcf   :  { %v159_v19 = vpop.f32.mrf.mxu0  ;;  %v191_v20 = vpop.f32.mrf.mxu1 }
  0xd0   :  { %v224_v21 = vsub.f32 0.0, %v674_v17  ;;  %v232_v22 = vsub.f32 0.0, %v677_v18  ;;  %v682_v23 = vadd.f32 %v671_v14, %v159_v19  ;;  %v685_v24 = vadd.f32 %v671_v14, %v191_v20 }
  0xd1   :  { %v517_v25 = vpop.f32.mrf.mxu0  ;;  %v525_v26 = vpop.f32.mrf.mxu1 }
  0xd2   :  { %v242_v27 = vmul.f32 1.442695, %v224_v21  ;;  %v258_v28 = vmul.f32 1.442695, %v232_v22  ;;  %v222_v29 = vsub.f32 0.0, %v682_v23  ;;  %v230_v30 = vsub.f32 0.0, %v685_v24 }
  0xd3   :  { %v690_v31 = vadd.f32 %v517_v25, %v671_v14  ;;  %v693_v32 = vadd.f32 %v525_v26, %v671_v14  ;;  %v162_v33 = vpop.f32.mrf.mxu0  ;;  %v194_v34 = vpop.f32.mrf.mxu1 }
  0xd4   :  { %545 = vpow2.f32 %v242_v27  ;;  %v238_v35 = vmul.f32 1.442695, %v222_v29  ;;  %v254_v36 = vmul.f32 1.442695, %v230_v30  ;;  %v696_v37 = vadd.f32 %v671_v14, %v162_v33 }
  0xd5   :  { %547 = vpow2.f32 %v258_v28  ;;  %v225_v38 = vsub.f32 0.0, %v690_v31  ;;  %v233_v39 = vsub.f32 0.0, %v693_v32  ;;  %v701_v40 = vadd.f32 %v671_v14, %v194_v34  ;;  %v520_v41 = vpop.f32.mrf.mxu0  ;;  %v528_v42 = vpop.f32.mrf.mxu1 }
  0xd6   :  { %549 = vpow2.f32 %v238_v35  ;;  %v223_v43 = vsub.f32 0.0, %v696_v37  ;;  %v705_v44 = vadd.f32 %v520_v41, %v671_v14  ;;  %v708_v45 = vadd.f32 %v528_v42, %v671_v14 }
  0xd7   :  { %551 = vpow2.f32 %v254_v36  ;;  %v244_v46 = vmul.f32 1.442695, %v225_v38  ;;  %v260_v47 = vmul.f32 1.442695, %v233_v39  ;;  %v231_v48 = vsub.f32 0.0, %v701_v40  ;;  %v175_v49 = vpop.f32.mrf.mxu0  ;;  %v207_v50 = vpop.f32.mrf.mxu1 }
  0xd8   :  { %v240_v51 = vmul.f32 1.442695, %v223_v43  ;;  %v228_v52 = vsub.f32 0.0, %v705_v44  ;;  %v236_v53 = vsub.f32 0.0, %v708_v45  ;;  %v714_v54 = vadd.f32 %v671_v14, %v175_v49 }
  0xd9   :  { %553 = vpow2.f32 %v244_v46  ;;  %v256_v55 = vmul.f32 1.442695, %v231_v48  ;;  %v717_v56 = vadd.f32 %v671_v14, %v207_v50  ;;  %v521_v57 = vpop.f32.mrf.mxu0  ;;  %v529_v58 = vpop.f32.mrf.mxu1 }
  0xda   :  { %555 = vpow2.f32 %v260_v47  ;;  %v250_v59 = vmul.f32 1.442695, %v228_v52  ;;  %v266_v60 = vmul.f32 1.442695, %v236_v53  ;;  %v226_v61 = vsub.f32 0.0, %v714_v54 }
  0xdb   :  { %557 = vpow2.f32 %v240_v51  ;;  %v234_v62 = vsub.f32 0.0, %v717_v56  ;;  %v722_v63 = vadd.f32 %v521_v57, %v671_v14  ;;  %v725_v0 = vadd.f32 %v529_v58, %v671_v14  ;;  %v178_v1 = vpop.f32.mrf.mxu0  ;;  %v210_v2 = vpop.f32.mrf.mxu1 }
  0xdc   :  { %559 = vpow2.f32 %v256_v55  ;;  %v246_v3 = vmul.f32 1.442695, %v226_v61  ;;  %v728_v4 = vadd.f32 %v671_v14, %v178_v1  ;;  %v731_v5 = vadd.f32 %v671_v14, %v210_v2 }
  0xdd   :  { %561 = vpow2.f32 %v250_v59  ;;  %v262_v6 = vmul.f32 1.442695, %v234_v62  ;;  %v229_v7 = vsub.f32 0.0, %v722_v63  ;;  %v237_v8 = vsub.f32 0.0, %v725_v0 }
  0xde   :  { %563 = vpow2.f32 %v266_v60  ;;  %v227_v9 = vsub.f32 0.0, %v728_v4  ;;  %v235_v13 = vsub.f32 0.0, %v731_v5 }
  0xdf   :  { %565 = vpow2.f32 %v246_v3  ;;  %v252_v10 = vmul.f32 1.442695, %v229_v7  ;;  %v268_v11 = vmul.f32 1.442695, %v237_v8 }
  0xe0   :  { %567 = vpow2.f32 %v262_v6  ;;  %v248_v12 = vmul.f32 1.442695, %v227_v9  ;;  %v264_v25 = vmul.f32 1.442695, %v235_v13 }
  0xe1   :  { %v546_v15 = vpop.eup %545  ;;  %569 = vpow2.f32 %v252_v10 }
  0xe2   :  { %v548_v14 = vpop.eup %547  ;;  %v272_v16 = vadd.f32 1.0, %v546_v15  ;;  %571 = vpow2.f32 %v268_v11 }
  0xe3   :  { %v550_v19 = vpop.eup %549  ;;  %v280_v20 = vadd.f32 1.0, %v548_v14  ;;  %573 = vpow2.f32 %v248_v12 }
  0xe4   :  { %v552_v21 = vpop.eup %551  ;;  %575 = vrcp.f32 %v272_v16  ;;  %v270_v22 = vadd.f32 1.0, %v550_v19 }
  0xe5   :  { %577 = vrcp.f32 %v280_v20  ;;  %v278_v26 = vadd.f32 1.0, %v552_v21 }
  0xe6   :  { %v554_v27 = vpop.eup %553  ;;  %579 = vrcp.f32 %v270_v22 }
  0xe7   :  { %v556_v28 = vpop.eup %555  ;;  %581 = vrcp.f32 %v278_v26  ;;  %v273_v29 = vadd.f32 1.0, %v554_v27 }
  0xe8   :  { %v558_v30 = vpop.eup %557  ;;  %v281_v33 = vadd.f32 1.0, %v556_v28  ;;  %583 = vpow2.f32 %v264_v25 }
  0xe9   :  { %v560_v34 = vpop.eup %559  ;;  %585 = vrcp.f32 %v273_v29  ;;  %v271_v35 = vadd.f32 1.0, %v558_v30 }
  0xea   :  { %v562_v36 = vpop.eup %561  ;;  %587 = vrcp.f32 %v281_v33  ;;  %v279_v38 = vadd.f32 1.0, %v560_v34 }
  0xeb   :  { %v564_v39 = vpop.eup %563  ;;  %589 = vrcp.f32 %v271_v35  ;;  %v276_v41 = vadd.f32 1.0, %v562_v36 }
  0xec   :  { %v566_v42 = vpop.eup %565  ;;  %591 = vrcp.f32 %v279_v38  ;;  %v284_v43 = vadd.f32 1.0, %v564_v39 }
  0xed   :  { %v568_v46 = vpop.eup %567  ;;  %v274_v47 = vadd.f32 1.0, %v566_v42  ;;  %593 = vrcp.f32 %v276_v41 }
  0xee   :  { %v570_v48 = vpop.eup %569  ;;  %595 = vrcp.f32 %v284_v43  ;;  %v282_v58 = vadd.f32 1.0, %v568_v46 }
  0xef   :  { %v572_v49 = vpop.eup %571  ;;  %v277_v50 = vadd.f32 1.0, %v570_v48  ;;  %597 = vrcp.f32 %v274_v47 }
  0xf0   :  { %v574_v51 = vpop.eup %573  ;;  %v285_v52 = vadd.f32 1.0, %v572_v49 }
  0xf1   :  { %v576_v53 = vpop.eup %575  ;;  %599 = vrcp.f32 %v277_v50  ;;  %v275_v55 = vadd.f32 1.0, %v574_v51 }
  0xf2   :  { %v578_v57 = vpop.eup %577  ;;  %601 = vrcp.f32 %v285_v52  ;;  %v304_v3 = vmul.f32 %v576_v53, %v674_v17 }
  0xf3   :  { %v580_v59 = vpop.eup %579  ;;  %603 = vrcp.f32 %v275_v55  ;;  %v312_v8 = vmul.f32 %v578_v57, %v677_v18 }
  0xf4   :  { %v582_v60 = vpop.eup %581  ;;  %605 = vrcp.f32 %v282_v58  ;;  %v302_v11 = vmul.f32 %v580_v59, %v682_v23 }
  0xf5   :  { %v584_v61 = vpop.eup %583  ;;  %v310_v15 = vmul.f32 %v582_v60, %v685_v24 }
  0xf6   :  { %v586_v62 = vpop.eup %585  ;;  %v283_v1 = vadd.f32 1.0, %v584_v61 }
  0xf7   :  { %v588_v2 = vpop.eup %587  ;;  %v305_v6 = vmul.f32 %v586_v62, %v690_v31 }
  0xf8   :  { %v590_v7 = vpop.eup %589  ;;  %v313_v9 = vmul.f32 %v588_v2, %v693_v32  ;;  %607 = vrcp.f32 %v283_v1 }
  0xf9   :  { %v592_v10 = vpop.eup %591  ;;  %v461_v12 = vpack.c.bf16 %v305_v6, %v304_v3  ;;  %v303_v13 = vmul.f32 %v590_v7, %v696_v37 }
  0xfa   :  { %v481_v14 = vpack.c.bf16 %v313_v9, %v312_v8  ;;  %v311_v16 = vmul.f32 %v592_v10, %v701_v40  ;;  %v594_v17 = vpop.eup %593 }
  0xfb   :  { %493 = vst [vmem:[%s780_s3 + $0x8] sm:$0xff] %v461_v12   ;;  %v456_v18 = vpack.c.bf16 %v303_v13, %v302_v11  ;;  %v596_v31 = vpop.eup %595  ;;  %v308_v40 = vmul.f32 %v594_v17, %v705_v44 }
  0xfc   :  { %497 = vst [vmem:[%s780_s3 + $0x28] sm:$0xff] %v481_v14   ;;  %v476_v23 = vpack.c.bf16 %v311_v16, %v310_v15  ;;  %v598_v32 = vpop.eup %597  ;;  %v316_v21 = vmul.f32 %v596_v31, %v708_v45 }
  0xfd   :  { %457 = vst [vmem:[%s780_s3] sm:$0xff] %v456_v18   ;;  %v306_v25 = vmul.f32 %v598_v32, %v714_v54 }
  0xfe   :  { %v600_v24 = vpop.eup %599  ;;  %496 = vst [vmem:[%s780_s3 + $0x20] sm:$0xff] %v476_v23  }
  0xff   :  { %v602_v37 = vpop.eup %601  ;;  %v309_v19 = vmul.f32 %v600_v24, %v722_v63 }
 0x100   :  { %v604_v20 = vpop.eup %603  ;;  %v317_v22 = vmul.f32 %v602_v37, %v725_v0 }
 0x101   :  { %v471_v26 = vpack.c.bf16 %v309_v19, %v308_v40  ;;  %v307_v27 = vmul.f32 %v604_v20, %v728_v4  ;;  %v606_v29 = vpop.eup %605 }
 0x102   :  { %v491_v28 = vpack.c.bf16 %v317_v22, %v316_v21  ;;  %v314_v45 = vmul.f32 %v606_v29, %v717_v56 }
 0x103   :  { %495 = vst [vmem:[%s780_s3 + $0x18] sm:$0xff] %v471_v26   ;;  %v466_v30 = vpack.c.bf16 %v307_v27, %v306_v25 }
 0x104   :  { %499 = vst [vmem:[%s780_s3 + $0x38] sm:$0xff] %v491_v28  }
 0x105   :  { %v608_v44 = vpop.eup %607  ;;  %494 = vst [vmem:[%s780_s3 + $0x10] sm:$0xff] %v466_v30  }
 0x106   :  { %v315_v54 = vmul.f32 %v608_v44, %v731_v5 }
 0x108   :  { %v486_v63 = vpack.c.bf16 %v315_v54, %v314_v45 }
 0x10a   :  { %498 = vst [vmem:[%s780_s3 + $0x30] sm:$0xff] %v486_v63  }

// kernel: _lambda_.35
= control target key start
LH: loop header
LB: loop body
LE: loop exit
PB: predicated region body
PF: predicated region fallthrough
CT: control target
= control target key end

     0   :  { %vm371_vm0 = vcmask 1042432   ;;  %vm346_vm1 = vcmask 703488   ;;  %s1378_s1 = inlined_call_operand.vmem [shape: bf16[342,128], index: 1, kind: input, shape index: {}]   ;;  %s1379_s0 = inlined_call_operand.vmem [shape: bf16[128,342], index: 0, kind: input, shape index: {}]   ;;  %s1380_s2 = inlined_call_operand.vmem [shape: f32[1,128], index: 2, kind: input, shape index: {}]   ;;  %s1381_s3 = inlined_call_operand.vmem [shape: bf16[128,128], index: 3, kind: output, shape index: {}]  }
   0x1   :  { %v990_v0 = vld [vmem:[%s1378_s1 + $0x78] sm:$0xff]   ;;  %v992_v2 = vld [vmem:[%s1378_s1 + $0x70] sm:$0xff]   ;;  %v994_v4 = vld [vmem:[%s1378_s1 + $0x68] sm:$0xff]  }
   0x2   :  { %v991_v1 = vld [vmem:[%s1378_s1 + $0x38] sm:$0xff]   ;;  %883 = vmatprep.subr.bf16.mxu0 %v990_v0  ;;  %v993_v3 = vld [vmem:[%s1378_s1 + $0x30] sm:$0xff]   ;;  %v995_v5 = vld [vmem:[%s1378_s1 + $0x28] sm:$0xff]  }
   0x3   :  { %884 = vmatpush3.bf16.msra.mxu0 %v991_v1  ;;  %v996_v6 = vld [vmem:[%s1378_s1 + $0x60] sm:$0xff]   ;;  %v997_v7 = vld [vmem:[%s1378_s1 + $0xa8] ss:$0 sps:$4 sm:$0x77]   ;;  %v999_v11 = vld [vmem:[%s1378_s1 + $0x58] sm:$0xff]  }
   0x4   :  { %885 = vmatprep.subr.bf16.mxu0 %v992_v2  ;;  %989 = vmatprep.subr.msk.bf16.mxu1 %vm371_vm0, %v997_v7  ;;  %v373_v8 = vsel %vm371_vm0, %v997_v7, 0  ;;  %v1000_v9 = vld [vmem:[%s1378_s1 + $0xa0] sm:$0xff]   ;;  %v1003_v12 = vld [vmem:[%s1378_s1 + $0x98] sm:$0xff]   ;;  %v1002_v14 = vld [vmem:[%s1378_s1 + $0x50] sm:$0xff]  }
   0x5   :  { %962 = vmatpush3.bf16.msra.mxu1 %v373_v8  ;;  %v998_v10 = vld [vmem:[%s1378_s1 + $0x20] sm:$0xff]   ;;  %v1001_v13 = vld [vmem:[%s1378_s1 + $0x18] sm:$0xff]   ;;  %v1006_v15 = vld [vmem:[%s1378_s1 + $0x90] sm:$0xff]  }
   0x6   :  { %963 = vmatprep.subr.bf16.mxu1 %v1000_v9  ;;  %v1004_v16 = vld [vmem:[%s1378_s1 + $0x10] sm:$0xff]   ;;  %v1009_v17 = vld [vmem:[%s1378_s1 + $0x88] sm:$0xff]   ;;  %v1014_v21 = vld [vmem:[%s1378_s1 + $0x80] sm:$0xff]  }
   0x7   :  { %886 = vmatpush3.bf16.msra.mxu0 %v993_v3  ;;  %v1005_v18 = vld [vmem:[%s1378_s1 + $0x48] sm:$0xff]   ;;  %v1013_v20 = vld [vmem:[%s1379_s0 + $0x4] ss:$12 sps:$4 sm:$0xff]   ;;  %v1020_v32 = vld [vmem:[%s1379_s0 + $0x34] ss:$12 sps:$4 sm:$0xff]  }
   0x8   :  { %887 = vmatprep.subr.bf16.mxu0 %v994_v4  ;;  %v1007_v19 = vld [vmem:[%s1378_s1 + $0x8] sm:$0xff]   ;;  %v1008_v23 = vld [vmem:[%s1378_s1 + $0x40] sm:$0xff]   ;;  %407 = vmatprep.mubr.bf16.mxu0 %v1013_v20  ;;  %v1024_v30 = vld [vmem:[%s1379_s0 + $0x50] ss:$12 sps:$4 sm:$0xff]  }
   0x9   :  { %964 = vmatpush3.bf16.msra.mxu1 %v1000_v9  ;;  %v1015_v22 = vld [vmem:[%s1379_s0 + $0x8] ss:$12 sps:$4 sm:$0xff]   ;;  %v1010_v24 = vld [vmem:[%s1378_s1] sm:$0xff]   ;;  %v1022_v34 = vld [vmem:[%s1379_s0 + $0x30] ss:$12 sps:$4 sm:$0xff]  }
   0xa   :  { %965 = vmatprep.subr.bf16.mxu1 %v1003_v12  ;;  %973 = vmatprep.mubr.msk.bf16.mxu1 %vm346_vm1, %v1015_v22  ;;  %v1016_v25 = vld [vmem:[%s1379_s0 + $0x20] ss:$12 sps:$4 sm:$0xff]   ;;  %v1023_v27 = vld [vmem:[%s1379_s0 + $0x38] ss:$12 sps:$4 sm:$0xff]   ;;  %v1017_v28 = vld [vmem:[%s1379_s0 + $0x1c] ss:$12 sps:$4 sm:$0xff]  }
   0xb   :  { %888 = vmatpush3.bf16.msra.mxu0 %v995_v5  ;;  %v1011_v26 = vld [vmem:[%s1379_s0] ss:$12 sps:$4 sm:$0xff]   ;;  %v1019_v29 = vld [vmem:[%s1379_s0 + $0x18] ss:$12 sps:$4 sm:$0xff]   ;;  %v1031_v31 = vld [vmem:[%s1379_s0 + $0x68] ss:$12 sps:$4 sm:$0xff]  }
   0xc   :  { %889 = vmatprep.subr.bf16.mxu0 %v996_v6  ;;  %v1032_v33 = vld [vmem:[%s1379_s0 + $0x80] ss:$12 sps:$4 sm:$0xff]   ;;  %v1039_v35 = vld [vmem:[%s1379_s0 + $0x98] ss:$12 sps:$4 sm:$0xff]   ;;  %v1040_v37 = vld [vmem:[%s1379_s0 + $0xb0] ss:$12 sps:$4 sm:$0xff]  }
   0xd   :  { %966 = vmatpush3.bf16.msra.mxu1 %v1003_v12  ;;  %v1025_v36 = vld [vmem:[%s1379_s0 + $0x4c] ss:$12 sps:$4 sm:$0xff]   ;;  %v1027_v38 = vld [vmem:[%s1379_s0 + $0x48] ss:$12 sps:$4 sm:$0xff]   ;;  %v1028_v39 = vld [vmem:[%s1379_s0 + $0x64] ss:$12 sps:$4 sm:$0xff]  }
   0xe   :  { %967 = vmatprep.subr.bf16.mxu1 %v1006_v15  ;;  %v1030_v40 = vld [vmem:[%s1379_s0 + $0x60] ss:$12 sps:$4 sm:$0xff]   ;;  %v1033_v41 = vld [vmem:[%s1379_s0 + $0x7c] ss:$12 sps:$4 sm:$0xff]   ;;  %v1035_v42 = vld [vmem:[%s1379_s0 + $0x78] ss:$12 sps:$4 sm:$0xff]  }
   0xf   :  { %890 = vmatpush3.bf16.msra.mxu0 %v998_v10  ;;  %v1036_v43 = vld [vmem:[%s1379_s0 + $0x94] ss:$12 sps:$4 sm:$0xff]   ;;  %v1038_v44 = vld [vmem:[%s1379_s0 + $0x90] ss:$12 sps:$4 sm:$0xff]   ;;  %v1041_v45 = vld [vmem:[%s1379_s0 + $0xac] ss:$12 sps:$4 sm:$0xff]  }
  0x10   :  { %891 = vmatprep.subr.bf16.mxu0 %v999_v11  ;;  %v1043_v46 = vld [vmem:[%s1379_s0 + $0xa8] ss:$12 sps:$4 sm:$0xff]   ;;  %v1277_v51 = vld [vmem:[%s1380_s2] ss:$0 sm:$0xff] }
  0x11   :  { %968 = vmatpush3.bf16.msra.mxu1 %v1006_v15 }
  0x12   :  { %969 = vmatprep.subr.bf16.mxu1 %v1009_v17 }
  0x13   :  { %892 = vmatpush3.bf16.msra.mxu0 %v1001_v13 }
  0x14   :  { %893 = vmatprep.subr.bf16.mxu0 %v1002_v14 }
  0x15   :  { %970 = vmatpush3.bf16.msra.mxu1 %v1009_v17 }
  0x16   :  { %971 = vmatprep.subr.bf16.mxu1 %v1014_v21 }
  0x17   :  { %894 = vmatpush3.bf16.msra.mxu0 %v1004_v16 }
  0x18   :  { %895 = vmatprep.subr.bf16.mxu0 %v1005_v18 }
  0x19   :  { %972 = vmatpush3.bf16.msra.mxu1 %v1014_v21 }
  0x1b   :  { %896 = vmatpush3.bf16.msra.mxu0 %v1007_v19 }
  0x1c   :  { %897 = vmatprep.subr.bf16.mxu0 %v1008_v23  ;;  %974 = vmatmul.mubr.msk.bf16.vlgmr.msra.gmra.mxu1 %vm346_vm1, %v1016_v25 }
  0x1d   :  { %977 = vmatprep.mubr.msk.bf16.mxu1 %vm346_vm1, %v1023_v27 }
  0x1f   :  { %898 = vmatpush3.bf16.msra.mxu0 %v1010_v24 }
  0x22   :  { %408 = vmatmul.mubr.bf16.vlgmr.msra.gmra.mxu0 %v1011_v26 }
  0x23   :  { %415 = vmatprep.mubr.bf16.mxu0 %v1017_v28 }
  0x24   :  { %978 = vmatmul.mubr.msk.bf16.gmra.mxu1 %vm346_vm1, %v1024_v30 }
  0x25   :  { %981 = vmatprep.mubr.msk.bf16.mxu1 %vm346_vm1, %v1031_v31 }
  0x2a   :  { %416 = vmatmul.mubr.bf16.gmra.mxu0 %v1019_v29 }
  0x2b   :  { %423 = vmatprep.mubr.bf16.mxu0 %v1020_v32 }
  0x2c   :  { %982 = vmatmul.mubr.msk.bf16.gmra.mxu1 %vm346_vm1, %v1032_v33 }
  0x2d   :  { %985 = vmatprep.mubr.msk.bf16.mxu1 %vm346_vm1, %v1039_v35 }
  0x32   :  { %424 = vmatmul.mubr.bf16.gmra.mxu0 %v1022_v34 }
  0x33   :  { %431 = vmatprep.mubr.bf16.mxu0 %v1025_v36 }
  0x34   :  { %986 = vmatmul.mubr.msk.bf16.gmra.mxu1 %vm346_vm1, %v1040_v37 }
  0x3a   :  { %432 = vmatmul.mubr.bf16.gmra.mxu0 %v1027_v38 }
  0x3b   :  { %439 = vmatprep.mubr.bf16.mxu0 %v1028_v39 }
  0x42   :  { %440 = vmatmul.mubr.bf16.gmra.mxu0 %v1030_v40 }
  0x43   :  { %447 = vmatprep.mubr.bf16.mxu0 %v1033_v41 }
  0x4a   :  { %448 = vmatmul.mubr.bf16.gmra.mxu0 %v1035_v42 }
  0x4b   :  { %455 = vmatprep.mubr.bf16.mxu0 %v1036_v43 }
  0x52   :  { %456 = vmatmul.mubr.bf16.gmra.mxu0 %v1038_v44 }
  0x53   :  { %463 = vmatprep.mubr.bf16.mxu0 %v1041_v45 }
  0x5a   :  { %464 = vmatmul.mubr.bf16.gmra.mxu0 %v1043_v46 }
  0xdc   :  { %v975_v47 = vpop.f32.mrf.mxu1 }
  0xde   :  { %v506_v49 = vpop.f32.mrf.mxu1 }
  0xe0   :  { %v976_v54 = vpop.f32.mrf.mxu1 }
  0xe2   :  { %v899_v48 = vpop.f32.mrf.mxu0  ;;  %v509_v60 = vpop.f32.mrf.mxu1 }
  0xe4   :  { %v900_v50 = vpop.f32.mrf.mxu0  ;;  %v979_v4 = vpop.f32.mrf.mxu1 }
  0xe5   :  { %v901_v52 = vadd.f32 %v900_v50, %v899_v48 }
  0xe6   :  { %v902_v53 = vpop.f32.mrf.mxu0  ;;  %v522_v12 = vpop.f32.mrf.mxu1 }
  0xe7   :  { %v410_v55 = vadd.f32 %v901_v52, %v1277_v51 }
  0xe8   :  { %v903_v56 = vpop.f32.mrf.mxu0  ;;  %v980_v20 = vpop.f32.mrf.mxu1 }
  0xe9   :  { %v904_v57 = vadd.f32 %v903_v56, %v902_v53  ;;  %v1280_v58 = vadd.f32 %v506_v49, %v410_v55 }
  0xea   :  { %v905_v59 = vpop.f32.mrf.mxu0  ;;  %v525_v28 = vpop.f32.mrf.mxu1 }
  0xeb   :  { %v569_v61 = vsub.f32 0.0, %v1280_v58  ;;  %v413_v62 = vadd.f32 %v904_v57, %v1277_v51 }
  0xec   :  { %v906_v63 = vpop.f32.mrf.mxu0  ;;  %v983_v38 = vpop.f32.mrf.mxu1 }
  0xed   :  { %v585_v0 = vmul.f32 1.442695, %v569_v61  ;;  %v907_v1 = vadd.f32 %v906_v63, %v905_v59  ;;  %v1284_v2 = vadd.f32 %v509_v60, %v413_v62 }
  0xee   :  { %v908_v3 = vpop.f32.mrf.mxu0  ;;  %v538_v48 = vpop.f32.mrf.mxu1 }
  0xef   :  { %1044 = vpow2.f32 %v585_v0  ;;  %v418_v5 = vadd.f32 %v907_v1, %v1277_v51  ;;  %v570_v6 = vsub.f32 0.0, %v1284_v2 }
  0xf0   :  { %v909_v7 = vpop.f32.mrf.mxu0  ;;  %v984_v60 = vpop.f32.mrf.mxu1 }
  0xf1   :  { %v1288_v8 = vadd.f32 %v975_v47, %v418_v5  ;;  %v587_v9 = vmul.f32 1.442695, %v570_v6  ;;  %v910_v10 = vadd.f32 %v909_v7, %v908_v3 }
  0xf2   :  { %v911_v11 = vpop.f32.mrf.mxu0  ;;  %v541_v7 = vpop.f32.mrf.mxu1 }
  0xf3   :  { %v571_v13 = vsub.f32 0.0, %v1288_v8  ;;  %1046 = vpow2.f32 %v587_v9  ;;  %v421_v14 = vadd.f32 %v910_v10, %v1277_v51 }
  0xf4   :  { %v912_v15 = vpop.f32.mrf.mxu0 }
  0xf5   :  { %v589_v16 = vmul.f32 1.442695, %v571_v13  ;;  %v1292_v17 = vadd.f32 %v976_v54, %v421_v14  ;;  %v913_v18 = vadd.f32 %v912_v15, %v911_v11 }
  0xf6   :  { %v914_v19 = vpop.f32.mrf.mxu0 }
  0xf7   :  { %1048 = vpow2.f32 %v589_v16  ;;  %v572_v21 = vsub.f32 0.0, %v1292_v17  ;;  %v426_v22 = vadd.f32 %v913_v18, %v1277_v51 }
  0xf8   :  { %v915_v23 = vpop.f32.mrf.mxu0 }
  0xf9   :  { %v591_v24 = vmul.f32 1.442695, %v572_v21  ;;  %v916_v25 = vadd.f32 %v915_v23, %v914_v19  ;;  %v1296_v26 = vadd.f32 %v522_v12, %v426_v22 }
  0xfa   :  { %v917_v27 = vpop.f32.mrf.mxu0 }
  0xfb   :  { %1050 = vpow2.f32 %v591_v24  ;;  %v573_v29 = vsub.f32 0.0, %v1296_v26  ;;  %v429_v30 = vadd.f32 %v916_v25, %v1277_v51 }
  0xfc   :  { %v1045_v31 = vpop.eup %1044  ;;  %v918_v32 = vpop.f32.mrf.mxu0 }
  0xfd   :  { %v617_v33 = vadd.f32 1.0, %v1045_v31  ;;  %v593_v34 = vmul.f32 1.442695, %v573_v29  ;;  %v919_v35 = vadd.f32 %v918_v32, %v917_v27  ;;  %v1300_v36 = vadd.f32 %v525_v28, %v429_v30 }
  0xfe   :  { %v920_v37 = vpop.f32.mrf.mxu0 }
  0xff   :  { %1052 = vrcp.f32 %v617_v33  ;;  %v434_v39 = vadd.f32 %v919_v35, %v1277_v51  ;;  %v574_v40 = vsub.f32 0.0, %v1300_v36 }
 0x100   :  { %v1047_v41 = vpop.eup %1046  ;;  %1054 = vpow2.f32 %v593_v34  ;;  %v921_v42 = vpop.f32.mrf.mxu0 }
 0x101   :  { %v618_v43 = vadd.f32 1.0, %v1047_v41  ;;  %v1304_v44 = vadd.f32 %v979_v4, %v434_v39  ;;  %v595_v45 = vmul.f32 1.442695, %v574_v40  ;;  %v922_v46 = vadd.f32 %v921_v42, %v920_v37 }
 0x102   :  { %v923_v47 = vpop.f32.mrf.mxu0 }
 0x103   :  { %1056 = vrcp.f32 %v618_v43  ;;  %v575_v49 = vsub.f32 0.0, %v1304_v44  ;;  %v437_v50 = vadd.f32 %v922_v46, %v1277_v51 }
 0x104   :  { %v1049_v52 = vpop.eup %1048  ;;  %1058 = vpow2.f32 %v595_v45  ;;  %v924_v53 = vpop.f32.mrf.mxu0 }
 0x105   :  { %v619_v54 = vadd.f32 1.0, %v1049_v52  ;;  %v597_v55 = vmul.f32 1.442695, %v575_v49  ;;  %v1308_v56 = vadd.f32 %v980_v20, %v437_v50  ;;  %v925_v57 = vadd.f32 %v924_v53, %v923_v47  ;;  %v1318_v20 = vpop.f32.mrf.mxu1 }
 0x106   :  { %v926_v59 = vpop.f32.mrf.mxu0 }
 0x107   :  { %1060 = vrcp.f32 %v619_v54  ;;  %v576_v61 = vsub.f32 0.0, %v1308_v56  ;;  %v442_v62 = vadd.f32 %v925_v57, %v1277_v51  ;;  %v554_v34 = vpop.f32.mrf.mxu1 }
 0x108   :  { %v1051_v63 = vpop.eup %1050  ;;  %1062 = vpow2.f32 %v597_v55  ;;  %v927_v0 = vpop.f32.mrf.mxu0 }
 0x109   :  { %v620_v1 = vadd.f32 1.0, %v1051_v63  ;;  %v599_v3 = vmul.f32 1.442695, %v576_v61  ;;  %v928_v4 = vadd.f32 %v927_v0, %v926_v59  ;;  %v1312_v5 = vadd.f32 %v538_v48, %v442_v62  ;;  %v988_v46 = vpop.f32.mrf.mxu1 }
 0x10a   :  { %v929_v6 = vpop.f32.mrf.mxu0 }
 0x10b   :  { %1064 = vrcp.f32 %v620_v1  ;;  %v577_v9 = vsub.f32 0.0, %v1312_v5  ;;  %v445_v10 = vadd.f32 %v928_v4, %v1277_v51  ;;  %v557_v62 = vpop.f32.mrf.mxu1 }
 0x10c   :  { %v1053_v11 = vpop.eup %1052  ;;  %1066 = vpow2.f32 %v599_v3  ;;  %v930_v12 = vpop.f32.mrf.mxu0 }
 0x10d   :  { %v1055_v13 = vpop.eup %1054  ;;  %v601_v14 = vmul.f32 1.442695, %v577_v9  ;;  %v931_v15 = vadd.f32 %v930_v12, %v929_v6  ;;  %v1316_v16 = vadd.f32 %v541_v7, %v445_v10  ;;  %v649_v24 = vmul.f32 %v1053_v11, %v1280_v58 }
 0x10e   :  { %v621_v18 = vadd.f32 1.0, %v1055_v13  ;;  %v932_v19 = vpop.f32.mrf.mxu0 }
 0x10f   :  { %1068 = vpow2.f32 %v601_v14  ;;  %v450_v21 = vadd.f32 %v931_v15, %v1277_v51  ;;  %v578_v22 = vsub.f32 0.0, %v1316_v16 }
 0x110   :  { %v1057_v23 = vpop.eup %1056  ;;  %v933_v25 = vpop.f32.mrf.mxu0  ;;  %1070 = vrcp.f32 %v621_v18 }
 0x111   :  { %v1059_v27 = vpop.eup %1058  ;;  %v650_v28 = vmul.f32 %v1057_v23, %v1284_v2  ;;  %v1324_v29 = vadd.f32 %v983_v38, %v450_v21  ;;  %v603_v30 = vmul.f32 1.442695, %v578_v22  ;;  %v934_v31 = vadd.f32 %v933_v25, %v932_v19 }
 0x112   :  { %v622_v32 = vadd.f32 1.0, %v1059_v27  ;;  %v935_v33 = vpop.f32.mrf.mxu0 }
 0x113   :  { %v839_v35 = vpack.c.bf16 %v650_v28, %v649_v24  ;;  %v579_v37 = vsub.f32 0.0, %v1324_v29  ;;  %1072 = vpow2.f32 %v603_v30  ;;  %v453_v39 = vadd.f32 %v934_v31, %v1277_v51 }
 0x114   :  { %v1061_v40 = vpop.eup %1060  ;;  %1074 = vrcp.f32 %v622_v32  ;;  %v936_v58 = vpop.f32.mrf.mxu0 }
 0x115   :  { %v1063_v41 = vpop.eup %1062  ;;  %840 = vst [vmem:[%s1381_s3] sm:$0xff] %v839_v35   ;;  %v605_v2 = vmul.f32 1.442695, %v579_v37  ;;  %v1331_v38 = vadd.f32 %v984_v60, %v453_v39  ;;  %v937_v42 = vadd.f32 %v936_v58, %v935_v33  ;;  %v651_v50 = vmul.f32 %v1061_v40, %v1288_v8 }
 0x116   :  { %v623_v43 = vadd.f32 1.0, %v1063_v41  ;;  %v938_v45 = vpop.f32.mrf.mxu0 }
 0x117   :  { %1076 = vpow2.f32 %v605_v2  ;;  %v580_v47 = vsub.f32 0.0, %v1331_v38  ;;  %v458_v48 = vadd.f32 %v937_v42, %v1277_v51 }
 0x118   :  { %v1065_v49 = vpop.eup %1064  ;;  %v939_v52 = vpop.f32.mrf.mxu0  ;;  %1078 = vrcp.f32 %v623_v43 }
 0x119   :  { %v1067_v53 = vpop.eup %1066  ;;  %v652_v54 = vmul.f32 %v1065_v49, %v1292_v17  ;;  %v607_v55 = vmul.f32 1.442695, %v580_v47  ;;  %v940_v57 = vadd.f32 %v939_v52, %v938_v45  ;;  %v1337_v59 = vadd.f32 %v554_v34, %v458_v48 }
 0x11a   :  { %v624_v60 = vadd.f32 1.0, %v1067_v53  ;;  %v941_v61 = vpop.f32.mrf.mxu0 }
 0x11b   :  { %v844_v63 = vpack.c.bf16 %v652_v54, %v651_v50  ;;  %1080 = vpow2.f32 %v607_v55  ;;  %v581_v0 = vsub.f32 0.0, %v1337_v59  ;;  %v461_v1 = vadd.f32 %v940_v57, %v1277_v51 }
 0x11c   :  { %v1069_v3 = vpop.eup %1068  ;;  %1082 = vrcp.f32 %v624_v60  ;;  %v942_v8 = vpop.f32.mrf.mxu0 }
 0x11d   :  { %876 = vst [vmem:[%s1381_s3 + $0x8] sm:$0xff] %v844_v63   ;;  %v625_v17 = vadd.f32 1.0, %v1069_v3  ;;  %v609_v4 = vmul.f32 1.442695, %v581_v0  ;;  %v943_v6 = vadd.f32 %v942_v8, %v941_v61  ;;  %v1344_v7 = vadd.f32 %v557_v62, %v461_v1  ;;  %v1071_v10 = vpop.eup %1070 }
 0x11e   :  { %v944_v9 = vpop.f32.mrf.mxu0  ;;  %v653_v23 = vmul.f32 %v1071_v10, %v1296_v26 }
 0x11f   :  { %1084 = vrcp.f32 %v625_v17  ;;  %v466_v11 = vadd.f32 %v943_v6, %v1277_v51  ;;  %v582_v12 = vsub.f32 0.0, %v1344_v7 }
 0x120   :  { %v1073_v13 = vpop.eup %1072  ;;  %1086 = vpow2.f32 %v609_v4  ;;  %v945_v14 = vpop.f32.mrf.mxu0 }
 0x121   :  { %v1075_v15 = vpop.eup %1074  ;;  %v626_v18 = vadd.f32 1.0, %v1073_v13  ;;  %v563_v19 = vadd.f32 %v1318_v20, %v466_v11  ;;  %v611_v21 = vmul.f32 1.442695, %v582_v12  ;;  %v946_v22 = vadd.f32 %v945_v14, %v944_v9 }
 0x122   :  { %v654_v24 = vmul.f32 %v1075_v15, %v1300_v36 }
 0x123   :  { %1088 = vrcp.f32 %v626_v18  ;;  %v583_v25 = vsub.f32 0.0, %v563_v19  ;;  %v469_v27 = vadd.f32 %v946_v22, %v1277_v51 }
 0x124   :  { %v1077_v28 = vpop.eup %1076  ;;  %v849_v30 = vpack.c.bf16 %v654_v24, %v653_v23  ;;  %1090 = vpow2.f32 %v611_v21 }
 0x125   :  { %v627_v31 = vadd.f32 1.0, %v1077_v28  ;;  %v613_v32 = vmul.f32 1.442695, %v583_v25  ;;  %v566_v33 = vadd.f32 %v988_v46, %v469_v27  ;;  %v1079_v20 = vpop.eup %1078 }
 0x126   :  { %877 = vst [vmem:[%s1381_s3 + $0x10] sm:$0xff] %v849_v30   ;;  %v655_v51 = vmul.f32 %v1079_v20, %v1304_v44 }
 0x127   :  { %v584_v34 = vsub.f32 0.0, %v566_v33  ;;  %1092 = vpow2.f32 %v613_v32 }
 0x128   :  { %v1081_v35 = vpop.eup %1080  ;;  %1094 = vrcp.f32 %v627_v31 }
 0x129   :  { %v1083_v26 = vpop.eup %1082  ;;  %v628_v36 = vadd.f32 1.0, %v1081_v35  ;;  %v615_v37 = vmul.f32 1.442695, %v584_v34 }
 0x12a   :  { %v656_v39 = vmul.f32 %v1083_v26, %v1308_v56 }
 0x12b   :  { %1096 = vrcp.f32 %v628_v36 }
 0x12c   :  { %v1085_v40 = vpop.eup %1084  ;;  %v854_v58 = vpack.c.bf16 %v656_v39, %v655_v51  ;;  %1098 = vpow2.f32 %v615_v37 }
 0x12d   :  { %v1087_v41 = vpop.eup %1086  ;;  %v657_v45 = vmul.f32 %v1085_v40, %v1312_v5 }
 0x12e   :  { %878 = vst [vmem:[%s1381_s3 + $0x18] sm:$0xff] %v854_v58   ;;  %v629_v2 = vadd.f32 1.0, %v1087_v41 }
 0x130   :  { %v1089_v42 = vpop.eup %1088  ;;  %1100 = vrcp.f32 %v629_v2 }
 0x131   :  { %v1091_v43 = vpop.eup %1090  ;;  %v658_v46 = vmul.f32 %v1089_v42, %v1316_v16 }
 0x132   :  { %v630_v44 = vadd.f32 1.0, %v1091_v43 }
 0x133   :  { %v859_v47 = vpack.c.bf16 %v658_v46, %v657_v45 }
 0x134   :  { %1102 = vrcp.f32 %v630_v44  ;;  %v1093_v56 = vpop.eup %1092 }
 0x135   :  { %879 = vst [vmem:[%s1381_s3 + $0x20] sm:$0xff] %v859_v47   ;;  %v1095_v48 = vpop.eup %1094  ;;  %v631_v49 = vadd.f32 1.0, %v1093_v56 }
 0x136   :  { %v659_v53 = vmul.f32 %v1095_v48, %v1324_v29 }
 0x137   :  { %1104 = vrcp.f32 %v631_v49 }
 0x138   :  { %v1097_v50 = vpop.eup %1096 }
 0x139   :  { %v1099_v52 = vpop.eup %1098  ;;  %v660_v54 = vmul.f32 %v1097_v50, %v1331_v38 }
 0x13a   :  { %v632_v5 = vadd.f32 1.0, %v1099_v52 }
 0x13b   :  { %v864_v16 = vpack.c.bf16 %v660_v54, %v659_v53 }
 0x13c   :  { %1106 = vrcp.f32 %v632_v5 }
 0x13d   :  { %880 = vst [vmem:[%s1381_s3 + $0x28] sm:$0xff] %v864_v16   ;;  %v1101_v55 = vpop.eup %1100 }
 0x13e   :  { %v661_v60 = vmul.f32 %v1101_v55, %v1337_v59 }
 0x141   :  { %v1103_v57 = vpop.eup %1102 }
 0x142   :  { %v662_v61 = vmul.f32 %v1103_v57, %v1344_v7 }
 0x144   :  { %v869_v62 = vpack.c.bf16 %v662_v61, %v661_v60  ;;  %v1105_v29 = vpop.eup %1104 }
 0x145   :  { %v663_v63 = vmul.f32 %v1105_v29, %v563_v19 }
 0x146   :  { %881 = vst [vmem:[%s1381_s3 + $0x30] sm:$0xff] %v869_v62  }
 0x149   :  { %v1107_v38 = vpop.eup %1106 }
 0x14a   :  { %v664_v0 = vmul.f32 %v1107_v38, %v566_v33 }
 0x14c   :  { %v874_v1 = vpack.c.bf16 %v664_v0, %v663_v63 }
 0x14e   :  { %882 = vst [vmem:[%s1381_s3 + $0x38] sm:$0xff] %v874_v1  }

// kernel: _lambda_.36
= control target key start
LH: loop header
LB: loop body
LE: loop exit
PB: predicated region body
PF: predicated region fallthrough
CT: control target
= control target key end

     0   :  { %vm115_vm0 = vcmask 1040384   ;;  %vm116_vm1 = vcmask 1041408   ;;  %v606_v1 = vmov 65535   ;;  %vm90_vm2 = vcmask 154624   ;;  %s774_s1 = inlined_call_operand.vmem [shape: bf16[19,128], index: 1, kind: input, shape index: {}]   ;;  %s775_s0 = inlined_call_operand.vmem [shape: bf16[128,19], index: 0, kind: input, shape index: {}]   ;;  %s776_s2 = inlined_call_operand.vmem [shape: f32[1,128], index: 2, kind: input, shape index: {}]   ;;  %s777_s3 = inlined_call_operand.vmem [shape: bf16[128,128], index: 3, kind: output, shape index: {}]  }
   0x1   :  { %v532_v0 = vld [vmem:[%s774_s1 + $0x8] ss:$0 sps:$4 sm:$0x33]   ;;  %v117_v2 = vsel %vm115_vm0, 4294967295, %v606_v1  ;;  %v533_v4 = vld [vmem:[%s774_s1] sm:$0xff]   ;;  %v538_v10 = vld [vmem:[%s775_s0 + $0x10] sm:$0xff]  }
   0x2   :  { %v118_v3 = vsel %vm116_vm1, %v117_v2, 0  ;;  %v534_v6 = vld [vmem:[%s775_s0] sm:$0xff]   ;;  %v536_v8 = vld [vmem:[%s775_s0 + $0x8] sm:$0xff]   ;;  %v539_v11 = vld [vmem:[%s775_s0 + $0x30] sm:$0xff]  }
   0x3   :  { %v120_v5 = vand.u32 %v532_v0, %v118_v3  ;;  %v535_v7 = vld [vmem:[%s775_s0 + $0x20] sm:$0xff]   ;;  %511 = vmatprep.mubr.msk.bf16.mxu0 %vm90_vm2, %v534_v6  ;;  %v537_v9 = vld [vmem:[%s775_s0 + $0x28] sm:$0xff]   ;;  %v540_v12 = vld [vmem:[%s775_s0 + $0x18] sm:$0xff]  }
   0x4   :  { %519 = vmatprep.mubr.msk.bf16.mxu1 %vm90_vm2, %v535_v7  ;;  %v541_v13 = vld [vmem:[%s775_s0 + $0x38] sm:$0xff]   ;;  %v668_v14 = vld [vmem:[%s776_s2] ss:$0 sm:$0xff] }
   0x5   :  { %507 = vmatprep.subr.bf16.mxu0 %v120_v5  ;;  %527 = vmatprep.subr.bf16.mxu1 %v120_v5 }
   0x6   :  { %508 = vmatpush3.bf16.msra.mxu0 %v120_v5  ;;  %529 = vmatpush3.bf16.msra.mxu1 %v120_v5 }
   0x7   :  { %509 = vmatprep.subr.bf16.mxu0 %v533_v4  ;;  %528 = vmatprep.subr.bf16.mxu1 %v533_v4 }
   0xa   :  { %510 = vmatpush3.bf16.msra.mxu0 %v533_v4  ;;  %530 = vmatpush3.bf16.msra.mxu1 %v533_v4 }
   0xd   :  { %512 = vmatmul.mubr.msk.bf16.vlgmr.msra.gmra.mxu0 %vm90_vm2, %v536_v8  ;;  %520 = vmatmul.mubr.msk.bf16.vlgmr.msra.gmra.mxu1 %vm90_vm2, %v537_v9 }
   0xe   :  { %515 = vmatprep.mubr.msk.bf16.mxu0 %vm90_vm2, %v538_v10  ;;  %523 = vmatprep.mubr.msk.bf16.mxu1 %vm90_vm2, %v539_v11 }
  0x15   :  { %516 = vmatmul.mubr.msk.bf16.gmra.mxu0 %vm90_vm2, %v540_v12  ;;  %524 = vmatmul.mubr.msk.bf16.gmra.mxu1 %vm90_vm2, %v541_v13 }
  0xcd   :  { %v513_v15 = vpop.f32.mrf.mxu0  ;;  %v521_v16 = vpop.f32.mrf.mxu1 }
  0xce   :  { %v671_v17 = vadd.f32 %v513_v15, %v668_v14  ;;  %v674_v18 = vadd.f32 %v521_v16, %v668_v14 }
  0xcf   :  { %v156_v19 = vpop.f32.mrf.mxu0  ;;  %v188_v20 = vpop.f32.mrf.mxu1 }
  0xd0   :  { %v221_v21 = vsub.f32 0.0, %v671_v17  ;;  %v229_v22 = vsub.f32 0.0, %v674_v18  ;;  %v679_v23 = vadd.f32 %v668_v14, %v156_v19  ;;  %v682_v24 = vadd.f32 %v668_v14, %v188_v20 }
  0xd1   :  { %v514_v25 = vpop.f32.mrf.mxu0  ;;  %v522_v26 = vpop.f32.mrf.mxu1 }
  0xd2   :  { %v239_v27 = vmul.f32 1.442695, %v221_v21  ;;  %v255_v28 = vmul.f32 1.442695, %v229_v22  ;;  %v219_v29 = vsub.f32 0.0, %v679_v23  ;;  %v227_v30 = vsub.f32 0.0, %v682_v24 }
  0xd3   :  { %v687_v31 = vadd.f32 %v514_v25, %v668_v14  ;;  %v690_v32 = vadd.f32 %v522_v26, %v668_v14  ;;  %v159_v33 = vpop.f32.mrf.mxu0  ;;  %v191_v34 = vpop.f32.mrf.mxu1 }
  0xd4   :  { %542 = vpow2.f32 %v239_v27  ;;  %v235_v35 = vmul.f32 1.442695, %v219_v29  ;;  %v251_v36 = vmul.f32 1.442695, %v227_v30  ;;  %v693_v37 = vadd.f32 %v668_v14, %v159_v33 }
  0xd5   :  { %544 = vpow2.f32 %v255_v28  ;;  %v222_v38 = vsub.f32 0.0, %v687_v31  ;;  %v230_v39 = vsub.f32 0.0, %v690_v32  ;;  %v698_v40 = vadd.f32 %v668_v14, %v191_v34  ;;  %v517_v41 = vpop.f32.mrf.mxu0  ;;  %v525_v42 = vpop.f32.mrf.mxu1 }
  0xd6   :  { %546 = vpow2.f32 %v235_v35  ;;  %v220_v43 = vsub.f32 0.0, %v693_v37  ;;  %v702_v44 = vadd.f32 %v517_v41, %v668_v14  ;;  %v705_v45 = vadd.f32 %v525_v42, %v668_v14 }
  0xd7   :  { %548 = vpow2.f32 %v251_v36  ;;  %v241_v46 = vmul.f32 1.442695, %v222_v38  ;;  %v257_v47 = vmul.f32 1.442695, %v230_v39  ;;  %v228_v48 = vsub.f32 0.0, %v698_v40  ;;  %v172_v49 = vpop.f32.mrf.mxu0  ;;  %v204_v50 = vpop.f32.mrf.mxu1 }
  0xd8   :  { %v237_v51 = vmul.f32 1.442695, %v220_v43  ;;  %v225_v52 = vsub.f32 0.0, %v702_v44  ;;  %v233_v53 = vsub.f32 0.0, %v705_v45  ;;  %v711_v54 = vadd.f32 %v668_v14, %v172_v49 }
  0xd9   :  { %550 = vpow2.f32 %v241_v46  ;;  %v253_v55 = vmul.f32 1.442695, %v228_v48  ;;  %v714_v56 = vadd.f32 %v668_v14, %v204_v50  ;;  %v518_v57 = vpop.f32.mrf.mxu0  ;;  %v526_v58 = vpop.f32.mrf.mxu1 }
  0xda   :  { %552 = vpow2.f32 %v257_v47  ;;  %v247_v59 = vmul.f32 1.442695, %v225_v52  ;;  %v263_v60 = vmul.f32 1.442695, %v233_v53  ;;  %v223_v61 = vsub.f32 0.0, %v711_v54 }
  0xdb   :  { %554 = vpow2.f32 %v237_v51  ;;  %v231_v62 = vsub.f32 0.0, %v714_v56  ;;  %v719_v63 = vadd.f32 %v518_v57, %v668_v14  ;;  %v722_v0 = vadd.f32 %v526_v58, %v668_v14  ;;  %v175_v1 = vpop.f32.mrf.mxu0  ;;  %v207_v2 = vpop.f32.mrf.mxu1 }
  0xdc   :  { %556 = vpow2.f32 %v253_v55  ;;  %v243_v3 = vmul.f32 1.442695, %v223_v61  ;;  %v725_v4 = vadd.f32 %v668_v14, %v175_v1  ;;  %v728_v5 = vadd.f32 %v668_v14, %v207_v2 }
  0xdd   :  { %558 = vpow2.f32 %v247_v59  ;;  %v259_v6 = vmul.f32 1.442695, %v231_v62  ;;  %v226_v7 = vsub.f32 0.0, %v719_v63  ;;  %v234_v8 = vsub.f32 0.0, %v722_v0 }
  0xde   :  { %560 = vpow2.f32 %v263_v60  ;;  %v224_v9 = vsub.f32 0.0, %v725_v4  ;;  %v232_v13 = vsub.f32 0.0, %v728_v5 }
  0xdf   :  { %562 = vpow2.f32 %v243_v3  ;;  %v249_v10 = vmul.f32 1.442695, %v226_v7  ;;  %v265_v11 = vmul.f32 1.442695, %v234_v8 }
  0xe0   :  { %564 = vpow2.f32 %v259_v6  ;;  %v245_v12 = vmul.f32 1.442695, %v224_v9  ;;  %v261_v25 = vmul.f32 1.442695, %v232_v13 }
  0xe1   :  { %v543_v15 = vpop.eup %542  ;;  %566 = vpow2.f32 %v249_v10 }
  0xe2   :  { %v545_v14 = vpop.eup %544  ;;  %v269_v16 = vadd.f32 1.0, %v543_v15  ;;  %568 = vpow2.f32 %v265_v11 }
  0xe3   :  { %v547_v19 = vpop.eup %546  ;;  %v277_v20 = vadd.f32 1.0, %v545_v14  ;;  %570 = vpow2.f32 %v245_v12 }
  0xe4   :  { %v549_v21 = vpop.eup %548  ;;  %572 = vrcp.f32 %v269_v16  ;;  %v267_v22 = vadd.f32 1.0, %v547_v19 }
  0xe5   :  { %574 = vrcp.f32 %v277_v20  ;;  %v275_v26 = vadd.f32 1.0, %v549_v21 }
  0xe6   :  { %v551_v27 = vpop.eup %550  ;;  %576 = vrcp.f32 %v267_v22 }
  0xe7   :  { %v553_v28 = vpop.eup %552  ;;  %578 = vrcp.f32 %v275_v26  ;;  %v270_v29 = vadd.f32 1.0, %v551_v27 }
  0xe8   :  { %v555_v30 = vpop.eup %554  ;;  %v278_v33 = vadd.f32 1.0, %v553_v28  ;;  %580 = vpow2.f32 %v261_v25 }
  0xe9   :  { %v557_v34 = vpop.eup %556  ;;  %582 = vrcp.f32 %v270_v29  ;;  %v268_v35 = vadd.f32 1.0, %v555_v30 }
  0xea   :  { %v559_v36 = vpop.eup %558  ;;  %584 = vrcp.f32 %v278_v33  ;;  %v276_v38 = vadd.f32 1.0, %v557_v34 }
  0xeb   :  { %v561_v39 = vpop.eup %560  ;;  %586 = vrcp.f32 %v268_v35  ;;  %v273_v41 = vadd.f32 1.0, %v559_v36 }
  0xec   :  { %v563_v42 = vpop.eup %562  ;;  %588 = vrcp.f32 %v276_v38  ;;  %v281_v43 = vadd.f32 1.0, %v561_v39 }
  0xed   :  { %v565_v46 = vpop.eup %564  ;;  %v271_v47 = vadd.f32 1.0, %v563_v42  ;;  %590 = vrcp.f32 %v273_v41 }
  0xee   :  { %v567_v48 = vpop.eup %566  ;;  %592 = vrcp.f32 %v281_v43  ;;  %v279_v58 = vadd.f32 1.0, %v565_v46 }
  0xef   :  { %v569_v49 = vpop.eup %568  ;;  %v274_v50 = vadd.f32 1.0, %v567_v48  ;;  %594 = vrcp.f32 %v271_v47 }
  0xf0   :  { %v571_v51 = vpop.eup %570  ;;  %v282_v52 = vadd.f32 1.0, %v569_v49 }
  0xf1   :  { %v573_v53 = vpop.eup %572  ;;  %596 = vrcp.f32 %v274_v50  ;;  %v272_v55 = vadd.f32 1.0, %v571_v51 }
  0xf2   :  { %v575_v57 = vpop.eup %574  ;;  %598 = vrcp.f32 %v282_v52  ;;  %v301_v3 = vmul.f32 %v573_v53, %v671_v17 }
  0xf3   :  { %v577_v59 = vpop.eup %576  ;;  %600 = vrcp.f32 %v272_v55  ;;  %v309_v8 = vmul.f32 %v575_v57, %v674_v18 }
  0xf4   :  { %v579_v60 = vpop.eup %578  ;;  %602 = vrcp.f32 %v279_v58  ;;  %v299_v11 = vmul.f32 %v577_v59, %v679_v23 }
  0xf5   :  { %v581_v61 = vpop.eup %580  ;;  %v307_v15 = vmul.f32 %v579_v60, %v682_v24 }
  0xf6   :  { %v583_v62 = vpop.eup %582  ;;  %v280_v1 = vadd.f32 1.0, %v581_v61 }
  0xf7   :  { %v585_v2 = vpop.eup %584  ;;  %v302_v6 = vmul.f32 %v583_v62, %v687_v31 }
  0xf8   :  { %v587_v7 = vpop.eup %586  ;;  %v310_v9 = vmul.f32 %v585_v2, %v690_v32  ;;  %604 = vrcp.f32 %v280_v1 }
  0xf9   :  { %v589_v10 = vpop.eup %588  ;;  %v458_v12 = vpack.c.bf16 %v302_v6, %v301_v3  ;;  %v300_v13 = vmul.f32 %v587_v7, %v693_v37 }
  0xfa   :  { %v478_v14 = vpack.c.bf16 %v310_v9, %v309_v8  ;;  %v308_v16 = vmul.f32 %v589_v10, %v698_v40  ;;  %v591_v17 = vpop.eup %590 }
  0xfb   :  { %490 = vst [vmem:[%s777_s3 + $0x8] sm:$0xff] %v458_v12   ;;  %v453_v18 = vpack.c.bf16 %v300_v13, %v299_v11  ;;  %v593_v31 = vpop.eup %592  ;;  %v305_v40 = vmul.f32 %v591_v17, %v702_v44 }
  0xfc   :  { %494 = vst [vmem:[%s777_s3 + $0x28] sm:$0xff] %v478_v14   ;;  %v473_v23 = vpack.c.bf16 %v308_v16, %v307_v15  ;;  %v595_v32 = vpop.eup %594  ;;  %v313_v21 = vmul.f32 %v593_v31, %v705_v45 }
  0xfd   :  { %454 = vst [vmem:[%s777_s3] sm:$0xff] %v453_v18   ;;  %v303_v25 = vmul.f32 %v595_v32, %v711_v54 }
  0xfe   :  { %v597_v24 = vpop.eup %596  ;;  %493 = vst [vmem:[%s777_s3 + $0x20] sm:$0xff] %v473_v23  }
  0xff   :  { %v599_v37 = vpop.eup %598  ;;  %v306_v19 = vmul.f32 %v597_v24, %v719_v63 }
 0x100   :  { %v601_v20 = vpop.eup %600  ;;  %v314_v22 = vmul.f32 %v599_v37, %v722_v0 }
 0x101   :  { %v468_v26 = vpack.c.bf16 %v306_v19, %v305_v40  ;;  %v304_v27 = vmul.f32 %v601_v20, %v725_v4  ;;  %v603_v29 = vpop.eup %602 }
 0x102   :  { %v488_v28 = vpack.c.bf16 %v314_v22, %v313_v21  ;;  %v311_v45 = vmul.f32 %v603_v29, %v714_v56 }
 0x103   :  { %492 = vst [vmem:[%s777_s3 + $0x18] sm:$0xff] %v468_v26   ;;  %v463_v30 = vpack.c.bf16 %v304_v27, %v303_v25 }
 0x104   :  { %496 = vst [vmem:[%s777_s3 + $0x38] sm:$0xff] %v488_v28  }
 0x105   :  { %v605_v44 = vpop.eup %604  ;;  %491 = vst [vmem:[%s777_s3 + $0x10] sm:$0xff] %v463_v30  }
 0x106   :  { %v312_v54 = vmul.f32 %v605_v44, %v728_v5 }
 0x108   :  { %v483_v63 = vpack.c.bf16 %v312_v54, %v311_v45 }
 0x10a   :  { %495 = vst [vmem:[%s777_s3 + $0x30] sm:$0xff] %v483_v63  }

// kernel: _lambda_.42
= control target key start
LH: loop header
LB: loop body
LE: loop exit
PB: predicated region body
PF: predicated region fallthrough
CT: control target
= control target key end

     0   :  { %vm110_vm0 = vcmask 1045504   ;;  %vm85_vm1 = vcmask 97280   ;;  %s756_s1 = inlined_call_operand.vmem [shape: bf16[12,128], index: 1, kind: input, shape index: {}]   ;;  %s757_s0 = inlined_call_operand.vmem [shape: bf16[128,12], index: 0, kind: input, shape index: {}]   ;;  %s758_s2 = inlined_call_operand.vmem [shape: f32[1,128], index: 2, kind: input, shape index: {}]   ;;  %s759_s3 = inlined_call_operand.vmem [shape: bf16[128,128], index: 3, kind: output, shape index: {}]  }
   0x1   :  { %v519_v0 = vld [vmem:[%s756_s1] sm:$0x3f]   ;;  %v522_v4 = vld [vmem:[%s757_s0 + $0x8] sm:$0xff]   ;;  %v524_v6 = vld [vmem:[%s757_s0 + $0x10] sm:$0xff]  }
   0x2   :  { %v520_v1 = vld [vmem:[%s757_s0] sm:$0xff]   ;;  %517 = vmatprep.subr.msk.bf16.mxu0 %vm110_vm0, %v519_v0  ;;  %518 = vmatprep.subr.msk.bf16.mxu1 %vm110_vm0, %v519_v0  ;;  %v112_v2 = vsel %vm110_vm0, %v519_v0, 0  ;;  %v523_v5 = vld [vmem:[%s757_s0 + $0x28] sm:$0xff]   ;;  %v525_v7 = vld [vmem:[%s757_s0 + $0x30] sm:$0xff]  }
   0x3   :  { %v521_v3 = vld [vmem:[%s757_s0 + $0x20] sm:$0xff]   ;;  %498 = vmatpush3.bf16.msra.mxu0 %v112_v2  ;;  %516 = vmatpush3.bf16.msra.mxu1 %v112_v2  ;;  %v526_v8 = vld [vmem:[%s757_s0 + $0x18] sm:$0xff]  }
   0x4   :  { %499 = vmatprep.mubr.msk.bf16.mxu0 %vm85_vm1, %v520_v1  ;;  %507 = vmatprep.mubr.msk.bf16.mxu1 %vm85_vm1, %v521_v3  ;;  %v527_v9 = vld [vmem:[%s757_s0 + $0x38] sm:$0xff]   ;;  %v650_v10 = vld [vmem:[%s758_s2] ss:$0 sm:$0xff] }
   0x6   :  { %500 = vmatmul.mubr.msk.bf16.vlgmr.msra.gmra.mxu0 %vm85_vm1, %v522_v4  ;;  %508 = vmatmul.mubr.msk.bf16.vlgmr.msra.gmra.mxu1 %vm85_vm1, %v523_v5 }
   0x7   :  { %503 = vmatprep.mubr.msk.bf16.mxu0 %vm85_vm1, %v524_v6  ;;  %511 = vmatprep.mubr.msk.bf16.mxu1 %vm85_vm1, %v525_v7 }
   0xe   :  { %504 = vmatmul.mubr.msk.bf16.gmra.mxu0 %vm85_vm1, %v526_v8  ;;  %512 = vmatmul.mubr.msk.bf16.gmra.mxu1 %vm85_vm1, %v527_v9 }
  0xc6   :  { %v501_v11 = vpop.f32.mrf.mxu0  ;;  %v509_v12 = vpop.f32.mrf.mxu1 }
  0xc7   :  { %v653_v13 = vadd.f32 %v501_v11, %v650_v10  ;;  %v656_v14 = vadd.f32 %v509_v12, %v650_v10 }
  0xc8   :  { %v148_v15 = vpop.f32.mrf.mxu0  ;;  %v180_v16 = vpop.f32.mrf.mxu1 }
  0xc9   :  { %v213_v17 = vsub.f32 0.0, %v653_v13  ;;  %v221_v18 = vsub.f32 0.0, %v656_v14  ;;  %v661_v19 = vadd.f32 %v650_v10, %v148_v15  ;;  %v664_v20 = vadd.f32 %v650_v10, %v180_v16 }
  0xca   :  { %v502_v21 = vpop.f32.mrf.mxu0  ;;  %v510_v22 = vpop.f32.mrf.mxu1 }
  0xcb   :  { %v231_v23 = vmul.f32 1.442695, %v213_v17  ;;  %v247_v24 = vmul.f32 1.442695, %v221_v18  ;;  %v211_v25 = vsub.f32 0.0, %v661_v19  ;;  %v219_v26 = vsub.f32 0.0, %v664_v20 }
  0xcc   :  { %v669_v27 = vadd.f32 %v502_v21, %v650_v10  ;;  %v672_v28 = vadd.f32 %v510_v22, %v650_v10  ;;  %v151_v29 = vpop.f32.mrf.mxu0  ;;  %v183_v30 = vpop.f32.mrf.mxu1 }
  0xcd   :  { %528 = vpow2.f32 %v231_v23  ;;  %v227_v31 = vmul.f32 1.442695, %v211_v25  ;;  %v243_v32 = vmul.f32 1.442695, %v219_v26  ;;  %v675_v33 = vadd.f32 %v650_v10, %v151_v29 }
  0xce   :  { %530 = vpow2.f32 %v247_v24  ;;  %v214_v34 = vsub.f32 0.0, %v669_v27  ;;  %v222_v35 = vsub.f32 0.0, %v672_v28  ;;  %v680_v36 = vadd.f32 %v650_v10, %v183_v30  ;;  %v505_v37 = vpop.f32.mrf.mxu0  ;;  %v513_v38 = vpop.f32.mrf.mxu1 }
  0xcf   :  { %532 = vpow2.f32 %v227_v31  ;;  %v212_v39 = vsub.f32 0.0, %v675_v33  ;;  %v684_v40 = vadd.f32 %v505_v37, %v650_v10  ;;  %v687_v41 = vadd.f32 %v513_v38, %v650_v10 }
  0xd0   :  { %534 = vpow2.f32 %v243_v32  ;;  %v233_v42 = vmul.f32 1.442695, %v214_v34  ;;  %v249_v43 = vmul.f32 1.442695, %v222_v35  ;;  %v220_v44 = vsub.f32 0.0, %v680_v36  ;;  %v164_v45 = vpop.f32.mrf.mxu0  ;;  %v196_v46 = vpop.f32.mrf.mxu1 }
  0xd1   :  { %v229_v47 = vmul.f32 1.442695, %v212_v39  ;;  %v217_v48 = vsub.f32 0.0, %v684_v40  ;;  %v225_v49 = vsub.f32 0.0, %v687_v41  ;;  %v693_v50 = vadd.f32 %v650_v10, %v164_v45 }
  0xd2   :  { %536 = vpow2.f32 %v233_v42  ;;  %v245_v51 = vmul.f32 1.442695, %v220_v44  ;;  %v696_v52 = vadd.f32 %v650_v10, %v196_v46  ;;  %v506_v53 = vpop.f32.mrf.mxu0  ;;  %v514_v54 = vpop.f32.mrf.mxu1 }
  0xd3   :  { %538 = vpow2.f32 %v249_v43  ;;  %v239_v55 = vmul.f32 1.442695, %v217_v48  ;;  %v255_v56 = vmul.f32 1.442695, %v225_v49  ;;  %v215_v57 = vsub.f32 0.0, %v693_v50 }
  0xd4   :  { %540 = vpow2.f32 %v229_v47  ;;  %v223_v58 = vsub.f32 0.0, %v696_v52  ;;  %v701_v59 = vadd.f32 %v506_v53, %v650_v10  ;;  %v704_v60 = vadd.f32 %v514_v54, %v650_v10  ;;  %v167_v61 = vpop.f32.mrf.mxu0  ;;  %v199_v62 = vpop.f32.mrf.mxu1 }
  0xd5   :  { %542 = vpow2.f32 %v245_v51  ;;  %v235_v63 = vmul.f32 1.442695, %v215_v57  ;;  %v707_v0 = vadd.f32 %v650_v10, %v167_v61  ;;  %v710_v1 = vadd.f32 %v650_v10, %v199_v62 }
  0xd6   :  { %544 = vpow2.f32 %v239_v55  ;;  %v251_v2 = vmul.f32 1.442695, %v223_v58  ;;  %v218_v3 = vsub.f32 0.0, %v701_v59  ;;  %v226_v4 = vsub.f32 0.0, %v704_v60 }
  0xd7   :  { %546 = vpow2.f32 %v255_v56  ;;  %v216_v5 = vsub.f32 0.0, %v707_v0  ;;  %v224_v9 = vsub.f32 0.0, %v710_v1 }
  0xd8   :  { %548 = vpow2.f32 %v235_v63  ;;  %v241_v6 = vmul.f32 1.442695, %v218_v3  ;;  %v257_v7 = vmul.f32 1.442695, %v226_v4 }
  0xd9   :  { %550 = vpow2.f32 %v251_v2  ;;  %v237_v8 = vmul.f32 1.442695, %v216_v5  ;;  %v253_v21 = vmul.f32 1.442695, %v224_v9 }
  0xda   :  { %v529_v11 = vpop.eup %528  ;;  %552 = vpow2.f32 %v241_v6 }
  0xdb   :  { %v531_v10 = vpop.eup %530  ;;  %v261_v12 = vadd.f32 1.0, %v529_v11  ;;  %554 = vpow2.f32 %v257_v7 }
  0xdc   :  { %v533_v15 = vpop.eup %532  ;;  %v269_v16 = vadd.f32 1.0, %v531_v10  ;;  %556 = vpow2.f32 %v237_v8 }
  0xdd   :  { %v535_v17 = vpop.eup %534  ;;  %558 = vrcp.f32 %v261_v12  ;;  %v259_v18 = vadd.f32 1.0, %v533_v15 }
  0xde   :  { %560 = vrcp.f32 %v269_v16  ;;  %v267_v22 = vadd.f32 1.0, %v535_v17 }
  0xdf   :  { %v537_v23 = vpop.eup %536  ;;  %562 = vrcp.f32 %v259_v18 }
  0xe0   :  { %v539_v24 = vpop.eup %538  ;;  %564 = vrcp.f32 %v267_v22  ;;  %v262_v25 = vadd.f32 1.0, %v537_v23 }
  0xe1   :  { %v541_v26 = vpop.eup %540  ;;  %v270_v29 = vadd.f32 1.0, %v539_v24  ;;  %566 = vpow2.f32 %v253_v21 }
  0xe2   :  { %v543_v30 = vpop.eup %542  ;;  %568 = vrcp.f32 %v262_v25  ;;  %v260_v31 = vadd.f32 1.0, %v541_v26 }
  0xe3   :  { %v545_v32 = vpop.eup %544  ;;  %570 = vrcp.f32 %v270_v29  ;;  %v268_v34 = vadd.f32 1.0, %v543_v30 }
  0xe4   :  { %v547_v35 = vpop.eup %546  ;;  %572 = vrcp.f32 %v260_v31  ;;  %v265_v37 = vadd.f32 1.0, %v545_v32 }
  0xe5   :  { %v549_v38 = vpop.eup %548  ;;  %574 = vrcp.f32 %v268_v34  ;;  %v273_v39 = vadd.f32 1.0, %v547_v35 }
  0xe6   :  { %v551_v42 = vpop.eup %550  ;;  %v263_v43 = vadd.f32 1.0, %v549_v38  ;;  %576 = vrcp.f32 %v265_v37 }
  0xe7   :  { %v553_v44 = vpop.eup %552  ;;  %578 = vrcp.f32 %v273_v39  ;;  %v271_v54 = vadd.f32 1.0, %v551_v42 }
  0xe8   :  { %v555_v45 = vpop.eup %554  ;;  %v266_v46 = vadd.f32 1.0, %v553_v44  ;;  %580 = vrcp.f32 %v263_v43 }
  0xe9   :  { %v557_v47 = vpop.eup %556  ;;  %v274_v48 = vadd.f32 1.0, %v555_v45 }
  0xea   :  { %v559_v49 = vpop.eup %558  ;;  %582 = vrcp.f32 %v266_v46  ;;  %v264_v51 = vadd.f32 1.0, %v557_v47 }
  0xeb   :  { %v561_v53 = vpop.eup %560  ;;  %584 = vrcp.f32 %v274_v48  ;;  %v293_v63 = vmul.f32 %v559_v49, %v653_v13 }
  0xec   :  { %v563_v55 = vpop.eup %562  ;;  %586 = vrcp.f32 %v264_v51  ;;  %v301_v4 = vmul.f32 %v561_v53, %v656_v14 }
  0xed   :  { %v565_v56 = vpop.eup %564  ;;  %588 = vrcp.f32 %v271_v54  ;;  %v291_v7 = vmul.f32 %v563_v55, %v661_v19 }
  0xee   :  { %v567_v57 = vpop.eup %566  ;;  %v299_v11 = vmul.f32 %v565_v56, %v664_v20 }
  0xef   :  { %v569_v58 = vpop.eup %568  ;;  %v272_v61 = vadd.f32 1.0, %v567_v57 }
  0xf0   :  { %v571_v62 = vpop.eup %570  ;;  %v294_v2 = vmul.f32 %v569_v58, %v669_v27 }
  0xf1   :  { %v573_v3 = vpop.eup %572  ;;  %v302_v5 = vmul.f32 %v571_v62, %v672_v28  ;;  %590 = vrcp.f32 %v272_v61 }
  0xf2   :  { %v575_v6 = vpop.eup %574  ;;  %v449_v8 = vpack.c.bf16 %v294_v2, %v293_v63  ;;  %v292_v9 = vmul.f32 %v573_v3, %v675_v33 }
  0xf3   :  { %v469_v10 = vpack.c.bf16 %v302_v5, %v301_v4  ;;  %v300_v12 = vmul.f32 %v575_v6, %v680_v36  ;;  %v577_v13 = vpop.eup %576 }
  0xf4   :  { %481 = vst [vmem:[%s759_s3 + $0x8] sm:$0xff] %v449_v8   ;;  %v444_v14 = vpack.c.bf16 %v292_v9, %v291_v7  ;;  %v579_v27 = vpop.eup %578  ;;  %v297_v36 = vmul.f32 %v577_v13, %v684_v40 }
  0xf5   :  { %485 = vst [vmem:[%s759_s3 + $0x28] sm:$0xff] %v469_v10   ;;  %v464_v19 = vpack.c.bf16 %v300_v12, %v299_v11  ;;  %v581_v28 = vpop.eup %580  ;;  %v305_v17 = vmul.f32 %v579_v27, %v687_v41 }
  0xf6   :  { %445 = vst [vmem:[%s759_s3] sm:$0xff] %v444_v14   ;;  %v295_v21 = vmul.f32 %v581_v28, %v693_v50 }
  0xf7   :  { %v583_v20 = vpop.eup %582  ;;  %484 = vst [vmem:[%s759_s3 + $0x20] sm:$0xff] %v464_v19  }
  0xf8   :  { %v585_v33 = vpop.eup %584  ;;  %v298_v15 = vmul.f32 %v583_v20, %v701_v59 }
  0xf9   :  { %v587_v16 = vpop.eup %586  ;;  %v306_v18 = vmul.f32 %v585_v33, %v704_v60 }
  0xfa   :  { %v459_v22 = vpack.c.bf16 %v298_v15, %v297_v36  ;;  %v296_v23 = vmul.f32 %v587_v16, %v707_v0  ;;  %v589_v25 = vpop.eup %588 }
  0xfb   :  { %v479_v24 = vpack.c.bf16 %v306_v18, %v305_v17  ;;  %v303_v41 = vmul.f32 %v589_v25, %v696_v52 }
  0xfc   :  { %483 = vst [vmem:[%s759_s3 + $0x18] sm:$0xff] %v459_v22   ;;  %v454_v26 = vpack.c.bf16 %v296_v23, %v295_v21 }
  0xfd   :  { %487 = vst [vmem:[%s759_s3 + $0x38] sm:$0xff] %v479_v24  }
  0xfe   :  { %v591_v40 = vpop.eup %590  ;;  %482 = vst [vmem:[%s759_s3 + $0x10] sm:$0xff] %v454_v26  }
  0xff   :  { %v304_v50 = vmul.f32 %v591_v40, %v710_v1 }
 0x101   :  { %v474_v59 = vpack.c.bf16 %v304_v50, %v303_v41 }
 0x103   :  { %486 = vst [vmem:[%s759_s3 + $0x30] sm:$0xff] %v474_v59  }

// kernel: _lambda_.37
= control target key start
LH: loop header
LB: loop body
LE: loop exit
PB: predicated region body
PF: predicated region fallthrough
CT: control target
= control target key end

     0   :  { %v773_v0 = vmov 0   ;;  %vm218_vm0 = vcmask 719872   ;;  %vm243_vm1 = vcmask 1043456   ;;  %s1029_s1 = inlined_call_operand.vmem [shape: bf16[216,128], index: 1, kind: input, shape index: {}]   ;;  %s1030_s0 = inlined_call_operand.vmem [shape: bf16[128,216], index: 0, kind: input, shape index: {}]   ;;  %s1031_s2 = inlined_call_operand.vmem [shape: f32[1,128], index: 2, kind: input, shape index: {}]   ;;  %s1032_s3 = inlined_call_operand.vmem [shape: bf16[128,128], index: 3, kind: output, shape index: {}]  }
   0x1   :  { %247 = vmatprep.subr.bf16.mxu0 %v773_v0  ;;  %642 = vmatprep.subr.bf16.mxu1 %v773_v0  ;;  %v671_v1 = vld [vmem:[%s1029_s1 + $0x38] sm:$0xff]   ;;  %v672_v2 = vld [vmem:[%s1029_s1 + $0x30] sm:$0xff]   ;;  %v673_v3 = vld [vmem:[%s1029_s1 + $0x28] sm:$0xff]  }
   0x2   :  { %248 = vmatpush1.bf16.msra.mxu0 %v671_v1  ;;  %656 = vmatpush1.bf16.msra.mxu1 %v671_v1  ;;  %v674_v4 = vld [vmem:[%s1029_s1 + $0x20] sm:$0xff]   ;;  %v675_v5 = vld [vmem:[%s1029_s1 + $0x18] sm:$0xff]   ;;  %v676_v8 = vld [vmem:[%s1029_s1 + $0x10] sm:$0xff]  }
   0x3   :  { %249 = vmatprep.subr.bf16.mxu0 %v773_v0  ;;  %643 = vmatprep.subr.bf16.mxu1 %v773_v0  ;;  %v687_v6 = vld [vmem:[%s1030_s0 + $0x4] ss:$8 sps:$4 sm:$0xff]   ;;  %v679_v11 = vld [vmem:[%s1029_s1 + $0x68] ss:$0 sps:$4 sm:$0xff]   ;;  %v681_v14 = vld [vmem:[%s1029_s1 + $0x58] sm:$0xff]  }
   0x4   :  { %555 = vmatprep.mubr.msk.bf16.mxu0 %vm218_vm0, %v687_v6  ;;  %v690_v7 = vld [vmem:[%s1030_s0 + $0x44] ss:$8 sps:$4 sm:$0xff]   ;;  %v245_v12 = vsel %vm243_vm1, %v679_v11, 0  ;;  %v682_v15 = vld [vmem:[%s1029_s1 + $0x50] sm:$0xff]   ;;  %v685_v18 = vld [vmem:[%s1030_s0] ss:$8 sps:$4 sm:$0xff]  }
   0x5   :  { %559 = vmatprep.mubr.msk.bf16.mxu1 %vm218_vm0, %v690_v7  ;;  %v677_v9 = vld [vmem:[%s1029_s1 + $0x8] sm:$0xff]   ;;  %v678_v10 = vld [vmem:[%s1029_s1] sm:$0xff]   ;;  %v691_v20 = vld [vmem:[%s1030_s0 + $0x14] ss:$8 sps:$4 sm:$0xff]  }
   0x6   :  { %250 = vmatpush1.bf16.msra.mxu0 %v672_v2  ;;  %657 = vmatpush1.bf16.msra.mxu1 %v672_v2  ;;  %v680_v13 = vld [vmem:[%s1029_s1 + $0x60] sm:$0xff]   ;;  %v683_v16 = vld [vmem:[%s1029_s1 + $0x48] sm:$0xff]   ;;  %v693_v21 = vld [vmem:[%s1030_s0 + $0x54] ss:$8 sps:$4 sm:$0xff]  }
   0x7   :  { %251 = vmatprep.subr.bf16.mxu0 %v773_v0  ;;  %644 = vmatprep.subr.bf16.mxu1 %v773_v0  ;;  %v684_v17 = vld [vmem:[%s1029_s1 + $0x40] sm:$0xff]   ;;  %v695_v22 = vld [vmem:[%s1030_s0 + $0x10] ss:$8 sps:$4 sm:$0xff]   ;;  %v703_v28 = vld [vmem:[%s1030_s0 + $0x34] ss:$8 sps:$4 sm:$0xff]  }
   0x8   :  { %v688_v19 = vld [vmem:[%s1030_s0 + $0x40] ss:$8 sps:$4 sm:$0xff]   ;;  %v696_v23 = vld [vmem:[%s1030_s0 + $0x50] ss:$8 sps:$4 sm:$0xff]   ;;  %v697_v24 = vld [vmem:[%s1030_s0 + $0x24] ss:$8 sps:$4 sm:$0xff]  }
   0x9   :  { %v699_v25 = vld [vmem:[%s1030_s0 + $0x64] ss:$8 sps:$4 sm:$0xff]   ;;  %v701_v26 = vld [vmem:[%s1030_s0 + $0x20] ss:$8 sps:$4 sm:$0xff]   ;;  %v705_v29 = vld [vmem:[%s1030_s0 + $0x74] ss:$8 sps:$4 sm:$0xff]  }
   0xa   :  { %252 = vmatpush1.bf16.msra.mxu0 %v673_v3  ;;  %658 = vmatpush1.bf16.msra.mxu1 %v673_v3  ;;  %v702_v27 = vld [vmem:[%s1030_s0 + $0x60] ss:$8 sps:$4 sm:$0xff]   ;;  %v707_v30 = vld [vmem:[%s1030_s0 + $0x30] ss:$8 sps:$4 sm:$0xff]  }
   0xb   :  { %253 = vmatprep.subr.bf16.mxu0 %v773_v0  ;;  %645 = vmatprep.subr.bf16.mxu1 %v773_v0  ;;  %v708_v31 = vld [vmem:[%s1030_s0 + $0x70] ss:$8 sps:$4 sm:$0xff]   ;;  %v923_v32 = vld [vmem:[%s1031_s2] ss:$0 sm:$0xff] }
   0xe   :  { %254 = vmatpush1.bf16.msra.mxu0 %v674_v4  ;;  %659 = vmatpush1.bf16.msra.mxu1 %v674_v4 }
   0xf   :  { %255 = vmatprep.subr.bf16.mxu0 %v773_v0  ;;  %646 = vmatprep.subr.bf16.mxu1 %v773_v0 }
  0x12   :  { %256 = vmatpush1.bf16.msra.mxu0 %v675_v5  ;;  %660 = vmatpush1.bf16.msra.mxu1 %v675_v5 }
  0x13   :  { %257 = vmatprep.subr.bf16.mxu0 %v773_v0  ;;  %647 = vmatprep.subr.bf16.mxu1 %v773_v0 }
  0x16   :  { %258 = vmatpush1.bf16.msra.mxu0 %v676_v8  ;;  %661 = vmatpush1.bf16.msra.mxu1 %v676_v8 }
  0x17   :  { %259 = vmatprep.subr.bf16.mxu0 %v773_v0  ;;  %648 = vmatprep.subr.bf16.mxu1 %v773_v0 }
  0x1a   :  { %260 = vmatpush1.bf16.msra.mxu0 %v677_v9  ;;  %662 = vmatpush1.bf16.msra.mxu1 %v677_v9 }
  0x1b   :  { %261 = vmatprep.subr.bf16.mxu0 %v773_v0  ;;  %649 = vmatprep.subr.bf16.mxu1 %v773_v0 }
  0x1e   :  { %262 = vmatpush1.bf16.msra.mxu0 %v678_v10  ;;  %663 = vmatpush1.bf16.msra.mxu1 %v678_v10 }
  0x1f   :  { %267 = vmatprep.subr.bf16.mxu0 %v773_v0  ;;  %650 = vmatprep.subr.bf16.mxu1 %v773_v0 }
  0x22   :  { %268 = vmatpush2.bf16.msra.mxu0 %v245_v12  ;;  %664 = vmatpush2.bf16.msra.mxu1 %v245_v12 }
  0x23   :  { %269 = vmatprep.subr.bf16.mxu0 %v773_v0  ;;  %651 = vmatprep.subr.bf16.mxu1 %v773_v0 }
  0x26   :  { %270 = vmatpush2.bf16.msra.mxu0 %v680_v13  ;;  %665 = vmatpush2.bf16.msra.mxu1 %v680_v13 }
  0x27   :  { %271 = vmatprep.subr.bf16.mxu0 %v773_v0  ;;  %652 = vmatprep.subr.bf16.mxu1 %v773_v0 }
  0x2a   :  { %272 = vmatpush2.bf16.msra.mxu0 %v681_v14  ;;  %666 = vmatpush2.bf16.msra.mxu1 %v681_v14 }
  0x2b   :  { %273 = vmatprep.subr.bf16.mxu0 %v773_v0  ;;  %653 = vmatprep.subr.bf16.mxu1 %v773_v0 }
  0x2e   :  { %274 = vmatpush2.bf16.msra.mxu0 %v682_v15  ;;  %667 = vmatpush2.bf16.msra.mxu1 %v682_v15 }
  0x2f   :  { %275 = vmatprep.subr.bf16.mxu0 %v773_v0  ;;  %654 = vmatprep.subr.bf16.mxu1 %v773_v0 }
  0x32   :  { %276 = vmatpush2.bf16.msra.mxu0 %v683_v16  ;;  %668 = vmatpush2.bf16.msra.mxu1 %v683_v16 }
  0x33   :  { %277 = vmatprep.subr.bf16.mxu0 %v773_v0  ;;  %655 = vmatprep.subr.bf16.mxu1 %v773_v0 }
  0x36   :  { %278 = vmatpush2.bf16.msra.mxu0 %v684_v17  ;;  %669 = vmatpush2.bf16.msra.mxu1 %v684_v17 }
  0x39   :  { %280 = vmatmul.mubr.bf16.vlgmr.msra.gmra.mxu0 %v685_v18  ;;  %312 = vmatmul.mubr.bf16.vlgmr.msra.gmra.mxu1 %v688_v19 }
  0x3a   :  { %556 = vmatprep.mubr.msk.bf16.mxu0 %vm218_vm0, %v691_v20  ;;  %560 = vmatprep.mubr.msk.bf16.mxu1 %vm218_vm0, %v693_v21 }
  0x41   :  { %288 = vmatmul.mubr.bf16.gmra.mxu0 %v695_v22  ;;  %320 = vmatmul.mubr.bf16.gmra.mxu1 %v696_v23 }
  0x42   :  { %557 = vmatprep.mubr.msk.bf16.mxu0 %vm218_vm0, %v697_v24  ;;  %561 = vmatprep.mubr.msk.bf16.mxu1 %vm218_vm0, %v699_v25 }
  0x49   :  { %296 = vmatmul.mubr.bf16.gmra.mxu0 %v701_v26  ;;  %328 = vmatmul.mubr.bf16.gmra.mxu1 %v702_v27 }
  0x4a   :  { %558 = vmatprep.mubr.msk.bf16.mxu0 %vm218_vm0, %v703_v28  ;;  %562 = vmatprep.mubr.msk.bf16.mxu1 %vm218_vm0, %v705_v29 }
  0x51   :  { %304 = vmatmul.mubr.bf16.gmra.mxu0 %v707_v30  ;;  %336 = vmatmul.mubr.bf16.gmra.mxu1 %v708_v31 }
  0xf9   :  { %v281_v33 = vpop.f32.mrf.mxu0  ;;  %v313_v34 = vpop.f32.mrf.mxu1 }
  0xfa   :  { %v926_v35 = vadd.f32 %v923_v32, %v281_v33  ;;  %v929_v36 = vadd.f32 %v923_v32, %v313_v34 }
  0xfb   :  { %v283_v37 = vpop.f32.mrf.mxu0  ;;  %v315_v38 = vpop.f32.mrf.mxu1 }
  0xfc   :  { %v344_v39 = vsub.f32 0.0, %v926_v35  ;;  %v352_v40 = vsub.f32 0.0, %v929_v36 }
  0xfd   :  { %v284_v41 = vpop.f32.mrf.mxu0  ;;  %v316_v42 = vpop.f32.mrf.mxu1 }
  0xfe   :  { %v360_v43 = vmul.f32 1.442695, %v344_v39  ;;  %v376_v44 = vmul.f32 1.442695, %v352_v40  ;;  %v934_v45 = vadd.f32 %v923_v32, %v284_v41  ;;  %v937_v46 = vadd.f32 %v923_v32, %v316_v42 }
  0xff   :  { %v286_v47 = vpop.f32.mrf.mxu0  ;;  %v318_v48 = vpop.f32.mrf.mxu1 }
 0x100   :  { %709 = vpow2.f32 %v360_v43  ;;  %v345_v49 = vsub.f32 0.0, %v934_v45  ;;  %v353_v50 = vsub.f32 0.0, %v937_v46 }
 0x101   :  { %711 = vpow2.f32 %v376_v44  ;;  %v289_v51 = vpop.f32.mrf.mxu0  ;;  %v321_v52 = vpop.f32.mrf.mxu1 }
 0x102   :  { %v362_v53 = vmul.f32 1.442695, %v345_v49  ;;  %v378_v54 = vmul.f32 1.442695, %v353_v50  ;;  %v942_v55 = vadd.f32 %v923_v32, %v289_v51  ;;  %v945_v56 = vadd.f32 %v923_v32, %v321_v52 }
 0x103   :  { %v291_v57 = vpop.f32.mrf.mxu0  ;;  %v323_v58 = vpop.f32.mrf.mxu1 }
 0x104   :  { %713 = vpow2.f32 %v362_v53  ;;  %v346_v59 = vsub.f32 0.0, %v942_v55  ;;  %v354_v60 = vsub.f32 0.0, %v945_v56 }
 0x105   :  { %715 = vpow2.f32 %v378_v54  ;;  %v292_v61 = vpop.f32.mrf.mxu0  ;;  %v324_v62 = vpop.f32.mrf.mxu1 }
 0x106   :  { %v364_v63 = vmul.f32 1.442695, %v346_v59  ;;  %v380_v0 = vmul.f32 1.442695, %v354_v60  ;;  %v950_v1 = vadd.f32 %v923_v32, %v292_v61  ;;  %v953_v2 = vadd.f32 %v923_v32, %v324_v62 }
 0x107   :  { %v294_v3 = vpop.f32.mrf.mxu0  ;;  %v326_v4 = vpop.f32.mrf.mxu1 }
 0x108   :  { %717 = vpow2.f32 %v364_v63  ;;  %v347_v5 = vsub.f32 0.0, %v950_v1  ;;  %v355_v6 = vsub.f32 0.0, %v953_v2 }
 0x109   :  { %719 = vpow2.f32 %v380_v0  ;;  %v297_v7 = vpop.f32.mrf.mxu0  ;;  %v329_v8 = vpop.f32.mrf.mxu1 }
 0x10a   :  { %v366_v9 = vmul.f32 1.442695, %v347_v5  ;;  %v382_v10 = vmul.f32 1.442695, %v355_v6  ;;  %v958_v11 = vadd.f32 %v923_v32, %v297_v7  ;;  %v961_v12 = vadd.f32 %v923_v32, %v329_v8 }
 0x10b   :  { %v299_v13 = vpop.f32.mrf.mxu0  ;;  %v331_v14 = vpop.f32.mrf.mxu1 }
 0x10c   :  { %721 = vpow2.f32 %v366_v9  ;;  %v348_v15 = vsub.f32 0.0, %v958_v11  ;;  %v356_v16 = vsub.f32 0.0, %v961_v12 }
 0x10d   :  { %v710_v17 = vpop.eup %709  ;;  %723 = vpow2.f32 %v382_v10  ;;  %v300_v18 = vpop.f32.mrf.mxu0 }
 0x10e   :  { %v332_v19 = vpop.f32.mrf.mxu1  ;;  %v712_v20 = vpop.eup %711  ;;  %v392_v21 = vadd.f32 1.0, %v710_v17  ;;  %v368_v22 = vmul.f32 1.442695, %v348_v15  ;;  %v966_v23 = vadd.f32 %v923_v32, %v300_v18  ;;  %v384_v25 = vmul.f32 1.442695, %v356_v16 }
 0x10f   :  { %v400_v24 = vadd.f32 1.0, %v712_v20  ;;  %v969_v26 = vadd.f32 %v923_v32, %v332_v19  ;;  %v302_v27 = vpop.f32.mrf.mxu0 }
 0x110   :  { %v334_v28 = vpop.f32.mrf.mxu1  ;;  %725 = vrcp.f32 %v392_v21  ;;  %v349_v29 = vsub.f32 0.0, %v966_v23 }
 0x111   :  { %v714_v30 = vpop.eup %713  ;;  %727 = vrcp.f32 %v400_v24  ;;  %v357_v31 = vsub.f32 0.0, %v969_v26  ;;  %v305_v33 = vpop.f32.mrf.mxu0 }
 0x112   :  { %v337_v34 = vpop.f32.mrf.mxu1  ;;  %v716_v37 = vpop.eup %715  ;;  %v393_v38 = vadd.f32 1.0, %v714_v30  ;;  %729 = vpow2.f32 %v368_v22  ;;  %v370_v39 = vmul.f32 1.442695, %v349_v29  ;;  %v974_v40 = vadd.f32 %v923_v32, %v305_v33 }
 0x113   :  { %v401_v41 = vadd.f32 1.0, %v716_v37  ;;  %731 = vpow2.f32 %v384_v25  ;;  %v386_v42 = vmul.f32 1.442695, %v357_v31  ;;  %v977_v43 = vadd.f32 %v923_v32, %v337_v34  ;;  %v307_v44 = vpop.f32.mrf.mxu0 }
 0x114   :  { %v339_v47 = vpop.f32.mrf.mxu1  ;;  %733 = vrcp.f32 %v393_v38  ;;  %v350_v48 = vsub.f32 0.0, %v974_v40 }
 0x115   :  { %v718_v49 = vpop.eup %717  ;;  %735 = vrcp.f32 %v401_v41  ;;  %v358_v50 = vsub.f32 0.0, %v977_v43  ;;  %v308_v51 = vpop.f32.mrf.mxu0 }
 0x116   :  { %v340_v52 = vpop.f32.mrf.mxu1  ;;  %v720_v53 = vpop.eup %719  ;;  %v394_v54 = vadd.f32 1.0, %v718_v49  ;;  %737 = vpow2.f32 %v370_v39  ;;  %v372_v57 = vmul.f32 1.442695, %v350_v48  ;;  %v982_v58 = vadd.f32 %v923_v32, %v308_v51 }
 0x117   :  { %v402_v59 = vadd.f32 1.0, %v720_v53  ;;  %739 = vpow2.f32 %v386_v42  ;;  %v388_v60 = vmul.f32 1.442695, %v358_v50  ;;  %v985_v61 = vadd.f32 %v923_v32, %v340_v52  ;;  %v310_v62 = vpop.f32.mrf.mxu0 }
 0x118   :  { %v342_v63 = vpop.f32.mrf.mxu1  ;;  %741 = vrcp.f32 %v394_v54  ;;  %v351_v0 = vsub.f32 0.0, %v982_v58 }
 0x119   :  { %v722_v3 = vpop.eup %721  ;;  %743 = vrcp.f32 %v402_v59  ;;  %v359_v4 = vsub.f32 0.0, %v985_v61 }
 0x11a   :  { %v724_v5 = vpop.eup %723  ;;  %v395_v6 = vadd.f32 1.0, %v722_v3  ;;  %745 = vpow2.f32 %v372_v57  ;;  %v374_v7 = vmul.f32 1.442695, %v351_v0 }
 0x11b   :  { %v403_v8 = vadd.f32 1.0, %v724_v5  ;;  %747 = vpow2.f32 %v388_v60  ;;  %v390_v9 = vmul.f32 1.442695, %v359_v4 }
 0x11c   :  { %749 = vrcp.f32 %v395_v6 }
 0x11d   :  { %v726_v10 = vpop.eup %725  ;;  %751 = vrcp.f32 %v403_v8 }
 0x11e   :  { %v728_v32 = vpop.eup %727  ;;  %753 = vpow2.f32 %v374_v7  ;;  %v424_v19 = vmul.f32 %v726_v10, %v926_v35 }
 0x11f   :  { %v730_v13 = vpop.eup %729  ;;  %755 = vpow2.f32 %v390_v9  ;;  %v432_v22 = vmul.f32 %v728_v32, %v929_v36 }
 0x120   :  { %v732_v14 = vpop.eup %731  ;;  %v396_v15 = vadd.f32 1.0, %v730_v13 }
 0x121   :  { %v734_v16 = vpop.eup %733  ;;  %v404_v17 = vadd.f32 1.0, %v732_v14 }
 0x122   :  { %v736_v18 = vpop.eup %735  ;;  %v425_v20 = vmul.f32 %v734_v16, %v934_v45  ;;  %757 = vrcp.f32 %v396_v15 }
 0x123   :  { %v738_v21 = vpop.eup %737  ;;  %v433_v24 = vmul.f32 %v736_v18, %v937_v46  ;;  %759 = vrcp.f32 %v404_v17 }
 0x124   :  { %v740_v25 = vpop.eup %739  ;;  %v598_v27 = vpack.c.bf16 %v425_v20, %v424_v19  ;;  %v397_v28 = vadd.f32 1.0, %v738_v21 }
 0x125   :  { %v742_v29 = vpop.eup %741  ;;  %v618_v30 = vpack.c.bf16 %v433_v24, %v432_v22  ;;  %v405_v31 = vadd.f32 1.0, %v740_v25 }
 0x126   :  { %v744_v33 = vpop.eup %743  ;;  %599 = vst [vmem:[%s1032_s3] sm:$0xff] %v598_v27   ;;  %761 = vrcp.f32 %v397_v28  ;;  %v426_v38 = vmul.f32 %v742_v29, %v942_v55 }
 0x127   :  { %v746_v35 = vpop.eup %745  ;;  %638 = vst [vmem:[%s1032_s3 + $0x20] sm:$0xff] %v618_v30   ;;  %763 = vrcp.f32 %v405_v31  ;;  %v434_v42 = vmul.f32 %v744_v33, %v945_v56 }
 0x128   :  { %v748_v36 = vpop.eup %747  ;;  %v398_v45 = vadd.f32 1.0, %v746_v35 }
 0x129   :  { %v750_v46 = vpop.eup %749  ;;  %v406_v34 = vadd.f32 1.0, %v748_v36 }
 0x12a   :  { %v752_v37 = vpop.eup %751  ;;  %v427_v39 = vmul.f32 %v750_v46, %v950_v1  ;;  %765 = vrcp.f32 %v398_v45 }
 0x12b   :  { %v754_v41 = vpop.eup %753  ;;  %v435_v44 = vmul.f32 %v752_v37, %v953_v2  ;;  %767 = vrcp.f32 %v406_v34 }
 0x12c   :  { %v756_v47 = vpop.eup %755  ;;  %v603_v48 = vpack.c.bf16 %v427_v39, %v426_v38  ;;  %v399_v49 = vadd.f32 1.0, %v754_v41 }
 0x12d   :  { %v623_v50 = vpack.c.bf16 %v435_v44, %v434_v42  ;;  %v407_v51 = vadd.f32 1.0, %v756_v47 }
 0x12e   :  { %635 = vst [vmem:[%s1032_s3 + $0x8] sm:$0xff] %v603_v48   ;;  %769 = vrcp.f32 %v399_v49 }
 0x12f   :  { %639 = vst [vmem:[%s1032_s3 + $0x28] sm:$0xff] %v623_v50   ;;  %771 = vrcp.f32 %v407_v51  ;;  %v758_v55 = vpop.eup %757 }
 0x130   :  { %v760_v56 = vpop.eup %759  ;;  %v428_v52 = vmul.f32 %v758_v55, %v958_v11 }
 0x131   :  { %v436_v54 = vmul.f32 %v760_v56, %v961_v12 }
 0x133   :  { %v762_v1 = vpop.eup %761 }
 0x134   :  { %v764_v2 = vpop.eup %763  ;;  %v429_v53 = vmul.f32 %v762_v1, %v966_v23 }
 0x135   :  { %v437_v57 = vmul.f32 %v764_v2, %v969_v26 }
 0x136   :  { %v608_v59 = vpack.c.bf16 %v429_v53, %v428_v52 }
 0x137   :  { %v628_v60 = vpack.c.bf16 %v437_v57, %v436_v54  ;;  %v766_v62 = vpop.eup %765 }
 0x138   :  { %636 = vst [vmem:[%s1032_s3 + $0x10] sm:$0xff] %v608_v59   ;;  %v768_v63 = vpop.eup %767  ;;  %v430_v23 = vmul.f32 %v766_v62, %v974_v40 }
 0x139   :  { %640 = vst [vmem:[%s1032_s3 + $0x30] sm:$0xff] %v628_v60   ;;  %v438_v26 = vmul.f32 %v768_v63, %v977_v43 }
 0x13b   :  { %v770_v0 = vpop.eup %769 }
 0x13c   :  { %v772_v11 = vpop.eup %771  ;;  %v431_v12 = vmul.f32 %v770_v0, %v982_v58 }
 0x13d   :  { %v439_v3 = vmul.f32 %v772_v11, %v985_v61 }
 0x13e   :  { %v613_v4 = vpack.c.bf16 %v431_v12, %v430_v23 }
 0x13f   :  { %v633_v5 = vpack.c.bf16 %v439_v3, %v438_v26 }
 0x140   :  { %637 = vst [vmem:[%s1032_s3 + $0x18] sm:$0xff] %v613_v4  }
 0x141   :  { %641 = vst [vmem:[%s1032_s3 + $0x38] sm:$0xff] %v633_v5  }

// kernel: _lambda_.39
= control target key start
LH: loop header
LB: loop body
LE: loop exit
PB: predicated region body
PF: predicated region fallthrough
CT: control target
= control target key end

     0   :  { %vm339_vm0 = vcmask 1042432   ;;  %vm340_vm1 = vcmask 1043456   ;;  %v1075_v16 = vmov 65535   ;;  %vm314_vm2 = vcmask 187392   ;;  %s1369_s1 = inlined_call_operand.vmem [shape: bf16[279,128], index: 1, kind: input, shape index: {}]   ;;  %s1370_s0 = inlined_call_operand.vmem [shape: bf16[128,279], index: 0, kind: input, shape index: {}]   ;;  %s1371_s2 = inlined_call_operand.vmem [shape: f32[1,128], index: 2, kind: input, shape index: {}]   ;;  %s1372_s3 = inlined_call_operand.vmem [shape: bf16[128,128], index: 3, kind: output, shape index: {}]  }
   0x1   :  { %v961_v0 = vld [vmem:[%s1369_s1 + $0x78] sm:$0xff]   ;;  %v963_v2 = vld [vmem:[%s1369_s1 + $0x70] sm:$0xff]   ;;  %v965_v4 = vld [vmem:[%s1369_s1 + $0x68] sm:$0xff]   ;;  %v341_v17 = vsel %vm339_vm0, 4294967295, %v1075_v16 }
   0x2   :  { %v962_v1 = vld [vmem:[%s1369_s1 + $0x38] sm:$0xff]   ;;  %850 = vmatprep.subr.bf16.mxu0 %v961_v0  ;;  %944 = vmatprep.subr.bf16.mxu1 %v961_v0  ;;  %v964_v3 = vld [vmem:[%s1369_s1 + $0x30] sm:$0xff]   ;;  %v966_v5 = vld [vmem:[%s1369_s1 + $0x28] sm:$0xff]   ;;  %v342_v20 = vsel %vm340_vm1, %v341_v17, 0 }
   0x3   :  { %851 = vmatpush3.bf16.msra.mxu0 %v962_v1  ;;  %952 = vmatpush3.bf16.msra.mxu1 %v962_v1  ;;  %v967_v6 = vld [vmem:[%s1369_s1 + $0x60] sm:$0xff]   ;;  %v969_v8 = vld [vmem:[%s1369_s1 + $0x58] sm:$0xff]   ;;  %v971_v10 = vld [vmem:[%s1369_s1 + $0x50] sm:$0xff]  }
   0x4   :  { %852 = vmatprep.subr.bf16.mxu0 %v963_v2  ;;  %945 = vmatprep.subr.bf16.mxu1 %v963_v2  ;;  %v968_v7 = vld [vmem:[%s1369_s1 + $0x20] sm:$0xff]   ;;  %v970_v9 = vld [vmem:[%s1369_s1 + $0x18] sm:$0xff]   ;;  %v972_v13 = vld [vmem:[%s1369_s1 + $0x10] sm:$0xff]  }
   0x5   :  { %v979_v11 = vld [vmem:[%s1370_s0 + $0x4] ss:$12 sps:$4 sm:$0xff]   ;;  %v982_v12 = vld [vmem:[%s1370_s0 + $0x94] ss:$12 sps:$4 sm:$0xff]   ;;  %v973_v14 = vld [vmem:[%s1369_s1 + $0x48] sm:$0xff]  }
   0x6   :  { %378 = vmatprep.mubr.bf16.mxu0 %v979_v11  ;;  %426 = vmatprep.mubr.bf16.mxu1 %v982_v12  ;;  %v974_v15 = vld [vmem:[%s1369_s1 + $0x8] sm:$0xff]   ;;  %v975_v18 = vld [vmem:[%s1369_s1 + $0x40] sm:$0xff]   ;;  %v980_v24 = vld [vmem:[%s1370_s0 + $0x90] ss:$12 sps:$4 sm:$0xff]  }
   0x7   :  { %853 = vmatpush3.bf16.msra.mxu0 %v964_v3  ;;  %953 = vmatpush3.bf16.msra.mxu1 %v964_v3  ;;  %v983_v19 = vld [vmem:[%s1369_s1 + $0x88] ss:$0 sps:$4 sm:$0xff]   ;;  %v976_v21 = vld [vmem:[%s1369_s1] sm:$0xff]   ;;  %v986_v26 = vld [vmem:[%s1370_s0 + $0xac] ss:$12 sps:$4 sm:$0xff]  }
   0x8   :  { %854 = vmatprep.subr.bf16.mxu0 %v965_v4  ;;  %946 = vmatprep.subr.bf16.mxu1 %v965_v4  ;;  %v344_v22 = vand.u32 %v983_v19, %v342_v20  ;;  %v977_v23 = vld [vmem:[%s1370_s0] ss:$12 sps:$4 sm:$0xff]   ;;  %v984_v25 = vld [vmem:[%s1370_s0 + $0x1c] ss:$12 sps:$4 sm:$0xff]   ;;  %v988_v28 = vld [vmem:[%s1370_s0 + $0x18] ss:$12 sps:$4 sm:$0xff]  }
   0x9   :  { %v990_v27 = vld [vmem:[%s1369_s1 + $0x80] sm:$0xff]   ;;  %v989_v29 = vld [vmem:[%s1370_s0 + $0xa8] ss:$12 sps:$4 sm:$0xff]   ;;  %v994_v32 = vld [vmem:[%s1370_s0 + $0x30] ss:$12 sps:$4 sm:$0xff]  }
   0xa   :  { %v991_v30 = vld [vmem:[%s1370_s0 + $0x34] ss:$12 sps:$4 sm:$0xff]   ;;  %v996_v34 = vld [vmem:[%s1370_s0 + $0x4c] ss:$12 sps:$4 sm:$0xff]   ;;  %v1000_v37 = vld [vmem:[%s1370_s0 + $0x50] ss:$12 sps:$4 sm:$0xff]  }
   0xb   :  { %855 = vmatpush3.bf16.msra.mxu0 %v966_v5  ;;  %954 = vmatpush3.bf16.msra.mxu1 %v966_v5  ;;  %v993_v31 = vld [vmem:[%s1370_s0 + $0x8] ss:$12 sps:$4 sm:$0xff]   ;;  %v995_v33 = vld [vmem:[%s1370_s0 + $0x20] ss:$12 sps:$4 sm:$0xff]   ;;  %v998_v35 = vld [vmem:[%s1370_s0 + $0x38] ss:$12 sps:$4 sm:$0xff]  }
   0xc   :  { %856 = vmatprep.subr.bf16.mxu0 %v967_v6  ;;  %947 = vmatprep.subr.bf16.mxu1 %v967_v6  ;;  %v999_v36 = vld [vmem:[%s1370_s0 + $0x48] ss:$12 sps:$4 sm:$0xff]   ;;  %v1001_v38 = vld [vmem:[%s1370_s0 + $0x64] ss:$12 sps:$4 sm:$0xff]   ;;  %v1004_v40 = vld [vmem:[%s1370_s0 + $0x60] ss:$12 sps:$4 sm:$0xff]  }
   0xd   :  { %v1003_v39 = vld [vmem:[%s1370_s0 + $0x68] ss:$12 sps:$4 sm:$0xff]   ;;  %v1005_v41 = vld [vmem:[%s1370_s0 + $0x80] ss:$12 sps:$4 sm:$0xff]   ;;  %v1008_v43 = vld [vmem:[%s1370_s0 + $0x98] ss:$12 sps:$4 sm:$0xff]  }
   0xe   :  { %v1006_v42 = vld [vmem:[%s1370_s0 + $0x7c] ss:$12 sps:$4 sm:$0xff]   ;;  %v1009_v44 = vld [vmem:[%s1370_s0 + $0x78] ss:$12 sps:$4 sm:$0xff]   ;;  %v1249_v0 = vld [vmem:[%s1371_s2] ss:$0 sm:$0xff] }
   0xf   :  { %857 = vmatpush3.bf16.msra.mxu0 %v968_v7  ;;  %955 = vmatpush3.bf16.msra.mxu1 %v968_v7  ;;  %v1010_v45 = vld [vmem:[%s1370_s0 + $0xb0] ss:$12 sps:$4 sm:$0xff]  }
  0x10   :  { %858 = vmatprep.subr.bf16.mxu0 %v969_v8  ;;  %948 = vmatprep.subr.bf16.mxu1 %v969_v8 }
  0x13   :  { %859 = vmatpush3.bf16.msra.mxu0 %v970_v9  ;;  %956 = vmatpush3.bf16.msra.mxu1 %v970_v9 }
  0x14   :  { %860 = vmatprep.subr.bf16.mxu0 %v971_v10  ;;  %949 = vmatprep.subr.bf16.mxu1 %v971_v10 }
  0x17   :  { %861 = vmatpush3.bf16.msra.mxu0 %v972_v13  ;;  %957 = vmatpush3.bf16.msra.mxu1 %v972_v13 }
  0x18   :  { %862 = vmatprep.subr.bf16.mxu0 %v973_v14  ;;  %950 = vmatprep.subr.bf16.mxu1 %v973_v14 }
  0x1b   :  { %863 = vmatpush3.bf16.msra.mxu0 %v974_v15  ;;  %958 = vmatpush3.bf16.msra.mxu1 %v974_v15 }
  0x1c   :  { %864 = vmatprep.subr.bf16.mxu0 %v975_v18  ;;  %951 = vmatprep.subr.bf16.mxu1 %v975_v18 }
  0x1f   :  { %865 = vmatpush3.bf16.msra.mxu0 %v976_v21  ;;  %959 = vmatpush3.bf16.msra.mxu1 %v976_v21 }
  0x20   :  { %924 = vmatprep.subr.bf16.mxu1 %v344_v22 }
  0x22   :  { %379 = vmatmul.mubr.bf16.vlgmr.msra.gmra.mxu0 %v977_v23  ;;  %427 = vmatmul.mubr.bf16.vlgmr.msra.gmra.mxu1 %v980_v24 }
  0x23   :  { %925 = vmatpush3.bf16.msra.mxu1 %v344_v22  ;;  %386 = vmatprep.mubr.bf16.mxu0 %v984_v25 }
  0x24   :  { %434 = vmatprep.mubr.bf16.mxu1 %v986_v26  ;;  %926 = vmatprep.subr.bf16.mxu1 %v990_v27 }
  0x27   :  { %927 = vmatpush3.bf16.msra.mxu1 %v990_v27 }
  0x2a   :  { %387 = vmatmul.mubr.bf16.gmra.mxu0 %v988_v28  ;;  %435 = vmatmul.mubr.bf16.gmra.mxu1 %v989_v29 }
  0x2b   :  { %394 = vmatprep.mubr.bf16.mxu0 %v991_v30  ;;  %928 = vmatprep.mubr.msk.bf16.mxu1 %vm314_vm2, %v993_v31 }
  0x32   :  { %395 = vmatmul.mubr.bf16.gmra.mxu0 %v994_v32  ;;  %929 = vmatmul.mubr.msk.bf16.vlgmr.msra.gmra.mxu1 %vm314_vm2, %v995_v33 }
  0x33   :  { %402 = vmatprep.mubr.bf16.mxu0 %v996_v34  ;;  %932 = vmatprep.mubr.msk.bf16.mxu1 %vm314_vm2, %v998_v35 }
  0x3a   :  { %403 = vmatmul.mubr.bf16.gmra.mxu0 %v999_v36  ;;  %933 = vmatmul.mubr.msk.bf16.gmra.mxu1 %vm314_vm2, %v1000_v37 }
  0x3b   :  { %410 = vmatprep.mubr.bf16.mxu0 %v1001_v38  ;;  %936 = vmatprep.mubr.msk.bf16.mxu1 %vm314_vm2, %v1003_v39 }
  0x42   :  { %411 = vmatmul.mubr.bf16.gmra.mxu0 %v1004_v40  ;;  %937 = vmatmul.mubr.msk.bf16.gmra.mxu1 %vm314_vm2, %v1005_v41 }
  0x43   :  { %418 = vmatprep.mubr.bf16.mxu0 %v1006_v42  ;;  %940 = vmatprep.mubr.msk.bf16.mxu1 %vm314_vm2, %v1008_v43 }
  0x4a   :  { %419 = vmatmul.mubr.bf16.gmra.mxu0 %v1009_v44  ;;  %941 = vmatmul.mubr.msk.bf16.gmra.mxu1 %vm314_vm2, %v1010_v45 }
  0xe2   :  { %v866_v46 = vpop.f32.mrf.mxu0  ;;  %v1230_v47 = vpop.f32.mrf.mxu1 }
  0xe4   :  { %v867_v48 = vpop.f32.mrf.mxu0  ;;  %v1232_v49 = vpop.f32.mrf.mxu1 }
  0xe5   :  { %v868_v61 = vadd.f32 %v867_v48, %v866_v46 }
  0xe6   :  { %v869_v50 = vpop.f32.mrf.mxu0  ;;  %v1234_v51 = vpop.f32.mrf.mxu1 }
  0xe7   :  { %v381_v6 = vadd.f32 %v868_v61, %v1249_v0 }
  0xe8   :  { %v870_v52 = vpop.f32.mrf.mxu0  ;;  %v1236_v53 = vpop.f32.mrf.mxu1 }
  0xe9   :  { %v871_v7 = vadd.f32 %v870_v52, %v869_v50 }
  0xea   :  { %v872_v54 = vpop.f32.mrf.mxu0  ;;  %v1238_v55 = vpop.f32.mrf.mxu1 }
  0xeb   :  { %v384_v20 = vadd.f32 %v871_v7, %v1249_v0 }
  0xec   :  { %v873_v56 = vpop.f32.mrf.mxu0  ;;  %v1240_v57 = vpop.f32.mrf.mxu1 }
  0xed   :  { %v874_v58 = vadd.f32 %v873_v56, %v872_v54 }
  0xee   :  { %v875_v59 = vpop.f32.mrf.mxu0  ;;  %v1242_v60 = vpop.f32.mrf.mxu1 }
  0xef   :  { %v389_v2 = vadd.f32 %v874_v58, %v1249_v0  ;;  %v910_v58 = vadd.f32 %v1240_v57, %v1238_v55 }
  0xf0   :  { %v876_v62 = vpop.f32.mrf.mxu0  ;;  %v1244_v63 = vpop.f32.mrf.mxu1 }
  0xf1   :  { %v877_v1 = vadd.f32 %v876_v62, %v875_v59 }
  0xf2   :  { %v878_v3 = vpop.f32.mrf.mxu0  ;;  %v930_v4 = vpop.f32.mrf.mxu1 }
  0xf3   :  { %v1252_v5 = vadd.f32 %v930_v4, %v389_v2  ;;  %v392_v12 = vadd.f32 %v877_v1, %v1249_v0 }
  0xf4   :  { %v879_v8 = vpop.f32.mrf.mxu0  ;;  %v477_v9 = vpop.f32.mrf.mxu1 }
  0xf5   :  { %v542_v10 = vsub.f32 0.0, %v1252_v5  ;;  %v1256_v11 = vadd.f32 %v477_v9, %v381_v6  ;;  %v880_v16 = vadd.f32 %v879_v8, %v878_v3  ;;  %v904_v6 = vadd.f32 %v1232_v49, %v1230_v47 }
  0xf6   :  { %v881_v13 = vpop.f32.mrf.mxu0  ;;  %v931_v14 = vpop.f32.mrf.mxu1  ;;  %v437_v47 = vadd.f32 %v910_v58, %v1249_v0 }
  0xf7   :  { %v560_v15 = vmul.f32 1.442695, %v542_v10  ;;  %v540_v17 = vsub.f32 0.0, %v1256_v11  ;;  %v1260_v18 = vadd.f32 %v931_v14, %v392_v12  ;;  %v397_v29 = vadd.f32 %v880_v16, %v1249_v0 }
  0xf8   :  { %v882_v19 = vpop.f32.mrf.mxu0  ;;  %v480_v21 = vpop.f32.mrf.mxu1  ;;  %v913_v12 = vadd.f32 %v1244_v63, %v1242_v60  ;;  %v907_v63 = vadd.f32 %v1236_v53, %v1234_v51 }
  0xf9   :  { %1011 = vpow2.f32 %v560_v15  ;;  %v556_v22 = vmul.f32 1.442695, %v540_v17  ;;  %v543_v23 = vsub.f32 0.0, %v1260_v18  ;;  %v1264_v24 = vadd.f32 %v480_v21, %v384_v20 }
  0xfa   :  { %v884_v25 = vpop.f32.mrf.mxu0  ;;  %v934_v26 = vpop.f32.mrf.mxu1  ;;  %v883_v28 = vadd.f32 %v882_v19, %v881_v13 }
  0xfb   :  { %1013 = vpow2.f32 %v556_v22  ;;  %v562_v27 = vmul.f32 1.442695, %v543_v23  ;;  %v541_v30 = vsub.f32 0.0, %v1264_v24  ;;  %v429_v22 = vadd.f32 %v904_v6, %v1249_v0 }
  0xfc   :  { %v885_v31 = vpop.f32.mrf.mxu0  ;;  %v493_v32 = vpop.f32.mrf.mxu1  ;;  %v400_v40 = vadd.f32 %v883_v28, %v1249_v0 }
  0xfd   :  { %1015 = vpow2.f32 %v562_v27  ;;  %v886_v33 = vadd.f32 %v885_v31, %v884_v25  ;;  %v1268_v34 = vadd.f32 %v493_v32, %v397_v29  ;;  %v558_v35 = vmul.f32 1.442695, %v541_v30 }
  0xfe   :  { %v887_v36 = vpop.f32.mrf.mxu0  ;;  %v935_v37 = vpop.f32.mrf.mxu1  ;;  %v440_v29 = vadd.f32 %v913_v12, %v1249_v0 }
  0xff   :  { %v405_v38 = vadd.f32 %v886_v33, %v1249_v0  ;;  %v544_v39 = vsub.f32 0.0, %v1268_v34  ;;  %1017 = vpow2.f32 %v558_v35 }
 0x100   :  { %v888_v41 = vpop.f32.mrf.mxu0  ;;  %v496_v42 = vpop.f32.mrf.mxu1 }
 0x101   :  { %v1273_v43 = vadd.f32 %v934_v26, %v405_v38  ;;  %v564_v44 = vmul.f32 1.442695, %v544_v39  ;;  %v889_v45 = vadd.f32 %v888_v41, %v887_v36  ;;  %v1275_v46 = vadd.f32 %v496_v42, %v400_v40 }
 0x102   :  { %v890_v48 = vpop.f32.mrf.mxu0  ;;  %v1277_v50 = vpop.f32.mrf.mxu1 }
 0x103   :  { %v546_v52 = vsub.f32 0.0, %v1273_v43  ;;  %1019 = vpow2.f32 %v564_v44  ;;  %v408_v54 = vadd.f32 %v889_v45, %v1249_v0  ;;  %v545_v56 = vsub.f32 0.0, %v1275_v46 }
 0x104   :  { %v891_v59 = vpop.f32.mrf.mxu0  ;;  %v509_v61 = vpop.f32.mrf.mxu1 }
 0x105   :  { %v568_v62 = vmul.f32 1.442695, %v546_v52  ;;  %v1284_v1 = vadd.f32 %v935_v37, %v408_v54  ;;  %v566_v2 = vmul.f32 1.442695, %v545_v56  ;;  %v892_v3 = vadd.f32 %v891_v59, %v890_v48 }
 0x106   :  { %v1012_v4 = vpop.eup %1011  ;;  %v893_v7 = vpop.f32.mrf.mxu0  ;;  %v432_v48 = vadd.f32 %v907_v63, %v1249_v0 }
 0x107   :  { %v1288_v8 = vpop.f32.mrf.mxu1  ;;  %v590_v9 = vadd.f32 1.0, %v1012_v4  ;;  %1021 = vpow2.f32 %v568_v62  ;;  %v547_v10 = vsub.f32 0.0, %v1284_v1  ;;  %v413_v55 = vadd.f32 %v892_v3, %v1249_v0 }
 0x108   :  { %v1014_v57 = vpop.eup %1013  ;;  %1023 = vpow2.f32 %v566_v2  ;;  %v894_v13 = vpop.f32.mrf.mxu0 }
 0x109   :  { %v512_v14 = vpop.f32.mrf.mxu1  ;;  %v570_v15 = vmul.f32 1.442695, %v547_v10  ;;  %v1294_v16 = vadd.f32 %v509_v61, %v413_v55  ;;  %v588_v17 = vadd.f32 1.0, %v1014_v57  ;;  %v895_v19 = vadd.f32 %v894_v13, %v893_v7 }
 0x10a   :  { %v1016_v49 = vpop.eup %1015  ;;  %v896_v20 = vpop.f32.mrf.mxu0  ;;  %1025 = vrcp.f32 %v590_v9 }
 0x10b   :  { %v942_v21 = vpop.f32.mrf.mxu1  ;;  %v591_v23 = vadd.f32 1.0, %v1016_v49  ;;  %v548_v25 = vsub.f32 0.0, %v1294_v16  ;;  %1027 = vpow2.f32 %v570_v15  ;;  %v416_v26 = vadd.f32 %v895_v19, %v1249_v0 }
 0x10c   :  { %v1299_v60 = vadd.f32 %v942_v21, %v437_v47  ;;  %v897_v27 = vpop.f32.mrf.mxu0  ;;  %v1018_v30 = vpop.eup %1017 }
 0x10d   :  { %v525_v28 = vpop.f32.mrf.mxu1  ;;  %1029 = vrcp.f32 %v591_v23  ;;  %v572_v31 = vmul.f32 1.442695, %v548_v25  ;;  %v898_v33 = vadd.f32 %v897_v27, %v896_v20  ;;  %v589_v35 = vadd.f32 1.0, %v1018_v30 }
 0x10e   :  { %v554_v32 = vsub.f32 0.0, %v1299_v60  ;;  %1031 = vrcp.f32 %v588_v17  ;;  %v1306_v36 = vadd.f32 %v512_v14, %v416_v26  ;;  %v1308_v37 = vadd.f32 %v525_v28, %v429_v22  ;;  %v899_v51 = vpop.f32.mrf.mxu0 }
 0x10f   :  { %v943_v53 = vpop.f32.mrf.mxu1  ;;  %1033 = vpow2.f32 %v572_v31  ;;  %v421_v39 = vadd.f32 %v898_v33, %v1249_v0 }
 0x110   :  { %v584_v38 = vmul.f32 1.442695, %v554_v32  ;;  %v1311_v40 = vadd.f32 %v943_v53, %v440_v29  ;;  %v1020_v41 = vpop.eup %1019  ;;  %1035 = vrcp.f32 %v589_v35  ;;  %v549_v42 = vsub.f32 0.0, %v1306_v36  ;;  %v900_v45 = vpop.f32.mrf.mxu0 }
 0x111   :  { %v552_v44 = vsub.f32 0.0, %v1308_v37  ;;  %v528_v52 = vpop.f32.mrf.mxu1  ;;  %v592_v54 = vadd.f32 1.0, %v1020_v41  ;;  %v1317_v56 = vadd.f32 %v1277_v50, %v421_v39  ;;  %v901_v62 = vadd.f32 %v900_v45, %v899_v51 }
 0x112   :  { %1037 = vpow2.f32 %v584_v38  ;;  %v555_v58 = vsub.f32 0.0, %v1311_v40  ;;  %v574_v59 = vmul.f32 1.442695, %v549_v42  ;;  %v1320_v2 = vadd.f32 %v528_v52, %v432_v48 }
 0x113   :  { %v580_v61 = vmul.f32 1.442695, %v552_v44  ;;  %1039 = vrcp.f32 %v592_v54  ;;  %v550_v3 = vsub.f32 0.0, %v1317_v56  ;;  %v424_v7 = vadd.f32 %v901_v62, %v1249_v0 }
 0x114   :  { %v586_v4 = vmul.f32 1.442695, %v555_v58  ;;  %v1022_v6 = vpop.eup %1021  ;;  %1041 = vpow2.f32 %v574_v59  ;;  %v553_v9 = vsub.f32 0.0, %v1320_v2 }
 0x115   :  { %v1024_v10 = vpop.eup %1023  ;;  %v594_v50 = vadd.f32 1.0, %v1022_v6  ;;  %v576_v55 = vmul.f32 1.442695, %v550_v3  ;;  %1043 = vpow2.f32 %v580_v61  ;;  %v1326_v12 = vadd.f32 %v1288_v8, %v424_v7 }
 0x116   :  { %v593_v57 = vadd.f32 1.0, %v1024_v10  ;;  %1045 = vpow2.f32 %v586_v4  ;;  %v582_v13 = vmul.f32 1.442695, %v553_v9 }
 0x117   :  { %1047 = vrcp.f32 %v594_v50  ;;  %v1026_v14 = vpop.eup %1025  ;;  %v551_v15 = vsub.f32 0.0, %v1326_v12 }
 0x118   :  { %1049 = vrcp.f32 %v593_v57  ;;  %v1028_v47 = vpop.eup %1027  ;;  %v622_v20 = vmul.f32 %v1026_v14, %v1252_v5 }
 0x119   :  { %1051 = vpow2.f32 %v576_v55  ;;  %v595_v49 = vadd.f32 1.0, %v1028_v47  ;;  %v578_v17 = vmul.f32 1.442695, %v551_v15 }
 0x11a   :  { %v1030_v0 = vpop.eup %1029  ;;  %1053 = vpow2.f32 %v582_v13 }
 0x11b   :  { %v1032_v19 = vpop.eup %1031  ;;  %v623_v21 = vmul.f32 %v1030_v0, %v1260_v18  ;;  %1055 = vrcp.f32 %v595_v49 }
 0x11c   :  { %v1034_v22 = vpop.eup %1033  ;;  %1057 = vpow2.f32 %v578_v17  ;;  %v620_v63 = vmul.f32 %v1032_v19, %v1256_v11 }
 0x11d   :  { %v1036_v8 = vpop.eup %1035  ;;  %v811_v23 = vpack.c.bf16 %v623_v21, %v622_v20  ;;  %v596_v27 = vadd.f32 1.0, %v1034_v22 }
 0x11e   :  { %v621_v26 = vmul.f32 %v1036_v8, %v1264_v24 }
 0x11f   :  { %v1038_v25 = vpop.eup %1037  ;;  %843 = vst [vmem:[%s1372_s3 + $0x8] sm:$0xff] %v811_v23   ;;  %1059 = vrcp.f32 %v596_v27 }
 0x120   :  { %v602_v28 = vadd.f32 1.0, %v1038_v25  ;;  %v1040_v29 = vpop.eup %1039  ;;  %v806_v5 = vpack.c.bf16 %v621_v26, %v620_v63 }
 0x121   :  { %v1042_v30 = vpop.eup %1041  ;;  %v624_v53 = vmul.f32 %v1040_v29, %v1268_v34 }
 0x122   :  { %v1044_v18 = vpop.eup %1043  ;;  %807 = vst [vmem:[%s1372_s3] sm:$0xff] %v806_v5   ;;  %v597_v31 = vadd.f32 1.0, %v1042_v30  ;;  %1061 = vrcp.f32 %v602_v28 }
 0x123   :  { %v1046_v32 = vpop.eup %1045  ;;  %v600_v24 = vadd.f32 1.0, %v1044_v18 }
 0x124   :  { %v1048_v11 = vpop.eup %1047  ;;  %1063 = vrcp.f32 %v597_v31  ;;  %v603_v33 = vadd.f32 1.0, %v1046_v32 }
 0x125   :  { %v1050_v35 = vpop.eup %1049  ;;  %v626_v52 = vmul.f32 %v1048_v11, %v1273_v43 }
 0x126   :  { %v1052_v51 = vpop.eup %1051  ;;  %v625_v38 = vmul.f32 %v1050_v35, %v1275_v46  ;;  %1065 = vrcp.f32 %v603_v33 }
 0x127   :  { %v1054_v39 = vpop.eup %1053  ;;  %v598_v41 = vadd.f32 1.0, %v1052_v51  ;;  %1067 = vrcp.f32 %v600_v24 }
 0x128   :  { %v816_v42 = vpack.c.bf16 %v625_v38, %v624_v53  ;;  %v601_v44 = vadd.f32 1.0, %v1054_v39  ;;  %v1056_v45 = vpop.eup %1055 }
 0x129   :  { %v1058_v48 = vpop.eup %1057  ;;  %v627_v54 = vmul.f32 %v1056_v45, %v1284_v1 }
 0x12a   :  { %844 = vst [vmem:[%s1372_s3 + $0x10] sm:$0xff] %v816_v42   ;;  %1069 = vrcp.f32 %v601_v44  ;;  %v599_v34 = vadd.f32 1.0, %v1058_v48 }
 0x12b   :  { %1071 = vrcp.f32 %v598_v41  ;;  %v821_v46 = vpack.c.bf16 %v627_v54, %v626_v52 }
 0x12c   :  { %1073 = vrcp.f32 %v599_v34  ;;  %v1060_v58 = vpop.eup %1059 }
 0x12d   :  { %845 = vst [vmem:[%s1372_s3 + $0x18] sm:$0xff] %v821_v46   ;;  %v628_v43 = vmul.f32 %v1060_v58, %v1294_v16 }
 0x12f   :  { %v1062_v59 = vpop.eup %1061 }
 0x130   :  { %v634_v4 = vmul.f32 %v1062_v59, %v1299_v60 }
 0x131   :  { %v1064_v61 = vpop.eup %1063 }
 0x132   :  { %v629_v1 = vmul.f32 %v1064_v61, %v1306_v36 }
 0x133   :  { %v1066_v62 = vpop.eup %1065 }
 0x134   :  { %v826_v3 = vpack.c.bf16 %v629_v1, %v628_v43  ;;  %v635_v6 = vmul.f32 %v1066_v62, %v1311_v40  ;;  %v1068_v7 = vpop.eup %1067 }
 0x135   :  { %v632_v55 = vmul.f32 %v1068_v7, %v1308_v37 }
 0x136   :  { %846 = vst [vmem:[%s1372_s3 + $0x20] sm:$0xff] %v826_v3   ;;  %v841_v9 = vpack.c.bf16 %v635_v6, %v634_v4 }
 0x137   :  { %v1070_v10 = vpop.eup %1069 }
 0x138   :  { %v1072_v50 = vpop.eup %1071  ;;  %849 = vst [vmem:[%s1372_s3 + $0x38] sm:$0xff] %v841_v9   ;;  %v633_v16 = vmul.f32 %v1070_v10, %v1320_v2 }
 0x139   :  { %v1074_v36 = vpop.eup %1073  ;;  %v630_v40 = vmul.f32 %v1072_v50, %v1317_v56 }
 0x13a   :  { %v836_v60 = vpack.c.bf16 %v633_v16, %v632_v55  ;;  %v631_v57 = vmul.f32 %v1074_v36, %v1326_v12 }
 0x13c   :  { %848 = vst [vmem:[%s1372_s3 + $0x30] sm:$0xff] %v836_v60   ;;  %v831_v13 = vpack.c.bf16 %v631_v57, %v630_v40 }
 0x13e   :  { %847 = vst [vmem:[%s1372_s3 + $0x28] sm:$0xff] %v831_v13  }

// kernel: _lambda_.48
= control target key start
LH: loop header
LB: loop body
LE: loop exit
PB: predicated region body
PF: predicated region fallthrough
CT: control target
= control target key end

     0   :  { %v787_v0 = vmov 0   ;;  %vm226_vm0 = vcmask 793600   ;;  %vm251_vm1 = vcmask 1040384   ;;  %s1049_s1 = inlined_call_operand.vmem [shape: bf16[225,128], index: 1, kind: input, shape index: {}]   ;;  %s1050_s0 = inlined_call_operand.vmem [shape: bf16[128,225], index: 0, kind: input, shape index: {}]   ;;  %s1051_s2 = inlined_call_operand.vmem [shape: f32[1,128], index: 2, kind: input, shape index: {}]   ;;  %s1052_s3 = inlined_call_operand.vmem [shape: bf16[128,128], index: 3, kind: output, shape index: {}]  }
   0x1   :  { %257 = vmatprep.subr.bf16.mxu0 %v787_v0  ;;  %653 = vmatprep.subr.bf16.mxu1 %v787_v0  ;;  %v684_v1 = vld [vmem:[%s1049_s1 + $0x38] sm:$0xff]   ;;  %v685_v2 = vld [vmem:[%s1049_s1 + $0x30] sm:$0xff]   ;;  %v686_v3 = vld [vmem:[%s1049_s1 + $0x28] sm:$0xff]   ;;  %v253_v12 = vsel %vm251_vm1, 65535, %v787_v0 }
   0x2   :  { %258 = vmatpush1.bf16.msra.mxu0 %v684_v1  ;;  %668 = vmatpush1.bf16.msra.mxu1 %v684_v1  ;;  %v687_v4 = vld [vmem:[%s1049_s1 + $0x20] sm:$0xff]   ;;  %v688_v5 = vld [vmem:[%s1049_s1 + $0x18] sm:$0xff]   ;;  %v689_v8 = vld [vmem:[%s1049_s1 + $0x10] sm:$0xff]  }
   0x3   :  { %259 = vmatprep.subr.bf16.mxu0 %v787_v0  ;;  %654 = vmatprep.subr.bf16.mxu1 %v787_v0  ;;  %v701_v6 = vld [vmem:[%s1050_s0 + $0x4] ss:$8 sps:$4 sm:$0xff]   ;;  %v692_v11 = vld [vmem:[%s1049_s1 + $0x70] ss:$0 sps:$4 sm:$0x11]   ;;  %v695_v16 = vld [vmem:[%s1049_s1 + $0x58] sm:$0xff]  }
   0x4   :  { %566 = vmatprep.mubr.msk.bf16.mxu0 %vm226_vm0, %v701_v6  ;;  %v704_v7 = vld [vmem:[%s1050_s0 + $0x44] ss:$8 sps:$4 sm:$0xff]   ;;  %v255_v13 = vand.u32 %v692_v11, %v253_v12  ;;  %v696_v17 = vld [vmem:[%s1049_s1 + $0x50] sm:$0xff]   ;;  %v699_v20 = vld [vmem:[%s1050_s0] ss:$8 sps:$4 sm:$0xff]  }
   0x5   :  { %570 = vmatprep.mubr.msk.bf16.mxu1 %vm226_vm0, %v704_v7  ;;  %v690_v9 = vld [vmem:[%s1049_s1 + $0x8] sm:$0xff]   ;;  %v691_v10 = vld [vmem:[%s1049_s1] sm:$0xff]   ;;  %v705_v22 = vld [vmem:[%s1050_s0 + $0x14] ss:$8 sps:$4 sm:$0xff]  }
   0x6   :  { %260 = vmatpush1.bf16.msra.mxu0 %v685_v2  ;;  %669 = vmatpush1.bf16.msra.mxu1 %v685_v2  ;;  %v693_v14 = vld [vmem:[%s1049_s1 + $0x68] sm:$0xff]   ;;  %v694_v15 = vld [vmem:[%s1049_s1 + $0x60] sm:$0xff]   ;;  %v707_v23 = vld [vmem:[%s1050_s0 + $0x54] ss:$8 sps:$4 sm:$0xff]  }
   0x7   :  { %261 = vmatprep.subr.bf16.mxu0 %v787_v0  ;;  %655 = vmatprep.subr.bf16.mxu1 %v787_v0  ;;  %v697_v18 = vld [vmem:[%s1049_s1 + $0x48] sm:$0xff]   ;;  %v698_v19 = vld [vmem:[%s1049_s1 + $0x40] sm:$0xff]   ;;  %v709_v24 = vld [vmem:[%s1050_s0 + $0x10] ss:$8 sps:$4 sm:$0xff]  }
   0x8   :  { %v702_v21 = vld [vmem:[%s1050_s0 + $0x40] ss:$8 sps:$4 sm:$0xff]   ;;  %v710_v25 = vld [vmem:[%s1050_s0 + $0x50] ss:$8 sps:$4 sm:$0xff]   ;;  %v711_v26 = vld [vmem:[%s1050_s0 + $0x24] ss:$8 sps:$4 sm:$0xff]  }
   0x9   :  { %v713_v27 = vld [vmem:[%s1050_s0 + $0x64] ss:$8 sps:$4 sm:$0xff]   ;;  %v715_v28 = vld [vmem:[%s1050_s0 + $0x20] ss:$8 sps:$4 sm:$0xff]   ;;  %v717_v30 = vld [vmem:[%s1050_s0 + $0x34] ss:$8 sps:$4 sm:$0xff]  }
   0xa   :  { %262 = vmatpush1.bf16.msra.mxu0 %v686_v3  ;;  %670 = vmatpush1.bf16.msra.mxu1 %v686_v3  ;;  %v716_v29 = vld [vmem:[%s1050_s0 + $0x60] ss:$8 sps:$4 sm:$0xff]   ;;  %v719_v31 = vld [vmem:[%s1050_s0 + $0x74] ss:$8 sps:$4 sm:$0xff]   ;;  %v721_v32 = vld [vmem:[%s1050_s0 + $0x30] ss:$8 sps:$4 sm:$0xff]  }
   0xb   :  { %263 = vmatprep.subr.bf16.mxu0 %v787_v0  ;;  %656 = vmatprep.subr.bf16.mxu1 %v787_v0  ;;  %v722_v33 = vld [vmem:[%s1050_s0 + $0x70] ss:$8 sps:$4 sm:$0xff]   ;;  %v943_v34 = vld [vmem:[%s1051_s2] ss:$0 sm:$0xff] }
   0xe   :  { %264 = vmatpush1.bf16.msra.mxu0 %v687_v4  ;;  %671 = vmatpush1.bf16.msra.mxu1 %v687_v4 }
   0xf   :  { %265 = vmatprep.subr.bf16.mxu0 %v787_v0  ;;  %657 = vmatprep.subr.bf16.mxu1 %v787_v0 }
  0x12   :  { %266 = vmatpush1.bf16.msra.mxu0 %v688_v5  ;;  %672 = vmatpush1.bf16.msra.mxu1 %v688_v5 }
  0x13   :  { %267 = vmatprep.subr.bf16.mxu0 %v787_v0  ;;  %658 = vmatprep.subr.bf16.mxu1 %v787_v0 }
  0x16   :  { %268 = vmatpush1.bf16.msra.mxu0 %v689_v8  ;;  %673 = vmatpush1.bf16.msra.mxu1 %v689_v8 }
  0x17   :  { %269 = vmatprep.subr.bf16.mxu0 %v787_v0  ;;  %659 = vmatprep.subr.bf16.mxu1 %v787_v0 }
  0x1a   :  { %270 = vmatpush1.bf16.msra.mxu0 %v690_v9  ;;  %674 = vmatpush1.bf16.msra.mxu1 %v690_v9 }
  0x1b   :  { %271 = vmatprep.subr.bf16.mxu0 %v787_v0  ;;  %660 = vmatprep.subr.bf16.mxu1 %v787_v0 }
  0x1e   :  { %272 = vmatpush1.bf16.msra.mxu0 %v691_v10  ;;  %675 = vmatpush1.bf16.msra.mxu1 %v691_v10 }
  0x1f   :  { %275 = vmatprep.subr.bf16.mxu0 %v787_v0  ;;  %661 = vmatprep.subr.bf16.mxu1 %v787_v0 }
  0x22   :  { %276 = vmatpush2.bf16.msra.mxu0 %v255_v13  ;;  %676 = vmatpush2.bf16.msra.mxu1 %v255_v13 }
  0x23   :  { %277 = vmatprep.subr.bf16.mxu0 %v787_v0  ;;  %662 = vmatprep.subr.bf16.mxu1 %v787_v0 }
  0x26   :  { %278 = vmatpush2.bf16.msra.mxu0 %v693_v14  ;;  %677 = vmatpush2.bf16.msra.mxu1 %v693_v14 }
  0x27   :  { %279 = vmatprep.subr.bf16.mxu0 %v787_v0  ;;  %663 = vmatprep.subr.bf16.mxu1 %v787_v0 }
  0x2a   :  { %280 = vmatpush2.bf16.msra.mxu0 %v694_v15  ;;  %678 = vmatpush2.bf16.msra.mxu1 %v694_v15 }
  0x2b   :  { %281 = vmatprep.subr.bf16.mxu0 %v787_v0  ;;  %664 = vmatprep.subr.bf16.mxu1 %v787_v0 }
  0x2e   :  { %282 = vmatpush2.bf16.msra.mxu0 %v695_v16  ;;  %679 = vmatpush2.bf16.msra.mxu1 %v695_v16 }
  0x2f   :  { %283 = vmatprep.subr.bf16.mxu0 %v787_v0  ;;  %665 = vmatprep.subr.bf16.mxu1 %v787_v0 }
  0x32   :  { %284 = vmatpush2.bf16.msra.mxu0 %v696_v17  ;;  %680 = vmatpush2.bf16.msra.mxu1 %v696_v17 }
  0x33   :  { %285 = vmatprep.subr.bf16.mxu0 %v787_v0  ;;  %666 = vmatprep.subr.bf16.mxu1 %v787_v0 }
  0x36   :  { %286 = vmatpush2.bf16.msra.mxu0 %v697_v18  ;;  %681 = vmatpush2.bf16.msra.mxu1 %v697_v18 }
  0x37   :  { %287 = vmatprep.subr.bf16.mxu0 %v787_v0  ;;  %667 = vmatprep.subr.bf16.mxu1 %v787_v0 }
  0x3a   :  { %288 = vmatpush2.bf16.msra.mxu0 %v698_v19  ;;  %682 = vmatpush2.bf16.msra.mxu1 %v698_v19 }
  0x3d   :  { %290 = vmatmul.mubr.bf16.vlgmr.msra.gmra.mxu0 %v699_v20  ;;  %322 = vmatmul.mubr.bf16.vlgmr.msra.gmra.mxu1 %v702_v21 }
  0x3e   :  { %567 = vmatprep.mubr.msk.bf16.mxu0 %vm226_vm0, %v705_v22  ;;  %571 = vmatprep.mubr.msk.bf16.mxu1 %vm226_vm0, %v707_v23 }
  0x45   :  { %298 = vmatmul.mubr.bf16.gmra.mxu0 %v709_v24  ;;  %330 = vmatmul.mubr.bf16.gmra.mxu1 %v710_v25 }
  0x46   :  { %568 = vmatprep.mubr.msk.bf16.mxu0 %vm226_vm0, %v711_v26  ;;  %572 = vmatprep.mubr.msk.bf16.mxu1 %vm226_vm0, %v713_v27 }
  0x4d   :  { %306 = vmatmul.mubr.bf16.gmra.mxu0 %v715_v28  ;;  %338 = vmatmul.mubr.bf16.gmra.mxu1 %v716_v29 }
  0x4e   :  { %569 = vmatprep.mubr.msk.bf16.mxu0 %vm226_vm0, %v717_v30  ;;  %573 = vmatprep.mubr.msk.bf16.mxu1 %vm226_vm0, %v719_v31 }
  0x55   :  { %314 = vmatmul.mubr.bf16.gmra.mxu0 %v721_v32  ;;  %346 = vmatmul.mubr.bf16.gmra.mxu1 %v722_v33 }
  0xfd   :  { %v291_v35 = vpop.f32.mrf.mxu0  ;;  %v323_v36 = vpop.f32.mrf.mxu1 }
  0xfe   :  { %v946_v37 = vadd.f32 %v943_v34, %v291_v35  ;;  %v949_v38 = vadd.f32 %v943_v34, %v323_v36 }
  0xff   :  { %v293_v39 = vpop.f32.mrf.mxu0  ;;  %v325_v40 = vpop.f32.mrf.mxu1 }
 0x100   :  { %v354_v41 = vsub.f32 0.0, %v946_v37  ;;  %v362_v42 = vsub.f32 0.0, %v949_v38 }
 0x101   :  { %v294_v43 = vpop.f32.mrf.mxu0  ;;  %v326_v44 = vpop.f32.mrf.mxu1 }
 0x102   :  { %v370_v45 = vmul.f32 1.442695, %v354_v41  ;;  %v386_v46 = vmul.f32 1.442695, %v362_v42  ;;  %v954_v47 = vadd.f32 %v943_v34, %v294_v43  ;;  %v957_v48 = vadd.f32 %v943_v34, %v326_v44 }
 0x103   :  { %v296_v49 = vpop.f32.mrf.mxu0  ;;  %v328_v50 = vpop.f32.mrf.mxu1 }
 0x104   :  { %723 = vpow2.f32 %v370_v45  ;;  %v355_v51 = vsub.f32 0.0, %v954_v47  ;;  %v363_v52 = vsub.f32 0.0, %v957_v48 }
 0x105   :  { %725 = vpow2.f32 %v386_v46  ;;  %v299_v53 = vpop.f32.mrf.mxu0  ;;  %v331_v54 = vpop.f32.mrf.mxu1 }
 0x106   :  { %v372_v55 = vmul.f32 1.442695, %v355_v51  ;;  %v388_v56 = vmul.f32 1.442695, %v363_v52  ;;  %v962_v57 = vadd.f32 %v943_v34, %v299_v53  ;;  %v965_v58 = vadd.f32 %v943_v34, %v331_v54 }
 0x107   :  { %v301_v59 = vpop.f32.mrf.mxu0  ;;  %v333_v60 = vpop.f32.mrf.mxu1 }
 0x108   :  { %727 = vpow2.f32 %v372_v55  ;;  %v356_v61 = vsub.f32 0.0, %v962_v57  ;;  %v364_v62 = vsub.f32 0.0, %v965_v58 }
 0x109   :  { %729 = vpow2.f32 %v388_v56  ;;  %v302_v63 = vpop.f32.mrf.mxu0  ;;  %v334_v0 = vpop.f32.mrf.mxu1 }
 0x10a   :  { %v374_v1 = vmul.f32 1.442695, %v356_v61  ;;  %v390_v2 = vmul.f32 1.442695, %v364_v62  ;;  %v970_v3 = vadd.f32 %v943_v34, %v302_v63  ;;  %v973_v4 = vadd.f32 %v943_v34, %v334_v0 }
 0x10b   :  { %v304_v5 = vpop.f32.mrf.mxu0  ;;  %v336_v6 = vpop.f32.mrf.mxu1 }
 0x10c   :  { %731 = vpow2.f32 %v374_v1  ;;  %v357_v7 = vsub.f32 0.0, %v970_v3  ;;  %v365_v8 = vsub.f32 0.0, %v973_v4 }
 0x10d   :  { %733 = vpow2.f32 %v390_v2  ;;  %v307_v9 = vpop.f32.mrf.mxu0  ;;  %v339_v10 = vpop.f32.mrf.mxu1 }
 0x10e   :  { %v376_v11 = vmul.f32 1.442695, %v357_v7  ;;  %v392_v12 = vmul.f32 1.442695, %v365_v8  ;;  %v978_v13 = vadd.f32 %v943_v34, %v307_v9  ;;  %v981_v14 = vadd.f32 %v943_v34, %v339_v10 }
 0x10f   :  { %v309_v15 = vpop.f32.mrf.mxu0  ;;  %v341_v16 = vpop.f32.mrf.mxu1 }
 0x110   :  { %735 = vpow2.f32 %v376_v11  ;;  %v358_v17 = vsub.f32 0.0, %v978_v13  ;;  %v366_v18 = vsub.f32 0.0, %v981_v14 }
 0x111   :  { %v724_v19 = vpop.eup %723  ;;  %737 = vpow2.f32 %v392_v12  ;;  %v310_v20 = vpop.f32.mrf.mxu0 }
 0x112   :  { %v342_v21 = vpop.f32.mrf.mxu1  ;;  %v726_v22 = vpop.eup %725  ;;  %v402_v23 = vadd.f32 1.0, %v724_v19  ;;  %v378_v24 = vmul.f32 1.442695, %v358_v17  ;;  %v986_v25 = vadd.f32 %v943_v34, %v310_v20  ;;  %v394_v27 = vmul.f32 1.442695, %v366_v18 }
 0x113   :  { %v410_v26 = vadd.f32 1.0, %v726_v22  ;;  %v989_v28 = vadd.f32 %v943_v34, %v342_v21  ;;  %v312_v29 = vpop.f32.mrf.mxu0 }
 0x114   :  { %v344_v30 = vpop.f32.mrf.mxu1  ;;  %739 = vrcp.f32 %v402_v23  ;;  %v359_v31 = vsub.f32 0.0, %v986_v25 }
 0x115   :  { %v728_v32 = vpop.eup %727  ;;  %741 = vrcp.f32 %v410_v26  ;;  %v367_v33 = vsub.f32 0.0, %v989_v28  ;;  %v315_v35 = vpop.f32.mrf.mxu0 }
 0x116   :  { %v347_v36 = vpop.f32.mrf.mxu1  ;;  %v730_v39 = vpop.eup %729  ;;  %v403_v40 = vadd.f32 1.0, %v728_v32  ;;  %743 = vpow2.f32 %v378_v24  ;;  %v380_v41 = vmul.f32 1.442695, %v359_v31  ;;  %v994_v42 = vadd.f32 %v943_v34, %v315_v35 }
 0x117   :  { %v411_v43 = vadd.f32 1.0, %v730_v39  ;;  %745 = vpow2.f32 %v394_v27  ;;  %v396_v44 = vmul.f32 1.442695, %v367_v33  ;;  %v997_v45 = vadd.f32 %v943_v34, %v347_v36  ;;  %v317_v46 = vpop.f32.mrf.mxu0 }
 0x118   :  { %v349_v49 = vpop.f32.mrf.mxu1  ;;  %747 = vrcp.f32 %v403_v40  ;;  %v360_v50 = vsub.f32 0.0, %v994_v42 }
 0x119   :  { %v732_v51 = vpop.eup %731  ;;  %749 = vrcp.f32 %v411_v43  ;;  %v368_v52 = vsub.f32 0.0, %v997_v45  ;;  %v318_v53 = vpop.f32.mrf.mxu0 }
 0x11a   :  { %v350_v54 = vpop.f32.mrf.mxu1  ;;  %v734_v55 = vpop.eup %733  ;;  %v404_v56 = vadd.f32 1.0, %v732_v51  ;;  %751 = vpow2.f32 %v380_v41  ;;  %v382_v59 = vmul.f32 1.442695, %v360_v50  ;;  %v1002_v60 = vadd.f32 %v943_v34, %v318_v53 }
 0x11b   :  { %v412_v61 = vadd.f32 1.0, %v734_v55  ;;  %753 = vpow2.f32 %v396_v44  ;;  %v398_v62 = vmul.f32 1.442695, %v368_v52  ;;  %v1005_v63 = vadd.f32 %v943_v34, %v350_v54  ;;  %v320_v0 = vpop.f32.mrf.mxu0 }
 0x11c   :  { %v352_v1 = vpop.f32.mrf.mxu1  ;;  %755 = vrcp.f32 %v404_v56  ;;  %v361_v2 = vsub.f32 0.0, %v1002_v60 }
 0x11d   :  { %v736_v5 = vpop.eup %735  ;;  %757 = vrcp.f32 %v412_v61  ;;  %v369_v6 = vsub.f32 0.0, %v1005_v63 }
 0x11e   :  { %v738_v7 = vpop.eup %737  ;;  %v405_v8 = vadd.f32 1.0, %v736_v5  ;;  %759 = vpow2.f32 %v382_v59  ;;  %v384_v9 = vmul.f32 1.442695, %v361_v2 }
 0x11f   :  { %v413_v10 = vadd.f32 1.0, %v738_v7  ;;  %761 = vpow2.f32 %v398_v62  ;;  %v400_v11 = vmul.f32 1.442695, %v369_v6 }
 0x120   :  { %763 = vrcp.f32 %v405_v8 }
 0x121   :  { %v740_v12 = vpop.eup %739  ;;  %765 = vrcp.f32 %v413_v10 }
 0x122   :  { %v742_v34 = vpop.eup %741  ;;  %767 = vpow2.f32 %v384_v9  ;;  %v434_v21 = vmul.f32 %v740_v12, %v946_v37 }
 0x123   :  { %v744_v15 = vpop.eup %743  ;;  %769 = vpow2.f32 %v400_v11  ;;  %v442_v24 = vmul.f32 %v742_v34, %v949_v38 }
 0x124   :  { %v746_v16 = vpop.eup %745  ;;  %v406_v17 = vadd.f32 1.0, %v744_v15 }
 0x125   :  { %v748_v18 = vpop.eup %747  ;;  %v414_v19 = vadd.f32 1.0, %v746_v16 }
 0x126   :  { %v750_v20 = vpop.eup %749  ;;  %v435_v22 = vmul.f32 %v748_v18, %v954_v47  ;;  %771 = vrcp.f32 %v406_v17 }
 0x127   :  { %v752_v23 = vpop.eup %751  ;;  %v443_v26 = vmul.f32 %v750_v20, %v957_v48  ;;  %773 = vrcp.f32 %v414_v19 }
 0x128   :  { %v754_v27 = vpop.eup %753  ;;  %v609_v29 = vpack.c.bf16 %v435_v22, %v434_v21  ;;  %v407_v30 = vadd.f32 1.0, %v752_v23 }
 0x129   :  { %v756_v31 = vpop.eup %755  ;;  %v629_v32 = vpack.c.bf16 %v443_v26, %v442_v24  ;;  %v415_v33 = vadd.f32 1.0, %v754_v27 }
 0x12a   :  { %v758_v35 = vpop.eup %757  ;;  %610 = vst [vmem:[%s1052_s3] sm:$0xff] %v609_v29   ;;  %775 = vrcp.f32 %v407_v30  ;;  %v436_v40 = vmul.f32 %v756_v31, %v962_v57 }
 0x12b   :  { %v760_v37 = vpop.eup %759  ;;  %649 = vst [vmem:[%s1052_s3 + $0x20] sm:$0xff] %v629_v32   ;;  %777 = vrcp.f32 %v415_v33  ;;  %v444_v44 = vmul.f32 %v758_v35, %v965_v58 }
 0x12c   :  { %v762_v38 = vpop.eup %761  ;;  %v408_v47 = vadd.f32 1.0, %v760_v37 }
 0x12d   :  { %v764_v48 = vpop.eup %763  ;;  %v416_v36 = vadd.f32 1.0, %v762_v38 }
 0x12e   :  { %v766_v39 = vpop.eup %765  ;;  %v437_v41 = vmul.f32 %v764_v48, %v970_v3  ;;  %779 = vrcp.f32 %v408_v47 }
 0x12f   :  { %v768_v43 = vpop.eup %767  ;;  %v445_v46 = vmul.f32 %v766_v39, %v973_v4  ;;  %781 = vrcp.f32 %v416_v36 }
 0x130   :  { %v770_v49 = vpop.eup %769  ;;  %v614_v50 = vpack.c.bf16 %v437_v41, %v436_v40  ;;  %v409_v51 = vadd.f32 1.0, %v768_v43 }
 0x131   :  { %v634_v52 = vpack.c.bf16 %v445_v46, %v444_v44  ;;  %v417_v53 = vadd.f32 1.0, %v770_v49 }
 0x132   :  { %646 = vst [vmem:[%s1052_s3 + $0x8] sm:$0xff] %v614_v50   ;;  %783 = vrcp.f32 %v409_v51 }
 0x133   :  { %650 = vst [vmem:[%s1052_s3 + $0x28] sm:$0xff] %v634_v52   ;;  %785 = vrcp.f32 %v417_v53  ;;  %v772_v57 = vpop.eup %771 }
 0x134   :  { %v774_v58 = vpop.eup %773  ;;  %v438_v54 = vmul.f32 %v772_v57, %v978_v13 }
 0x135   :  { %v446_v56 = vmul.f32 %v774_v58, %v981_v14 }
 0x137   :  { %v776_v3 = vpop.eup %775 }
 0x138   :  { %v778_v4 = vpop.eup %777  ;;  %v439_v55 = vmul.f32 %v776_v3, %v986_v25 }
 0x139   :  { %v447_v59 = vmul.f32 %v778_v4, %v989_v28 }
 0x13a   :  { %v619_v61 = vpack.c.bf16 %v439_v55, %v438_v54 }
 0x13b   :  { %v639_v62 = vpack.c.bf16 %v447_v59, %v446_v56  ;;  %v780_v0 = vpop.eup %779 }
 0x13c   :  { %647 = vst [vmem:[%s1052_s3 + $0x10] sm:$0xff] %v619_v61   ;;  %v782_v1 = vpop.eup %781  ;;  %v440_v25 = vmul.f32 %v780_v0, %v994_v42 }
 0x13d   :  { %651 = vst [vmem:[%s1052_s3 + $0x30] sm:$0xff] %v639_v62   ;;  %v448_v28 = vmul.f32 %v782_v1, %v997_v45 }
 0x13f   :  { %v784_v2 = vpop.eup %783 }
 0x140   :  { %v786_v13 = vpop.eup %785  ;;  %v441_v14 = vmul.f32 %v784_v2, %v1002_v60 }
 0x141   :  { %v449_v5 = vmul.f32 %v786_v13, %v1005_v63 }
 0x142   :  { %v624_v6 = vpack.c.bf16 %v441_v14, %v440_v25 }
 0x143   :  { %v644_v7 = vpack.c.bf16 %v449_v5, %v448_v28 }
 0x144   :  { %648 = vst [vmem:[%s1052_s3 + $0x18] sm:$0xff] %v624_v6  }
 0x145   :  { %652 = vst [vmem:[%s1052_s3 + $0x38] sm:$0xff] %v644_v7  }

</bundles_post_ra>
